<compile_context>
chip_gen: v7x
topology: tpu7x:2x2x1
jax: 0.10.0
libtpu: 0.0.40
codegen_flags: <defaults>
</compile_context>

<pallas_src>
import functools
import math

import jax
import jax.numpy as jnp
from jax.experimental import pallas as pl
from jax.experimental.pallas import tpu as pltpu


def _round_up(x, m):
    return ((x + m - 1) // m) * m


# --------------------------- Pallas kernels ---------------------------------

def _gemm_bias_act_kernel(x_ref, w_ref, b_ref, o_ref, *, apply_act, neg_slope):
    """One M-tile: out = act(X @ W + b). X:(tm, K) W:(K, Cout) b:(1, Cout)."""
    y = jnp.dot(x_ref[...], w_ref[...], preferred_element_type=jnp.float32)
    y = y + b_ref[...]
    if apply_act:
        y = jnp.where(y >= 0, y, neg_slope * y)
    o_ref[...] = y


def _fused_resconv_kernel(x_ref, w_ref, b_ref, beta_ref, mask_ref, o_ref,
                          src_ref, acc_ref, *, m, wf, pad_top, n_blocks,
                          neg_slope):
    """8x ResConv fused: feature map of one image stays resident in VMEM.

    x_ref   : (m, C) bf16       flattened (H*W, C) feature of one image
    w_ref   : (8*9, C, C) bf16  per-block, per-tap conv weights
    b_ref   : (8, 1, C) f32     conv biases
    beta_ref: (8, 1, C) f32     ResConv betas
    mask_ref: (2, m, 1) bf16    [0]=valid for kx==0 taps, [1]=valid for kx==2
    o_ref   : (m, C) f32
    src_ref : (pad_top + m + wf + 1, C) bf16 VMEM scratch (feature + zero halo)
    acc_ref : (m, C) f32 VMEM accumulator
    """
    # Zero halo rows and park the bf16 feature tile in the VMEM scratch.
    src_ref[...] = jnp.zeros_like(src_ref)
    src_ref[pl.ds(pad_top, m), :] = x_ref[...]
    left = mask_ref[0]    # 0 where output column w == 0   (kx == 0 wraps)
    right = mask_ref[1]   # 0 where output column w == wf-1 (kx == 2 wraps)

    for blk in range(n_blocks):
        # 3x3 conv: nine shifted-slice matmuls, f32 accumulation in VMEM.
        for t in range(9):
            ky, kx = t // 3, t % 3
            shift = (ky - 1) * wf + (kx - 1)
            lhs = src_ref[pl.ds(pad_top + shift, m), :]
            if kx == 0:
                lhs = lhs * left
            elif kx == 2:
                lhs = lhs * right
            contrib = jnp.dot(lhs, w_ref[blk * 9 + t],
                              preferred_element_type=jnp.float32)
            if t == 0:
                acc_ref[...] = contrib
            else:
                acc_ref[...] += contrib
        # Epilogue: (conv + bias) * beta + residual, LeakyReLU(0.2).
        res = src_ref[pl.ds(pad_top, m), :].astype(jnp.float32)
        y = (acc_ref[...] + b_ref[blk]) * beta_ref[blk] + res
        y = jnp.where(y >= 0, y, neg_slope * y)
        src_ref[pl.ds(pad_top, m), :] = y.astype(jnp.bfloat16)

    o_ref[...] = src_ref[pl.ds(pad_top, m), :].astype(jnp.float32)


# --------------------------- Pallas wrappers ---------------------------------

def gemm_bias_act(x, w, b, *, apply_act, neg_slope=0.2,
                  compute_dtype=jnp.bfloat16, block_m=512):
    """x:(M, K) @ w:(K, Cout) + b, optional LeakyReLU.  M tiled on the grid."""
    M, K = x.shape
    Cout = w.shape[1]
    tm = min(block_m, _round_up(M, 8))
    Mp = _round_up(M, tm)
    if Mp != M:
        x = jnp.pad(x, ((0, Mp - M), (0, 0)))
    xk = x.astype(compute_dtype)
    wk = w.astype(compute_dtype)
    b2 = b.reshape(1, Cout).astype(jnp.float32)
    kernel = functools.partial(_gemm_bias_act_kernel, apply_act=apply_act,
                               neg_slope=neg_slope)
    out = pl.pallas_call(
        kernel,
        out_shape=jax.ShapeDtypeStruct((Mp, Cout), jnp.float32),
        grid_spec=pltpu.PrefetchScalarGridSpec(
            num_scalar_prefetch=0,
            grid=(Mp // tm,),
            in_specs=[
                pl.BlockSpec((tm, K), lambda i: (i, 0)),
                pl.BlockSpec((K, Cout), lambda i: (0, 0)),
                pl.BlockSpec((1, Cout), lambda i: (0, 0)),
            ],
            out_specs=pl.BlockSpec((tm, Cout), lambda i: (i, 0)),
        ),
        compiler_params=pltpu.CompilerParams(
            dimension_semantics=("parallel",)),
    )(xk, wk, b2)
    return out[:M]


def fused_resconv_stack(feat, w_res, b_res, beta_res, *, neg_slope=0.2):
    """Apply 8 ResConv(c) blocks in a single pallas_call.  feat: (N,H,W,C) f32."""
    n, hf, wf, c = feat.shape
    m = hf * wf
    x = feat.reshape(n, m, c).astype(jnp.bfloat16)
    # Column-wrap masks (computed once in XLA, reused for every block/tap).
    col = jnp.arange(m, dtype=jnp.int32) % wf
    left = (col >= 1).astype(jnp.bfloat16).reshape(m, 1)
    right = (col <= wf - 2).astype(jnp.bfloat16).reshape(m, 1)
    masks = jnp.stack([left, right], 0)                      # (2, m, 1)

    n_blocks = w_res.shape[0] // 9
    wk = w_res.astype(jnp.bfloat16)                          # (8*9, c, c)
    bk = b_res.astype(jnp.float32)                           # (8, 1, c)
    betak = beta_res.astype(jnp.float32)                     # (8, 1, c)

    pad_top = _round_up(wf + 1, 8)       # aligned feature start in the scratch
    src_rows = pad_top + m + wf + 1

    kernel = functools.partial(_fused_resconv_kernel, m=m, wf=wf,
                               pad_top=pad_top, n_blocks=n_blocks,
                               neg_slope=neg_slope)
    out = pl.pallas_call(
        kernel,
        out_shape=jax.ShapeDtypeStruct((n, m, c), jnp.float32),
        grid_spec=pltpu.PrefetchScalarGridSpec(
            num_scalar_prefetch=0,
            grid=(n,),
            in_specs=[
                pl.BlockSpec((None, m, c), lambda i: (i, 0, 0)),   # squeezed N
                pl.BlockSpec((n_blocks * 9, c, c), lambda i: (0, 0, 0)),
                pl.BlockSpec((n_blocks, 1, c), lambda i: (0, 0, 0)),
                pl.BlockSpec((n_blocks, 1, c), lambda i: (0, 0, 0)),
                pl.BlockSpec((2, m, 1), lambda i: (0, 0, 0)),
            ],
            out_specs=pl.BlockSpec((None, m, c), lambda i: (i, 0, 0)),
            scratch_shapes=[
                pltpu.VMEM((src_rows, c), jnp.bfloat16),   # resident feature
                pltpu.VMEM((m, c), jnp.float32),           # conv accumulator
            ],
        ),
        compiler_params=pltpu.CompilerParams(
            dimension_semantics=("parallel",)),
    )(x, wk, bk, betak, masks)
    return out.reshape(n, hf, wf, c)


# --------------------------- JAX glue ----------------------------------------

def im2col_folded(x, ksize, stride, padding):
    """x:(N,H,W,C) NHWC -> columns (N*Ho*Wo, k*k*C) with tap-major channels."""
    N, H, W, C = x.shape
    xp = jnp.pad(x, ((0, 0), (padding, padding), (padding, padding), (0, 0)))
    Ho = (H + 2 * padding - ksize) // stride + 1
    Wo = (W + 2 * padding - ksize) // stride + 1
    cols = []
    for ky in range(ksize):
        for kx in range(ksize):
            sl = xp[:, ky: ky + (Ho - 1) * stride + 1: stride,
                    kx: kx + (Wo - 1) * stride + 1: stride, :]
            cols.append(sl)
    cols = jnp.concatenate(cols, axis=-1).reshape(N * Ho * Wo, ksize * ksize * C)
    return cols, (N, Ho, Wo)


def conv2d_gemm(x, w, b, *, stride, padding, apply_act,
                compute_dtype=jnp.bfloat16, neg_slope=0.2):
    """x NHWC, w (kh,kw,Cin,Cout), b (Cout,) -> NHWC."""
    kh, kw, cin, cout = w.shape
    cols, (n, ho, wo) = im2col_folded(x, kh, stride, padding)
    wm = w.reshape(kh * kw * cin, cout)
    out = gemm_bias_act(cols, wm, b, apply_act=apply_act,
                        compute_dtype=compute_dtype, neg_slope=neg_slope)
    return out.reshape(n, ho, wo, cout)


def bilinear_resize_nhwc(x, out_h, out_w):
    """PyTorch F.interpolate(mode='bilinear', align_corners=False) semantics."""
    N, H, W, C = x.shape
    if out_h == H and out_w == W:
        return x

    def src_idx(out_size, in_size):
        d = jnp.arange(out_size, dtype=jnp.float32)
        s = (d + 0.5) * (in_size / out_size) - 0.5
        s = jnp.clip(s, 0.0, in_size - 1)
        i0 = jnp.floor(s).astype(jnp.int32)
        i1 = jnp.minimum(i0 + 1, in_size - 1)
        frac = s - i0.astype(jnp.float32)
        return i0, i1, frac

    y0, y1, wy = src_idx(out_h, H)
    x0, x1, wx = src_idx(out_w, W)
    top = (x[:, y0, :, :] * (1.0 - wy)[None, :, None, None]
           + x[:, y1, :, :] * wy[None, :, None, None])
    out = (top[:, :, x0, :] * (1.0 - wx)[None, None, :, None]
           + top[:, :, x1, :] * wx[None, None, :, None])
    return out


def build_lastconv_gemm_weights(wt, bt):
    """ConvTranspose2d(Cin,Cout,4,2,1) -> phase-decomposed stride-1 GEMM weight.

    wt: PyTorch layout (Cin, Cout, 4, 4).  Returns (9*Cin, 4*Cout) and (4*Cout,)
    so that a 3x3-neighbourhood GEMM yields all 4 output phases (phase-major).
    """
    Cin, Cout = wt.shape[0], wt.shape[1]
    wm = jnp.zeros((9 * Cin, 4 * Cout), jnp.float32)
    for dy in range(2):
        for dx in range(2):
            for a in range(2):
                for bb in range(2):
                    r, s = dy + a, dx + bb
                    ky, kx = 3 - dy - 2 * a, 3 - dx - 2 * bb
                    wm = wm.at[(r * 3 + s) * Cin:(r * 3 + s + 1) * Cin,
                               (dy * 2 + dx) * Cout:(dy * 2 + dx + 1) * Cout
                               ].set(wt[:, :, ky, kx])
    b4 = jnp.tile(bt, 4)
    return wm, b4


def lastconv_and_pixelshuffle(feat, w_last, b_last):
    """Phase-decomposed ConvTranspose2d(c,24,4,2,1) + PixelShuffle(2).

    Single GEMM over the 3x3 neighbourhood followed by one combined
    phase-interleave + pixel-shuffle transpose: (n,hf,wf,c) -> (n,4hf,4wf,6).
    """
    n, hf, wf, _ = feat.shape
    cols, _ = im2col_folded(feat, 3, 1, 1)
    cout4 = b_last.shape[0]                  # 4 * 24
    cout_t = cout4 // 4                      # 24 ConvTranspose output channels
    co = cout_t // 4                         # 6 channels after PixelShuffle(2)
    tmp = gemm_bias_act(cols, w_last, b_last, apply_act=False,
                        compute_dtype=jnp.bfloat16)
    # GEMM columns factor as (dy, dx, co, i, j); output pixel is
    # (4h + 2*dy + i, 4w + 2*dx + j, co).
    tmp = tmp.reshape(n, hf, wf, 2, 2, co, 2, 2)
    tmp = jnp.transpose(tmp, (0, 1, 3, 6, 2, 4, 7, 5))
    return tmp.reshape(n, 4 * hf, 4 * wf, co)


# --------------------------- IFBlock ----------------------------------------

def _init_conv(key, kh, kw, cin, cout):
    kw_key, kb_key = jax.random.split(key)
    fan_in = cin * kh * kw
    w = jax.random.normal(kw_key, (kh, kw, cin, cout), jnp.float32) / math.sqrt(fan_in)
    b = jax.random.uniform(kb_key, (cout,), jnp.float32, minval=-0.1, maxval=0.1)
    return w, b


def _ifblock_forward(params, x, flow, scale):
    # x, flow: NCHW float32 (PyTorch convention)
    N, _, H, W = x.shape
    xh = jnp.transpose(x, (0, 2, 3, 1)).astype(jnp.float32)   # -> NHWC
    hs, ws = int(H * (1.0 / scale)), int(W * (1.0 / scale))
    xh = bilinear_resize_nhwc(xh, hs, ws)
    if flow is not None:
        fh = jnp.transpose(flow, (0, 2, 3, 1)).astype(jnp.float32)
        fh = bilinear_resize_nhwc(fh, hs, ws) * (1.0 / scale)
        xh = jnp.concatenate([xh, fh], axis=-1)

    # conv0: two strided convs + LeakyReLU (bf16 MXU, f32 accumulation).
    feat = conv2d_gemm(xh, params["w0a"], params["b0a"], stride=2, padding=1,
                       apply_act=True)
    feat = conv2d_gemm(feat, params["w0b"], params["b0b"], stride=2, padding=1,
                       apply_act=True)

    # 8x ResConv fused into one VMEM-resident Pallas kernel.
    feat = fused_resconv_stack(feat, params["w_res"], params["b_res"],
                               params["beta_res"])

    # lastconv: phase-decomposed ConvTranspose2d + PixelShuffle (one GEMM).
    tmp = lastconv_and_pixelshuffle(feat, params["w_last"], params["b_last"])
    tmp = bilinear_resize_nhwc(tmp, int(tmp.shape[1] * scale),
                               int(tmp.shape[2] * scale))

    flow_out = tmp[..., :4] * scale
    mask = tmp[..., 4:5]
    return (jnp.transpose(flow_out, (0, 3, 1, 2)),
            jnp.transpose(mask, (0, 3, 1, 2)))


_ifblock_forward_jit = jax.jit(_ifblock_forward, static_argnums=(3,))


class IFBlockPallas:
    def __init__(self, in_planes, c=64, key=None):
        if key is None:
            key = jax.random.PRNGKey(42)
        keys = jax.random.split(key, 11)
        self.c = c
        # conv0: conv(in_planes, c//2, 3, 2, 1) + conv(c//2, c, 3, 2, 1)
        w0a, b0a = _init_conv(keys[0], 3, 3, in_planes, c // 2)
        w0b, b0b = _init_conv(keys[1], 3, 3, c // 2, c)
        # convblock: 8 x ResConv(c)  (beta = ones, as in nn.Parameter init)
        res_w, res_b = [], []
        for i in range(8):
            w, b = _init_conv(keys[2 + i], 3, 3, c, c)
            res_w.append(w.reshape(9, c, c))
            res_b.append(b)
        w_res = jnp.concatenate(res_w, axis=0)               # (72, c, c)
        b_res = jnp.stack(res_b, 0).reshape(8, 1, c)
        beta_res = jnp.ones((8, 1, c), jnp.float32)
        # lastconv: ConvTranspose2d(c, 4*6, 4, 2, 1) (PyTorch weight (Cin,Cout,4,4))
        kt1, kt2 = jax.random.split(keys[10])
        wt = jax.random.normal(kt1, (c, 4 * 6, 4, 4), jnp.float32) / math.sqrt(c * 16.0)
        bt = jax.random.uniform(kt2, (4 * 6,), jnp.float32, minval=-0.1, maxval=0.1)
        w_last, b_last = build_lastconv_gemm_weights(wt, bt)
        self.params = dict(w0a=w0a, b0a=b0a, w0b=w0b, b0b=b0b,
                           w_res=w_res, b_res=b_res, beta_res=beta_res,
                           w_last=w_last, b_last=b_last)

    def __call__(self, x, flow=None, scale=1):
        return _ifblock_forward_jit(self.params, x, flow, scale)


# --------------------------- main --------------------------------------------

if __name__ == "__main__":
    key = jax.random.PRNGKey(0)
    kx_, kf_ = jax.random.split(key)
    x = jax.random.normal(kx_, (2, 7, 16, 16), jnp.float32)
    flow_in = jax.random.normal(kf_, (2, 4, 16, 16), jnp.float32)

    block = IFBlockPallas(in_planes=7 + 4, c=32, key=jax.random.PRNGKey(42))
    flow_out, mask = block(x, flow_in, scale=1)
    flow_out, mask = jax.block_until_ready((flow_out, mask))

    assert flow_out.shape == (2, 4, 16, 16), flow_out.shape
    assert mask.shape == (2, 1, 16, 16), mask.shape
    assert bool(jnp.all(jnp.isfinite(flow_out))) and bool(jnp.all(jnp.isfinite(mask)))
    print("KERNEL_OK")
</pallas_src>

<mosaic_0001>
module attributes {stable_mosaic.version = 11 : i64} {
  func.func @_gemm_bias_act_kernel(%arg0: i32, %arg1: memref<128x99xbf16, #tpu.memory_space<vmem>>, %arg2: memref<99x16xbf16, #tpu.memory_space<vmem>>, %arg3: memref<1x16xf32, #tpu.memory_space<vmem>>, %arg4: memref<128x16xf32, #tpu.memory_space<vmem>>) attributes {dimension_semantics = [#tpu.dimension_semantics<parallel>], iteration_bounds = array<i64: 1>, scalar_prefetch = 0 : i64, scratch_operands = 0 : i64, tpu.core_type = #tpu.core_type<tc>, window_params = [{transform_indices = @transform_0, window_bounds = array<i64: 128, 99>}, {pipeline_mode = #tpu.pipeline_mode<synchronous>, transform_indices = @transform_1, window_bounds = array<i64: 99, 16>}, {pipeline_mode = #tpu.pipeline_mode<synchronous>, transform_indices = @transform_2, window_bounds = array<i64: 1, 16>}, {transform_indices = @transform_3, window_bounds = array<i64: 128, 16>}]} {
    %c0 = arith.constant 0 : index
    %c0_0 = arith.constant 0 : index
    %0 = vector.load %arg1[%c0, %c0_0] : memref<128x99xbf16, #tpu.memory_space<vmem>>, vector<128x99xbf16>
    %c0_1 = arith.constant 0 : index
    %c0_2 = arith.constant 0 : index
    %1 = vector.load %arg2[%c0_1, %c0_2] : memref<99x16xbf16, #tpu.memory_space<vmem>>, vector<99x16xbf16>
    %cst = arith.constant dense<0.000000e+00> : vector<128x16xf32>
    %2 = tpu.matmul %0, %1, %cst {dimension_numbers = #tpu.dot_dimension_numbers<[1], [0], [0], [1], [0, 0, 1, 1], [], []>} : vector<128x99xbf16>, vector<99x16xbf16>, vector<128x16xf32> -> vector<128x16xf32>
    %c0_3 = arith.constant 0 : index
    %c0_4 = arith.constant 0 : index
    %3 = vector.load %arg3[%c0_3, %c0_4] : memref<1x16xf32, #tpu.memory_space<vmem>>, vector<1x16xf32>
    %4 = vector.broadcast %3 : vector<1x16xf32> to vector<128x16xf32>
    %5 = arith.addf %2, %4 : vector<128x16xf32>
    %cst_5 = arith.constant 0.000000e+00 : f32
    %6 = vector.broadcast %cst_5 : f32 to vector<128x16xf32>
    %7 = arith.cmpf oge, %5, %6 : vector<128x16xf32>
    %cst_6 = arith.constant 2.000000e-01 : f32
    %8 = vector.broadcast %cst_6 : f32 to vector<128x16xf32>
    %9 = arith.mulf %8, %5 : vector<128x16xf32>
    %10 = arith.select %7, %5, %9 : vector<128x16xi1>, vector<128x16xf32>
    %c0_7 = arith.constant 0 : index
    %c0_8 = arith.constant 0 : index
    %11 = vector.load %arg4[%c0_7, %c0_8] : memref<128x16xf32, #tpu.memory_space<vmem>>, vector<128x16xf32>
    tpu.vector_store %arg4[%c0_7, %c0_8], %10 {strides = array<i32>} : memref<128x16xf32, #tpu.memory_space<vmem>>, vector<128x16xf32>,
    return
  }
  func.func @transform_0(%arg0: i32) -> (i32, i32) {
    %c0_i32 = arith.constant 0 : i32
    %c0_i32_0 = arith.constant 0 : i32
    return %arg0, %c0_i32 : i32, i32
  }
  func.func @transform_1(%arg0: i32) -> (i32, i32) {
    %c0_i32 = arith.constant 0 : i32
    %c0_i32_0 = arith.constant 0 : i32
    %c0_i32_1 = arith.constant 0 : i32
    return %c0_i32, %c0_i32_0 : i32, i32
  }
  func.func @transform_2(%arg0: i32) -> (i32, i32) {
    %c0_i32 = arith.constant 0 : i32
    %c0_i32_0 = arith.constant 0 : i32
    %c0_i32_1 = arith.constant 0 : i32
    return %c0_i32, %c0_i32_0 : i32, i32
  }
  func.func @transform_3(%arg0: i32) -> (i32, i32) {
    %c0_i32 = arith.constant 0 : i32
    %c0_i32_0 = arith.constant 0 : i32
    return %arg0, %c0_i32 : i32, i32
  }
}

module attributes {stable_mosaic.version = 11 : i64} {
  func.func @_gemm_bias_act_kernel(%arg0: i32, %arg1: memref<32x144xbf16, #tpu.memory_space<vmem>>, %arg2: memref<144x32xbf16, #tpu.memory_space<vmem>>, %arg3: memref<1x32xf32, #tpu.memory_space<vmem>>, %arg4: memref<32x32xf32, #tpu.memory_space<vmem>>) attributes {dimension_semantics = [#tpu.dimension_semantics<parallel>], iteration_bounds = array<i64: 1>, scalar_prefetch = 0 : i64, scratch_operands = 0 : i64, tpu.core_type = #tpu.core_type<tc>, window_params = [{transform_indices = @transform_0, window_bounds = array<i64: 32, 144>}, {pipeline_mode = #tpu.pipeline_mode<synchronous>, transform_indices = @transform_1, window_bounds = array<i64: 144, 32>}, {pipeline_mode = #tpu.pipeline_mode<synchronous>, transform_indices = @transform_2, window_bounds = array<i64: 1, 32>}, {transform_indices = @transform_3, window_bounds = array<i64: 32, 32>}]} {
    %c0 = arith.constant 0 : index
    %c0_0 = arith.constant 0 : index
    %0 = vector.load %arg1[%c0, %c0_0] : memref<32x144xbf16, #tpu.memory_space<vmem>>, vector<32x144xbf16>
    %c0_1 = arith.constant 0 : index
    %c0_2 = arith.constant 0 : index
    %1 = vector.load %arg2[%c0_1, %c0_2] : memref<144x32xbf16, #tpu.memory_space<vmem>>, vector<144x32xbf16>
    %cst = arith.constant dense<0.000000e+00> : vector<32x32xf32>
    %2 = tpu.matmul %0, %1, %cst {dimension_numbers = #tpu.dot_dimension_numbers<[1], [0], [0], [1], [0, 0, 1, 1], [], []>} : vector<32x144xbf16>, vector<144x32xbf16>, vector<32x32xf32> -> vector<32x32xf32>
    %c0_3 = arith.constant 0 : index
    %c0_4 = arith.constant 0 : index
    %3 = vector.load %arg3[%c0_3, %c0_4] : memref<1x32xf32, #tpu.memory_space<vmem>>, vector<1x32xf32>
    %4 = vector.broadcast %3 : vector<1x32xf32> to vector<32x32xf32>
    %5 = arith.addf %2, %4 : vector<32x32xf32>
    %cst_5 = arith.constant 0.000000e+00 : f32
    %6 = vector.broadcast %cst_5 : f32 to vector<32x32xf32>
    %7 = arith.cmpf oge, %5, %6 : vector<32x32xf32>
    %cst_6 = arith.constant 2.000000e-01 : f32
    %8 = vector.broadcast %cst_6 : f32 to vector<32x32xf32>
    %9 = arith.mulf %8, %5 : vector<32x32xf32>
    %10 = arith.select %7, %5, %9 : vector<32x32xi1>, vector<32x32xf32>
    %c0_7 = arith.constant 0 : index
    %c0_8 = arith.constant 0 : index
    %11 = vector.load %arg4[%c0_7, %c0_8] : memref<32x32xf32, #tpu.memory_space<vmem>>, vector<32x32xf32>
    tpu.vector_store %arg4[%c0_7, %c0_8], %10 {strides = array<i32>} : memref<32x32xf32, #tpu.memory_space<vmem>>, vector<32x32xf32>,
    return
  }
  func.func @transform_0(%arg0: i32) -> (i32, i32) {
    %c0_i32 = arith.constant 0 : i32
    %c0_i32_0 = arith.constant 0 : i32
    return %arg0, %c0_i32 : i32, i32
  }
  func.func @transform_1(%arg0: i32) -> (i32, i32) {
    %c0_i32 = arith.constant 0 : i32
    %c0_i32_0 = arith.constant 0 : i32
    %c0_i32_1 = arith.constant 0 : i32
    return %c0_i32, %c0_i32_0 : i32, i32
  }
  func.func @transform_2(%arg0: i32) -> (i32, i32) {
    %c0_i32 = arith.constant 0 : i32
    %c0_i32_0 = arith.constant 0 : i32
    %c0_i32_1 = arith.constant 0 : i32
    return %c0_i32, %c0_i32_0 : i32, i32
  }
  func.func @transform_3(%arg0: i32) -> (i32, i32) {
    %c0_i32 = arith.constant 0 : i32
    %c0_i32_0 = arith.constant 0 : i32
    return %arg0, %c0_i32 : i32, i32
  }
}

module attributes {stable_mosaic.version = 11 : i64} {
  func.func @_gemm_bias_act_kernel(%arg0: i32, %arg1: memref<32x288xbf16, #tpu.memory_space<vmem>>, %arg2: memref<288x96xbf16, #tpu.memory_space<vmem>>, %arg3: memref<1x96xf32, #tpu.memory_space<vmem>>, %arg4: memref<32x96xf32, #tpu.memory_space<vmem>>) attributes {dimension_semantics = [#tpu.dimension_semantics<parallel>], iteration_bounds = array<i64: 1>, scalar_prefetch = 0 : i64, scratch_operands = 0 : i64, tpu.core_type = #tpu.core_type<tc>, window_params = [{transform_indices = @transform_0, window_bounds = array<i64: 32, 288>}, {pipeline_mode = #tpu.pipeline_mode<synchronous>, transform_indices = @transform_1, window_bounds = array<i64: 288, 96>}, {pipeline_mode = #tpu.pipeline_mode<synchronous>, transform_indices = @transform_2, window_bounds = array<i64: 1, 96>}, {transform_indices = @transform_3, window_bounds = array<i64: 32, 96>}]} {
    %c0 = arith.constant 0 : index
    %c0_0 = arith.constant 0 : index
    %0 = vector.load %arg1[%c0, %c0_0] : memref<32x288xbf16, #tpu.memory_space<vmem>>, vector<32x288xbf16>
    %c0_1 = arith.constant 0 : index
    %c0_2 = arith.constant 0 : index
    %1 = vector.load %arg2[%c0_1, %c0_2] : memref<288x96xbf16, #tpu.memory_space<vmem>>, vector<288x96xbf16>
    %cst = arith.constant dense<0.000000e+00> : vector<32x96xf32>
    %2 = tpu.matmul %0, %1, %cst {dimension_numbers = #tpu.dot_dimension_numbers<[1], [0], [0], [1], [0, 0, 1, 1], [], []>} : vector<32x288xbf16>, vector<288x96xbf16>, vector<32x96xf32> -> vector<32x96xf32>
    %c0_3 = arith.constant 0 : index
    %c0_4 = arith.constant 0 : index
    %3 = vector.load %arg3[%c0_3, %c0_4] : memref<1x96xf32, #tpu.memory_space<vmem>>, vector<1x96xf32>
    %4 = vector.broadcast %3 : vector<1x96xf32> to vector<32x96xf32>
    %5 = arith.addf %2, %4 : vector<32x96xf32>
    %c0_5 = arith.constant 0 : index
    %c0_6 = arith.constant 0 : index
    %6 = vector.load %arg4[%c0_5, %c0_6] : memref<32x96xf32, #tpu.memory_space<vmem>>, vector<32x96xf32>
    tpu.vector_store %arg4[%c0_5, %c0_6], %5 {strides = array<i32>} : memref<32x96xf32, #tpu.memory_space<vmem>>, vector<32x96xf32>,
    return
  }
  func.func @transform_0(%arg0: i32) -> (i32, i32) {
    %c0_i32 = arith.constant 0 : i32
    %c0_i32_0 = arith.constant 0 : i32
    return %arg0, %c0_i32 : i32, i32
  }
  func.func @transform_1(%arg0: i32) -> (i32, i32) {
    %c0_i32 = arith.constant 0 : i32
    %c0_i32_0 = arith.constant 0 : i32
    %c0_i32_1 = arith.constant 0 : i32
    return %c0_i32, %c0_i32_0 : i32, i32
  }
  func.func @transform_2(%arg0: i32) -> (i32, i32) {
    %c0_i32 = arith.constant 0 : i32
    %c0_i32_0 = arith.constant 0 : i32
    %c0_i32_1 = arith.constant 0 : i32
    return %c0_i32, %c0_i32_0 : i32, i32
  }
  func.func @transform_3(%arg0: i32) -> (i32, i32) {
    %c0_i32 = arith.constant 0 : i32
    %c0_i32_0 = arith.constant 0 : i32
    return %arg0, %c0_i32 : i32, i32
  }
}

module attributes {stable_mosaic.version = 11 : i64} {
  func.func @_fused_resconv_kernel(%arg0: i32, %arg1: memref<1x16x32xbf16, #tpu.memory_space<vmem>>, %arg2: memref<72x32x32xbf16, #tpu.memory_space<vmem>>, %arg3: memref<8x1x32xf32, #tpu.memory_space<vmem>>, %arg4: memref<8x1x32xf32, #tpu.memory_space<vmem>>, %arg5: memref<2x16x1xbf16, #tpu.memory_space<vmem>>, %arg6: memref<1x16x32xf32, #tpu.memory_space<vmem>>, %arg7: memref<29x32xbf16, #tpu.memory_space<vmem>>, %arg8: memref<16x32xf32, #tpu.memory_space<vmem>>) attributes {dimension_semantics = [#tpu.dimension_semantics<parallel>], iteration_bounds = array<i64: 2>, scalar_prefetch = 0 : i64, scratch_operands = 2 : i64, tpu.core_type = #tpu.core_type<tc>, window_params = [{transform_indices = @transform_0, window_bounds = array<i64: 1, 16, 32>}, {pipeline_mode = #tpu.pipeline_mode<synchronous>, transform_indices = @transform_1, window_bounds = array<i64: 72, 32, 32>}, {pipeline_mode = #tpu.pipeline_mode<synchronous>, transform_indices = @transform_2, window_bounds = array<i64: 8, 1, 32>}, {pipeline_mode = #tpu.pipeline_mode<synchronous>, transform_indices = @transform_3, window_bounds = array<i64: 8, 1, 32>}, {pipeline_mode = #tpu.pipeline_mode<synchronous>, transform_indices = @transform_4, window_bounds = array<i64: 2, 16, 1>}, {transform_indices = @transform_5, window_bounds = array<i64: 1, 16, 32>}]} {
    %cst = arith.constant 0.000000e+00 : bf16
    %0 = vector.broadcast %cst : bf16 to vector<29x32xbf16>
    %c0 = arith.constant 0 : index
    %c0_0 = arith.constant 0 : index
    %1 = vector.load %arg7[%c0, %c0_0] : memref<29x32xbf16, #tpu.memory_space<vmem>>, vector<29x32xbf16>
    tpu.vector_store %arg7[%c0, %c0_0], %0 {strides = array<i32>} : memref<29x32xbf16, #tpu.memory_space<vmem>>, vector<29x32xbf16>,
    %c0_1 = arith.constant 0 : index
    %c0_2 = arith.constant 0 : index
    %c0_3 = arith.constant 0 : index
    %2 = vector.load %arg1[%c0_1, %c0_2, %c0_3] : memref<1x16x32xbf16, #tpu.memory_space<vmem>>, vector<1x16x32xbf16>
    %3 = vector.shape_cast %2 : vector<1x16x32xbf16> to vector<16x32xbf16>
    %c8 = arith.constant 8 : index
    %c0_4 = arith.constant 0 : index
    %4 = vector.load %arg7[%c8, %c0_4] : memref<29x32xbf16, #tpu.memory_space<vmem>>, vector<16x32xbf16>
    tpu.vector_store %arg7[%c8, %c0_4], %3 {strides = array<i32>} : memref<29x32xbf16, #tpu.memory_space<vmem>>, vector<16x32xbf16>,
    %c0_5 = arith.constant 0 : index
    %c0_6 = arith.constant 0 : index
    %c0_7 = arith.constant 0 : index
    %5 = vector.load %arg5[%c0_5, %c0_6, %c0_7] : memref<2x16x1xbf16, #tpu.memory_space<vmem>>, vector<1x16x1xbf16>
    %6 = vector.shape_cast %5 : vector<1x16x1xbf16> to vector<16x1xbf16>
    %c1 = arith.constant 1 : index
    %c0_8 = arith.constant 0 : index
    %c0_9 = arith.constant 0 : index
    %7 = vector.load %arg5[%c1, %c0_8, %c0_9] : memref<2x16x1xbf16, #tpu.memory_space<vmem>>, vector<1x16x1xbf16>
    %8 = vector.shape_cast %7 : vector<1x16x1xbf16> to vector<16x1xbf16>
    %c3 = arith.constant 3 : index
    %c0_10 = arith.constant 0 : index
    %9 = vector.load %arg7[%c3, %c0_10] : memref<29x32xbf16, #tpu.memory_space<vmem>>, vector<16x32xbf16>
    %10 = vector.broadcast %6 : vector<16x1xbf16> to vector<16x32xbf16>
    %11 = arith.mulf %9, %10 : vector<16x32xbf16>
    %c0_11 = arith.constant 0 : index
    %c0_12 = arith.constant 0 : index
    %c0_13 = arith.constant 0 : index
    %12 = vector.load %arg2[%c0_11, %c0_12, %c0_13] : memref<72x32x32xbf16, #tpu.memory_space<vmem>>, vector<1x32x32xbf16>
    %13 = vector.shape_cast %12 : vector<1x32x32xbf16> to vector<32x32xbf16>
    %cst_14 = arith.constant dense<0.000000e+00> : vector<16x32xf32>
    %14 = tpu.matmul %11, %13, %cst_14 {dimension_numbers = #tpu.dot_dimension_numbers<[1], [0], [0], [1], [0, 0, 1, 1], [], []>} : vector<16x32xbf16>, vector<32x32xbf16>, vector<16x32xf32> -> vector<16x32xf32>
    %c0_15 = arith.constant 0 : index
    %c0_16 = arith.constant 0 : index
    %15 = vector.load %arg8[%c0_15, %c0_16] : memref<16x32xf32, #tpu.memory_space<vmem>>, vector<16x32xf32>
    tpu.vector_store %arg8[%c0_15, %c0_16], %14 {strides = array<i32>} : memref<16x32xf32, #tpu.memory_space<vmem>>, vector<16x32xf32>,
    %c4 = arith.constant 4 : index
    %c0_17 = arith.constant 0 : index
    %16 = vector.load %arg7[%c4, %c0_17] : memref<29x32xbf16, #tpu.memory_space<vmem>>, vector<16x32xbf16>
    %c1_18 = arith.constant 1 : index
    %c0_19 = arith.constant 0 : index
    %c0_20 = arith.constant 0 : index
    %17 = vector.load %arg2[%c1_18, %c0_19, %c0_20] : memref<72x32x32xbf16, #tpu.memory_space<vmem>>, vector<1x32x32xbf16>
    %18 = vector.shape_cast %17 : vector<1x32x32xbf16> to vector<32x32xbf16>
    %cst_21 = arith.constant dense<0.000000e+00> : vector<16x32xf32>
    %19 = tpu.matmul %16, %18, %cst_21 {dimension_numbers = #tpu.dot_dimension_numbers<[1], [0], [0], [1], [0, 0, 1, 1], [], []>} : vector<16x32xbf16>, vector<32x32xbf16>, vector<16x32xf32> -> vector<16x32xf32>
    %c0_22 = arith.constant 0 : index
    %c0_23 = arith.constant 0 : index
    %20 = vector.load %arg8[%c0_22, %c0_23] : memref<16x32xf32, #tpu.memory_space<vmem>>, vector<16x32xf32>
    %21 = arith.addf %20, %19 : vector<16x32xf32>
    %c0_24 = arith.constant 0 : index
    %c0_25 = arith.constant 0 : index
    %22 = vector.load %arg8[%c0_24, %c0_25] : memref<16x32xf32, #tpu.memory_space<vmem>>, vector<16x32xf32>
    tpu.vector_store %arg8[%c0_24, %c0_25], %21 {strides = array<i32>} : memref<16x32xf32, #tpu.memory_space<vmem>>, vector<16x32xf32>,
    %c5 = arith.constant 5 : index
    %c0_26 = arith.constant 0 : index
    %23 = vector.load %arg7[%c5, %c0_26] : memref<29x32xbf16, #tpu.memory_space<vmem>>, vector<16x32xbf16>
    %24 = vector.broadcast %8 : vector<16x1xbf16> to vector<16x32xbf16>
    %25 = arith.mulf %23, %24 : vector<16x32xbf16>
    %c2 = arith.constant 2 : index
    %c0_27 = arith.constant 0 : index
    %c0_28 = arith.constant 0 : index
    %26 = vector.load %arg2[%c2, %c0_27, %c0_28] : memref<72x32x32xbf16, #tpu.memory_space<vmem>>, vector<1x32x32xbf16>
    %27 = vector.shape_cast %26 : vector<1x32x32xbf16> to vector<32x32xbf16>
    %cst_29 = arith.constant dense<0.000000e+00> : vector<16x32xf32>
    %28 = tpu.matmul %25, %27, %cst_29 {dimension_numbers = #tpu.dot_dimension_numbers<[1], [0], [0], [1], [0, 0, 1, 1], [], []>} : vector<16x32xbf16>, vector<32x32xbf16>, vector<16x32xf32> -> vector<16x32xf32>
    %c0_30 = arith.constant 0 : index
    %c0_31 = arith.constant 0 : index
    %29 = vector.load %arg8[%c0_30, %c0_31] : memref<16x32xf32, #tpu.memory_space<vmem>>, vector<16x32xf32>
    %30 = arith.addf %29, %28 : vector<16x32xf32>
    %c0_32 = arith.constant 0 : index
    %c0_33 = arith.constant 0 : index
    %31 = vector.load %arg8[%c0_32, %c0_33] : memref<16x32xf32, #tpu.memory_space<vmem>>, vector<16x32xf32>
    tpu.vector_store %arg8[%c0_32, %c0_33], %30 {strides = array<i32>} : memref<16x32xf32, #tpu.memory_space<vmem>>, vector<16x32xf32>,
    %c7 = arith.constant 7 : index
    %c0_34 = arith.constant 0 : index
    %32 = vector.load %arg7[%c7, %c0_34] : memref<29x32xbf16, #tpu.memory_space<vmem>>, vector<16x32xbf16>
    %33 = vector.broadcast %6 : vector<16x1xbf16> to vector<16x32xbf16>
    %34 = arith.mulf %32, %33 : vector<16x32xbf16>
    %c3_35 = arith.constant 3 : index
    %c0_36 = arith.constant 0 : index
    %c0_37 = arith.constant 0 : index
    %35 = vector.load %arg2[%c3_35, %c0_36, %c0_37] : memref<72x32x32xbf16, #tpu.memory_space<vmem>>, vector<1x32x32xbf16>
    %36 = vector.shape_cast %35 : vector<1x32x32xbf16> to vector<32x32xbf16>
    %cst_38 = arith.constant dense<0.000000e+00> : vector<16x32xf32>
    %37 = tpu.matmul %34, %36, %cst_38 {dimension_numbers = #tpu.dot_dimension_numbers<[1], [0], [0], [1], [0, 0, 1, 1], [], []>} : vector<16x32xbf16>, vector<32x32xbf16>, vector<16x32xf32> -> vector<16x32xf32>
    %c0_39 = arith.constant 0 : index
    %c0_40 = arith.constant 0 : index
    %38 = vector.load %arg8[%c0_39, %c0_40] : memref<16x32xf32, #tpu.memory_space<vmem>>, vector<16x32xf32>
    %39 = arith.addf %38, %37 : vector<16x32xf32>
    %c0_41 = arith.constant 0 : index
    %c0_42 = arith.constant 0 : index
    %40 = vector.load %arg8[%c0_41, %c0_42] : memref<16x32xf32, #tpu.memory_space<vmem>>, vector<16x32xf32>
    tpu.vector_store %arg8[%c0_41, %c0_42], %39 {strides = array<i32>} : memref<16x32xf32, #tpu.memory_space<vmem>>, vector<16x32xf32>,
    %c8_43 = arith.constant 8 : index
    %c0_44 = arith.constant 0 : index
    %41 = vector.load %arg7[%c8_43, %c0_44] : memref<29x32xbf16, #tpu.memory_space<vmem>>, vector<16x32xbf16>
    %c4_45 = arith.constant 4 : index
    %c0_46 = arith.constant 0 : index
    %c0_47 = arith.constant 0 : index
    %42 = vector.load %arg2[%c4_45, %c0_46, %c0_47] : memref<72x32x32xbf16, #tpu.memory_space<vmem>>, vector<1x32x32xbf16>
    %43 = vector.shape_cast %42 : vector<1x32x32xbf16> to vector<32x32xbf16>
    %cst_48 = arith.constant dense<0.000000e+00> : vector<16x32xf32>
    %44 = tpu.matmul %41, %43, %cst_48 {dimension_numbers = #tpu.dot_dimension_numbers<[1], [0], [0], [1], [0, 0, 1, 1], [], []>} : vector<16x32xbf16>, vector<32x32xbf16>, vector<16x32xf32> -> vector<16x32xf32>
    %c0_49 = arith.constant 0 : index
    %c0_50 = arith.constant 0 : index
    %45 = vector.load %arg8[%c0_49, %c0_50] : memref<16x32xf32, #tpu.memory_space<vmem>>, vector<16x32xf32>
    %46 = arith.addf %45, %44 : vector<16x32xf32>
    %c0_51 = arith.constant 0 : index
    %c0_52 = arith.constant 0 : index
    %47 = vector.load %arg8[%c0_51, %c0_52] : memref<16x32xf32, #tpu.memory_space<vmem>>, vector<16x32xf32>
    tpu.vector_store %arg8[%c0_51, %c0_52], %46 {strides = array<i32>} : memref<16x32xf32, #tpu.memory_space<vmem>>, vector<16x32xf32>,
    %c9 = arith.constant 9 : index
    %c0_53 = arith.constant 0 : index
    %48 = vector.load %arg7[%c9, %c0_53] : memref<29x32xbf16, #tpu.memory_space<vmem>>, vector<16x32xbf16>
    %49 = vector.broadcast %8 : vector<16x1xbf16> to vector<16x32xbf16>
    %50 = arith.mulf %48, %49 : vector<16x32xbf16>
    %c5_54 = arith.constant 5 : index
    %c0_55 = arith.constant 0 : index
    %c0_56 = arith.constant 0 : index
    %51 = vector.load %arg2[%c5_54, %c0_55, %c0_56] : memref<72x32x32xbf16, #tpu.memory_space<vmem>>, vector<1x32x32xbf16>
    %52 = vector.shape_cast %51 : vector<1x32x32xbf16> to vector<32x32xbf16>
    %cst_57 = arith.constant dense<0.000000e+00> : vector<16x32xf32>
    %53 = tpu.matmul %50, %52, %cst_57 {dimension_numbers = #tpu.dot_dimension_numbers<[1], [0], [0], [1], [0, 0, 1, 1], [], []>} : vector<16x32xbf16>, vector<32x32xbf16>, vector<16x32xf32> -> vector<16x32xf32>
    %c0_58 = arith.constant 0 : index
    %c0_59 = arith.constant 0 : index
    %54 = vector.load %arg8[%c0_58, %c0_59] : memref<16x32xf32, #tpu.memory_space<vmem>>, vector<16x32xf32>
    %55 = arith.addf %54, %53 : vector<16x32xf32>
    %c0_60 = arith.constant 0 : index
    %c0_61 = arith.constant 0 : index
    %56 = vector.load %arg8[%c0_60, %c0_61] : memref<16x32xf32, #tpu.memory_space<vmem>>, vector<16x32xf32>
    tpu.vector_store %arg8[%c0_60, %c0_61], %55 {strides = array<i32>} : memref<16x32xf32, #tpu.memory_space<vmem>>, vector<16x32xf32>,
    %c11 = arith.constant 11 : index
    %c0_62 = arith.constant 0 : index
    %57 = vector.load %arg7[%c11, %c0_62] : memref<29x32xbf16, #tpu.memory_space<vmem>>, vector<16x32xbf16>
    %58 = vector.broadcast %6 : vector<16x1xbf16> to vector<16x32xbf16>
    %59 = arith.mulf %57, %58 : vector<16x32xbf16>
    %c6 = arith.constant 6 : index
    %c0_63 = arith.constant 0 : index
    %c0_64 = arith.constant 0 : index
    %60 = vector.load %arg2[%c6, %c0_63, %c0_64] : memref<72x32x32xbf16, #tpu.memory_space<vmem>>, vector<1x32x32xbf16>
    %61 = vector.shape_cast %60 : vector<1x32x32xbf16> to vector<32x32xbf16>
    %cst_65 = arith.constant dense<0.000000e+00> : vector<16x32xf32>
    %62 = tpu.matmul %59, %61, %cst_65 {dimension_numbers = #tpu.dot_dimension_numbers<[1], [0], [0], [1], [0, 0, 1, 1], [], []>} : vector<16x32xbf16>, vector<32x32xbf16>, vector<16x32xf32> -> vector<16x32xf32>
    %c0_66 = arith.constant 0 : index
    %c0_67 = arith.constant 0 : index
    %63 = vector.load %arg8[%c0_66, %c0_67] : memref<16x32xf32, #tpu.memory_space<vmem>>, vector<16x32xf32>
    %64 = arith.addf %63, %62 : vector<16x32xf32>
    %c0_68 = arith.constant 0 : index
    %c0_69 = arith.constant 0 : index
    %65 = vector.load %arg8[%c0_68, %c0_69] : memref<16x32xf32, #tpu.memory_space<vmem>>, vector<16x32xf32>
    tpu.vector_store %arg8[%c0_68, %c0_69], %64 {strides = array<i32>} : memref<16x32xf32, #tpu.memory_space<vmem>>, vector<16x32xf32>,
    %c12 = arith.constant 12 : index
    %c0_70 = arith.constant 0 : index
    %66 = vector.load %arg7[%c12, %c0_70] : memref<29x32xbf16, #tpu.memory_space<vmem>>, vector<16x32xbf16>
    %c7_71 = arith.constant 7 : index
    %c0_72 = arith.constant 0 : index
    %c0_73 = arith.constant 0 : index
    %67 = vector.load %arg2[%c7_71, %c0_72, %c0_73] : memref<72x32x32xbf16, #tpu.memory_space<vmem>>, vector<1x32x32xbf16>
    %68 = vector.shape_cast %67 : vector<1x32x32xbf16> to vector<32x32xbf16>
    %cst_74 = arith.constant dense<0.000000e+00> : vector<16x32xf32>
    %69 = tpu.matmul %66, %68, %cst_74 {dimension_numbers = #tpu.dot_dimension_numbers<[1], [0], [0], [1], [0, 0, 1, 1], [], []>} : vector<16x32xbf16>, vector<32x32xbf16>, vector<16x32xf32> -> vector<16x32xf32>
    %c0_75 = arith.constant 0 : index
    %c0_76 = arith.constant 0 : index
    %70 = vector.load %arg8[%c0_75, %c0_76] : memref<16x32xf32, #tpu.memory_space<vmem>>, vector<16x32xf32>
    %71 = arith.addf %70, %69 : vector<16x32xf32>
    %c0_77 = arith.constant 0 : index
    %c0_78 = arith.constant 0 : index
    %72 = vector.load %arg8[%c0_77, %c0_78] : memref<16x32xf32, #tpu.memory_space<vmem>>, vector<16x32xf32>
    tpu.vector_store %arg8[%c0_77, %c0_78], %71 {strides = array<i32>} : memref<16x32xf32, #tpu.memory_space<vmem>>, vector<16x32xf32>,
    %c13 = arith.constant 13 : index
    %c0_79 = arith.constant 0 : index
    %73 = vector.load %arg7[%c13, %c0_79] : memref<29x32xbf16, #tpu.memory_space<vmem>>, vector<16x32xbf16>
    %74 = vector.broadcast %8 : vector<16x1xbf16> to vector<16x32xbf16>
    %75 = arith.mulf %73, %74 : vector<16x32xbf16>
    %c8_80 = arith.constant 8 : index
    %c0_81 = arith.constant 0 : index
    %c0_82 = arith.constant 0 : index
    %76 = vector.load %arg2[%c8_80, %c0_81, %c0_82] : memref<72x32x32xbf16, #tpu.memory_space<vmem>>, vector<1x32x32xbf16>
    %77 = vector.shape_cast %76 : vector<1x32x32xbf16> to vector<32x32xbf16>
    %cst_83 = arith.constant dense<0.000000e+00> : vector<16x32xf32>
    %78 = tpu.matmul %75, %77, %cst_83 {dimension_numbers = #tpu.dot_dimension_numbers<[1], [0], [0], [1], [0, 0, 1, 1], [], []>} : vector<16x32xbf16>, vector<32x32xbf16>, vector<16x32xf32> -> vector<16x32xf32>
    %c0_84 = arith.constant 0 : index
    %c0_85 = arith.constant 0 : index
    %79 = vector.load %arg8[%c0_84, %c0_85] : memref<16x32xf32, #tpu.memory_space<vmem>>, vector<16x32xf32>
    %80 = arith.addf %79, %78 : vector<16x32xf32>
    %c0_86 = arith.constant 0 : index
    %c0_87 = arith.constant 0 : index
    %81 = vector.load %arg8[%c0_86, %c0_87] : memref<16x32xf32, #tpu.memory_space<vmem>>, vector<16x32xf32>
    tpu.vector_store %arg8[%c0_86, %c0_87], %80 {strides = array<i32>} : memref<16x32xf32, #tpu.memory_space<vmem>>, vector<16x32xf32>,
    %c8_88 = arith.constant 8 : index
    %c0_89 = arith.constant 0 : index
    %82 = vector.load %arg7[%c8_88, %c0_89] : memref<29x32xbf16, #tpu.memory_space<vmem>>, vector<16x32xbf16>
    %83 = arith.extf %82 : vector<16x32xbf16> to vector<16x32xf32>
    %c0_90 = arith.constant 0 : index
    %c0_91 = arith.constant 0 : index
    %84 = vector.load %arg8[%c0_90, %c0_91] : memref<16x32xf32, #tpu.memory_space<vmem>>, vector<16x32xf32>
    %c0_92 = arith.constant 0 : index
    %c0_93 = arith.constant 0 : index
    %c0_94 = arith.constant 0 : index
    %85 = vector.load %arg3[%c0_92, %c0_93, %c0_94] : memref<8x1x32xf32, #tpu.memory_space<vmem>>, vector<1x1x32xf32>
    %86 = vector.shape_cast %85 : vector<1x1x32xf32> to vector<1x32xf32>
    %87 = vector.broadcast %86 : vector<1x32xf32> to vector<16x32xf32>
    %88 = arith.addf %84, %87 : vector<16x32xf32>
    %c0_95 = arith.constant 0 : index
    %c0_96 = arith.constant 0 : index
    %c0_97 = arith.constant 0 : index
    %89 = vector.load %arg4[%c0_95, %c0_96, %c0_97] : memref<8x1x32xf32, #tpu.memory_space<vmem>>, vector<1x1x32xf32>
    %90 = vector.shape_cast %89 : vector<1x1x32xf32> to vector<1x32xf32>
    %91 = vector.broadcast %90 : vector<1x32xf32> to vector<16x32xf32>
    %92 = arith.mulf %88, %91 : vector<16x32xf32>
    %93 = arith.addf %92, %83 : vector<16x32xf32>
    %cst_98 = arith.constant 0.000000e+00 : f32
    %94 = vector.broadcast %cst_98 : f32 to vector<16x32xf32>
    %95 = arith.cmpf oge, %93, %94 : vector<16x32xf32>
    %cst_99 = arith.constant 2.000000e-01 : f32
    %96 = vector.broadcast %cst_99 : f32 to vector<16x32xf32>
    %97 = arith.mulf %96, %93 : vector<16x32xf32>
    %98 = arith.select %95, %93, %97 : vector<16x32xi1>, vector<16x32xf32>
    %99 = arith.truncf %98 : vector<16x32xf32> to vector<16x32xbf16>
    %c8_100 = arith.constant 8 : index
    %c0_101 = arith.constant 0 : index
    %100 = vector.load %arg7[%c8_100, %c0_101] : memref<29x32xbf16, #tpu.memory_space<vmem>>, vector<16x32xbf16>
    tpu.vector_store %arg7[%c8_100, %c0_101], %99 {strides = array<i32>} : memref<29x32xbf16, #tpu.memory_space<vmem>>, vector<16x32xbf16>,
    %c3_102 = arith.constant 3 : index
    %c0_103 = arith.constant 0 : index
    %101 = vector.load %arg7[%c3_102, %c0_103] : memref<29x32xbf16, #tpu.memory_space<vmem>>, vector<16x32xbf16>
    %102 = vector.broadcast %6 : vector<16x1xbf16> to vector<16x32xbf16>
    %103 = arith.mulf %101, %102 : vector<16x32xbf16>
    %c9_104 = arith.constant 9 : index
    %c0_105 = arith.constant 0 : index
    %c0_106 = arith.constant 0 : index
    %104 = vector.load %arg2[%c9_104, %c0_105, %c0_106] : memref<72x32x32xbf16, #tpu.memory_space<vmem>>, vector<1x32x32xbf16>
    %105 = vector.shape_cast %104 : vector<1x32x32xbf16> to vector<32x32xbf16>
    %cst_107 = arith.constant dense<0.000000e+00> : vector<16x32xf32>
    %106 = tpu.matmul %103, %105, %cst_107 {dimension_numbers = #tpu.dot_dimension_numbers<[1], [0], [0], [1], [0, 0, 1, 1], [], []>} : vector<16x32xbf16>, vector<32x32xbf16>, vector<16x32xf32> -> vector<16x32xf32>
    %c0_108 = arith.constant 0 : index
    %c0_109 = arith.constant 0 : index
    %107 = vector.load %arg8[%c0_108, %c0_109] : memref<16x32xf32, #tpu.memory_space<vmem>>, vector<16x32xf32>
    tpu.vector_store %arg8[%c0_108, %c0_109], %106 {strides = array<i32>} : memref<16x32xf32, #tpu.memory_space<vmem>>, vector<16x32xf32>,
    %c4_110 = arith.constant 4 : index
    %c0_111 = arith.constant 0 : index
    %108 = vector.load %arg7[%c4_110, %c0_111] : memref<29x32xbf16, #tpu.memory_space<vmem>>, vector<16x32xbf16>
    %c10 = arith.constant 10 : index
    %c0_112 = arith.constant 0 : index
    %c0_113 = arith.constant 0 : index
    %109 = vector.load %arg2[%c10, %c0_112, %c0_113] : memref<72x32x32xbf16, #tpu.memory_space<vmem>>, vector<1x32x32xbf16>
    %110 = vector.shape_cast %109 : vector<1x32x32xbf16> to vector<32x32xbf16>
    %cst_114 = arith.constant dense<0.000000e+00> : vector<16x32xf32>
    %111 = tpu.matmul %108, %110, %cst_114 {dimension_numbers = #tpu.dot_dimension_numbers<[1], [0], [0], [1], [0, 0, 1, 1], [], []>} : vector<16x32xbf16>, vector<32x32xbf16>, vector<16x32xf32> -> vector<16x32xf32>
    %c0_115 = arith.constant 0 : index
    %c0_116 = arith.constant 0 : index
    %112 = vector.load %arg8[%c0_115, %c0_116] : memref<16x32xf32, #tpu.memory_space<vmem>>, vector<16x32xf32>
    %113 = arith.addf %112, %111 : vector<16x32xf32>
    %c0_117 = arith.constant 0 : index
    %c0_118 = arith.constant 0 : index
    %114 = vector.load %arg8[%c0_117, %c0_118] : memref<16x32xf32, #tpu.memory_space<vmem>>, vector<16x32xf32>
    tpu.vector_store %arg8[%c0_117, %c0_118], %113 {strides = array<i32>} : memref<16x32xf32, #tpu.memory_space<vmem>>, vector<16x32xf32>,
    %c5_119 = arith.constant 5 : index
    %c0_120 = arith.constant 0 : index
    %115 = vector.load %arg7[%c5_119, %c0_120] : memref<29x32xbf16, #tpu.memory_space<vmem>>, vector<16x32xbf16>
    %116 = vector.broadcast %8 : vector<16x1xbf16> to vector<16x32xbf16>
    %117 = arith.mulf %115, %116 : vector<16x32xbf16>
    %c11_121 = arith.constant 11 : index
    %c0_122 = arith.constant 0 : index
    %c0_123 = arith.constant 0 : index
    %118 = vector.load %arg2[%c11_121, %c0_122, %c0_123] : memref<72x32x32xbf16, #tpu.memory_space<vmem>>, vector<1x32x32xbf16>
    %119 = vector.shape_cast %118 : vector<1x32x32xbf16> to vector<32x32xbf16>
    %cst_124 = arith.constant dense<0.000000e+00> : vector<16x32xf32>
    %120 = tpu.matmul %117, %119, %cst_124 {dimension_numbers = #tpu.dot_dimension_numbers<[1], [0], [0], [1], [0, 0, 1, 1], [], []>} : vector<16x32xbf16>, vector<32x32xbf16>, vector<16x32xf32> -> vector<16x32xf32>
    %c0_125 = arith.constant 0 : index
    %c0_126 = arith.constant 0 : index
    %121 = vector.load %arg8[%c0_125, %c0_126] : memref<16x32xf32, #tpu.memory_space<vmem>>, vector<16x32xf32>
    %122 = arith.addf %121, %120 : vector<16x32xf32>
    %c0_127 = arith.constant 0 : index
    %c0_128 = arith.constant 0 : index
    %123 = vector.load %arg8[%c0_127, %c0_128] : memref<16x32xf32, #tpu.memory_space<vmem>>, vector<16x32xf32>
    tpu.vector_store %arg8[%c0_127, %c0_128], %122 {strides = array<i32>} : memref<16x32xf32, #tpu.memory_space<vmem>>, vector<16x32xf32>,
    %c7_129 = arith.constant 7 : index
    %c0_130 = arith.constant 0 : index
    %124 = vector.load %arg7[%c7_129, %c0_130] : memref<29x32xbf16, #tpu.memory_space<vmem>>, vector<16x32xbf16>
    %125 = vector.broadcast %6 : vector<16x1xbf16> to vector<16x32xbf16>
    %126 = arith.mulf %124, %125 : vector<16x32xbf16>
    %c12_131 = arith.constant 12 : index
    %c0_132 = arith.constant 0 : index
    %c0_133 = arith.constant 0 : index
    %127 = vector.load %arg2[%c12_131, %c0_132, %c0_133] : memref<72x32x32xbf16, #tpu.memory_space<vmem>>, vector<1x32x32xbf16>
    %128 = vector.shape_cast %127 : vector<1x32x32xbf16> to vector<32x32xbf16>
    %cst_134 = arith.constant dense<0.000000e+00> : vector<16x32xf32>
    %129 = tpu.matmul %126, %128, %cst_134 {dimension_numbers = #tpu.dot_dimension_numbers<[1], [0], [0], [1], [0, 0, 1, 1], [], []>} : vector<16x32xbf16>, vector<32x32xbf16>, vector<16x32xf32> -> vector<16x32xf32>
    %c0_135 = arith.constant 0 : index
    %c0_136 = arith.constant 0 : index
    %130 = vector.load %arg8[%c0_135, %c0_136] : memref<16x32xf32, #tpu.memory_space<vmem>>, vector<16x32xf32>
    %131 = arith.addf %130, %129 : vector<16x32xf32>
    %c0_137 = arith.constant 0 : index
    %c0_138 = arith.constant 0 : index
    %132 = vector.load %arg8[%c0_137, %c0_138] : memref<16x32xf32, #tpu.memory_space<vmem>>, vector<16x32xf32>
    tpu.vector_store %arg8[%c0_137, %c0_138], %131 {strides = array<i32>} : memref<16x32xf32, #tpu.memory_space<vmem>>, vector<16x32xf32>,
    %c8_139 = arith.constant 8 : index
    %c0_140 = arith.constant 0 : index
    %133 = vector.load %arg7[%c8_139, %c0_140] : memref<29x32xbf16, #tpu.memory_space<vmem>>, vector<16x32xbf16>
    %c13_141 = arith.constant 13 : index
    %c0_142 = arith.constant 0 : index
    %c0_143 = arith.constant 0 : index
    %134 = vector.load %arg2[%c13_141, %c0_142, %c0_143] : memref<72x32x32xbf16, #tpu.memory_space<vmem>>, vector<1x32x32xbf16>
    %135 = vector.shape_cast %134 : vector<1x32x32xbf16> to vector<32x32xbf16>
    %cst_144 = arith.constant dense<0.000000e+00> : vector<16x32xf32>
    %136 = tpu.matmul %133, %135, %cst_144 {dimension_numbers = #tpu.dot_dimension_numbers<[1], [0], [0], [1], [0, 0, 1, 1], [], []>} : vector<16x32xbf16>, vector<32x32xbf16>, vector<16x32xf32> -> vector<16x32xf32>
    %c0_145 = arith.constant 0 : index
    %c0_146 = arith.constant 0 : index
    %137 = vector.load %arg8[%c0_145, %c0_146] : memref<16x32xf32, #tpu.memory_space<vmem>>, vector<16x32xf32>
    %138 = arith.addf %137, %136 : vector<16x32xf32>
    %c0_147 = arith.constant 0 : index
    %c0_148 = arith.constant 0 : index
    %139 = vector.load %arg8[%c0_147, %c0_148] : memref<16x32xf32, #tpu.memory_space<vmem>>, vector<16x32xf32>
    tpu.vector_store %arg8[%c0_147, %c0_148], %138 {strides = array<i32>} : memref<16x32xf32, #tpu.memory_space<vmem>>, vector<16x32xf32>,
    %c9_149 = arith.constant 9 : index
    %c0_150 = arith.constant 0 : index
    %140 = vector.load %arg7[%c9_149, %c0_150] : memref<29x32xbf16, #tpu.memory_space<vmem>>, vector<16x32xbf16>
    %141 = vector.broadcast %8 : vector<16x1xbf16> to vector<16x32xbf16>
    %142 = arith.mulf %140, %141 : vector<16x32xbf16>
    %c14 = arith.constant 14 : index
    %c0_151 = arith.constant 0 : index
    %c0_152 = arith.constant 0 : index
    %143 = vector.load %arg2[%c14, %c0_151, %c0_152] : memref<72x32x32xbf16, #tpu.memory_space<vmem>>, vector<1x32x32xbf16>
    %144 = vector.shape_cast %143 : vector<1x32x32xbf16> to vector<32x32xbf16>
    %cst_153 = arith.constant dense<0.000000e+00> : vector<16x32xf32>
    %145 = tpu.matmul %142, %144, %cst_153 {dimension_numbers = #tpu.dot_dimension_numbers<[1], [0], [0], [1], [0, 0, 1, 1], [], []>} : vector<16x32xbf16>, vector<32x32xbf16>, vector<16x32xf32> -> vector<16x32xf32>
    %c0_154 = arith.constant 0 : index
    %c0_155 = arith.constant 0 : index
    %146 = vector.load %arg8[%c0_154, %c0_155] : memref<16x32xf32, #tpu.memory_space<vmem>>, vector<16x32xf32>
    %147 = arith.addf %146, %145 : vector<16x32xf32>
    %c0_156 = arith.constant 0 : index
    %c0_157 = arith.constant 0 : index
    %148 = vector.load %arg8[%c0_156, %c0_157] : memref<16x32xf32, #tpu.memory_space<vmem>>, vector<16x32xf32>
    tpu.vector_store %arg8[%c0_156, %c0_157], %147 {strides = array<i32>} : memref<16x32xf32, #tpu.memory_space<vmem>>, vector<16x32xf32>,
    %c11_158 = arith.constant 11 : index
    %c0_159 = arith.constant 0 : index
    %149 = vector.load %arg7[%c11_158, %c0_159] : memref<29x32xbf16, #tpu.memory_space<vmem>>, vector<16x32xbf16>
    %150 = vector.broadcast %6 : vector<16x1xbf16> to vector<16x32xbf16>
    %151 = arith.mulf %149, %150 : vector<16x32xbf16>
    %c15 = arith.constant 15 : index
    %c0_160 = arith.constant 0 : index
    %c0_161 = arith.constant 0 : index
    %152 = vector.load %arg2[%c15, %c0_160, %c0_161] : memref<72x32x32xbf16, #tpu.memory_space<vmem>>, vector<1x32x32xbf16>
    %153 = vector.shape_cast %152 : vector<1x32x32xbf16> to vector<32x32xbf16>
    %cst_162 = arith.constant dense<0.000000e+00> : vector<16x32xf32>
    %154 = tpu.matmul %151, %153, %cst_162 {dimension_numbers = #tpu.dot_dimension_numbers<[1], [0], [0], [1], [0, 0, 1, 1], [], []>} : vector<16x32xbf16>, vector<32x32xbf16>, vector<16x32xf32> -> vector<16x32xf32>
    %c0_163 = arith.constant 0 : index
    %c0_164 = arith.constant 0 : index
    %155 = vector.load %arg8[%c0_163, %c0_164] : memref<16x32xf32, #tpu.memory_space<vmem>>, vector<16x32xf32>
    %156 = arith.addf %155, %154 : vector<16x32xf32>
    %c0_165 = arith.constant 0 : index
    %c0_166 = arith.constant 0 : index
    %157 = vector.load %arg8[%c0_165, %c0_166] : memref<16x32xf32, #tpu.memory_space<vmem>>, vector<16x32xf32>
    tpu.vector_store %arg8[%c0_165, %c0_166], %156 {strides = array<i32>} : memref<16x32xf32, #tpu.memory_space<vmem>>, vector<16x32xf32>,
    %c12_167 = arith.constant 12 : index
    %c0_168 = arith.constant 0 : index
    %158 = vector.load %arg7[%c12_167, %c0_168] : memref<29x32xbf16, #tpu.memory_space<vmem>>, vector<16x32xbf16>
    %c16 = arith.constant 16 : index
    %c0_169 = arith.constant 0 : index
    %c0_170 = arith.constant 0 : index
    %159 = vector.load %arg2[%c16, %c0_169, %c0_170] : memref<72x32x32xbf16, #tpu.memory_space<vmem>>, vector<1x32x32xbf16>
    %160 = vector.shape_cast %159 : vector<1x32x32xbf16> to vector<32x32xbf16>
    %cst_171 = arith.constant dense<0.000000e+00> : vector<16x32xf32>
    %161 = tpu.matmul %158, %160, %cst_171 {dimension_numbers = #tpu.dot_dimension_numbers<[1], [0], [0], [1], [0, 0, 1, 1], [], []>} : vector<16x32xbf16>, vector<32x32xbf16>, vector<16x32xf32> -> vector<16x32xf32>
    %c0_172 = arith.constant 0 : index
    %c0_173 = arith.constant 0 : index
    %162 = vector.load %arg8[%c0_172, %c0_173] : memref<16x32xf32, #tpu.memory_space<vmem>>, vector<16x32xf32>
    %163 = arith.addf %162, %161 : vector<16x32xf32>
    %c0_174 = arith.constant 0 : index
    %c0_175 = arith.constant 0 : index
    %164 = vector.load %arg8[%c0_174, %c0_175] : memref<16x32xf32, #tpu.memory_space<vmem>>, vector<16x32xf32>
    tpu.vector_store %arg8[%c0_174, %c0_175], %163 {strides = array<i32>} : memref<16x32xf32, #tpu.memory_space<vmem>>, vector<16x32xf32>,
    %c13_176 = arith.constant 13 : index
    %c0_177 = arith.constant 0 : index
    %165 = vector.load %arg7[%c13_176, %c0_177] : memref<29x32xbf16, #tpu.memory_space<vmem>>, vector<16x32xbf16>
    %166 = vector.broadcast %8 : vector<16x1xbf16> to vector<16x32xbf16>
    %167 = arith.mulf %165, %166 : vector<16x32xbf16>
    %c17 = arith.constant 17 : index
    %c0_178 = arith.constant 0 : index
    %c0_179 = arith.constant 0 : index
    %168 = vector.load %arg2[%c17, %c0_178, %c0_179] : memref<72x32x32xbf16, #tpu.memory_space<vmem>>, vector<1x32x32xbf16>
    %169 = vector.shape_cast %168 : vector<1x32x32xbf16> to vector<32x32xbf16>
    %cst_180 = arith.constant dense<0.000000e+00> : vector<16x32xf32>
    %170 = tpu.matmul %167, %169, %cst_180 {dimension_numbers = #tpu.dot_dimension_numbers<[1], [0], [0], [1], [0, 0, 1, 1], [], []>} : vector<16x32xbf16>, vector<32x32xbf16>, vector<16x32xf32> -> vector<16x32xf32>
    %c0_181 = arith.constant 0 : index
    %c0_182 = arith.constant 0 : index
    %171 = vector.load %arg8[%c0_181, %c0_182] : memref<16x32xf32, #tpu.memory_space<vmem>>, vector<16x32xf32>
    %172 = arith.addf %171, %170 : vector<16x32xf32>
    %c0_183 = arith.constant 0 : index
    %c0_184 = arith.constant 0 : index
    %173 = vector.load %arg8[%c0_183, %c0_184] : memref<16x32xf32, #tpu.memory_space<vmem>>, vector<16x32xf32>
    tpu.vector_store %arg8[%c0_183, %c0_184], %172 {strides = array<i32>} : memref<16x32xf32, #tpu.memory_space<vmem>>, vector<16x32xf32>,
    %c8_185 = arith.constant 8 : index
    %c0_186 = arith.constant 0 : index
    %174 = vector.load %arg7[%c8_185, %c0_186] : memref<29x32xbf16, #tpu.memory_space<vmem>>, vector<16x32xbf16>
    %175 = arith.extf %174 : vector<16x32xbf16> to vector<16x32xf32>
    %c0_187 = arith.constant 0 : index
    %c0_188 = arith.constant 0 : index
    %176 = vector.load %arg8[%c0_187, %c0_188] : memref<16x32xf32, #tpu.memory_space<vmem>>, vector<16x32xf32>
    %c1_189 = arith.constant 1 : index
    %c0_190 = arith.constant 0 : index
    %c0_191 = arith.constant 0 : index
    %177 = vector.load %arg3[%c1_189, %c0_190, %c0_191] : memref<8x1x32xf32, #tpu.memory_space<vmem>>, vector<1x1x32xf32>
    %178 = vector.shape_cast %177 : vector<1x1x32xf32> to vector<1x32xf32>
    %179 = vector.broadcast %178 : vector<1x32xf32> to vector<16x32xf32>
    %180 = arith.addf %176, %179 : vector<16x32xf32>
    %c1_192 = arith.constant 1 : index
    %c0_193 = arith.constant 0 : index
    %c0_194 = arith.constant 0 : index
    %181 = vector.load %arg4[%c1_192, %c0_193, %c0_194] : memref<8x1x32xf32, #tpu.memory_space<vmem>>, vector<1x1x32xf32>
    %182 = vector.shape_cast %181 : vector<1x1x32xf32> to vector<1x32xf32>
    %183 = vector.broadcast %182 : vector<1x32xf32> to vector<16x32xf32>
    %184 = arith.mulf %180, %183 : vector<16x32xf32>
    %185 = arith.addf %184, %175 : vector<16x32xf32>
    %cst_195 = arith.constant 0.000000e+00 : f32
    %186 = vector.broadcast %cst_195 : f32 to vector<16x32xf32>
    %187 = arith.cmpf oge, %185, %186 : vector<16x32xf32>
    %cst_196 = arith.constant 2.000000e-01 : f32
    %188 = vector.broadcast %cst_196 : f32 to vector<16x32xf32>
    %189 = arith.mulf %188, %185 : vector<16x32xf32>
    %190 = arith.select %187, %185, %189 : vector<16x32xi1>, vector<16x32xf32>
    %191 = arith.truncf %190 : vector<16x32xf32> to vector<16x32xbf16>
    %c8_197 = arith.constant 8 : index
    %c0_198 = arith.constant 0 : index
    %192 = vector.load %arg7[%c8_197, %c0_198] : memref<29x32xbf16, #tpu.memory_space<vmem>>, vector<16x32xbf16>
    tpu.vector_store %arg7[%c8_197, %c0_198], %191 {strides = array<i32>} : memref<29x32xbf16, #tpu.memory_space<vmem>>, vector<16x32xbf16>,
    %c3_199 = arith.constant 3 : index
    %c0_200 = arith.constant 0 : index
    %193 = vector.load %arg7[%c3_199, %c0_200] : memref<29x32xbf16, #tpu.memory_space<vmem>>, vector<16x32xbf16>
    %194 = vector.broadcast %6 : vector<16x1xbf16> to vector<16x32xbf16>
    %195 = arith.mulf %193, %194 : vector<16x32xbf16>
    %c18 = arith.constant 18 : index
    %c0_201 = arith.constant 0 : index
    %c0_202 = arith.constant 0 : index
    %196 = vector.load %arg2[%c18, %c0_201, %c0_202] : memref<72x32x32xbf16, #tpu.memory_space<vmem>>, vector<1x32x32xbf16>
    %197 = vector.shape_cast %196 : vector<1x32x32xbf16> to vector<32x32xbf16>
    %cst_203 = arith.constant dense<0.000000e+00> : vector<16x32xf32>
    %198 = tpu.matmul %195, %197, %cst_203 {dimension_numbers = #tpu.dot_dimension_numbers<[1], [0], [0], [1], [0, 0, 1, 1], [], []>} : vector<16x32xbf16>, vector<32x32xbf16>, vector<16x32xf32> -> vector<16x32xf32>
    %c0_204 = arith.constant 0 : index
    %c0_205 = arith.constant 0 : index
    %199 = vector.load %arg8[%c0_204, %c0_205] : memref<16x32xf32, #tpu.memory_space<vmem>>, vector<16x32xf32>
    tpu.vector_store %arg8[%c0_204, %c0_205], %198 {strides = array<i32>} : memref<16x32xf32, #tpu.memory_space<vmem>>, vector<16x32xf32>,
    %c4_206 = arith.constant 4 : index
    %c0_207 = arith.constant 0 : index
    %200 = vector.load %arg7[%c4_206, %c0_207] : memref<29x32xbf16, #tpu.memory_space<vmem>>, vector<16x32xbf16>
    %c19 = arith.constant 19 : index
    %c0_208 = arith.constant 0 : index
    %c0_209 = arith.constant 0 : index
    %201 = vector.load %arg2[%c19, %c0_208, %c0_209] : memref<72x32x32xbf16, #tpu.memory_space<vmem>>, vector<1x32x32xbf16>
    %202 = vector.shape_cast %201 : vector<1x32x32xbf16> to vector<32x32xbf16>
    %cst_210 = arith.constant dense<0.000000e+00> : vector<16x32xf32>
    %203 = tpu.matmul %200, %202, %cst_210 {dimension_numbers = #tpu.dot_dimension_numbers<[1], [0], [0], [1], [0, 0, 1, 1], [], []>} : vector<16x32xbf16>, vector<32x32xbf16>, vector<16x32xf32> -> vector<16x32xf32>
    %c0_211 = arith.constant 0 : index
    %c0_212 = arith.constant 0 : index
    %204 = vector.load %arg8[%c0_211, %c0_212] : memref<16x32xf32, #tpu.memory_space<vmem>>, vector<16x32xf32>
    %205 = arith.addf %204, %203 : vector<16x32xf32>
    %c0_213 = arith.constant 0 : index
    %c0_214 = arith.constant 0 : index
    %206 = vector.load %arg8[%c0_213, %c0_214] : memref<16x32xf32, #tpu.memory_space<vmem>>, vector<16x32xf32>
    tpu.vector_store %arg8[%c0_213, %c0_214], %205 {strides = array<i32>} : memref<16x32xf32, #tpu.memory_space<vmem>>, vector<16x32xf32>,
    %c5_215 = arith.constant 5 : index
    %c0_216 = arith.constant 0 : index
    %207 = vector.load %arg7[%c5_215, %c0_216] : memref<29x32xbf16, #tpu.memory_space<vmem>>, vector<16x32xbf16>
    %208 = vector.broadcast %8 : vector<16x1xbf16> to vector<16x32xbf16>
    %209 = arith.mulf %207, %208 : vector<16x32xbf16>
    %c20 = arith.constant 20 : index
    %c0_217 = arith.constant 0 : index
    %c0_218 = arith.constant 0 : index
    %210 = vector.load %arg2[%c20, %c0_217, %c0_218] : memref<72x32x32xbf16, #tpu.memory_space<vmem>>, vector<1x32x32xbf16>
    %211 = vector.shape_cast %210 : vector<1x32x32xbf16> to vector<32x32xbf16>
    %cst_219 = arith.constant dense<0.000000e+00> : vector<16x32xf32>
    %212 = tpu.matmul %209, %211, %cst_219 {dimension_numbers = #tpu.dot_dimension_numbers<[1], [0], [0], [1], [0, 0, 1, 1], [], []>} : vector<16x32xbf16>, vector<32x32xbf16>, vector<16x32xf32> -> vector<16x32xf32>
    %c0_220 = arith.constant 0 : index
    %c0_221 = arith.constant 0 : index
    %213 = vector.load %arg8[%c0_220, %c0_221] : memref<16x32xf32, #tpu.memory_space<vmem>>, vector<16x32xf32>
    %214 = arith.addf %213, %212 : vector<16x32xf32>
    %c0_222 = arith.constant 0 : index
    %c0_223 = arith.constant 0 : index
    %215 = vector.load %arg8[%c0_222, %c0_223] : memref<16x32xf32, #tpu.memory_space<vmem>>, vector<16x32xf32>
    tpu.vector_store %arg8[%c0_222, %c0_223], %214 {strides = array<i32>} : memref<16x32xf32, #tpu.memory_space<vmem>>, vector<16x32xf32>,
    %c7_224 = arith.constant 7 : index
    %c0_225 = arith.constant 0 : index
    %216 = vector.load %arg7[%c7_224, %c0_225] : memref<29x32xbf16, #tpu.memory_space<vmem>>, vector<16x32xbf16>
    %217 = vector.broadcast %6 : vector<16x1xbf16> to vector<16x32xbf16>
    %218 = arith.mulf %216, %217 : vector<16x32xbf16>
    %c21 = arith.constant 21 : index
    %c0_226 = arith.constant 0 : index
    %c0_227 = arith.constant 0 : index
    %219 = vector.load %arg2[%c21, %c0_226, %c0_227] : memref<72x32x32xbf16, #tpu.memory_space<vmem>>, vector<1x32x32xbf16>
    %220 = vector.shape_cast %219 : vector<1x32x32xbf16> to vector<32x32xbf16>
    %cst_228 = arith.constant dense<0.000000e+00> : vector<16x32xf32>
    %221 = tpu.matmul %218, %220, %cst_228 {dimension_numbers = #tpu.dot_dimension_numbers<[1], [0], [0], [1], [0, 0, 1, 1], [], []>} : vector<16x32xbf16>, vector<32x32xbf16>, vector<16x32xf32> -> vector<16x32xf32>
    %c0_229 = arith.constant 0 : index
    %c0_230 = arith.constant 0 : index
    %222 = vector.load %arg8[%c0_229, %c0_230] : memref<16x32xf32, #tpu.memory_space<vmem>>, vector<16x32xf32>
    %223 = arith.addf %222, %221 : vector<16x32xf32>
    %c0_231 = arith.constant 0 : index
    %c0_232 = arith.constant 0 : index
    %224 = vector.load %arg8[%c0_231, %c0_232] : memref<16x32xf32, #tpu.memory_space<vmem>>, vector<16x32xf32>
    tpu.vector_store %arg8[%c0_231, %c0_232], %223 {strides = array<i32>} : memref<16x32xf32, #tpu.memory_space<vmem>>, vector<16x32xf32>,
    %c8_233 = arith.constant 8 : index
    %c0_234 = arith.constant 0 : index
    %225 = vector.load %arg7[%c8_233, %c0_234] : memref<29x32xbf16, #tpu.memory_space<vmem>>, vector<16x32xbf16>
    %c22 = arith.constant 22 : index
    %c0_235 = arith.constant 0 : index
    %c0_236 = arith.constant 0 : index
    %226 = vector.load %arg2[%c22, %c0_235, %c0_236] : memref<72x32x32xbf16, #tpu.memory_space<vmem>>, vector<1x32x32xbf16>
    %227 = vector.shape_cast %226 : vector<1x32x32xbf16> to vector<32x32xbf16>
    %cst_237 = arith.constant dense<0.000000e+00> : vector<16x32xf32>
    %228 = tpu.matmul %225, %227, %cst_237 {dimension_numbers = #tpu.dot_dimension_numbers<[1], [0], [0], [1], [0, 0, 1, 1], [], []>} : vector<16x32xbf16>, vector<32x32xbf16>, vector<16x32xf32> -> vector<16x32xf32>
    %c0_238 = arith.constant 0 : index
    %c0_239 = arith.constant 0 : index
    %229 = vector.load %arg8[%c0_238, %c0_239] : memref<16x32xf32, #tpu.memory_space<vmem>>, vector<16x32xf32>
    %230 = arith.addf %229, %228 : vector<16x32xf32>
    %c0_240 = arith.constant 0 : index
    %c0_241 = arith.constant 0 : index
    %231 = vector.load %arg8[%c0_240, %c0_241] : memref<16x32xf32, #tpu.memory_space<vmem>>, vector<16x32xf32>
    tpu.vector_store %arg8[%c0_240, %c0_241], %230 {strides = array<i32>} : memref<16x32xf32, #tpu.memory_space<vmem>>, vector<16x32xf32>,
    %c9_242 = arith.constant 9 : index
    %c0_243 = arith.constant 0 : index
    %232 = vector.load %arg7[%c9_242, %c0_243] : memref<29x32xbf16, #tpu.memory_space<vmem>>, vector<16x32xbf16>
    %233 = vector.broadcast %8 : vector<16x1xbf16> to vector<16x32xbf16>
    %234 = arith.mulf %232, %233 : vector<16x32xbf16>
    %c23 = arith.constant 23 : index
    %c0_244 = arith.constant 0 : index
    %c0_245 = arith.constant 0 : index
    %235 = vector.load %arg2[%c23, %c0_244, %c0_245] : memref<72x32x32xbf16, #tpu.memory_space<vmem>>, vector<1x32x32xbf16>
    %236 = vector.shape_cast %235 : vector<1x32x32xbf16> to vector<32x32xbf16>
    %cst_246 = arith.constant dense<0.000000e+00> : vector<16x32xf32>
    %237 = tpu.matmul %234, %236, %cst_246 {dimension_numbers = #tpu.dot_dimension_numbers<[1], [0], [0], [1], [0, 0, 1, 1], [], []>} : vector<16x32xbf16>, vector<32x32xbf16>, vector<16x32xf32> -> vector<16x32xf32>
    %c0_247 = arith.constant 0 : index
    %c0_248 = arith.constant 0 : index
    %238 = vector.load %arg8[%c0_247, %c0_248] : memref<16x32xf32, #tpu.memory_space<vmem>>, vector<16x32xf32>
    %239 = arith.addf %238, %237 : vector<16x32xf32>
    %c0_249 = arith.constant 0 : index
    %c0_250 = arith.constant 0 : index
    %240 = vector.load %arg8[%c0_249, %c0_250] : memref<16x32xf32, #tpu.memory_space<vmem>>, vector<16x32xf32>
    tpu.vector_store %arg8[%c0_249, %c0_250], %239 {strides = array<i32>} : memref<16x32xf32, #tpu.memory_space<vmem>>, vector<16x32xf32>,
    %c11_251 = arith.constant 11 : index
    %c0_252 = arith.constant 0 : index
    %241 = vector.load %arg7[%c11_251, %c0_252] : memref<29x32xbf16, #tpu.memory_space<vmem>>, vector<16x32xbf16>
    %242 = vector.broadcast %6 : vector<16x1xbf16> to vector<16x32xbf16>
    %243 = arith.mulf %241, %242 : vector<16x32xbf16>
    %c24 = arith.constant 24 : index
    %c0_253 = arith.constant 0 : index
    %c0_254 = arith.constant 0 : index
    %244 = vector.load %arg2[%c24, %c0_253, %c0_254] : memref<72x32x32xbf16, #tpu.memory_space<vmem>>, vector<1x32x32xbf16>
    %245 = vector.shape_cast %244 : vector<1x32x32xbf16> to vector<32x32xbf16>
    %cst_255 = arith.constant dense<0.000000e+00> : vector<16x32xf32>
    %246 = tpu.matmul %243, %245, %cst_255 {dimension_numbers = #tpu.dot_dimension_numbers<[1], [0], [0], [1], [0, 0, 1, 1], [], []>} : vector<16x32xbf16>, vector<32x32xbf16>, vector<16x32xf32> -> vector<16x32xf32>
    %c0_256 = arith.constant 0 : index
    %c0_257 = arith.constant 0 : index
    %247 = vector.load %arg8[%c0_256, %c0_257] : memref<16x32xf32, #tpu.memory_space<vmem>>, vector<16x32xf32>
    %248 = arith.addf %247, %246 : vector<16x32xf32>
    %c0_258 = arith.constant 0 : index
    %c0_259 = arith.constant 0 : index
    %249 = vector.load %arg8[%c0_258, %c0_259] : memref<16x32xf32, #tpu.memory_space<vmem>>, vector<16x32xf32>
    tpu.vector_store %arg8[%c0_258, %c0_259], %248 {strides = array<i32>} : memref<16x32xf32, #tpu.memory_space<vmem>>, vector<16x32xf32>,
    %c12_260 = arith.constant 12 : index
    %c0_261 = arith.constant 0 : index
    %250 = vector.load %arg7[%c12_260, %c0_261] : memref<29x32xbf16, #tpu.memory_space<vmem>>, vector<16x32xbf16>
    %c25 = arith.constant 25 : index
    %c0_262 = arith.constant 0 : index
    %c0_263 = arith.constant 0 : index
    %251 = vector.load %arg2[%c25, %c0_262, %c0_263] : memref<72x32x32xbf16, #tpu.memory_space<vmem>>, vector<1x32x32xbf16>
    %252 = vector.shape_cast %251 : vector<1x32x32xbf16> to vector<32x32xbf16>
    %cst_264 = arith.constant dense<0.000000e+00> : vector<16x32xf32>
    %253 = tpu.matmul %250, %252, %cst_264 {dimension_numbers = #tpu.dot_dimension_numbers<[1], [0], [0], [1], [0, 0, 1, 1], [], []>} : vector<16x32xbf16>, vector<32x32xbf16>, vector<16x32xf32> -> vector<16x32xf32>
    %c0_265 = arith.constant 0 : index
    %c0_266 = arith.constant 0 : index
    %254 = vector.load %arg8[%c0_265, %c0_266] : memref<16x32xf32, #tpu.memory_space<vmem>>, vector<16x32xf32>
    %255 = arith.addf %254, %253 : vector<16x32xf32>
    %c0_267 = arith.constant 0 : index
    %c0_268 = arith.constant 0 : index
    %256 = vector.load %arg8[%c0_267, %c0_268] : memref<16x32xf32, #tpu.memory_space<vmem>>, vector<16x32xf32>
    tpu.vector_store %arg8[%c0_267, %c0_268], %255 {strides = array<i32>} : memref<16x32xf32, #tpu.memory_space<vmem>>, vector<16x32xf32>,
    %c13_269 = arith.constant 13 : index
    %c0_270 = arith.constant 0 : index
    %257 = vector.load %arg7[%c13_269, %c0_270] : memref<29x32xbf16, #tpu.memory_space<vmem>>, vector<16x32xbf16>
    %258 = vector.broadcast %8 : vector<16x1xbf16> to vector<16x32xbf16>
    %259 = arith.mulf %257, %258 : vector<16x32xbf16>
    %c26 = arith.constant 26 : index
    %c0_271 = arith.constant 0 : index
    %c0_272 = arith.constant 0 : index
    %260 = vector.load %arg2[%c26, %c0_271, %c0_272] : memref<72x32x32xbf16, #tpu.memory_space<vmem>>, vector<1x32x32xbf16>
    %261 = vector.shape_cast %260 : vector<1x32x32xbf16> to vector<32x32xbf16>
    %cst_273 = arith.constant dense<0.000000e+00> : vector<16x32xf32>
    %262 = tpu.matmul %259, %261, %cst_273 {dimension_numbers = #tpu.dot_dimension_numbers<[1], [0], [0], [1], [0, 0, 1, 1], [], []>} : vector<16x32xbf16>, vector<32x32xbf16>, vector<16x32xf32> -> vector<16x32xf32>
    %c0_274 = arith.constant 0 : index
    %c0_275 = arith.constant 0 : index
    %263 = vector.load %arg8[%c0_274, %c0_275] : memref<16x32xf32, #tpu.memory_space<vmem>>, vector<16x32xf32>
    %264 = arith.addf %263, %262 : vector<16x32xf32>
    %c0_276 = arith.constant 0 : index
    %c0_277 = arith.constant 0 : index
    %265 = vector.load %arg8[%c0_276, %c0_277] : memref<16x32xf32, #tpu.memory_space<vmem>>, vector<16x32xf32>
    tpu.vector_store %arg8[%c0_276, %c0_277], %264 {strides = array<i32>} : memref<16x32xf32, #tpu.memory_space<vmem>>, vector<16x32xf32>,
    %c8_278 = arith.constant 8 : index
    %c0_279 = arith.constant 0 : index
    %266 = vector.load %arg7[%c8_278, %c0_279] : memref<29x32xbf16, #tpu.memory_space<vmem>>, vector<16x32xbf16>
    %267 = arith.extf %266 : vector<16x32xbf16> to vector<16x32xf32>
    %c0_280 = arith.constant 0 : index
    %c0_281 = arith.constant 0 : index
    %268 = vector.load %arg8[%c0_280, %c0_281] : memref<16x32xf32, #tpu.memory_space<vmem>>, vector<16x32xf32>
    %c2_282 = arith.constant 2 : index
    %c0_283 = arith.constant 0 : index
    %c0_284 = arith.constant 0 : index
    %269 = vector.load %arg3[%c2_282, %c0_283, %c0_284] : memref<8x1x32xf32, #tpu.memory_space<vmem>>, vector<1x1x32xf32>
    %270 = vector.shape_cast %269 : vector<1x1x32xf32> to vector<1x32xf32>
    %271 = vector.broadcast %270 : vector<1x32xf32> to vector<16x32xf32>
    %272 = arith.addf %268, %271 : vector<16x32xf32>
    %c2_285 = arith.constant 2 : index
    %c0_286 = arith.constant 0 : index
    %c0_287 = arith.constant 0 : index
    %273 = vector.load %arg4[%c2_285, %c0_286, %c0_287] : memref<8x1x32xf32, #tpu.memory_space<vmem>>, vector<1x1x32xf32>
    %274 = vector.shape_cast %273 : vector<1x1x32xf32> to vector<1x32xf32>
    %275 = vector.broadcast %274 : vector<1x32xf32> to vector<16x32xf32>
    %276 = arith.mulf %272, %275 : vector<16x32xf32>
    %277 = arith.addf %276, %267 : vector<16x32xf32>
    %cst_288 = arith.constant 0.000000e+00 : f32
    %278 = vector.broadcast %cst_288 : f32 to vector<16x32xf32>
    %279 = arith.cmpf oge, %277, %278 : vector<16x32xf32>
    %cst_289 = arith.constant 2.000000e-01 : f32
    %280 = vector.broadcast %cst_289 : f32 to vector<16x32xf32>
    %281 = arith.mulf %280, %277 : vector<16x32xf32>
    %282 = arith.select %279, %277, %281 : vector<16x32xi1>, vector<16x32xf32>
    %283 = arith.truncf %282 : vector<16x32xf32> to vector<16x32xbf16>
    %c8_290 = arith.constant 8 : index
    %c0_291 = arith.constant 0 : index
    %284 = vector.load %arg7[%c8_290, %c0_291] : memref<29x32xbf16, #tpu.memory_space<vmem>>, vector<16x32xbf16>
    tpu.vector_store %arg7[%c8_290, %c0_291], %283 {strides = array<i32>} : memref<29x32xbf16, #tpu.memory_space<vmem>>, vector<16x32xbf16>,
    %c3_292 = arith.constant 3 : index
    %c0_293 = arith.constant 0 : index
    %285 = vector.load %arg7[%c3_292, %c0_293] : memref<29x32xbf16, #tpu.memory_space<vmem>>, vector<16x32xbf16>
    %286 = vector.broadcast %6 : vector<16x1xbf16> to vector<16x32xbf16>
    %287 = arith.mulf %285, %286 : vector<16x32xbf16>
    %c27 = arith.constant 27 : index
    %c0_294 = arith.constant 0 : index
    %c0_295 = arith.constant 0 : index
    %288 = vector.load %arg2[%c27, %c0_294, %c0_295] : memref<72x32x32xbf16, #tpu.memory_space<vmem>>, vector<1x32x32xbf16>
    %289 = vector.shape_cast %288 : vector<1x32x32xbf16> to vector<32x32xbf16>
    %cst_296 = arith.constant dense<0.000000e+00> : vector<16x32xf32>
    %290 = tpu.matmul %287, %289, %cst_296 {dimension_numbers = #tpu.dot_dimension_numbers<[1], [0], [0], [1], [0, 0, 1, 1], [], []>} : vector<16x32xbf16>, vector<32x32xbf16>, vector<16x32xf32> -> vector<16x32xf32>
    %c0_297 = arith.constant 0 : index
    %c0_298 = arith.constant 0 : index
    %291 = vector.load %arg8[%c0_297, %c0_298] : memref<16x32xf32, #tpu.memory_space<vmem>>, vector<16x32xf32>
    tpu.vector_store %arg8[%c0_297, %c0_298], %290 {strides = array<i32>} : memref<16x32xf32, #tpu.memory_space<vmem>>, vector<16x32xf32>,
    %c4_299 = arith.constant 4 : index
    %c0_300 = arith.constant 0 : index
    %292 = vector.load %arg7[%c4_299, %c0_300] : memref<29x32xbf16, #tpu.memory_space<vmem>>, vector<16x32xbf16>
    %c28 = arith.constant 28 : index
    %c0_301 = arith.constant 0 : index
    %c0_302 = arith.constant 0 : index
    %293 = vector.load %arg2[%c28, %c0_301, %c0_302] : memref<72x32x32xbf16, #tpu.memory_space<vmem>>, vector<1x32x32xbf16>
    %294 = vector.shape_cast %293 : vector<1x32x32xbf16> to vector<32x32xbf16>
    %cst_303 = arith.constant dense<0.000000e+00> : vector<16x32xf32>
    %295 = tpu.matmul %292, %294, %cst_303 {dimension_numbers = #tpu.dot_dimension_numbers<[1], [0], [0], [1], [0, 0, 1, 1], [], []>} : vector<16x32xbf16>, vector<32x32xbf16>, vector<16x32xf32> -> vector<16x32xf32>
    %c0_304 = arith.constant 0 : index
    %c0_305 = arith.constant 0 : index
    %296 = vector.load %arg8[%c0_304, %c0_305] : memref<16x32xf32, #tpu.memory_space<vmem>>, vector<16x32xf32>
    %297 = arith.addf %296, %295 : vector<16x32xf32>
    %c0_306 = arith.constant 0 : index
    %c0_307 = arith.constant 0 : index
    %298 = vector.load %arg8[%c0_306, %c0_307] : memref<16x32xf32, #tpu.memory_space<vmem>>, vector<16x32xf32>
    tpu.vector_store %arg8[%c0_306, %c0_307], %297 {strides = array<i32>} : memref<16x32xf32, #tpu.memory_space<vmem>>, vector<16x32xf32>,
    %c5_308 = arith.constant 5 : index
    %c0_309 = arith.constant 0 : index
    %299 = vector.load %arg7[%c5_308, %c0_309] : memref<29x32xbf16, #tpu.memory_space<vmem>>, vector<16x32xbf16>
    %300 = vector.broadcast %8 : vector<16x1xbf16> to vector<16x32xbf16>
    %301 = arith.mulf %299, %300 : vector<16x32xbf16>
    %c29 = arith.constant 29 : index
    %c0_310 = arith.constant 0 : index
    %c0_311 = arith.constant 0 : index
    %302 = vector.load %arg2[%c29, %c0_310, %c0_311] : memref<72x32x32xbf16, #tpu.memory_space<vmem>>, vector<1x32x32xbf16>
    %303 = vector.shape_cast %302 : vector<1x32x32xbf16> to vector<32x32xbf16>
    %cst_312 = arith.constant dense<0.000000e+00> : vector<16x32xf32>
    %304 = tpu.matmul %301, %303, %cst_312 {dimension_numbers = #tpu.dot_dimension_numbers<[1], [0], [0], [1], [0, 0, 1, 1], [], []>} : vector<16x32xbf16>, vector<32x32xbf16>, vector<16x32xf32> -> vector<16x32xf32>
    %c0_313 = arith.constant 0 : index
    %c0_314 = arith.constant 0 : index
    %305 = vector.load %arg8[%c0_313, %c0_314] : memref<16x32xf32, #tpu.memory_space<vmem>>, vector<16x32xf32>
    %306 = arith.addf %305, %304 : vector<16x32xf32>
    %c0_315 = arith.constant 0 : index
    %c0_316 = arith.constant 0 : index
    %307 = vector.load %arg8[%c0_315, %c0_316] : memref<16x32xf32, #tpu.memory_space<vmem>>, vector<16x32xf32>
    tpu.vector_store %arg8[%c0_315, %c0_316], %306 {strides = array<i32>} : memref<16x32xf32, #tpu.memory_space<vmem>>, vector<16x32xf32>,
    %c7_317 = arith.constant 7 : index
    %c0_318 = arith.constant 0 : index
    %308 = vector.load %arg7[%c7_317, %c0_318] : memref<29x32xbf16, #tpu.memory_space<vmem>>, vector<16x32xbf16>
    %309 = vector.broadcast %6 : vector<16x1xbf16> to vector<16x32xbf16>
    %310 = arith.mulf %308, %309 : vector<16x32xbf16>
    %c30 = arith.constant 30 : index
    %c0_319 = arith.constant 0 : index
    %c0_320 = arith.constant 0 : index
    %311 = vector.load %arg2[%c30, %c0_319, %c0_320] : memref<72x32x32xbf16, #tpu.memory_space<vmem>>, vector<1x32x32xbf16>
    %312 = vector.shape_cast %311 : vector<1x32x32xbf16> to vector<32x32xbf16>
    %cst_321 = arith.constant dense<0.000000e+00> : vector<16x32xf32>
    %313 = tpu.matmul %310, %312, %cst_321 {dimension_numbers = #tpu.dot_dimension_numbers<[1], [0], [0], [1], [0, 0, 1, 1], [], []>} : vector<16x32xbf16>, vector<32x32xbf16>, vector<16x32xf32> -> vector<16x32xf32>
    %c0_322 = arith.constant 0 : index
    %c0_323 = arith.constant 0 : index
    %314 = vector.load %arg8[%c0_322, %c0_323] : memref<16x32xf32, #tpu.memory_space<vmem>>, vector<16x32xf32>
    %315 = arith.addf %314, %313 : vector<16x32xf32>
    %c0_324 = arith.constant 0 : index
    %c0_325 = arith.constant 0 : index
    %316 = vector.load %arg8[%c0_324, %c0_325] : memref<16x32xf32, #tpu.memory_space<vmem>>, vector<16x32xf32>
    tpu.vector_store %arg8[%c0_324, %c0_325], %315 {strides = array<i32>} : memref<16x32xf32, #tpu.memory_space<vmem>>, vector<16x32xf32>,
    %c8_326 = arith.constant 8 : index
    %c0_327 = arith.constant 0 : index
    %317 = vector.load %arg7[%c8_326, %c0_327] : memref<29x32xbf16, #tpu.memory_space<vmem>>, vector<16x32xbf16>
    %c31 = arith.constant 31 : index
    %c0_328 = arith.constant 0 : index
    %c0_329 = arith.constant 0 : index
    %318 = vector.load %arg2[%c31, %c0_328, %c0_329] : memref<72x32x32xbf16, #tpu.memory_space<vmem>>, vector<1x32x32xbf16>
    %319 = vector.shape_cast %318 : vector<1x32x32xbf16> to vector<32x32xbf16>
    %cst_330 = arith.constant dense<0.000000e+00> : vector<16x32xf32>
    %320 = tpu.matmul %317, %319, %cst_330 {dimension_numbers = #tpu.dot_dimension_numbers<[1], [0], [0], [1], [0, 0, 1, 1], [], []>} : vector<16x32xbf16>, vector<32x32xbf16>, vector<16x32xf32> -> vector<16x32xf32>
    %c0_331 = arith.constant 0 : index
    %c0_332 = arith.constant 0 : index
    %321 = vector.load %arg8[%c0_331, %c0_332] : memref<16x32xf32, #tpu.memory_space<vmem>>, vector<16x32xf32>
    %322 = arith.addf %321, %320 : vector<16x32xf32>
    %c0_333 = arith.constant 0 : index
    %c0_334 = arith.constant 0 : index
    %323 = vector.load %arg8[%c0_333, %c0_334] : memref<16x32xf32, #tpu.memory_space<vmem>>, vector<16x32xf32>
    tpu.vector_store %arg8[%c0_333, %c0_334], %322 {strides = array<i32>} : memref<16x32xf32, #tpu.memory_space<vmem>>, vector<16x32xf32>,
    %c9_335 = arith.constant 9 : index
    %c0_336 = arith.constant 0 : index
    %324 = vector.load %arg7[%c9_335, %c0_336] : memref<29x32xbf16, #tpu.memory_space<vmem>>, vector<16x32xbf16>
    %325 = vector.broadcast %8 : vector<16x1xbf16> to vector<16x32xbf16>
    %326 = arith.mulf %324, %325 : vector<16x32xbf16>
    %c32 = arith.constant 32 : index
    %c0_337 = arith.constant 0 : index
    %c0_338 = arith.constant 0 : index
    %327 = vector.load %arg2[%c32, %c0_337, %c0_338] : memref<72x32x32xbf16, #tpu.memory_space<vmem>>, vector<1x32x32xbf16>
    %328 = vector.shape_cast %327 : vector<1x32x32xbf16> to vector<32x32xbf16>
    %cst_339 = arith.constant dense<0.000000e+00> : vector<16x32xf32>
    %329 = tpu.matmul %326, %328, %cst_339 {dimension_numbers = #tpu.dot_dimension_numbers<[1], [0], [0], [1], [0, 0, 1, 1], [], []>} : vector<16x32xbf16>, vector<32x32xbf16>, vector<16x32xf32> -> vector<16x32xf32>
    %c0_340 = arith.constant 0 : index
    %c0_341 = arith.constant 0 : index
    %330 = vector.load %arg8[%c0_340, %c0_341] : memref<16x32xf32, #tpu.memory_space<vmem>>, vector<16x32xf32>
    %331 = arith.addf %330, %329 : vector<16x32xf32>
    %c0_342 = arith.constant 0 : index
    %c0_343 = arith.constant 0 : index
    %332 = vector.load %arg8[%c0_342, %c0_343] : memref<16x32xf32, #tpu.memory_space<vmem>>, vector<16x32xf32>
    tpu.vector_store %arg8[%c0_342, %c0_343], %331 {strides = array<i32>} : memref<16x32xf32, #tpu.memory_space<vmem>>, vector<16x32xf32>,
    %c11_344 = arith.constant 11 : index
    %c0_345 = arith.constant 0 : index
    %333 = vector.load %arg7[%c11_344, %c0_345] : memref<29x32xbf16, #tpu.memory_space<vmem>>, vector<16x32xbf16>
    %334 = vector.broadcast %6 : vector<16x1xbf16> to vector<16x32xbf16>
    %335 = arith.mulf %333, %334 : vector<16x32xbf16>
    %c33 = arith.constant 33 : index
    %c0_346 = arith.constant 0 : index
    %c0_347 = arith.constant 0 : index
    %336 = vector.load %arg2[%c33, %c0_346, %c0_347] : memref<72x32x32xbf16, #tpu.memory_space<vmem>>, vector<1x32x32xbf16>
    %337 = vector.shape_cast %336 : vector<1x32x32xbf16> to vector<32x32xbf16>
    %cst_348 = arith.constant dense<0.000000e+00> : vector<16x32xf32>
    %338 = tpu.matmul %335, %337, %cst_348 {dimension_numbers = #tpu.dot_dimension_numbers<[1], [0], [0], [1], [0, 0, 1, 1], [], []>} : vector<16x32xbf16>, vector<32x32xbf16>, vector<16x32xf32> -> vector<16x32xf32>
    %c0_349 = arith.constant 0 : index
    %c0_350 = arith.constant 0 : index
    %339 = vector.load %arg8[%c0_349, %c0_350] : memref<16x32xf32, #tpu.memory_space<vmem>>, vector<16x32xf32>
    %340 = arith.addf %339, %338 : vector<16x32xf32>
    %c0_351 = arith.constant 0 : index
    %c0_352 = arith.constant 0 : index
    %341 = vector.load %arg8[%c0_351, %c0_352] : memref<16x32xf32, #tpu.memory_space<vmem>>, vector<16x32xf32>
    tpu.vector_store %arg8[%c0_351, %c0_352], %340 {strides = array<i32>} : memref<16x32xf32, #tpu.memory_space<vmem>>, vector<16x32xf32>,
    %c12_353 = arith.constant 12 : index
    %c0_354 = arith.constant 0 : index
    %342 = vector.load %arg7[%c12_353, %c0_354] : memref<29x32xbf16, #tpu.memory_space<vmem>>, vector<16x32xbf16>
    %c34 = arith.constant 34 : index
    %c0_355 = arith.constant 0 : index
    %c0_356 = arith.constant 0 : index
    %343 = vector.load %arg2[%c34, %c0_355, %c0_356] : memref<72x32x32xbf16, #tpu.memory_space<vmem>>, vector<1x32x32xbf16>
    %344 = vector.shape_cast %343 : vector<1x32x32xbf16> to vector<32x32xbf16>
    %cst_357 = arith.constant dense<0.000000e+00> : vector<16x32xf32>
    %345 = tpu.matmul %342, %344, %cst_357 {dimension_numbers = #tpu.dot_dimension_numbers<[1], [0], [0], [1], [0, 0, 1, 1], [], []>} : vector<16x32xbf16>, vector<32x32xbf16>, vector<16x32xf32> -> vector<16x32xf32>
    %c0_358 = arith.constant 0 : index
    %c0_359 = arith.constant 0 : index
    %346 = vector.load %arg8[%c0_358, %c0_359] : memref<16x32xf32, #tpu.memory_space<vmem>>, vector<16x32xf32>
    %347 = arith.addf %346, %345 : vector<16x32xf32>
    %c0_360 = arith.constant 0 : index
    %c0_361 = arith.constant 0 : index
    %348 = vector.load %arg8[%c0_360, %c0_361] : memref<16x32xf32, #tpu.memory_space<vmem>>, vector<16x32xf32>
    tpu.vector_store %arg8[%c0_360, %c0_361], %347 {strides = array<i32>} : memref<16x32xf32, #tpu.memory_space<vmem>>, vector<16x32xf32>,
    %c13_362 = arith.constant 13 : index
    %c0_363 = arith.constant 0 : index
    %349 = vector.load %arg7[%c13_362, %c0_363] : memref<29x32xbf16, #tpu.memory_space<vmem>>, vector<16x32xbf16>
    %350 = vector.broadcast %8 : vector<16x1xbf16> to vector<16x32xbf16>
    %351 = arith.mulf %349, %350 : vector<16x32xbf16>
    %c35 = arith.constant 35 : index
    %c0_364 = arith.constant 0 : index
    %c0_365 = arith.constant 0 : index
    %352 = vector.load %arg2[%c35, %c0_364, %c0_365] : memref<72x32x32xbf16, #tpu.memory_space<vmem>>, vector<1x32x32xbf16>
    %353 = vector.shape_cast %352 : vector<1x32x32xbf16> to vector<32x32xbf16>
    %cst_366 = arith.constant dense<0.000000e+00> : vector<16x32xf32>
    %354 = tpu.matmul %351, %353, %cst_366 {dimension_numbers = #tpu.dot_dimension_numbers<[1], [0], [0], [1], [0, 0, 1, 1], [], []>} : vector<16x32xbf16>, vector<32x32xbf16>, vector<16x32xf32> -> vector<16x32xf32>
    %c0_367 = arith.constant 0 : index
    %c0_368 = arith.constant 0 : index
    %355 = vector.load %arg8[%c0_367, %c0_368] : memref<16x32xf32, #tpu.memory_space<vmem>>, vector<16x32xf32>
    %356 = arith.addf %355, %354 : vector<16x32xf32>
    %c0_369 = arith.constant 0 : index
    %c0_370 = arith.constant 0 : index
    %357 = vector.load %arg8[%c0_369, %c0_370] : memref<16x32xf32, #tpu.memory_space<vmem>>, vector<16x32xf32>
    tpu.vector_store %arg8[%c0_369, %c0_370], %356 {strides = array<i32>} : memref<16x32xf32, #tpu.memory_space<vmem>>, vector<16x32xf32>,
    %c8_371 = arith.constant 8 : index
    %c0_372 = arith.constant 0 : index
    %358 = vector.load %arg7[%c8_371, %c0_372] : memref<29x32xbf16, #tpu.memory_space<vmem>>, vector<16x32xbf16>
    %359 = arith.extf %358 : vector<16x32xbf16> to vector<16x32xf32>
    %c0_373 = arith.constant 0 : index
    %c0_374 = arith.constant 0 : index
    %360 = vector.load %arg8[%c0_373, %c0_374] : memref<16x32xf32, #tpu.memory_space<vmem>>, vector<16x32xf32>
    %c3_375 = arith.constant 3 : index
    %c0_376 = arith.constant 0 : index
    %c0_377 = arith.constant 0 : index
    %361 = vector.load %arg3[%c3_375, %c0_376, %c0_377] : memref<8x1x32xf32, #tpu.memory_space<vmem>>, vector<1x1x32xf32>
    %362 = vector.shape_cast %361 : vector<1x1x32xf32> to vector<1x32xf32>
    %363 = vector.broadcast %362 : vector<1x32xf32> to vector<16x32xf32>
    %364 = arith.addf %360, %363 : vector<16x32xf32>
    %c3_378 = arith.constant 3 : index
    %c0_379 = arith.constant 0 : index
    %c0_380 = arith.constant 0 : index
    %365 = vector.load %arg4[%c3_378, %c0_379, %c0_380] : memref<8x1x32xf32, #tpu.memory_space<vmem>>, vector<1x1x32xf32>
    %366 = vector.shape_cast %365 : vector<1x1x32xf32> to vector<1x32xf32>
    %367 = vector.broadcast %366 : vector<1x32xf32> to vector<16x32xf32>
    %368 = arith.mulf %364, %367 : vector<16x32xf32>
    %369 = arith.addf %368, %359 : vector<16x32xf32>
    %cst_381 = arith.constant 0.000000e+00 : f32
    %370 = vector.broadcast %cst_381 : f32 to vector<16x32xf32>
    %371 = arith.cmpf oge, %369, %370 : vector<16x32xf32>
    %cst_382 = arith.constant 2.000000e-01 : f32
    %372 = vector.broadcast %cst_382 : f32 to vector<16x32xf32>
    %373 = arith.mulf %372, %369 : vector<16x32xf32>
    %374 = arith.select %371, %369, %373 : vector<16x32xi1>, vector<16x32xf32>
    %375 = arith.truncf %374 : vector<16x32xf32> to vector<16x32xbf16>
    %c8_383 = arith.constant 8 : index
    %c0_384 = arith.constant 0 : index
    %376 = vector.load %arg7[%c8_383, %c0_384] : memref<29x32xbf16, #tpu.memory_space<vmem>>, vector<16x32xbf16>
    tpu.vector_store %arg7[%c8_383, %c0_384], %375 {strides = array<i32>} : memref<29x32xbf16, #tpu.memory_space<vmem>>, vector<16x32xbf16>,
    %c3_385 = arith.constant 3 : index
    %c0_386 = arith.constant 0 : index
    %377 = vector.load %arg7[%c3_385, %c0_386] : memref<29x32xbf16, #tpu.memory_space<vmem>>, vector<16x32xbf16>
    %378 = vector.broadcast %6 : vector<16x1xbf16> to vector<16x32xbf16>
    %379 = arith.mulf %377, %378 : vector<16x32xbf16>
    %c36 = arith.constant 36 : index
    %c0_387 = arith.constant 0 : index
    %c0_388 = arith.constant 0 : index
    %380 = vector.load %arg2[%c36, %c0_387, %c0_388] : memref<72x32x32xbf16, #tpu.memory_space<vmem>>, vector<1x32x32xbf16>
    %381 = vector.shape_cast %380 : vector<1x32x32xbf16> to vector<32x32xbf16>
    %cst_389 = arith.constant dense<0.000000e+00> : vector<16x32xf32>
    %382 = tpu.matmul %379, %381, %cst_389 {dimension_numbers = #tpu.dot_dimension_numbers<[1], [0], [0], [1], [0, 0, 1, 1], [], []>} : vector<16x32xbf16>, vector<32x32xbf16>, vector<16x32xf32> -> vector<16x32xf32>
    %c0_390 = arith.constant 0 : index
    %c0_391 = arith.constant 0 : index
    %383 = vector.load %arg8[%c0_390, %c0_391] : memref<16x32xf32, #tpu.memory_space<vmem>>, vector<16x32xf32>
    tpu.vector_store %arg8[%c0_390, %c0_391], %382 {strides = array<i32>} : memref<16x32xf32, #tpu.memory_space<vmem>>, vector<16x32xf32>,
    %c4_392 = arith.constant 4 : index
    %c0_393 = arith.constant 0 : index
    %384 = vector.load %arg7[%c4_392, %c0_393] : memref<29x32xbf16, #tpu.memory_space<vmem>>, vector<16x32xbf16>
    %c37 = arith.constant 37 : index
    %c0_394 = arith.constant 0 : index
    %c0_395 = arith.constant 0 : index
    %385 = vector.load %arg2[%c37, %c0_394, %c0_395] : memref<72x32x32xbf16, #tpu.memory_space<vmem>>, vector<1x32x32xbf16>
    %386 = vector.shape_cast %385 : vector<1x32x32xbf16> to vector<32x32xbf16>
    %cst_396 = arith.constant dense<0.000000e+00> : vector<16x32xf32>
    %387 = tpu.matmul %384, %386, %cst_396 {dimension_numbers = #tpu.dot_dimension_numbers<[1], [0], [0], [1], [0, 0, 1, 1], [], []>} : vector<16x32xbf16>, vector<32x32xbf16>, vector<16x32xf32> -> vector<16x32xf32>
    %c0_397 = arith.constant 0 : index
    %c0_398 = arith.constant 0 : index
    %388 = vector.load %arg8[%c0_397, %c0_398] : memref<16x32xf32, #tpu.memory_space<vmem>>, vector<16x32xf32>
    %389 = arith.addf %388, %387 : vector<16x32xf32>
    %c0_399 = arith.constant 0 : index
    %c0_400 = arith.constant 0 : index
    %390 = vector.load %arg8[%c0_399, %c0_400] : memref<16x32xf32, #tpu.memory_space<vmem>>, vector<16x32xf32>
    tpu.vector_store %arg8[%c0_399, %c0_400], %389 {strides = array<i32>} : memref<16x32xf32, #tpu.memory_space<vmem>>, vector<16x32xf32>,
    %c5_401 = arith.constant 5 : index
    %c0_402 = arith.constant 0 : index
    %391 = vector.load %arg7[%c5_401, %c0_402] : memref<29x32xbf16, #tpu.memory_space<vmem>>, vector<16x32xbf16>
    %392 = vector.broadcast %8 : vector<16x1xbf16> to vector<16x32xbf16>
    %393 = arith.mulf %391, %392 : vector<16x32xbf16>
    %c38 = arith.constant 38 : index
    %c0_403 = arith.constant 0 : index
    %c0_404 = arith.constant 0 : index
    %394 = vector.load %arg2[%c38, %c0_403, %c0_404] : memref<72x32x32xbf16, #tpu.memory_space<vmem>>, vector<1x32x32xbf16>
    %395 = vector.shape_cast %394 : vector<1x32x32xbf16> to vector<32x32xbf16>
    %cst_405 = arith.constant dense<0.000000e+00> : vector<16x32xf32>
    %396 = tpu.matmul %393, %395, %cst_405 {dimension_numbers = #tpu.dot_dimension_numbers<[1], [0], [0], [1], [0, 0, 1, 1], [], []>} : vector<16x32xbf16>, vector<32x32xbf16>, vector<16x32xf32> -> vector<16x32xf32>
    %c0_406 = arith.constant 0 : index
    %c0_407 = arith.constant 0 : index
    %397 = vector.load %arg8[%c0_406, %c0_407] : memref<16x32xf32, #tpu.memory_space<vmem>>, vector<16x32xf32>
    %398 = arith.addf %397, %396 : vector<16x32xf32>
    %c0_408 = arith.constant 0 : index
    %c0_409 = arith.constant 0 : index
    %399 = vector.load %arg8[%c0_408, %c0_409] : memref<16x32xf32, #tpu.memory_space<vmem>>, vector<16x32xf32>
    tpu.vector_store %arg8[%c0_408, %c0_409], %398 {strides = array<i32>} : memref<16x32xf32, #tpu.memory_space<vmem>>, vector<16x32xf32>,
    %c7_410 = arith.constant 7 : index
    %c0_411 = arith.constant 0 : index
    %400 = vector.load %arg7[%c7_410, %c0_411] : memref<29x32xbf16, #tpu.memory_space<vmem>>, vector<16x32xbf16>
    %401 = vector.broadcast %6 : vector<16x1xbf16> to vector<16x32xbf16>
    %402 = arith.mulf %400, %401 : vector<16x32xbf16>
    %c39 = arith.constant 39 : index
    %c0_412 = arith.constant 0 : index
    %c0_413 = arith.constant 0 : index
    %403 = vector.load %arg2[%c39, %c0_412, %c0_413] : memref<72x32x32xbf16, #tpu.memory_space<vmem>>, vector<1x32x32xbf16>
    %404 = vector.shape_cast %403 : vector<1x32x32xbf16> to vector<32x32xbf16>
    %cst_414 = arith.constant dense<0.000000e+00> : vector<16x32xf32>
    %405 = tpu.matmul %402, %404, %cst_414 {dimension_numbers = #tpu.dot_dimension_numbers<[1], [0], [0], [1], [0, 0, 1, 1], [], []>} : vector<16x32xbf16>, vector<32x32xbf16>, vector<16x32xf32> -> vector<16x32xf32>
    %c0_415 = arith.constant 0 : index
    %c0_416 = arith.constant 0 : index
    %406 = vector.load %arg8[%c0_415, %c0_416] : memref<16x32xf32, #tpu.memory_space<vmem>>, vector<16x32xf32>
    %407 = arith.addf %406, %405 : vector<16x32xf32>
    %c0_417 = arith.constant 0 : index
    %c0_418 = arith.constant 0 : index
    %408 = vector.load %arg8[%c0_417, %c0_418] : memref<16x32xf32, #tpu.memory_space<vmem>>, vector<16x32xf32>
    tpu.vector_store %arg8[%c0_417, %c0_418], %407 {strides = array<i32>} : memref<16x32xf32, #tpu.memory_space<vmem>>, vector<16x32xf32>,
    %c8_419 = arith.constant 8 : index
    %c0_420 = arith.constant 0 : index
    %409 = vector.load %arg7[%c8_419, %c0_420] : memref<29x32xbf16, #tpu.memory_space<vmem>>, vector<16x32xbf16>
    %c40 = arith.constant 40 : index
    %c0_421 = arith.constant 0 : index
    %c0_422 = arith.constant 0 : index
    %410 = vector.load %arg2[%c40, %c0_421, %c0_422] : memref<72x32x32xbf16, #tpu.memory_space<vmem>>, vector<1x32x32xbf16>
    %411 = vector.shape_cast %410 : vector<1x32x32xbf16> to vector<32x32xbf16>
    %cst_423 = arith.constant dense<0.000000e+00> : vector<16x32xf32>
    %412 = tpu.matmul %409, %411, %cst_423 {dimension_numbers = #tpu.dot_dimension_numbers<[1], [0], [0], [1], [0, 0, 1, 1], [], []>} : vector<16x32xbf16>, vector<32x32xbf16>, vector<16x32xf32> -> vector<16x32xf32>
    %c0_424 = arith.constant 0 : index
    %c0_425 = arith.constant 0 : index
    %413 = vector.load %arg8[%c0_424, %c0_425] : memref<16x32xf32, #tpu.memory_space<vmem>>, vector<16x32xf32>
    %414 = arith.addf %413, %412 : vector<16x32xf32>
    %c0_426 = arith.constant 0 : index
    %c0_427 = arith.constant 0 : index
    %415 = vector.load %arg8[%c0_426, %c0_427] : memref<16x32xf32, #tpu.memory_space<vmem>>, vector<16x32xf32>
    tpu.vector_store %arg8[%c0_426, %c0_427], %414 {strides = array<i32>} : memref<16x32xf32, #tpu.memory_space<vmem>>, vector<16x32xf32>,
    %c9_428 = arith.constant 9 : index
    %c0_429 = arith.constant 0 : index
    %416 = vector.load %arg7[%c9_428, %c0_429] : memref<29x32xbf16, #tpu.memory_space<vmem>>, vector<16x32xbf16>
    %417 = vector.broadcast %8 : vector<16x1xbf16> to vector<16x32xbf16>
    %418 = arith.mulf %416, %417 : vector<16x32xbf16>
    %c41 = arith.constant 41 : index
    %c0_430 = arith.constant 0 : index
    %c0_431 = arith.constant 0 : index
    %419 = vector.load %arg2[%c41, %c0_430, %c0_431] : memref<72x32x32xbf16, #tpu.memory_space<vmem>>, vector<1x32x32xbf16>
    %420 = vector.shape_cast %419 : vector<1x32x32xbf16> to vector<32x32xbf16>
    %cst_432 = arith.constant dense<0.000000e+00> : vector<16x32xf32>
    %421 = tpu.matmul %418, %420, %cst_432 {dimension_numbers = #tpu.dot_dimension_numbers<[1], [0], [0], [1], [0, 0, 1, 1], [], []>} : vector<16x32xbf16>, vector<32x32xbf16>, vector<16x32xf32> -> vector<16x32xf32>
    %c0_433 = arith.constant 0 : index
    %c0_434 = arith.constant 0 : index
    %422 = vector.load %arg8[%c0_433, %c0_434] : memref<16x32xf32, #tpu.memory_space<vmem>>, vector<16x32xf32>
    %423 = arith.addf %422, %421 : vector<16x32xf32>
    %c0_435 = arith.constant 0 : index
    %c0_436 = arith.constant 0 : index
    %424 = vector.load %arg8[%c0_435, %c0_436] : memref<16x32xf32, #tpu.memory_space<vmem>>, vector<16x32xf32>
    tpu.vector_store %arg8[%c0_435, %c0_436], %423 {strides = array<i32>} : memref<16x32xf32, #tpu.memory_space<vmem>>, vector<16x32xf32>,
    %c11_437 = arith.constant 11 : index
    %c0_438 = arith.constant 0 : index
    %425 = vector.load %arg7[%c11_437, %c0_438] : memref<29x32xbf16, #tpu.memory_space<vmem>>, vector<16x32xbf16>
    %426 = vector.broadcast %6 : vector<16x1xbf16> to vector<16x32xbf16>
    %427 = arith.mulf %425, %426 : vector<16x32xbf16>
    %c42 = arith.constant 42 : index
    %c0_439 = arith.constant 0 : index
    %c0_440 = arith.constant 0 : index
    %428 = vector.load %arg2[%c42, %c0_439, %c0_440] : memref<72x32x32xbf16, #tpu.memory_space<vmem>>, vector<1x32x32xbf16>
    %429 = vector.shape_cast %428 : vector<1x32x32xbf16> to vector<32x32xbf16>
    %cst_441 = arith.constant dense<0.000000e+00> : vector<16x32xf32>
    %430 = tpu.matmul %427, %429, %cst_441 {dimension_numbers = #tpu.dot_dimension_numbers<[1], [0], [0], [1], [0, 0, 1, 1], [], []>} : vector<16x32xbf16>, vector<32x32xbf16>, vector<16x32xf32> -> vector<16x32xf32>
    %c0_442 = arith.constant 0 : index
    %c0_443 = arith.constant 0 : index
    %431 = vector.load %arg8[%c0_442, %c0_443] : memref<16x32xf32, #tpu.memory_space<vmem>>, vector<16x32xf32>
    %432 = arith.addf %431, %430 : vector<16x32xf32>
    %c0_444 = arith.constant 0 : index
    %c0_445 = arith.constant 0 : index
    %433 = vector.load %arg8[%c0_444, %c0_445] : memref<16x32xf32, #tpu.memory_space<vmem>>, vector<16x32xf32>
    tpu.vector_store %arg8[%c0_444, %c0_445], %432 {strides = array<i32>} : memref<16x32xf32, #tpu.memory_space<vmem>>, vector<16x32xf32>,
    %c12_446 = arith.constant 12 : index
    %c0_447 = arith.constant 0 : index
    %434 = vector.load %arg7[%c12_446, %c0_447] : memref<29x32xbf16, #tpu.memory_space<vmem>>, vector<16x32xbf16>
    %c43 = arith.constant 43 : index
    %c0_448 = arith.constant 0 : index
    %c0_449 = arith.constant 0 : index
    %435 = vector.load %arg2[%c43, %c0_448, %c0_449] : memref<72x32x32xbf16, #tpu.memory_space<vmem>>, vector<1x32x32xbf16>
    %436 = vector.shape_cast %435 : vector<1x32x32xbf16> to vector<32x32xbf16>
    %cst_450 = arith.constant dense<0.000000e+00> : vector<16x32xf32>
    %437 = tpu.matmul %434, %436, %cst_450 {dimension_numbers = #tpu.dot_dimension_numbers<[1], [0], [0], [1], [0, 0, 1, 1], [], []>} : vector<16x32xbf16>, vector<32x32xbf16>, vector<16x32xf32> -> vector<16x32xf32>
    %c0_451 = arith.constant 0 : index
    %c0_452 = arith.constant 0 : index
    %438 = vector.load %arg8[%c0_451, %c0_452] : memref<16x32xf32, #tpu.memory_space<vmem>>, vector<16x32xf32>
    %439 = arith.addf %438, %437 : vector<16x32xf32>
    %c0_453 = arith.constant 0 : index
    %c0_454 = arith.constant 0 : index
    %440 = vector.load %arg8[%c0_453, %c0_454] : memref<16x32xf32, #tpu.memory_space<vmem>>, vector<16x32xf32>
    tpu.vector_store %arg8[%c0_453, %c0_454], %439 {strides = array<i32>} : memref<16x32xf32, #tpu.memory_space<vmem>>, vector<16x32xf32>,
    %c13_455 = arith.constant 13 : index
    %c0_456 = arith.constant 0 : index
    %441 = vector.load %arg7[%c13_455, %c0_456] : memref<29x32xbf16, #tpu.memory_space<vmem>>, vector<16x32xbf16>
    %442 = vector.broadcast %8 : vector<16x1xbf16> to vector<16x32xbf16>
    %443 = arith.mulf %441, %442 : vector<16x32xbf16>
    %c44 = arith.constant 44 : index
    %c0_457 = arith.constant 0 : index
    %c0_458 = arith.constant 0 : index
    %444 = vector.load %arg2[%c44, %c0_457, %c0_458] : memref<72x32x32xbf16, #tpu.memory_space<vmem>>, vector<1x32x32xbf16>
    %445 = vector.shape_cast %444 : vector<1x32x32xbf16> to vector<32x32xbf16>
    %cst_459 = arith.constant dense<0.000000e+00> : vector<16x32xf32>
    %446 = tpu.matmul %443, %445, %cst_459 {dimension_numbers = #tpu.dot_dimension_numbers<[1], [0], [0], [1], [0, 0, 1, 1], [], []>} : vector<16x32xbf16>, vector<32x32xbf16>, vector<16x32xf32> -> vector<16x32xf32>
    %c0_460 = arith.constant 0 : index
    %c0_461 = arith.constant 0 : index
    %447 = vector.load %arg8[%c0_460, %c0_461] : memref<16x32xf32, #tpu.memory_space<vmem>>, vector<16x32xf32>
    %448 = arith.addf %447, %446 : vector<16x32xf32>
    %c0_462 = arith.constant 0 : index
    %c0_463 = arith.constant 0 : index
    %449 = vector.load %arg8[%c0_462, %c0_463] : memref<16x32xf32, #tpu.memory_space<vmem>>, vector<16x32xf32>
    tpu.vector_store %arg8[%c0_462, %c0_463], %448 {strides = array<i32>} : memref<16x32xf32, #tpu.memory_space<vmem>>, vector<16x32xf32>,
    %c8_464 = arith.constant 8 : index
    %c0_465 = arith.constant 0 : index
    %450 = vector.load %arg7[%c8_464, %c0_465] : memref<29x32xbf16, #tpu.memory_space<vmem>>, vector<16x32xbf16>
    %451 = arith.extf %450 : vector<16x32xbf16> to vector<16x32xf32>
    %c0_466 = arith.constant 0 : index
    %c0_467 = arith.constant 0 : index
    %452 = vector.load %arg8[%c0_466, %c0_467] : memref<16x32xf32, #tpu.memory_space<vmem>>, vector<16x32xf32>
    %c4_468 = arith.constant 4 : index
    %c0_469 = arith.constant 0 : index
    %c0_470 = arith.constant 0 : index
    %453 = vector.load %arg3[%c4_468, %c0_469, %c0_470] : memref<8x1x32xf32, #tpu.memory_space<vmem>>, vector<1x1x32xf32>
    %454 = vector.shape_cast %453 : vector<1x1x32xf32> to vector<1x32xf32>
    %455 = vector.broadcast %454 : vector<1x32xf32> to vector<16x32xf32>
    %456 = arith.addf %452, %455 : vector<16x32xf32>
    %c4_471 = arith.constant 4 : index
    %c0_472 = arith.constant 0 : index
    %c0_473 = arith.constant 0 : index
    %457 = vector.load %arg4[%c4_471, %c0_472, %c0_473] : memref<8x1x32xf32, #tpu.memory_space<vmem>>, vector<1x1x32xf32>
    %458 = vector.shape_cast %457 : vector<1x1x32xf32> to vector<1x32xf32>
    %459 = vector.broadcast %458 : vector<1x32xf32> to vector<16x32xf32>
    %460 = arith.mulf %456, %459 : vector<16x32xf32>
    %461 = arith.addf %460, %451 : vector<16x32xf32>
    %cst_474 = arith.constant 0.000000e+00 : f32
    %462 = vector.broadcast %cst_474 : f32 to vector<16x32xf32>
    %463 = arith.cmpf oge, %461, %462 : vector<16x32xf32>
    %cst_475 = arith.constant 2.000000e-01 : f32
    %464 = vector.broadcast %cst_475 : f32 to vector<16x32xf32>
    %465 = arith.mulf %464, %461 : vector<16x32xf32>
    %466 = arith.select %463, %461, %465 : vector<16x32xi1>, vector<16x32xf32>
    %467 = arith.truncf %466 : vector<16x32xf32> to vector<16x32xbf16>
    %c8_476 = arith.constant 8 : index
    %c0_477 = arith.constant 0 : index
    %468 = vector.load %arg7[%c8_476, %c0_477] : memref<29x32xbf16, #tpu.memory_space<vmem>>, vector<16x32xbf16>
    tpu.vector_store %arg7[%c8_476, %c0_477], %467 {strides = array<i32>} : memref<29x32xbf16, #tpu.memory_space<vmem>>, vector<16x32xbf16>,
    %c3_478 = arith.constant 3 : index
    %c0_479 = arith.constant 0 : index
    %469 = vector.load %arg7[%c3_478, %c0_479] : memref<29x32xbf16, #tpu.memory_space<vmem>>, vector<16x32xbf16>
    %470 = vector.broadcast %6 : vector<16x1xbf16> to vector<16x32xbf16>
    %471 = arith.mulf %469, %470 : vector<16x32xbf16>
    %c45 = arith.constant 45 : index
    %c0_480 = arith.constant 0 : index
    %c0_481 = arith.constant 0 : index
    %472 = vector.load %arg2[%c45, %c0_480, %c0_481] : memref<72x32x32xbf16, #tpu.memory_space<vmem>>, vector<1x32x32xbf16>
    %473 = vector.shape_cast %472 : vector<1x32x32xbf16> to vector<32x32xbf16>
    %cst_482 = arith.constant dense<0.000000e+00> : vector<16x32xf32>
    %474 = tpu.matmul %471, %473, %cst_482 {dimension_numbers = #tpu.dot_dimension_numbers<[1], [0], [0], [1], [0, 0, 1, 1], [], []>} : vector<16x32xbf16>, vector<32x32xbf16>, vector<16x32xf32> -> vector<16x32xf32>
    %c0_483 = arith.constant 0 : index
    %c0_484 = arith.constant 0 : index
    %475 = vector.load %arg8[%c0_483, %c0_484] : memref<16x32xf32, #tpu.memory_space<vmem>>, vector<16x32xf32>
    tpu.vector_store %arg8[%c0_483, %c0_484], %474 {strides = array<i32>} : memref<16x32xf32, #tpu.memory_space<vmem>>, vector<16x32xf32>,
    %c4_485 = arith.constant 4 : index
    %c0_486 = arith.constant 0 : index
    %476 = vector.load %arg7[%c4_485, %c0_486] : memref<29x32xbf16, #tpu.memory_space<vmem>>, vector<16x32xbf16>
    %c46 = arith.constant 46 : index
    %c0_487 = arith.constant 0 : index
    %c0_488 = arith.constant 0 : index
    %477 = vector.load %arg2[%c46, %c0_487, %c0_488] : memref<72x32x32xbf16, #tpu.memory_space<vmem>>, vector<1x32x32xbf16>
    %478 = vector.shape_cast %477 : vector<1x32x32xbf16> to vector<32x32xbf16>
    %cst_489 = arith.constant dense<0.000000e+00> : vector<16x32xf32>
    %479 = tpu.matmul %476, %478, %cst_489 {dimension_numbers = #tpu.dot_dimension_numbers<[1], [0], [0], [1], [0, 0, 1, 1], [], []>} : vector<16x32xbf16>, vector<32x32xbf16>, vector<16x32xf32> -> vector<16x32xf32>
    %c0_490 = arith.constant 0 : index
    %c0_491 = arith.constant 0 : index
    %480 = vector.load %arg8[%c0_490, %c0_491] : memref<16x32xf32, #tpu.memory_space<vmem>>, vector<16x32xf32>
    %481 = arith.addf %480, %479 : vector<16x32xf32>
    %c0_492 = arith.constant 0 : index
    %c0_493 = arith.constant 0 : index
    %482 = vector.load %arg8[%c0_492, %c0_493] : memref<16x32xf32, #tpu.memory_space<vmem>>, vector<16x32xf32>
    tpu.vector_store %arg8[%c0_492, %c0_493], %481 {strides = array<i32>} : memref<16x32xf32, #tpu.memory_space<vmem>>, vector<16x32xf32>,
    %c5_494 = arith.constant 5 : index
    %c0_495 = arith.constant 0 : index
    %483 = vector.load %arg7[%c5_494, %c0_495] : memref<29x32xbf16, #tpu.memory_space<vmem>>, vector<16x32xbf16>
    %484 = vector.broadcast %8 : vector<16x1xbf16> to vector<16x32xbf16>
    %485 = arith.mulf %483, %484 : vector<16x32xbf16>
    %c47 = arith.constant 47 : index
    %c0_496 = arith.constant 0 : index
    %c0_497 = arith.constant 0 : index
    %486 = vector.load %arg2[%c47, %c0_496, %c0_497] : memref<72x32x32xbf16, #tpu.memory_space<vmem>>, vector<1x32x32xbf16>
    %487 = vector.shape_cast %486 : vector<1x32x32xbf16> to vector<32x32xbf16>
    %cst_498 = arith.constant dense<0.000000e+00> : vector<16x32xf32>
    %488 = tpu.matmul %485, %487, %cst_498 {dimension_numbers = #tpu.dot_dimension_numbers<[1], [0], [0], [1], [0, 0, 1, 1], [], []>} : vector<16x32xbf16>, vector<32x32xbf16>, vector<16x32xf32> -> vector<16x32xf32>
    %c0_499 = arith.constant 0 : index
    %c0_500 = arith.constant 0 : index
    %489 = vector.load %arg8[%c0_499, %c0_500] : memref<16x32xf32, #tpu.memory_space<vmem>>, vector<16x32xf32>
    %490 = arith.addf %489, %488 : vector<16x32xf32>
    %c0_501 = arith.constant 0 : index
    %c0_502 = arith.constant 0 : index
    %491 = vector.load %arg8[%c0_501, %c0_502] : memref<16x32xf32, #tpu.memory_space<vmem>>, vector<16x32xf32>
    tpu.vector_store %arg8[%c0_501, %c0_502], %490 {strides = array<i32>} : memref<16x32xf32, #tpu.memory_space<vmem>>, vector<16x32xf32>,
    %c7_503 = arith.constant 7 : index
    %c0_504 = arith.constant 0 : index
    %492 = vector.load %arg7[%c7_503, %c0_504] : memref<29x32xbf16, #tpu.memory_space<vmem>>, vector<16x32xbf16>
    %493 = vector.broadcast %6 : vector<16x1xbf16> to vector<16x32xbf16>
    %494 = arith.mulf %492, %493 : vector<16x32xbf16>
    %c48 = arith.constant 48 : index
    %c0_505 = arith.constant 0 : index
    %c0_506 = arith.constant 0 : index
    %495 = vector.load %arg2[%c48, %c0_505, %c0_506] : memref<72x32x32xbf16, #tpu.memory_space<vmem>>, vector<1x32x32xbf16>
    %496 = vector.shape_cast %495 : vector<1x32x32xbf16> to vector<32x32xbf16>
    %cst_507 = arith.constant dense<0.000000e+00> : vector<16x32xf32>
    %497 = tpu.matmul %494, %496, %cst_507 {dimension_numbers = #tpu.dot_dimension_numbers<[1], [0], [0], [1], [0, 0, 1, 1], [], []>} : vector<16x32xbf16>, vector<32x32xbf16>, vector<16x32xf32> -> vector<16x32xf32>
    %c0_508 = arith.constant 0 : index
    %c0_509 = arith.constant 0 : index
    %498 = vector.load %arg8[%c0_508, %c0_509] : memref<16x32xf32, #tpu.memory_space<vmem>>, vector<16x32xf32>
    %499 = arith.addf %498, %497 : vector<16x32xf32>
    %c0_510 = arith.constant 0 : index
    %c0_511 = arith.constant 0 : index
    %500 = vector.load %arg8[%c0_510, %c0_511] : memref<16x32xf32, #tpu.memory_space<vmem>>, vector<16x32xf32>
    tpu.vector_store %arg8[%c0_510, %c0_511], %499 {strides = array<i32>} : memref<16x32xf32, #tpu.memory_space<vmem>>, vector<16x32xf32>,
    %c8_512 = arith.constant 8 : index
    %c0_513 = arith.constant 0 : index
    %501 = vector.load %arg7[%c8_512, %c0_513] : memref<29x32xbf16, #tpu.memory_space<vmem>>, vector<16x32xbf16>
    %c49 = arith.constant 49 : index
    %c0_514 = arith.constant 0 : index
    %c0_515 = arith.constant 0 : index
    %502 = vector.load %arg2[%c49, %c0_514, %c0_515] : memref<72x32x32xbf16, #tpu.memory_space<vmem>>, vector<1x32x32xbf16>
    %503 = vector.shape_cast %502 : vector<1x32x32xbf16> to vector<32x32xbf16>
    %cst_516 = arith.constant dense<0.000000e+00> : vector<16x32xf32>
    %504 = tpu.matmul %501, %503, %cst_516 {dimension_numbers = #tpu.dot_dimension_numbers<[1], [0], [0], [1], [0, 0, 1, 1], [], []>} : vector<16x32xbf16>, vector<32x32xbf16>, vector<16x32xf32> -> vector<16x32xf32>
    %c0_517 = arith.constant 0 : index
    %c0_518 = arith.constant 0 : index
    %505 = vector.load %arg8[%c0_517, %c0_518] : memref<16x32xf32, #tpu.memory_space<vmem>>, vector<16x32xf32>
    %506 = arith.addf %505, %504 : vector<16x32xf32>
    %c0_519 = arith.constant 0 : index
    %c0_520 = arith.constant 0 : index
    %507 = vector.load %arg8[%c0_519, %c0_520] : memref<16x32xf32, #tpu.memory_space<vmem>>, vector<16x32xf32>
    tpu.vector_store %arg8[%c0_519, %c0_520], %506 {strides = array<i32>} : memref<16x32xf32, #tpu.memory_space<vmem>>, vector<16x32xf32>,
    %c9_521 = arith.constant 9 : index
    %c0_522 = arith.constant 0 : index
    %508 = vector.load %arg7[%c9_521, %c0_522] : memref<29x32xbf16, #tpu.memory_space<vmem>>, vector<16x32xbf16>
    %509 = vector.broadcast %8 : vector<16x1xbf16> to vector<16x32xbf16>
    %510 = arith.mulf %508, %509 : vector<16x32xbf16>
    %c50 = arith.constant 50 : index
    %c0_523 = arith.constant 0 : index
    %c0_524 = arith.constant 0 : index
    %511 = vector.load %arg2[%c50, %c0_523, %c0_524] : memref<72x32x32xbf16, #tpu.memory_space<vmem>>, vector<1x32x32xbf16>
    %512 = vector.shape_cast %511 : vector<1x32x32xbf16> to vector<32x32xbf16>
    %cst_525 = arith.constant dense<0.000000e+00> : vector<16x32xf32>
    %513 = tpu.matmul %510, %512, %cst_525 {dimension_numbers = #tpu.dot_dimension_numbers<[1], [0], [0], [1], [0, 0, 1, 1], [], []>} : vector<16x32xbf16>, vector<32x32xbf16>, vector<16x32xf32> -> vector<16x32xf32>
    %c0_526 = arith.constant 0 : index
    %c0_527 = arith.constant 0 : index
    %514 = vector.load %arg8[%c0_526, %c0_527] : memref<16x32xf32, #tpu.memory_space<vmem>>, vector<16x32xf32>
    %515 = arith.addf %514, %513 : vector<16x32xf32>
    %c0_528 = arith.constant 0 : index
    %c0_529 = arith.constant 0 : index
    %516 = vector.load %arg8[%c0_528, %c0_529] : memref<16x32xf32, #tpu.memory_space<vmem>>, vector<16x32xf32>
    tpu.vector_store %arg8[%c0_528, %c0_529], %515 {strides = array<i32>} : memref<16x32xf32, #tpu.memory_space<vmem>>, vector<16x32xf32>,
    %c11_530 = arith.constant 11 : index
    %c0_531 = arith.constant 0 : index
    %517 = vector.load %arg7[%c11_530, %c0_531] : memref<29x32xbf16, #tpu.memory_space<vmem>>, vector<16x32xbf16>
    %518 = vector.broadcast %6 : vector<16x1xbf16> to vector<16x32xbf16>
    %519 = arith.mulf %517, %518 : vector<16x32xbf16>
    %c51 = arith.constant 51 : index
    %c0_532 = arith.constant 0 : index
    %c0_533 = arith.constant 0 : index
    %520 = vector.load %arg2[%c51, %c0_532, %c0_533] : memref<72x32x32xbf16, #tpu.memory_space<vmem>>, vector<1x32x32xbf16>
    %521 = vector.shape_cast %520 : vector<1x32x32xbf16> to vector<32x32xbf16>
    %cst_534 = arith.constant dense<0.000000e+00> : vector<16x32xf32>
    %522 = tpu.matmul %519, %521, %cst_534 {dimension_numbers = #tpu.dot_dimension_numbers<[1], [0], [0], [1], [0, 0, 1, 1], [], []>} : vector<16x32xbf16>, vector<32x32xbf16>, vector<16x32xf32> -> vector<16x32xf32>
    %c0_535 = arith.constant 0 : index
    %c0_536 = arith.constant 0 : index
    %523 = vector.load %arg8[%c0_535, %c0_536] : memref<16x32xf32, #tpu.memory_space<vmem>>, vector<16x32xf32>
    %524 = arith.addf %523, %522 : vector<16x32xf32>
    %c0_537 = arith.constant 0 : index
    %c0_538 = arith.constant 0 : index
    %525 = vector.load %arg8[%c0_537, %c0_538] : memref<16x32xf32, #tpu.memory_space<vmem>>, vector<16x32xf32>
    tpu.vector_store %arg8[%c0_537, %c0_538], %524 {strides = array<i32>} : memref<16x32xf32, #tpu.memory_space<vmem>>, vector<16x32xf32>,
    %c12_539 = arith.constant 12 : index
    %c0_540 = arith.constant 0 : index
    %526 = vector.load %arg7[%c12_539, %c0_540] : memref<29x32xbf16, #tpu.memory_space<vmem>>, vector<16x32xbf16>
    %c52 = arith.constant 52 : index
    %c0_541 = arith.constant 0 : index
    %c0_542 = arith.constant 0 : index
    %527 = vector.load %arg2[%c52, %c0_541, %c0_542] : memref<72x32x32xbf16, #tpu.memory_space<vmem>>, vector<1x32x32xbf16>
    %528 = vector.shape_cast %527 : vector<1x32x32xbf16> to vector<32x32xbf16>
    %cst_543 = arith.constant dense<0.000000e+00> : vector<16x32xf32>
    %529 = tpu.matmul %526, %528, %cst_543 {dimension_numbers = #tpu.dot_dimension_numbers<[1], [0], [0], [1], [0, 0, 1, 1], [], []>} : vector<16x32xbf16>, vector<32x32xbf16>, vector<16x32xf32> -> vector<16x32xf32>
    %c0_544 = arith.constant 0 : index
    %c0_545 = arith.constant 0 : index
    %530 = vector.load %arg8[%c0_544, %c0_545] : memref<16x32xf32, #tpu.memory_space<vmem>>, vector<16x32xf32>
    %531 = arith.addf %530, %529 : vector<16x32xf32>
    %c0_546 = arith.constant 0 : index
    %c0_547 = arith.constant 0 : index
    %532 = vector.load %arg8[%c0_546, %c0_547] : memref<16x32xf32, #tpu.memory_space<vmem>>, vector<16x32xf32>
    tpu.vector_store %arg8[%c0_546, %c0_547], %531 {strides = array<i32>} : memref<16x32xf32, #tpu.memory_space<vmem>>, vector<16x32xf32>,
    %c13_548 = arith.constant 13 : index
    %c0_549 = arith.constant 0 : index
    %533 = vector.load %arg7[%c13_548, %c0_549] : memref<29x32xbf16, #tpu.memory_space<vmem>>, vector<16x32xbf16>
    %534 = vector.broadcast %8 : vector<16x1xbf16> to vector<16x32xbf16>
    %535 = arith.mulf %533, %534 : vector<16x32xbf16>
    %c53 = arith.constant 53 : index
    %c0_550 = arith.constant 0 : index
    %c0_551 = arith.constant 0 : index
    %536 = vector.load %arg2[%c53, %c0_550, %c0_551] : memref<72x32x32xbf16, #tpu.memory_space<vmem>>, vector<1x32x32xbf16>
    %537 = vector.shape_cast %536 : vector<1x32x32xbf16> to vector<32x32xbf16>
    %cst_552 = arith.constant dense<0.000000e+00> : vector<16x32xf32>
    %538 = tpu.matmul %535, %537, %cst_552 {dimension_numbers = #tpu.dot_dimension_numbers<[1], [0], [0], [1], [0, 0, 1, 1], [], []>} : vector<16x32xbf16>, vector<32x32xbf16>, vector<16x32xf32> -> vector<16x32xf32>
    %c0_553 = arith.constant 0 : index
    %c0_554 = arith.constant 0 : index
    %539 = vector.load %arg8[%c0_553, %c0_554] : memref<16x32xf32, #tpu.memory_space<vmem>>, vector<16x32xf32>
    %540 = arith.addf %539, %538 : vector<16x32xf32>
    %c0_555 = arith.constant 0 : index
    %c0_556 = arith.constant 0 : index
    %541 = vector.load %arg8[%c0_555, %c0_556] : memref<16x32xf32, #tpu.memory_space<vmem>>, vector<16x32xf32>
    tpu.vector_store %arg8[%c0_555, %c0_556], %540 {strides = array<i32>} : memref<16x32xf32, #tpu.memory_space<vmem>>, vector<16x32xf32>,
    %c8_557 = arith.constant 8 : index
    %c0_558 = arith.constant 0 : index
    %542 = vector.load %arg7[%c8_557, %c0_558] : memref<29x32xbf16, #tpu.memory_space<vmem>>, vector<16x32xbf16>
    %543 = arith.extf %542 : vector<16x32xbf16> to vector<16x32xf32>
    %c0_559 = arith.constant 0 : index
    %c0_560 = arith.constant 0 : index
    %544 = vector.load %arg8[%c0_559, %c0_560] : memref<16x32xf32, #tpu.memory_space<vmem>>, vector<16x32xf32>
    %c5_561 = arith.constant 5 : index
    %c0_562 = arith.constant 0 : index
    %c0_563 = arith.constant 0 : index
    %545 = vector.load %arg3[%c5_561, %c0_562, %c0_563] : memref<8x1x32xf32, #tpu.memory_space<vmem>>, vector<1x1x32xf32>
    %546 = vector.shape_cast %545 : vector<1x1x32xf32> to vector<1x32xf32>
    %547 = vector.broadcast %546 : vector<1x32xf32> to vector<16x32xf32>
    %548 = arith.addf %544, %547 : vector<16x32xf32>
    %c5_564 = arith.constant 5 : index
    %c0_565 = arith.constant 0 : index
    %c0_566 = arith.constant 0 : index
    %549 = vector.load %arg4[%c5_564, %c0_565, %c0_566] : memref<8x1x32xf32, #tpu.memory_space<vmem>>, vector<1x1x32xf32>
    %550 = vector.shape_cast %549 : vector<1x1x32xf32> to vector<1x32xf32>
    %551 = vector.broadcast %550 : vector<1x32xf32> to vector<16x32xf32>
    %552 = arith.mulf %548, %551 : vector<16x32xf32>
    %553 = arith.addf %552, %543 : vector<16x32xf32>
    %cst_567 = arith.constant 0.000000e+00 : f32
    %554 = vector.broadcast %cst_567 : f32 to vector<16x32xf32>
    %555 = arith.cmpf oge, %553, %554 : vector<16x32xf32>
    %cst_568 = arith.constant 2.000000e-01 : f32
    %556 = vector.broadcast %cst_568 : f32 to vector<16x32xf32>
    %557 = arith.mulf %556, %553 : vector<16x32xf32>
    %558 = arith.select %555, %553, %557 : vector<16x32xi1>, vector<16x32xf32>
    %559 = arith.truncf %558 : vector<16x32xf32> to vector<16x32xbf16>
    %c8_569 = arith.constant 8 : index
    %c0_570 = arith.constant 0 : index
    %560 = vector.load %arg7[%c8_569, %c0_570] : memref<29x32xbf16, #tpu.memory_space<vmem>>, vector<16x32xbf16>
    tpu.vector_store %arg7[%c8_569, %c0_570], %559 {strides = array<i32>} : memref<29x32xbf16, #tpu.memory_space<vmem>>, vector<16x32xbf16>,
    %c3_571 = arith.constant 3 : index
    %c0_572 = arith.constant 0 : index
    %561 = vector.load %arg7[%c3_571, %c0_572] : memref<29x32xbf16, #tpu.memory_space<vmem>>, vector<16x32xbf16>
    %562 = vector.broadcast %6 : vector<16x1xbf16> to vector<16x32xbf16>
    %563 = arith.mulf %561, %562 : vector<16x32xbf16>
    %c54 = arith.constant 54 : index
    %c0_573 = arith.constant 0 : index
    %c0_574 = arith.constant 0 : index
    %564 = vector.load %arg2[%c54, %c0_573, %c0_574] : memref<72x32x32xbf16, #tpu.memory_space<vmem>>, vector<1x32x32xbf16>
    %565 = vector.shape_cast %564 : vector<1x32x32xbf16> to vector<32x32xbf16>
    %cst_575 = arith.constant dense<0.000000e+00> : vector<16x32xf32>
    %566 = tpu.matmul %563, %565, %cst_575 {dimension_numbers = #tpu.dot_dimension_numbers<[1], [0], [0], [1], [0, 0, 1, 1], [], []>} : vector<16x32xbf16>, vector<32x32xbf16>, vector<16x32xf32> -> vector<16x32xf32>
    %c0_576 = arith.constant 0 : index
    %c0_577 = arith.constant 0 : index
    %567 = vector.load %arg8[%c0_576, %c0_577] : memref<16x32xf32, #tpu.memory_space<vmem>>, vector<16x32xf32>
    tpu.vector_store %arg8[%c0_576, %c0_577], %566 {strides = array<i32>} : memref<16x32xf32, #tpu.memory_space<vmem>>, vector<16x32xf32>,
    %c4_578 = arith.constant 4 : index
    %c0_579 = arith.constant 0 : index
    %568 = vector.load %arg7[%c4_578, %c0_579] : memref<29x32xbf16, #tpu.memory_space<vmem>>, vector<16x32xbf16>
    %c55 = arith.constant 55 : index
    %c0_580 = arith.constant 0 : index
    %c0_581 = arith.constant 0 : index
    %569 = vector.load %arg2[%c55, %c0_580, %c0_581] : memref<72x32x32xbf16, #tpu.memory_space<vmem>>, vector<1x32x32xbf16>
    %570 = vector.shape_cast %569 : vector<1x32x32xbf16> to vector<32x32xbf16>
    %cst_582 = arith.constant dense<0.000000e+00> : vector<16x32xf32>
    %571 = tpu.matmul %568, %570, %cst_582 {dimension_numbers = #tpu.dot_dimension_numbers<[1], [0], [0], [1], [0, 0, 1, 1], [], []>} : vector<16x32xbf16>, vector<32x32xbf16>, vector<16x32xf32> -> vector<16x32xf32>
    %c0_583 = arith.constant 0 : index
    %c0_584 = arith.constant 0 : index
    %572 = vector.load %arg8[%c0_583, %c0_584] : memref<16x32xf32, #tpu.memory_space<vmem>>, vector<16x32xf32>
    %573 = arith.addf %572, %571 : vector<16x32xf32>
    %c0_585 = arith.constant 0 : index
    %c0_586 = arith.constant 0 : index
    %574 = vector.load %arg8[%c0_585, %c0_586] : memref<16x32xf32, #tpu.memory_space<vmem>>, vector<16x32xf32>
    tpu.vector_store %arg8[%c0_585, %c0_586], %573 {strides = array<i32>} : memref<16x32xf32, #tpu.memory_space<vmem>>, vector<16x32xf32>,
    %c5_587 = arith.constant 5 : index
    %c0_588 = arith.constant 0 : index
    %575 = vector.load %arg7[%c5_587, %c0_588] : memref<29x32xbf16, #tpu.memory_space<vmem>>, vector<16x32xbf16>
    %576 = vector.broadcast %8 : vector<16x1xbf16> to vector<16x32xbf16>
    %577 = arith.mulf %575, %576 : vector<16x32xbf16>
    %c56 = arith.constant 56 : index
    %c0_589 = arith.constant 0 : index
    %c0_590 = arith.constant 0 : index
    %578 = vector.load %arg2[%c56, %c0_589, %c0_590] : memref<72x32x32xbf16, #tpu.memory_space<vmem>>, vector<1x32x32xbf16>
    %579 = vector.shape_cast %578 : vector<1x32x32xbf16> to vector<32x32xbf16>
    %cst_591 = arith.constant dense<0.000000e+00> : vector<16x32xf32>
    %580 = tpu.matmul %577, %579, %cst_591 {dimension_numbers = #tpu.dot_dimension_numbers<[1], [0], [0], [1], [0, 0, 1, 1], [], []>} : vector<16x32xbf16>, vector<32x32xbf16>, vector<16x32xf32> -> vector<16x32xf32>
    %c0_592 = arith.constant 0 : index
    %c0_593 = arith.constant 0 : index
    %581 = vector.load %arg8[%c0_592, %c0_593] : memref<16x32xf32, #tpu.memory_space<vmem>>, vector<16x32xf32>
    %582 = arith.addf %581, %580 : vector<16x32xf32>
    %c0_594 = arith.constant 0 : index
    %c0_595 = arith.constant 0 : index
    %583 = vector.load %arg8[%c0_594, %c0_595] : memref<16x32xf32, #tpu.memory_space<vmem>>, vector<16x32xf32>
    tpu.vector_store %arg8[%c0_594, %c0_595], %582 {strides = array<i32>} : memref<16x32xf32, #tpu.memory_space<vmem>>, vector<16x32xf32>,
    %c7_596 = arith.constant 7 : index
    %c0_597 = arith.constant 0 : index
    %584 = vector.load %arg7[%c7_596, %c0_597] : memref<29x32xbf16, #tpu.memory_space<vmem>>, vector<16x32xbf16>
    %585 = vector.broadcast %6 : vector<16x1xbf16> to vector<16x32xbf16>
    %586 = arith.mulf %584, %585 : vector<16x32xbf16>
    %c57 = arith.constant 57 : index
    %c0_598 = arith.constant 0 : index
    %c0_599 = arith.constant 0 : index
    %587 = vector.load %arg2[%c57, %c0_598, %c0_599] : memref<72x32x32xbf16, #tpu.memory_space<vmem>>, vector<1x32x32xbf16>
    %588 = vector.shape_cast %587 : vector<1x32x32xbf16> to vector<32x32xbf16>
    %cst_600 = arith.constant dense<0.000000e+00> : vector<16x32xf32>
    %589 = tpu.matmul %586, %588, %cst_600 {dimension_numbers = #tpu.dot_dimension_numbers<[1], [0], [0], [1], [0, 0, 1, 1], [], []>} : vector<16x32xbf16>, vector<32x32xbf16>, vector<16x32xf32> -> vector<16x32xf32>
    %c0_601 = arith.constant 0 : index
    %c0_602 = arith.constant 0 : index
    %590 = vector.load %arg8[%c0_601, %c0_602] : memref<16x32xf32, #tpu.memory_space<vmem>>, vector<16x32xf32>
    %591 = arith.addf %590, %589 : vector<16x32xf32>
    %c0_603 = arith.constant 0 : index
    %c0_604 = arith.constant 0 : index
    %592 = vector.load %arg8[%c0_603, %c0_604] : memref<16x32xf32, #tpu.memory_space<vmem>>, vector<16x32xf32>
    tpu.vector_store %arg8[%c0_603, %c0_604], %591 {strides = array<i32>} : memref<16x32xf32, #tpu.memory_space<vmem>>, vector<16x32xf32>,
    %c8_605 = arith.constant 8 : index
    %c0_606 = arith.constant 0 : index
    %593 = vector.load %arg7[%c8_605, %c0_606] : memref<29x32xbf16, #tpu.memory_space<vmem>>, vector<16x32xbf16>
    %c58 = arith.constant 58 : index
    %c0_607 = arith.constant 0 : index
    %c0_608 = arith.constant 0 : index
    %594 = vector.load %arg2[%c58, %c0_607, %c0_608] : memref<72x32x32xbf16, #tpu.memory_space<vmem>>, vector<1x32x32xbf16>
    %595 = vector.shape_cast %594 : vector<1x32x32xbf16> to vector<32x32xbf16>
    %cst_609 = arith.constant dense<0.000000e+00> : vector<16x32xf32>
    %596 = tpu.matmul %593, %595, %cst_609 {dimension_numbers = #tpu.dot_dimension_numbers<[1], [0], [0], [1], [0, 0, 1, 1], [], []>} : vector<16x32xbf16>, vector<32x32xbf16>, vector<16x32xf32> -> vector<16x32xf32>
    %c0_610 = arith.constant 0 : index
    %c0_611 = arith.constant 0 : index
    %597 = vector.load %arg8[%c0_610, %c0_611] : memref<16x32xf32, #tpu.memory_space<vmem>>, vector<16x32xf32>
    %598 = arith.addf %597, %596 : vector<16x32xf32>
    %c0_612 = arith.constant 0 : index
    %c0_613 = arith.constant 0 : index
    %599 = vector.load %arg8[%c0_612, %c0_613] : memref<16x32xf32, #tpu.memory_space<vmem>>, vector<16x32xf32>
    tpu.vector_store %arg8[%c0_612, %c0_613], %598 {strides = array<i32>} : memref<16x32xf32, #tpu.memory_space<vmem>>, vector<16x32xf32>,
    %c9_614 = arith.constant 9 : index
    %c0_615 = arith.constant 0 : index
    %600 = vector.load %arg7[%c9_614, %c0_615] : memref<29x32xbf16, #tpu.memory_space<vmem>>, vector<16x32xbf16>
    %601 = vector.broadcast %8 : vector<16x1xbf16> to vector<16x32xbf16>
    %602 = arith.mulf %600, %601 : vector<16x32xbf16>
    %c59 = arith.constant 59 : index
    %c0_616 = arith.constant 0 : index
    %c0_617 = arith.constant 0 : index
    %603 = vector.load %arg2[%c59, %c0_616, %c0_617] : memref<72x32x32xbf16, #tpu.memory_space<vmem>>, vector<1x32x32xbf16>
    %604 = vector.shape_cast %603 : vector<1x32x32xbf16> to vector<32x32xbf16>
    %cst_618 = arith.constant dense<0.000000e+00> : vector<16x32xf32>
    %605 = tpu.matmul %602, %604, %cst_618 {dimension_numbers = #tpu.dot_dimension_numbers<[1], [0], [0], [1], [0, 0, 1, 1], [], []>} : vector<16x32xbf16>, vector<32x32xbf16>, vector<16x32xf32> -> vector<16x32xf32>
    %c0_619 = arith.constant 0 : index
    %c0_620 = arith.constant 0 : index
    %606 = vector.load %arg8[%c0_619, %c0_620] : memref<16x32xf32, #tpu.memory_space<vmem>>, vector<16x32xf32>
    %607 = arith.addf %606, %605 : vector<16x32xf32>
    %c0_621 = arith.constant 0 : index
    %c0_622 = arith.constant 0 : index
    %608 = vector.load %arg8[%c0_621, %c0_622] : memref<16x32xf32, #tpu.memory_space<vmem>>, vector<16x32xf32>
    tpu.vector_store %arg8[%c0_621, %c0_622], %607 {strides = array<i32>} : memref<16x32xf32, #tpu.memory_space<vmem>>, vector<16x32xf32>,
    %c11_623 = arith.constant 11 : index
    %c0_624 = arith.constant 0 : index
    %609 = vector.load %arg7[%c11_623, %c0_624] : memref<29x32xbf16, #tpu.memory_space<vmem>>, vector<16x32xbf16>
    %610 = vector.broadcast %6 : vector<16x1xbf16> to vector<16x32xbf16>
    %611 = arith.mulf %609, %610 : vector<16x32xbf16>
    %c60 = arith.constant 60 : index
    %c0_625 = arith.constant 0 : index
    %c0_626 = arith.constant 0 : index
    %612 = vector.load %arg2[%c60, %c0_625, %c0_626] : memref<72x32x32xbf16, #tpu.memory_space<vmem>>, vector<1x32x32xbf16>
    %613 = vector.shape_cast %612 : vector<1x32x32xbf16> to vector<32x32xbf16>
    %cst_627 = arith.constant dense<0.000000e+00> : vector<16x32xf32>
    %614 = tpu.matmul %611, %613, %cst_627 {dimension_numbers = #tpu.dot_dimension_numbers<[1], [0], [0], [1], [0, 0, 1, 1], [], []>} : vector<16x32xbf16>, vector<32x32xbf16>, vector<16x32xf32> -> vector<16x32xf32>
    %c0_628 = arith.constant 0 : index
    %c0_629 = arith.constant 0 : index
    %615 = vector.load %arg8[%c0_628, %c0_629] : memref<16x32xf32, #tpu.memory_space<vmem>>, vector<16x32xf32>
    %616 = arith.addf %615, %614 : vector<16x32xf32>
    %c0_630 = arith.constant 0 : index
    %c0_631 = arith.constant 0 : index
    %617 = vector.load %arg8[%c0_630, %c0_631] : memref<16x32xf32, #tpu.memory_space<vmem>>, vector<16x32xf32>
    tpu.vector_store %arg8[%c0_630, %c0_631], %616 {strides = array<i32>} : memref<16x32xf32, #tpu.memory_space<vmem>>, vector<16x32xf32>,
    %c12_632 = arith.constant 12 : index
    %c0_633 = arith.constant 0 : index
    %618 = vector.load %arg7[%c12_632, %c0_633] : memref<29x32xbf16, #tpu.memory_space<vmem>>, vector<16x32xbf16>
    %c61 = arith.constant 61 : index
    %c0_634 = arith.constant 0 : index
    %c0_635 = arith.constant 0 : index
    %619 = vector.load %arg2[%c61, %c0_634, %c0_635] : memref<72x32x32xbf16, #tpu.memory_space<vmem>>, vector<1x32x32xbf16>
    %620 = vector.shape_cast %619 : vector<1x32x32xbf16> to vector<32x32xbf16>
    %cst_636 = arith.constant dense<0.000000e+00> : vector<16x32xf32>
    %621 = tpu.matmul %618, %620, %cst_636 {dimension_numbers = #tpu.dot_dimension_numbers<[1], [0], [0], [1], [0, 0, 1, 1], [], []>} : vector<16x32xbf16>, vector<32x32xbf16>, vector<16x32xf32> -> vector<16x32xf32>
    %c0_637 = arith.constant 0 : index
    %c0_638 = arith.constant 0 : index
    %622 = vector.load %arg8[%c0_637, %c0_638] : memref<16x32xf32, #tpu.memory_space<vmem>>, vector<16x32xf32>
    %623 = arith.addf %622, %621 : vector<16x32xf32>
    %c0_639 = arith.constant 0 : index
    %c0_640 = arith.constant 0 : index
    %624 = vector.load %arg8[%c0_639, %c0_640] : memref<16x32xf32, #tpu.memory_space<vmem>>, vector<16x32xf32>
    tpu.vector_store %arg8[%c0_639, %c0_640], %623 {strides = array<i32>} : memref<16x32xf32, #tpu.memory_space<vmem>>, vector<16x32xf32>,
    %c13_641 = arith.constant 13 : index
    %c0_642 = arith.constant 0 : index
    %625 = vector.load %arg7[%c13_641, %c0_642] : memref<29x32xbf16, #tpu.memory_space<vmem>>, vector<16x32xbf16>
    %626 = vector.broadcast %8 : vector<16x1xbf16> to vector<16x32xbf16>
    %627 = arith.mulf %625, %626 : vector<16x32xbf16>
    %c62 = arith.constant 62 : index
    %c0_643 = arith.constant 0 : index
    %c0_644 = arith.constant 0 : index
    %628 = vector.load %arg2[%c62, %c0_643, %c0_644] : memref<72x32x32xbf16, #tpu.memory_space<vmem>>, vector<1x32x32xbf16>
    %629 = vector.shape_cast %628 : vector<1x32x32xbf16> to vector<32x32xbf16>
    %cst_645 = arith.constant dense<0.000000e+00> : vector<16x32xf32>
    %630 = tpu.matmul %627, %629, %cst_645 {dimension_numbers = #tpu.dot_dimension_numbers<[1], [0], [0], [1], [0, 0, 1, 1], [], []>} : vector<16x32xbf16>, vector<32x32xbf16>, vector<16x32xf32> -> vector<16x32xf32>
    %c0_646 = arith.constant 0 : index
    %c0_647 = arith.constant 0 : index
    %631 = vector.load %arg8[%c0_646, %c0_647] : memref<16x32xf32, #tpu.memory_space<vmem>>, vector<16x32xf32>
    %632 = arith.addf %631, %630 : vector<16x32xf32>
    %c0_648 = arith.constant 0 : index
    %c0_649 = arith.constant 0 : index
    %633 = vector.load %arg8[%c0_648, %c0_649] : memref<16x32xf32, #tpu.memory_space<vmem>>, vector<16x32xf32>
    tpu.vector_store %arg8[%c0_648, %c0_649], %632 {strides = array<i32>} : memref<16x32xf32, #tpu.memory_space<vmem>>, vector<16x32xf32>,
    %c8_650 = arith.constant 8 : index
    %c0_651 = arith.constant 0 : index
    %634 = vector.load %arg7[%c8_650, %c0_651] : memref<29x32xbf16, #tpu.memory_space<vmem>>, vector<16x32xbf16>
    %635 = arith.extf %634 : vector<16x32xbf16> to vector<16x32xf32>
    %c0_652 = arith.constant 0 : index
    %c0_653 = arith.constant 0 : index
    %636 = vector.load %arg8[%c0_652, %c0_653] : memref<16x32xf32, #tpu.memory_space<vmem>>, vector<16x32xf32>
    %c6_654 = arith.constant 6 : index
    %c0_655 = arith.constant 0 : index
    %c0_656 = arith.constant 0 : index
    %637 = vector.load %arg3[%c6_654, %c0_655, %c0_656] : memref<8x1x32xf32, #tpu.memory_space<vmem>>, vector<1x1x32xf32>
    %638 = vector.shape_cast %637 : vector<1x1x32xf32> to vector<1x32xf32>
    %639 = vector.broadcast %638 : vector<1x32xf32> to vector<16x32xf32>
    %640 = arith.addf %636, %639 : vector<16x32xf32>
    %c6_657 = arith.constant 6 : index
    %c0_658 = arith.constant 0 : index
    %c0_659 = arith.constant 0 : index
    %641 = vector.load %arg4[%c6_657, %c0_658, %c0_659] : memref<8x1x32xf32, #tpu.memory_space<vmem>>, vector<1x1x32xf32>
    %642 = vector.shape_cast %641 : vector<1x1x32xf32> to vector<1x32xf32>
    %643 = vector.broadcast %642 : vector<1x32xf32> to vector<16x32xf32>
    %644 = arith.mulf %640, %643 : vector<16x32xf32>
    %645 = arith.addf %644, %635 : vector<16x32xf32>
    %cst_660 = arith.constant 0.000000e+00 : f32
    %646 = vector.broadcast %cst_660 : f32 to vector<16x32xf32>
    %647 = arith.cmpf oge, %645, %646 : vector<16x32xf32>
    %cst_661 = arith.constant 2.000000e-01 : f32
    %648 = vector.broadcast %cst_661 : f32 to vector<16x32xf32>
    %649 = arith.mulf %648, %645 : vector<16x32xf32>
    %650 = arith.select %647, %645, %649 : vector<16x32xi1>, vector<16x32xf32>
    %651 = arith.truncf %650 : vector<16x32xf32> to vector<16x32xbf16>
    %c8_662 = arith.constant 8 : index
    %c0_663 = arith.constant 0 : index
    %652 = vector.load %arg7[%c8_662, %c0_663] : memref<29x32xbf16, #tpu.memory_space<vmem>>, vector<16x32xbf16>
    tpu.vector_store %arg7[%c8_662, %c0_663], %651 {strides = array<i32>} : memref<29x32xbf16, #tpu.memory_space<vmem>>, vector<16x32xbf16>,
    %c3_664 = arith.constant 3 : index
    %c0_665 = arith.constant 0 : index
    %653 = vector.load %arg7[%c3_664, %c0_665] : memref<29x32xbf16, #tpu.memory_space<vmem>>, vector<16x32xbf16>
    %654 = vector.broadcast %6 : vector<16x1xbf16> to vector<16x32xbf16>
    %655 = arith.mulf %653, %654 : vector<16x32xbf16>
    %c63 = arith.constant 63 : index
    %c0_666 = arith.constant 0 : index
    %c0_667 = arith.constant 0 : index
    %656 = vector.load %arg2[%c63, %c0_666, %c0_667] : memref<72x32x32xbf16, #tpu.memory_space<vmem>>, vector<1x32x32xbf16>
    %657 = vector.shape_cast %656 : vector<1x32x32xbf16> to vector<32x32xbf16>
    %cst_668 = arith.constant dense<0.000000e+00> : vector<16x32xf32>
    %658 = tpu.matmul %655, %657, %cst_668 {dimension_numbers = #tpu.dot_dimension_numbers<[1], [0], [0], [1], [0, 0, 1, 1], [], []>} : vector<16x32xbf16>, vector<32x32xbf16>, vector<16x32xf32> -> vector<16x32xf32>
    %c0_669 = arith.constant 0 : index
    %c0_670 = arith.constant 0 : index
    %659 = vector.load %arg8[%c0_669, %c0_670] : memref<16x32xf32, #tpu.memory_space<vmem>>, vector<16x32xf32>
    tpu.vector_store %arg8[%c0_669, %c0_670], %658 {strides = array<i32>} : memref<16x32xf32, #tpu.memory_space<vmem>>, vector<16x32xf32>,
    %c4_671 = arith.constant 4 : index
    %c0_672 = arith.constant 0 : index
    %660 = vector.load %arg7[%c4_671, %c0_672] : memref<29x32xbf16, #tpu.memory_space<vmem>>, vector<16x32xbf16>
    %c64 = arith.constant 64 : index
    %c0_673 = arith.constant 0 : index
    %c0_674 = arith.constant 0 : index
    %661 = vector.load %arg2[%c64, %c0_673, %c0_674] : memref<72x32x32xbf16, #tpu.memory_space<vmem>>, vector<1x32x32xbf16>
    %662 = vector.shape_cast %661 : vector<1x32x32xbf16> to vector<32x32xbf16>
    %cst_675 = arith.constant dense<0.000000e+00> : vector<16x32xf32>
    %663 = tpu.matmul %660, %662, %cst_675 {dimension_numbers = #tpu.dot_dimension_numbers<[1], [0], [0], [1], [0, 0, 1, 1], [], []>} : vector<16x32xbf16>, vector<32x32xbf16>, vector<16x32xf32> -> vector<16x32xf32>
    %c0_676 = arith.constant 0 : index
    %c0_677 = arith.constant 0 : index
    %664 = vector.load %arg8[%c0_676, %c0_677] : memref<16x32xf32, #tpu.memory_space<vmem>>, vector<16x32xf32>
    %665 = arith.addf %664, %663 : vector<16x32xf32>
    %c0_678 = arith.constant 0 : index
    %c0_679 = arith.constant 0 : index
    %666 = vector.load %arg8[%c0_678, %c0_679] : memref<16x32xf32, #tpu.memory_space<vmem>>, vector<16x32xf32>
    tpu.vector_store %arg8[%c0_678, %c0_679], %665 {strides = array<i32>} : memref<16x32xf32, #tpu.memory_space<vmem>>, vector<16x32xf32>,
    %c5_680 = arith.constant 5 : index
    %c0_681 = arith.constant 0 : index
    %667 = vector.load %arg7[%c5_680, %c0_681] : memref<29x32xbf16, #tpu.memory_space<vmem>>, vector<16x32xbf16>
    %668 = vector.broadcast %8 : vector<16x1xbf16> to vector<16x32xbf16>
    %669 = arith.mulf %667, %668 : vector<16x32xbf16>
    %c65 = arith.constant 65 : index
    %c0_682 = arith.constant 0 : index
    %c0_683 = arith.constant 0 : index
    %670 = vector.load %arg2[%c65, %c0_682, %c0_683] : memref<72x32x32xbf16, #tpu.memory_space<vmem>>, vector<1x32x32xbf16>
    %671 = vector.shape_cast %670 : vector<1x32x32xbf16> to vector<32x32xbf16>
    %cst_684 = arith.constant dense<0.000000e+00> : vector<16x32xf32>
    %672 = tpu.matmul %669, %671, %cst_684 {dimension_numbers = #tpu.dot_dimension_numbers<[1], [0], [0], [1], [0, 0, 1, 1], [], []>} : vector<16x32xbf16>, vector<32x32xbf16>, vector<16x32xf32> -> vector<16x32xf32>
    %c0_685 = arith.constant 0 : index
    %c0_686 = arith.constant 0 : index
    %673 = vector.load %arg8[%c0_685, %c0_686] : memref<16x32xf32, #tpu.memory_space<vmem>>, vector<16x32xf32>
    %674 = arith.addf %673, %672 : vector<16x32xf32>
    %c0_687 = arith.constant 0 : index
    %c0_688 = arith.constant 0 : index
    %675 = vector.load %arg8[%c0_687, %c0_688] : memref<16x32xf32, #tpu.memory_space<vmem>>, vector<16x32xf32>
    tpu.vector_store %arg8[%c0_687, %c0_688], %674 {strides = array<i32>} : memref<16x32xf32, #tpu.memory_space<vmem>>, vector<16x32xf32>,
    %c7_689 = arith.constant 7 : index
    %c0_690 = arith.constant 0 : index
    %676 = vector.load %arg7[%c7_689, %c0_690] : memref<29x32xbf16, #tpu.memory_space<vmem>>, vector<16x32xbf16>
    %677 = vector.broadcast %6 : vector<16x1xbf16> to vector<16x32xbf16>
    %678 = arith.mulf %676, %677 : vector<16x32xbf16>
    %c66 = arith.constant 66 : index
    %c0_691 = arith.constant 0 : index
    %c0_692 = arith.constant 0 : index
    %679 = vector.load %arg2[%c66, %c0_691, %c0_692] : memref<72x32x32xbf16, #tpu.memory_space<vmem>>, vector<1x32x32xbf16>
    %680 = vector.shape_cast %679 : vector<1x32x32xbf16> to vector<32x32xbf16>
    %cst_693 = arith.constant dense<0.000000e+00> : vector<16x32xf32>
    %681 = tpu.matmul %678, %680, %cst_693 {dimension_numbers = #tpu.dot_dimension_numbers<[1], [0], [0], [1], [0, 0, 1, 1], [], []>} : vector<16x32xbf16>, vector<32x32xbf16>, vector<16x32xf32> -> vector<16x32xf32>
    %c0_694 = arith.constant 0 : index
    %c0_695 = arith.constant 0 : index
    %682 = vector.load %arg8[%c0_694, %c0_695] : memref<16x32xf32, #tpu.memory_space<vmem>>, vector<16x32xf32>
    %683 = arith.addf %682, %681 : vector<16x32xf32>
    %c0_696 = arith.constant 0 : index
    %c0_697 = arith.constant 0 : index
    %684 = vector.load %arg8[%c0_696, %c0_697] : memref<16x32xf32, #tpu.memory_space<vmem>>, vector<16x32xf32>
    tpu.vector_store %arg8[%c0_696, %c0_697], %683 {strides = array<i32>} : memref<16x32xf32, #tpu.memory_space<vmem>>, vector<16x32xf32>,
    %c8_698 = arith.constant 8 : index
    %c0_699 = arith.constant 0 : index
    %685 = vector.load %arg7[%c8_698, %c0_699] : memref<29x32xbf16, #tpu.memory_space<vmem>>, vector<16x32xbf16>
    %c67 = arith.constant 67 : index
    %c0_700 = arith.constant 0 : index
    %c0_701 = arith.constant 0 : index
    %686 = vector.load %arg2[%c67, %c0_700, %c0_701] : memref<72x32x32xbf16, #tpu.memory_space<vmem>>, vector<1x32x32xbf16>
    %687 = vector.shape_cast %686 : vector<1x32x32xbf16> to vector<32x32xbf16>
    %cst_702 = arith.constant dense<0.000000e+00> : vector<16x32xf32>
    %688 = tpu.matmul %685, %687, %cst_702 {dimension_numbers = #tpu.dot_dimension_numbers<[1], [0], [0], [1], [0, 0, 1, 1], [], []>} : vector<16x32xbf16>, vector<32x32xbf16>, vector<16x32xf32> -> vector<16x32xf32>
    %c0_703 = arith.constant 0 : index
    %c0_704 = arith.constant 0 : index
    %689 = vector.load %arg8[%c0_703, %c0_704] : memref<16x32xf32, #tpu.memory_space<vmem>>, vector<16x32xf32>
    %690 = arith.addf %689, %688 : vector<16x32xf32>
    %c0_705 = arith.constant 0 : index
    %c0_706 = arith.constant 0 : index
    %691 = vector.load %arg8[%c0_705, %c0_706] : memref<16x32xf32, #tpu.memory_space<vmem>>, vector<16x32xf32>
    tpu.vector_store %arg8[%c0_705, %c0_706], %690 {strides = array<i32>} : memref<16x32xf32, #tpu.memory_space<vmem>>, vector<16x32xf32>,
    %c9_707 = arith.constant 9 : index
    %c0_708 = arith.constant 0 : index
    %692 = vector.load %arg7[%c9_707, %c0_708] : memref<29x32xbf16, #tpu.memory_space<vmem>>, vector<16x32xbf16>
    %693 = vector.broadcast %8 : vector<16x1xbf16> to vector<16x32xbf16>
    %694 = arith.mulf %692, %693 : vector<16x32xbf16>
    %c68 = arith.constant 68 : index
    %c0_709 = arith.constant 0 : index
    %c0_710 = arith.constant 0 : index
    %695 = vector.load %arg2[%c68, %c0_709, %c0_710] : memref<72x32x32xbf16, #tpu.memory_space<vmem>>, vector<1x32x32xbf16>
    %696 = vector.shape_cast %695 : vector<1x32x32xbf16> to vector<32x32xbf16>
    %cst_711 = arith.constant dense<0.000000e+00> : vector<16x32xf32>
    %697 = tpu.matmul %694, %696, %cst_711 {dimension_numbers = #tpu.dot_dimension_numbers<[1], [0], [0], [1], [0, 0, 1, 1], [], []>} : vector<16x32xbf16>, vector<32x32xbf16>, vector<16x32xf32> -> vector<16x32xf32>
    %c0_712 = arith.constant 0 : index
    %c0_713 = arith.constant 0 : index
    %698 = vector.load %arg8[%c0_712, %c0_713] : memref<16x32xf32, #tpu.memory_space<vmem>>, vector<16x32xf32>
    %699 = arith.addf %698, %697 : vector<16x32xf32>
    %c0_714 = arith.constant 0 : index
    %c0_715 = arith.constant 0 : index
    %700 = vector.load %arg8[%c0_714, %c0_715] : memref<16x32xf32, #tpu.memory_space<vmem>>, vector<16x32xf32>
    tpu.vector_store %arg8[%c0_714, %c0_715], %699 {strides = array<i32>} : memref<16x32xf32, #tpu.memory_space<vmem>>, vector<16x32xf32>,
    %c11_716 = arith.constant 11 : index
    %c0_717 = arith.constant 0 : index
    %701 = vector.load %arg7[%c11_716, %c0_717] : memref<29x32xbf16, #tpu.memory_space<vmem>>, vector<16x32xbf16>
    %702 = vector.broadcast %6 : vector<16x1xbf16> to vector<16x32xbf16>
    %703 = arith.mulf %701, %702 : vector<16x32xbf16>
    %c69 = arith.constant 69 : index
    %c0_718 = arith.constant 0 : index
    %c0_719 = arith.constant 0 : index
    %704 = vector.load %arg2[%c69, %c0_718, %c0_719] : memref<72x32x32xbf16, #tpu.memory_space<vmem>>, vector<1x32x32xbf16>
    %705 = vector.shape_cast %704 : vector<1x32x32xbf16> to vector<32x32xbf16>
    %cst_720 = arith.constant dense<0.000000e+00> : vector<16x32xf32>
    %706 = tpu.matmul %703, %705, %cst_720 {dimension_numbers = #tpu.dot_dimension_numbers<[1], [0], [0], [1], [0, 0, 1, 1], [], []>} : vector<16x32xbf16>, vector<32x32xbf16>, vector<16x32xf32> -> vector<16x32xf32>
    %c0_721 = arith.constant 0 : index
    %c0_722 = arith.constant 0 : index
    %707 = vector.load %arg8[%c0_721, %c0_722] : memref<16x32xf32, #tpu.memory_space<vmem>>, vector<16x32xf32>
    %708 = arith.addf %707, %706 : vector<16x32xf32>
    %c0_723 = arith.constant 0 : index
    %c0_724 = arith.constant 0 : index
    %709 = vector.load %arg8[%c0_723, %c0_724] : memref<16x32xf32, #tpu.memory_space<vmem>>, vector<16x32xf32>
    tpu.vector_store %arg8[%c0_723, %c0_724], %708 {strides = array<i32>} : memref<16x32xf32, #tpu.memory_space<vmem>>, vector<16x32xf32>,
    %c12_725 = arith.constant 12 : index
    %c0_726 = arith.constant 0 : index
    %710 = vector.load %arg7[%c12_725, %c0_726] : memref<29x32xbf16, #tpu.memory_space<vmem>>, vector<16x32xbf16>
    %c70 = arith.constant 70 : index
    %c0_727 = arith.constant 0 : index
    %c0_728 = arith.constant 0 : index
    %711 = vector.load %arg2[%c70, %c0_727, %c0_728] : memref<72x32x32xbf16, #tpu.memory_space<vmem>>, vector<1x32x32xbf16>
    %712 = vector.shape_cast %711 : vector<1x32x32xbf16> to vector<32x32xbf16>
    %cst_729 = arith.constant dense<0.000000e+00> : vector<16x32xf32>
    %713 = tpu.matmul %710, %712, %cst_729 {dimension_numbers = #tpu.dot_dimension_numbers<[1], [0], [0], [1], [0, 0, 1, 1], [], []>} : vector<16x32xbf16>, vector<32x32xbf16>, vector<16x32xf32> -> vector<16x32xf32>
    %c0_730 = arith.constant 0 : index
    %c0_731 = arith.constant 0 : index
    %714 = vector.load %arg8[%c0_730, %c0_731] : memref<16x32xf32, #tpu.memory_space<vmem>>, vector<16x32xf32>
    %715 = arith.addf %714, %713 : vector<16x32xf32>
    %c0_732 = arith.constant 0 : index
    %c0_733 = arith.constant 0 : index
    %716 = vector.load %arg8[%c0_732, %c0_733] : memref<16x32xf32, #tpu.memory_space<vmem>>, vector<16x32xf32>
    tpu.vector_store %arg8[%c0_732, %c0_733], %715 {strides = array<i32>} : memref<16x32xf32, #tpu.memory_space<vmem>>, vector<16x32xf32>,
    %c13_734 = arith.constant 13 : index
    %c0_735 = arith.constant 0 : index
    %717 = vector.load %arg7[%c13_734, %c0_735] : memref<29x32xbf16, #tpu.memory_space<vmem>>, vector<16x32xbf16>
    %718 = vector.broadcast %8 : vector<16x1xbf16> to vector<16x32xbf16>
    %719 = arith.mulf %717, %718 : vector<16x32xbf16>
    %c71 = arith.constant 71 : index
    %c0_736 = arith.constant 0 : index
    %c0_737 = arith.constant 0 : index
    %720 = vector.load %arg2[%c71, %c0_736, %c0_737] : memref<72x32x32xbf16, #tpu.memory_space<vmem>>, vector<1x32x32xbf16>
    %721 = vector.shape_cast %720 : vector<1x32x32xbf16> to vector<32x32xbf16>
    %cst_738 = arith.constant dense<0.000000e+00> : vector<16x32xf32>
    %722 = tpu.matmul %719, %721, %cst_738 {dimension_numbers = #tpu.dot_dimension_numbers<[1], [0], [0], [1], [0, 0, 1, 1], [], []>} : vector<16x32xbf16>, vector<32x32xbf16>, vector<16x32xf32> -> vector<16x32xf32>
    %c0_739 = arith.constant 0 : index
    %c0_740 = arith.constant 0 : index
    %723 = vector.load %arg8[%c0_739, %c0_740] : memref<16x32xf32, #tpu.memory_space<vmem>>, vector<16x32xf32>
    %724 = arith.addf %723, %722 : vector<16x32xf32>
    %c0_741 = arith.constant 0 : index
    %c0_742 = arith.constant 0 : index
    %725 = vector.load %arg8[%c0_741, %c0_742] : memref<16x32xf32, #tpu.memory_space<vmem>>, vector<16x32xf32>
    tpu.vector_store %arg8[%c0_741, %c0_742], %724 {strides = array<i32>} : memref<16x32xf32, #tpu.memory_space<vmem>>, vector<16x32xf32>,
    %c8_743 = arith.constant 8 : index
    %c0_744 = arith.constant 0 : index
    %726 = vector.load %arg7[%c8_743, %c0_744] : memref<29x32xbf16, #tpu.memory_space<vmem>>, vector<16x32xbf16>
    %727 = arith.extf %726 : vector<16x32xbf16> to vector<16x32xf32>
    %c0_745 = arith.constant 0 : index
    %c0_746 = arith.constant 0 : index
    %728 = vector.load %arg8[%c0_745, %c0_746] : memref<16x32xf32, #tpu.memory_space<vmem>>, vector<16x32xf32>
    %c7_747 = arith.constant 7 : index
    %c0_748 = arith.constant 0 : index
    %c0_749 = arith.constant 0 : index
    %729 = vector.load %arg3[%c7_747, %c0_748, %c0_749] : memref<8x1x32xf32, #tpu.memory_space<vmem>>, vector<1x1x32xf32>
    %730 = vector.shape_cast %729 : vector<1x1x32xf32> to vector<1x32xf32>
    %731 = vector.broadcast %730 : vector<1x32xf32> to vector<16x32xf32>
    %732 = arith.addf %728, %731 : vector<16x32xf32>
    %c7_750 = arith.constant 7 : index
    %c0_751 = arith.constant 0 : index
    %c0_752 = arith.constant 0 : index
    %733 = vector.load %arg4[%c7_750, %c0_751, %c0_752] : memref<8x1x32xf32, #tpu.memory_space<vmem>>, vector<1x1x32xf32>
    %734 = vector.shape_cast %733 : vector<1x1x32xf32> to vector<1x32xf32>
    %735 = vector.broadcast %734 : vector<1x32xf32> to vector<16x32xf32>
    %736 = arith.mulf %732, %735 : vector<16x32xf32>
    %737 = arith.addf %736, %727 : vector<16x32xf32>
    %cst_753 = arith.constant 0.000000e+00 : f32
    %738 = vector.broadcast %cst_753 : f32 to vector<16x32xf32>
    %739 = arith.cmpf oge, %737, %738 : vector<16x32xf32>
    %cst_754 = arith.constant 2.000000e-01 : f32
    %740 = vector.broadcast %cst_754 : f32 to vector<16x32xf32>
    %741 = arith.mulf %740, %737 : vector<16x32xf32>
    %742 = arith.select %739, %737, %741 : vector<16x32xi1>, vector<16x32xf32>
    %743 = arith.truncf %742 : vector<16x32xf32> to vector<16x32xbf16>
    %c8_755 = arith.constant 8 : index
    %c0_756 = arith.constant 0 : index
    %744 = vector.load %arg7[%c8_755, %c0_756] : memref<29x32xbf16, #tpu.memory_space<vmem>>, vector<16x32xbf16>
    tpu.vector_store %arg7[%c8_755, %c0_756], %743 {strides = array<i32>} : memref<29x32xbf16, #tpu.memory_space<vmem>>, vector<16x32xbf16>,
    %c8_757 = arith.constant 8 : index
    %c0_758 = arith.constant 0 : index
    %745 = vector.load %arg7[%c8_757, %c0_758] : memref<29x32xbf16, #tpu.memory_space<vmem>>, vector<16x32xbf16>
    %746 = arith.extf %745 : vector<16x32xbf16> to vector<16x32xf32>
    %c0_759 = arith.constant 0 : index
    %c0_760 = arith.constant 0 : index
    %c0_761 = arith.constant 0 : index
    %747 = vector.load %arg6[%c0_759, %c0_760, %c0_761] : memref<1x16x32xf32, #tpu.memory_space<vmem>>, vector<1x16x32xf32>
    %748 = vector.shape_cast %747 : vector<1x16x32xf32> to vector<16x32xf32>
    %749 = vector.shape_cast %746 : vector<16x32xf32> to vector<1x16x32xf32>
    tpu.vector_store %arg6[%c0_759, %c0_760, %c0_761], %749 {strides = array<i32>} : memref<1x16x32xf32, #tpu.memory_space<vmem>>, vector<1x16x32xf32>,
    return
  }
  func.func @transform_0(%arg0: i32) -> (i32, i32, i32) {
    %c0_i32 = arith.constant 0 : i32
    %c0_i32_0 = arith.constant 0 : i32
    %c0_i32_1 = arith.constant 0 : i32
    return %arg0, %c0_i32, %c0_i32_0 : i32, i32, i32
  }
  func.func @transform_1(%arg0: i32) -> (i32, i32, i32) {
    %c0_i32 = arith.constant 0 : i32
    %c0_i32_0 = arith.constant 0 : i32
    %c0_i32_1 = arith.constant 0 : i32
    %c0_i32_2 = arith.constant 0 : i32
    return %c0_i32, %c0_i32_0, %c0_i32_1 : i32, i32, i32
  }
  func.func @transform_2(%arg0: i32) -> (i32, i32, i32) {
    %c0_i32 = arith.constant 0 : i32
    %c0_i32_0 = arith.constant 0 : i32
    %c0_i32_1 = arith.constant 0 : i32
    %c0_i32_2 = arith.constant 0 : i32
    return %c0_i32, %c0_i32_0, %c0_i32_1 : i32, i32, i32
  }
  func.func @transform_3(%arg0: i32) -> (i32, i32, i32) {
    %c0_i32 = arith.constant 0 : i32
    %c0_i32_0 = arith.constant 0 : i32
    %c0_i32_1 = arith.constant 0 : i32
    %c0_i32_2 = arith.constant 0 : i32
    return %c0_i32, %c0_i32_0, %c0_i32_1 : i32, i32, i32
  }
  func.func @transform_4(%arg0: i32) -> (i32, i32, i32) {
    %c0_i32 = arith.constant 0 : i32
    %c0_i32_0 = arith.constant 0 : i32
    %c0_i32_1 = arith.constant 0 : i32
    %c0_i32_2 = arith.constant 0 : i32
    return %c0_i32, %c0_i32_0, %c0_i32_1 : i32, i32, i32
  }
  func.func @transform_5(%arg0: i32) -> (i32, i32, i32) {
    %c0_i32 = arith.constant 0 : i32
    %c0_i32_0 = arith.constant 0 : i32
    %c0_i32_1 = arith.constant 0 : i32
    return %arg0, %c0_i32, %c0_i32_0 : i32, i32, i32
  }
}

</mosaic_0001>

<bundles_post_ra>
// kernel: _ifblock_forward.4
= control target key start
LH: loop header
LB: loop body
LE: loop exit
PB: predicated region body
PF: predicated region fallthrough
CT: control target
= control target key end

     0   :  { %vm130_vm0 = vcmask 809984   ;;  %vm155_vm1 = vcmask 1040384   ;;  %vm156_vm2 = vcmask 1041408   ;;  %v427_v7 = vmov 65535   ;;  %s586_s1 = inlined_call_operand.vmem [shape: bf16[99,16], index: 1, kind: input, shape index: {}]   ;;  %s587_s0 = inlined_call_operand.vmem [shape: bf16[128,99], index: 0, kind: input, shape index: {}]   ;;  %s588_s2 = inlined_call_operand.vmem [shape: f32[1,16], index: 2, kind: input, shape index: {}]   ;;  %s589_s3 = inlined_call_operand.vmem [shape: f32[128,16], index: 3, kind: output, shape index: {}]  }
   0x1   :  { %v412_v0 = vld [vmem:[%s586_s1] sm:$0xff]   ;;  %v413_v1 = vld [vmem:[%s586_s1 + $0x8] sm:$0xff]   ;;  %v414_v2 = vld [vmem:[%s586_s1 + $0x10] sm:$0xff]   ;;  %v157_v8 = vsel %vm155_vm1, 4294967295, %v427_v7  ;;  %vm307_vm3 = vcmask 130048  }
   0x2   :  { %367 = vmatprep.subr.bf16.mxu0 %v412_v0  ;;  %397 = vmatprep.subr.bf16.mxu1 %v412_v0  ;;  %v415_v3 = vld [vmem:[%s586_s1 + $0x18] sm:$0xff]   ;;  %v419_v4 = vld [vmem:[%s587_s0] sm:$0xff]   ;;  %v417_v9 = vld [vmem:[%s586_s1 + $0x28] sm:$0xff]   ;;  %v158_v11 = vsel %vm156_vm2, %v157_v8, 0 }
   0x3   :  { %368 = vmatpush3.bf16.msra.mxu0 %v412_v0  ;;  %404 = vmatpush3.bf16.msra.mxu1 %v412_v0  ;;  %v420_v5 = vld [vmem:[%s587_s0 + $0x20] sm:$0xff]   ;;  %v418_v10 = vld [vmem:[%s586_s1 + $0x30] ss:$0 sps:$4 sm:$0x33]   ;;  %v421_v13 = vld [vmem:[%s587_s0 + $0x8] sm:$0xff]  }
   0x4   :  { %369 = vmatprep.subr.bf16.mxu0 %v413_v1  ;;  %398 = vmatprep.subr.bf16.mxu1 %v413_v1  ;;  %v416_v6 = vld [vmem:[%s586_s1 + $0x20] sm:$0xff]   ;;  %v160_v12 = vand.u32 %v418_v10, %v158_v11  ;;  %v422_v14 = vld [vmem:[%s587_s0 + $0x28] sm:$0xff]   ;;  %v423_v15 = vld [vmem:[%s587_s0 + $0x10] sm:$0xff]  }
   0x5   :  { %381 = vmatprep.mubr.msk.bf16.mxu0 %vm130_vm0, %v419_v4  ;;  %389 = vmatprep.mubr.msk.bf16.mxu1 %vm130_vm0, %v420_v5  ;;  %v424_v16 = vld [vmem:[%s587_s0 + $0x30] sm:$0xff]   ;;  %v425_v17 = vld [vmem:[%s587_s0 + $0x18] sm:$0xff]   ;;  %v504_v19 = vld [vmem:[%s588_s2] ss:$0 sm:$0xff] }
   0x6   :  { %v426_v18 = vld [vmem:[%s587_s0 + $0x38] sm:$0xff]  }
   0x7   :  { %370 = vmatpush3.bf16.msra.mxu0 %v413_v1  ;;  %405 = vmatpush3.bf16.msra.mxu1 %v413_v1 }
   0x8   :  { %371 = vmatprep.subr.bf16.mxu0 %v414_v2  ;;  %399 = vmatprep.subr.bf16.mxu1 %v414_v2 }
   0xb   :  { %372 = vmatpush3.bf16.msra.mxu0 %v414_v2  ;;  %406 = vmatpush3.bf16.msra.mxu1 %v414_v2 }
   0xc   :  { %373 = vmatprep.subr.bf16.mxu0 %v415_v3  ;;  %400 = vmatprep.subr.bf16.mxu1 %v415_v3 }
   0xf   :  { %374 = vmatpush3.bf16.msra.mxu0 %v415_v3  ;;  %407 = vmatpush3.bf16.msra.mxu1 %v415_v3 }
  0x10   :  { %375 = vmatprep.subr.bf16.mxu0 %v416_v6  ;;  %401 = vmatprep.subr.bf16.mxu1 %v416_v6 }
  0x13   :  { %376 = vmatpush3.bf16.msra.mxu0 %v416_v6  ;;  %408 = vmatpush3.bf16.msra.mxu1 %v416_v6 }
  0x14   :  { %377 = vmatprep.subr.bf16.mxu0 %v417_v9  ;;  %402 = vmatprep.subr.bf16.mxu1 %v417_v9 }
  0x17   :  { %378 = vmatpush3.bf16.msra.mxu0 %v417_v9  ;;  %409 = vmatpush3.bf16.msra.mxu1 %v417_v9 }
  0x18   :  { %379 = vmatprep.subr.bf16.mxu0 %v160_v12  ;;  %403 = vmatprep.subr.bf16.mxu1 %v160_v12 }
  0x1b   :  { %380 = vmatpush3.bf16.msra.mxu0 %v160_v12  ;;  %410 = vmatpush3.bf16.msra.mxu1 %v160_v12 }
  0x1e   :  { %382 = vmatmul.mubr.msk.bf16.vlgmr.msra.gmra.mrb[0].mxu0 %vm130_vm0, %v421_v13  ;;  %390 = vmatmul.mubr.msk.bf16.vlgmr.msra.gmra.mrb[0].mxu1 %vm130_vm0, %v422_v14 }
  0x1f   :  { %385 = vmatprep.mubr.msk.bf16.mxu0 %vm130_vm0, %v423_v15  ;;  %393 = vmatprep.mubr.msk.bf16.mxu1 %vm130_vm0, %v424_v16 }
  0x26   :  { %386 = vmatmul.mubr.msk.bf16.gmra.mrb[4].mxu0 %vm130_vm0, %v425_v17  ;;  %394 = vmatmul.mubr.msk.bf16.gmra.mrb[4].mxu1 %vm130_vm0, %v426_v18 }
  0xf1   :  { %v383_v20 = vpop.f32.mrb[0].mxu0  ;;  %v391_v21 = vpop.f32.mrb[0].mxu1 }
  0xf2   :  { %v205_v22 = vadd.f32 %v383_v20, %v504_v19  ;;  %v237_v23 = vadd.f32 %v391_v21, %v504_v19  ;;  %v196_v24 = vpop.f32.mrb[1].mxu0  ;;  %v228_v25 = vpop.f32.mrb[1].mxu1 }
  0xf3   :  { %v197_v26 = vadd.f32 %v504_v19, %v196_v24  ;;  %v229_v27 = vadd.f32 %v504_v19, %v228_v25  ;;  %v384_v28 = vpop.f32.mrb[2].mxu0  ;;  %v392_v29 = vpop.f32.mrb[2].mxu1 }
  0xf4   :  { %vm261_vm4 = vcmp.ge.f32.partialorder %v205_v22, 0.0  ;;  %v277_v30 = vmul.f32 0.2, %v205_v22  ;;  %vm269_vm5 = vcmp.ge.f32.partialorder %v237_v23, 0.0  ;;  %v285_v31 = vmul.f32 0.2, %v237_v23 }
  0xf5   :  { %vm259_vm6 = vcmp.ge.f32.partialorder %v197_v26, 0.0  ;;  %v275_v32 = vmul.f32 0.2, %v197_v26  ;;  %vm267_vm7 = vcmp.ge.f32.partialorder %v229_v27, 0.0  ;;  %v283_v33 = vmul.f32 0.2, %v229_v27 }
  0xf6   :  { %v293_v34 = vsel %vm261_vm4, %v205_v22, %v277_v30  ;;  %v301_v35 = vsel %vm269_vm5, %v237_v23, %v285_v31  ;;  %v208_v36 = vadd.f32 %v384_v28, %v504_v19  ;;  %v240_v37 = vadd.f32 %v392_v29, %v504_v19  ;;  %v199_v38 = vpop.f32.mrb[3].mxu0  ;;  %v231_v39 = vpop.f32.mrb[3].mxu1 }
  0xf7   :  { %310 = vst.msk [vmem:[%s589_s3 + $0x10] sm:$0xff] %vm307_vm3, %v293_v34  ;;  %318 = vst.msk [vmem:[%s589_s3 + $0x50] sm:$0xff] %vm307_vm3, %v301_v35  ;;  %v291_v40 = vsel %vm259_vm6, %v197_v26, %v275_v32  ;;  %v299_v41 = vsel %vm267_vm7, %v229_v27, %v283_v33  ;;  %v200_v42 = vadd.f32 %v504_v19, %v199_v38 }
  0xf8   :  { %v232_v43 = vadd.f32 %v504_v19, %v231_v39  ;;  %308 = vst.msk [vmem:[%s589_s3] sm:$0xff] %vm307_vm3, %v291_v40  ;;  %316 = vst.msk [vmem:[%s589_s3 + $0x40] sm:$0xff] %vm307_vm3, %v299_v41  ;;  %vm262_vm8 = vcmp.ge.f32.partialorder %v208_v36, 0.0  ;;  %v278_v44 = vmul.f32 0.2, %v208_v36  ;;  %vm270_vm9 = vcmp.ge.f32.partialorder %v240_v37, 0.0 }
  0xf9   :  { %v286_v45 = vmul.f32 0.2, %v240_v37  ;;  %vm260_vm10 = vcmp.ge.f32.partialorder %v200_v42, 0.0  ;;  %v276_v46 = vmul.f32 0.2, %v200_v42  ;;  %v387_v50 = vpop.f32.mrb[4].mxu0 }
  0xfa   :  { %vm268_vm11 = vcmp.ge.f32.partialorder %v232_v43, 0.0  ;;  %v284_v47 = vmul.f32 0.2, %v232_v43  ;;  %v294_v48 = vsel %vm262_vm8, %v208_v36, %v278_v44  ;;  %v395_v51 = vpop.f32.mrb[4].mxu1  ;;  %v221_v54 = vadd.f32 %v387_v50, %v504_v19  ;;  %v212_v56 = vpop.f32.mrb[5].mxu0 }
  0xfb   :  { %v302_v49 = vsel %vm270_vm9, %v240_v37, %v286_v45  ;;  %311 = vst.msk [vmem:[%s589_s3 + $0x18] sm:$0xff] %vm307_vm3, %v294_v48  ;;  %v292_v52 = vsel %vm260_vm10, %v200_v42, %v276_v46  ;;  %v253_v55 = vadd.f32 %v395_v51, %v504_v19  ;;  %v244_v57 = vpop.f32.mrb[5].mxu1  ;;  %v213_v58 = vadd.f32 %v504_v19, %v212_v56  ;;  %v388_v60 = vpop.f32.mrb[6].mxu0 }
  0xfc   :  { %319 = vst.msk [vmem:[%s589_s3 + $0x58] sm:$0xff] %vm307_vm3, %v302_v49  ;;  %v300_v53 = vsel %vm268_vm11, %v232_v43, %v284_v47  ;;  %309 = vst.msk [vmem:[%s589_s3 + $0x8] sm:$0xff] %vm307_vm3, %v292_v52  ;;  %v245_v59 = vadd.f32 %v504_v19, %v244_v57  ;;  %v396_v61 = vpop.f32.mrb[6].mxu1  ;;  %vm265_vm12 = vcmp.ge.f32.partialorder %v221_v54, 0.0  ;;  %v281_v62 = vmul.f32 0.2, %v221_v54 }
  0xfd   :  { %317 = vst.msk [vmem:[%s589_s3 + $0x48] sm:$0xff] %vm307_vm3, %v300_v53  ;;  %vm273_vm13 = vcmp.ge.f32.partialorder %v253_v55, 0.0  ;;  %v289_v63 = vmul.f32 0.2, %v253_v55  ;;  %vm263_vm14 = vcmp.ge.f32.partialorder %v213_v58, 0.0  ;;  %v224_v4 = vadd.f32 %v388_v60, %v504_v19  ;;  %v215_v6 = vpop.f32.mrb[7].mxu0 }
  0xfe   :  { %v279_v0 = vmul.f32 0.2, %v213_v58  ;;  %vm271_vm15 = vcmp.ge.f32.partialorder %v245_v59, 0.0  ;;  %v287_v1 = vmul.f32 0.2, %v245_v59  ;;  %v297_v2 = vsel %vm265_vm12, %v221_v54, %v281_v62  ;;  %v247_v7 = vpop.f32.mrb[7].mxu1 }
  0xff   :  { %v305_v3 = vsel %vm273_vm13, %v253_v55, %v289_v63  ;;  %v256_v5 = vadd.f32 %v396_v61, %v504_v19  ;;  %314 = vst.msk [vmem:[%s589_s3 + $0x30] sm:$0xff] %vm307_vm3, %v297_v2  ;;  %v216_v10 = vadd.f32 %v504_v19, %v215_v6  ;;  %v248_v11 = vadd.f32 %v504_v19, %v247_v7 }
 0x100   :  { %322 = vst.msk [vmem:[%s589_s3 + $0x70] sm:$0xff] %vm307_vm3, %v305_v3  ;;  %v295_v8 = vsel %vm263_vm14, %v213_v58, %v279_v0  ;;  %v303_v9 = vsel %vm271_vm15, %v245_v59, %v287_v1  ;;  %vm266_vm0 = vcmp.ge.f32.partialorder %v224_v4, 0.0  ;;  %v282_v12 = vmul.f32 0.2, %v224_v4 }
 0x101   :  { %312 = vst.msk [vmem:[%s589_s3 + $0x20] sm:$0xff] %vm307_vm3, %v295_v8  ;;  %320 = vst.msk [vmem:[%s589_s3 + $0x60] sm:$0xff] %vm307_vm3, %v303_v9  ;;  %vm274_vm1 = vcmp.ge.f32.partialorder %v256_v5, 0.0  ;;  %v290_v13 = vmul.f32 0.2, %v256_v5  ;;  %vm264_vm2 = vcmp.ge.f32.partialorder %v216_v10, 0.0 }
 0x102   :  { %v280_v14 = vmul.f32 0.2, %v216_v10  ;;  %vm272_vm4 = vcmp.ge.f32.partialorder %v248_v11, 0.0  ;;  %v288_v15 = vmul.f32 0.2, %v248_v11  ;;  %v298_v16 = vsel %vm266_vm0, %v224_v4, %v282_v12 }
 0x103   :  { %v306_v17 = vsel %vm274_vm1, %v256_v5, %v290_v13  ;;  %315 = vst.msk [vmem:[%s589_s3 + $0x38] sm:$0xff] %vm307_vm3, %v298_v16 }
 0x104   :  { %323 = vst.msk [vmem:[%s589_s3 + $0x78] sm:$0xff] %vm307_vm3, %v306_v17  ;;  %v296_v18 = vsel %vm264_vm2, %v216_v10, %v280_v14  ;;  %v304_v19 = vsel %vm272_vm4, %v248_v11, %v288_v15 }
 0x105   :  { %313 = vst.msk [vmem:[%s589_s3 + $0x28] sm:$0xff] %vm307_vm3, %v296_v18  ;;  %321 = vst.msk [vmem:[%s589_s3 + $0x68] sm:$0xff] %vm307_vm3, %v304_v19 }

// kernel: _ifblock_forward.5
= control target key start
LH: loop header
LB: loop body
LE: loop exit
PB: predicated region body
PF: predicated region fallthrough
CT: control target
= control target key end

     0   :  { %v243_v0 = vmov 0   ;;  %vm116_vm0 = vcmask 130048   ;;  %vm184_vm1 = vcmask 261120   ;;  %s322_s1 = inlined_call_operand.vmem [shape: bf16[144,32], index: 1, kind: input, shape index: {}]   ;;  %s323_s0 = inlined_call_operand.vmem [shape: bf16[32,144], index: 0, kind: input, shape index: {}]   ;;  %s324_s2 = inlined_call_operand.vmem [shape: f32[1,32], index: 2, kind: input, shape index: {}]   ;;  %s325_s3 = inlined_call_operand.vmem [shape: f32[32,32], index: 3, kind: output, shape index: {}]  }
   0x1   :  { %123 = vmatprep.subr.bf16.mxu0 %v243_v0  ;;  %209 = vmatprep.subr.bf16.mxu1 %v243_v0  ;;  %v228_v1 = vld [vmem:[%s322_s1] sm:$0xff]   ;;  %v229_v2 = vld [vmem:[%s322_s1 + $0x8] sm:$0xff]   ;;  %v230_v3 = vld [vmem:[%s322_s1 + $0x10] sm:$0xff]  }
   0x2   :  { %124 = vmatpush1.bf16.msra.mxu0 %v228_v1  ;;  %218 = vmatpush1.bf16.msra.mxu1 %v228_v1  ;;  %v231_v4 = vld [vmem:[%s322_s1 + $0x18] sm:$0xff]   ;;  %v239_v5 = vld [vmem:[%s323_s0 + $0x4] ss:$8 sps:$4 sm:$0xff]   ;;  %v234_v9 = vld [vmem:[%s322_s1 + $0x30] sm:$0xff]  }
   0x3   :  { %125 = vmatprep.subr.bf16.mxu0 %v243_v0  ;;  %210 = vmatprep.subr.bf16.mxu1 %v243_v0  ;;  %v242_v6 = vld [vmem:[%s323_s0 + $0x14] ss:$8 sps:$4 sm:$0xff]   ;;  %v232_v7 = vld [vmem:[%s322_s1 + $0x20] sm:$0xff]   ;;  %v233_v8 = vld [vmem:[%s322_s1 + $0x28] sm:$0xff]  }
   0x4   :  { %207 = vmatprep.mubr.msk.bf16.mxu0 %vm116_vm0, %v239_v5  ;;  %208 = vmatprep.mubr.msk.bf16.mxu1 %vm116_vm0, %v242_v6  ;;  %v235_v10 = vld [vmem:[%s322_s1 + $0x38] sm:$0xff]   ;;  %v236_v11 = vld [vmem:[%s322_s1 + $0x40] sm:$0xff]  }
   0x5   :  { %v237_v12 = vld [vmem:[%s323_s0] ss:$8 sps:$4 sm:$0xff]   ;;  %v240_v13 = vld [vmem:[%s323_s0 + $0x10] ss:$8 sps:$4 sm:$0xff]  }
   0x6   :  { %126 = vmatpush1.bf16.msra.mxu0 %v229_v2  ;;  %219 = vmatpush1.bf16.msra.mxu1 %v229_v2  ;;  %v193_v14 = vld [vmem:[%s324_s2] ss:$0 sm:$0xff] }
   0x7   :  { %127 = vmatprep.subr.bf16.mxu0 %v243_v0  ;;  %211 = vmatprep.subr.bf16.mxu1 %v243_v0 }
   0xa   :  { %128 = vmatpush1.bf16.msra.mxu0 %v230_v3  ;;  %220 = vmatpush1.bf16.msra.mxu1 %v230_v3 }
   0xb   :  { %129 = vmatprep.subr.bf16.mxu0 %v243_v0  ;;  %212 = vmatprep.subr.bf16.mxu1 %v243_v0 }
   0xe   :  { %130 = vmatpush1.bf16.msra.mxu0 %v231_v4  ;;  %221 = vmatpush1.bf16.msra.mxu1 %v231_v4 }
   0xf   :  { %131 = vmatprep.subr.bf16.mxu0 %v243_v0  ;;  %213 = vmatprep.subr.bf16.mxu1 %v243_v0 }
  0x12   :  { %132 = vmatpush1.bf16.msra.mxu0 %v232_v7  ;;  %222 = vmatpush1.bf16.msra.mxu1 %v232_v7 }
  0x13   :  { %133 = vmatprep.subr.bf16.mxu0 %v243_v0  ;;  %214 = vmatprep.subr.bf16.mxu1 %v243_v0 }
  0x16   :  { %134 = vmatpush1.bf16.msra.mxu0 %v233_v8  ;;  %223 = vmatpush1.bf16.msra.mxu1 %v233_v8 }
  0x17   :  { %135 = vmatprep.subr.bf16.mxu0 %v243_v0  ;;  %215 = vmatprep.subr.bf16.mxu1 %v243_v0 }
  0x1a   :  { %136 = vmatpush1.bf16.msra.mxu0 %v234_v9  ;;  %224 = vmatpush1.bf16.msra.mxu1 %v234_v9 }
  0x1b   :  { %137 = vmatprep.subr.bf16.mxu0 %v243_v0  ;;  %216 = vmatprep.subr.bf16.mxu1 %v243_v0 }
  0x1e   :  { %138 = vmatpush1.bf16.msra.mxu0 %v235_v10  ;;  %225 = vmatpush1.bf16.msra.mxu1 %v235_v10 }
  0x1f   :  { %139 = vmatprep.subr.bf16.mxu0 %v243_v0  ;;  %217 = vmatprep.subr.bf16.mxu1 %v243_v0 }
  0x22   :  { %140 = vmatpush1.bf16.msra.mxu0 %v236_v11  ;;  %226 = vmatpush1.bf16.msra.mxu1 %v236_v11 }
  0x25   :  { %156 = vmatmul.mubr.bf16.vlgmr.msra.gmra.mrb[0].mxu0 %v237_v12  ;;  %164 = vmatmul.mubr.bf16.vlgmr.msra.gmra.mrb[0].mxu1 %v240_v13 }
  0xf8   :  { %v157_v15 = vpop.f32.mrb[0].mxu0  ;;  %v165_v16 = vpop.f32.mrb[0].mxu1 }
  0xf9   :  { %v158_v17 = vadd.f32 %v193_v14, %v157_v15  ;;  %v166_v18 = vadd.f32 %v193_v14, %v165_v16  ;;  %v159_v19 = vpop.f32.mrb[1].mxu0  ;;  %v167_v20 = vpop.f32.mrb[1].mxu1 }
  0xfa   :  { %v160_v21 = vpop.f32.mrb[2].mxu0  ;;  %v168_v22 = vpop.f32.mrb[2].mxu1 }
  0xfb   :  { %vm172_vm2 = vcmp.ge.f32.partialorder %v158_v17, 0.0  ;;  %v176_v23 = vmul.f32 0.2, %v158_v17  ;;  %vm174_vm3 = vcmp.ge.f32.partialorder %v166_v18, 0.0  ;;  %v178_v24 = vmul.f32 0.2, %v166_v18 }
  0xfc   :  { %v161_v25 = vadd.f32 %v193_v14, %v160_v21  ;;  %v169_v26 = vadd.f32 %v193_v14, %v168_v22  ;;  %v162_v27 = vpop.f32.mrb[3].mxu0  ;;  %v170_v28 = vpop.f32.mrb[3].mxu1 }
  0xfd   :  { %v180_v29 = vsel %vm172_vm2, %v158_v17, %v176_v23  ;;  %v182_v30 = vsel %vm174_vm3, %v166_v18, %v178_v24 }
  0xfe   :  { %185 = vst.msk [vmem:[%s325_s3] sm:$0xff] %vm184_vm1, %v180_v29  ;;  %187 = vst.msk [vmem:[%s325_s3 + $0x10] sm:$0xff] %vm184_vm1, %v182_v30  ;;  %vm173_vm4 = vcmp.ge.f32.partialorder %v161_v25, 0.0  ;;  %v177_v31 = vmul.f32 0.2, %v161_v25  ;;  %vm175_vm5 = vcmp.ge.f32.partialorder %v169_v26, 0.0 }
  0xff   :  { %v179_v32 = vmul.f32 0.2, %v169_v26 }
 0x100   :  { %v181_v33 = vsel %vm173_vm4, %v161_v25, %v177_v31 }
 0x101   :  { %v183_v34 = vsel %vm175_vm5, %v169_v26, %v179_v32  ;;  %186 = vst.msk [vmem:[%s325_s3 + $0x8] sm:$0xff] %vm184_vm1, %v181_v33 }
 0x102   :  { %188 = vst.msk [vmem:[%s325_s3 + $0x18] sm:$0xff] %vm184_vm1, %v183_v34 }

// kernel: _ifblock_forward.7
= control target key start
LH: loop header
LB: loop body
LE: loop exit
PB: predicated region body
PF: predicated region fallthrough
CT: control target
= control target key end

     0   :  { %vm204_vm0 = vcmask 261120   ;;  %vm309_vm1 = vcmask 785408   ;;  %s522_s1 = inlined_call_operand.vmem [shape: bf16[288,96], index: 1, kind: input, shape index: {}]   ;;  %s523_s0 = inlined_call_operand.vmem [shape: bf16[32,288], index: 0, kind: input, shape index: {}]   ;;  %s524_s2 = inlined_call_operand.vmem [shape: f32[1,96], index: 2, kind: input, shape index: {}]   ;;  %s525_s3 = inlined_call_operand.vmem [shape: f32[32,96], index: 3, kind: output, shape index: {}]  }
   0x1   :  { %v385_v0 = vld [vmem:[%s522_s1 + $0x40] sm:$0xff]   ;;  %v387_v2 = vld [vmem:[%s522_s1 + $0x48] sm:$0xff]   ;;  %v389_v4 = vld [vmem:[%s522_s1 + $0x50] sm:$0xff]  }
   0x2   :  { %v386_v1 = vld [vmem:[%s522_s1] sm:$0xff]   ;;  %345 = vmatprep.subr.bf16.mxu0 %v385_v0  ;;  %v388_v3 = vld [vmem:[%s522_s1 + $0x8] sm:$0xff]   ;;  %v390_v5 = vld [vmem:[%s522_s1 + $0x10] sm:$0xff]  }
   0x3   :  { %346 = vmatpush3.bf16.msra.mxu0 %v386_v1  ;;  %v391_v6 = vld [vmem:[%s522_s1 + $0x58] sm:$0xff]   ;;  %v393_v8 = vld [vmem:[%s522_s1 + $0x60] sm:$0xff]   ;;  %v395_v11 = vld [vmem:[%s522_s1 + $0x68] sm:$0xff]  }
   0x4   :  { %347 = vmatprep.subr.bf16.mxu0 %v387_v2  ;;  %v392_v7 = vld [vmem:[%s522_s1 + $0x18] sm:$0xff]   ;;  %v394_v9 = vld [vmem:[%s522_s1 + $0x20] sm:$0xff]   ;;  %v396_v12 = vld [vmem:[%s522_s1 + $0x28] sm:$0xff]  }
   0x5   :  { %v400_v10 = vld [vmem:[%s522_s1 + $0x80] sm:$0xff]   ;;  %v397_v13 = vld [vmem:[%s522_s1 + $0x70] sm:$0xff]   ;;  %v405_v15 = vld [vmem:[%s522_s1 + $0x88] sm:$0xff]  }
   0x6   :  { %377 = vmatprep.subr.bf16.mxu1 %v400_v10  ;;  %v404_v14 = vld [vmem:[%s523_s0 + $0x4] ss:$12 sps:$4 sm:$0xff]   ;;  %v406_v16 = vld [vmem:[%s523_s0 + $0x8] ss:$12 sps:$4 sm:$0xff]   ;;  %v407_v17 = vld [vmem:[%s523_s0 + $0x20] ss:$12 sps:$4 sm:$0xff]  }
   0x7   :  { %348 = vmatpush3.bf16.msra.mxu0 %v388_v3  ;;  %378 = vmatpush3.bf16.msra.mxu1 %v400_v10  ;;  %v398_v18 = vld [vmem:[%s522_s1 + $0x30] sm:$0xff]   ;;  %v399_v19 = vld [vmem:[%s522_s1 + $0x78] sm:$0xff]   ;;  %v402_v21 = vld [vmem:[%s523_s0] ss:$12 sps:$4 sm:$0xff]  }
   0x8   :  { %349 = vmatprep.subr.bf16.mxu0 %v389_v4  ;;  %243 = vmatprep.mubr.bf16.mxu0 %v404_v14  ;;  %v401_v20 = vld [vmem:[%s522_s1 + $0x38] sm:$0xff]   ;;  %v318_v30 = vld [vmem:[%s524_s2] ss:$0 sm:$0xff] }
   0x9   :  { %379 = vmatprep.subr.bf16.mxu1 %v405_v15  ;;  %381 = vmatprep.mubr.msk.bf16.mxu1 %vm204_vm0, %v406_v16  ;;  %v408_v22 = vld [vmem:[%s523_s0 + $0x1c] ss:$12 sps:$4 sm:$0xff]   ;;  %v410_v23 = vld [vmem:[%s523_s0 + $0x18] ss:$12 sps:$4 sm:$0xff]  }
   0xb   :  { %350 = vmatpush3.bf16.msra.mxu0 %v390_v5  ;;  %380 = vmatpush3.bf16.msra.mxu1 %v405_v15 }
   0xc   :  { %351 = vmatprep.subr.bf16.mxu0 %v391_v6 }
   0xe   :  { %382 = vmatmul.mubr.msk.bf16.vlgmr.msra.gmra.mrb[0].mxu1 %vm204_vm0, %v407_v17 }
   0xf   :  { %352 = vmatpush3.bf16.msra.mxu0 %v392_v7 }
  0x10   :  { %353 = vmatprep.subr.bf16.mxu0 %v393_v8 }
  0x13   :  { %354 = vmatpush3.bf16.msra.mxu0 %v394_v9 }
  0x14   :  { %355 = vmatprep.subr.bf16.mxu0 %v395_v11 }
  0x17   :  { %356 = vmatpush3.bf16.msra.mxu0 %v396_v12 }
  0x18   :  { %357 = vmatprep.subr.bf16.mxu0 %v397_v13 }
  0x1b   :  { %358 = vmatpush3.bf16.msra.mxu0 %v398_v18 }
  0x1c   :  { %359 = vmatprep.subr.bf16.mxu0 %v399_v19 }
  0x1f   :  { %360 = vmatpush3.bf16.msra.mxu0 %v401_v20 }
  0x22   :  { %244 = vmatmul.mubr.bf16.vlgmr.msra.gmra.mrb[0].mxu0 %v402_v21 }
  0x23   :  { %251 = vmatprep.mubr.bf16.mxu0 %v408_v22 }
  0x2a   :  { %252 = vmatmul.mubr.bf16.gmra.mrb[4].mxu0 %v410_v23 }
  0xe1   :  { %v383_v24 = vpop.f32.mrb[0].mxu1 }
  0xe2   :  { %v294_v25 = vpop.f32.mrb[1].mxu1 }
  0xe3   :  { %v384_v26 = vpop.f32.mrb[2].mxu1 }
  0xe4   :  { %v297_v27 = vpop.f32.mrb[3].mxu1 }
  0xf5   :  { %v361_v28 = vpop.f32.mrb[0].mxu0 }
  0xf6   :  { %v362_v29 = vpop.f32.mrb[1].mxu0 }
  0xf7   :  { %v363_v31 = vadd.f32 %v362_v29, %v361_v28  ;;  %v364_v32 = vpop.f32.mrb[2].mxu0 }
  0xf8   :  { %v365_v33 = vpop.f32.mrb[3].mxu0 }
  0xf9   :  { %v366_v34 = vadd.f32 %v365_v33, %v364_v32  ;;  %v246_v35 = vadd.f32 %v363_v31, %v318_v30 }
  0xfb   :  { %v295_v36 = vadd.f32 %v294_v25, %v246_v35  ;;  %v249_v37 = vadd.f32 %v366_v34, %v318_v30 }
  0xfd   :  { %310 = vst.msk [vmem:[%s525_s3] sm:$0xff] %vm309_vm1, %v295_v36  ;;  %v298_v38 = vadd.f32 %v297_v27, %v249_v37  ;;  %v367_v39 = vpop.f32.mrb[4].mxu0 }
  0xfe   :  { %v368_v40 = vpop.f32.mrb[5].mxu0 }
  0xff   :  { %311 = vst.msk [vmem:[%s525_s3 + $0x8] sm:$0xff] %vm309_vm1, %v298_v38  ;;  %v369_v41 = vadd.f32 %v368_v40, %v367_v39  ;;  %v370_v42 = vpop.f32.mrb[6].mxu0 }
 0x100   :  { %v371_v43 = vpop.f32.mrb[7].mxu0 }
 0x101   :  { %v254_v44 = vadd.f32 %v369_v41, %v318_v30  ;;  %v372_v45 = vadd.f32 %v371_v43, %v370_v42 }
 0x103   :  { %v303_v46 = vadd.f32 %v383_v24, %v254_v44  ;;  %v257_v47 = vadd.f32 %v372_v45, %v318_v30 }
 0x105   :  { %312 = vst.msk [vmem:[%s525_s3 + $0x10] sm:$0xff] %vm309_vm1, %v303_v46  ;;  %v306_v48 = vadd.f32 %v384_v26, %v257_v47 }
 0x107   :  { %313 = vst.msk [vmem:[%s525_s3 + $0x18] sm:$0xff] %vm309_vm1, %v306_v48 }

// kernel: _ifblock_forward.6
= control target key start
LH: loop header
LB: loop body
LE: loop exit
PB: predicated region body
PF: predicated region fallthrough
CT: control target
= control target key end

     0   :  { %s9051_s18 = smov 0   ;;  %s10356_s0 = inlined_call_operand.vmem [shape: bf16[2,16,32], index: 0, kind: input, shape index: {}]   ;;  %s10357_s1 = inlined_call_operand.vmem [shape: bf16[72,32,32], index: 1, kind: input, shape index: {}]   ;;  %s10358_s2 = inlined_call_operand.vmem [shape: f32[8,1,32], index: 2, kind: input, shape index: {}]   ;;  %s10359_s3 = inlined_call_operand.vmem [shape: f32[8,1,32], index: 3, kind: input, shape index: {}]   ;;  %s10360_s4 = inlined_call_operand.vmem [shape: bf16[2,16,1], index: 4, kind: input, shape index: {}]   ;;  %s10361_s5 = inlined_call_operand.vmem [shape: f32[2,16,32], index: 5, kind: output, shape index: {}]  }
   0x1 LB: > { %s7306_s19 = sadd.s32 4294967295, %s9015_s18   ;;  %p7310_p0 = scmp.ge.s32.totalorder %s9015_s18, 1  ;;  %s9015_s18 = sphi %s9051_s18, %s15_s18  }
   0x2   : > { %p187_p1 = scmp.lt.s32.totalorder %s9015_s18, 3 }
   0x4   : > { %p188_p2 = pnand %p7310_p0, %p187_p1 }
   0x5   : > { %p215_p3 = scmp.lt.s32.totalorder (!%p188_p2), %s7306_s19, 1  ;;  %vm226_vm0 = vcmask (!%p188_p2), 257024   ;;  %v240_v0 = vld [vmem:[%s10360_s4] sm:$0xf] (!%p188_p2)  ;;  %v9017_v1 = vmov (!%p188_p2), 0   ;;  %vm230_vm1 = vcmask (!%p188_p2), 256000   ;;  %v256_v23 = vlaneseq (!%p188_p2) }
   0x6   : > { %191 = sbr.rel (%p188_p2) target bundleno = 2823 (0xb07), region = 40  ;;  %8823 = vset.pattern.permute.xlu0 (!%p188_p2), %v9017_v1  ;;  %227 = vst.msk [vmem:[#allocation2] sm:$0xf] (!%p188_p2), %vm226_vm0, %v9017_v1  ;;  %228 = vst.msk [vmem:[#allocation2 + $0x4] sm:$0xf] (!%p188_p2), %vm226_vm0, %v9017_v1  ;;  %8824 = vset.pattern.permute.xlu1 (!%p188_p2), %v9017_v1  ;;  %v8825_v9 = vld [vmem:[%s10357_s1 + $0x10] sm:$0xff] (!%p188_p2)  }
   0x7   : > { %229 = vst.msk [vmem:[#allocation2 + $0x8] sm:$0xf] (!%p188_p2), %vm226_vm0, %v9017_v1  ;;  %v241_v2 = vld [vmem:[%s10360_s4 + $0x4] sm:$0xf] (!%p188_p2)  ;;  %v7315_v3 = vld [vmem:[%s10360_s4 + $0x8] sm:$0xf] (!%p188_p2)  ;;  %250 = vperm.xlu0 (!%p188_p2), %8823, %v240_v0  }
   0x8   : > { %476 = vperm.xlu1 (!%p188_p2), %8824, %v7315_v3   ;;  %v7316_v4 = vld [vmem:[%s10360_s4 + $0xc] sm:$0xf] (!%p188_p2)  ;;  %vm231_vm2 = vsmask.f32 (!%p188_p2), 2304  ;;  %v9018_v10 = vmov (!%p188_p2), 0.0   ;;  %v8826_v11 = vld [vmem:[%s10357_s1 + $0x18] sm:$0xff] (!%p188_p2)  }
   0x9   : > { %v233_v7 = vld [vmem:[#allocation2 + $0xc] sm:$0x7] (!%p188_p2)  ;;  %vm232_vm3 = vmand (!%p188_p2), %vm230_vm1, %vm231_vm2  ;;  %8243 = vmatprep.subr.bf16.mxu1 (!%p188_p2), %v9018_v10  ;;  %8235 = vmatprep.subr.bf16.mxu0 (!%p188_p2), %v9018_v10  ;;  %vm405_vm4 = vcmask (!%p188_p2), 1045504   ;;  %v8829_v15 = vld [vmem:[%s10357_s1] sm:$0xff] (!%p188_p2)   ;;  %vm9019_vm5 = vmmov (!%p188_p2), 0   ;;  %vm342_vm6 = vcmask (!%p188_p2), 261120  }
   0xa   : > { %v234_v8 = vsel (!%p188_p2), %vm232_vm3, 0, %v233_v7  ;;  %8244 = vmatpush3.bf16.msra.mxu1 (!%p188_p2), %v8825_v9  ;;  %8247 = vmatprep.mubr.msk.bf16.mxu1 (!%p188_p2), %vm9019_vm5, %v9018_v10  ;;  %v8830_v17 = vld [vmem:[%s10357_s1 + $0x30] sm:$0xff] (!%p188_p2)   ;;  %v8831_v18 = vld [vmem:[%s10357_s1 + $0x8] sm:$0xff] (!%p188_p2)   ;;  %v8832_v20 = vld [vmem:[%s10357_s1 + $0x38] sm:$0xff] (!%p188_p2)   ;;  %v9020_v21 = vmov (!%p188_p2), 839922192  }
   0xb   : > { %262 = vperm.xlu0 (!%p188_p2), %8823, %v241_v2   ;;  %235 = vst [vmem:[#allocation2 + $0xc] sm:$0x7] (!%p188_p2), %v234_v8  ;;  %8245 = vmatprep.subr.bf16.mxu1 (!%p188_p2), %v9018_v10  ;;  %v254_v22 = vunpack.c.l.s4 (!%p188_p2), %v9020_v21  ;;  %v257_v25 = vshrl.u32 (!%p188_p2), %v256_v23, 7  ;;  %vm621_vm7 = vsmask.f32 (!%p188_p2), 3328 }
   0xc   : > { %488 = vperm.xlu1 (!%p188_p2), %8824, %v7316_v4   ;;  %8236 = vmatpush3.bf16.msra.mxu0 (!%p188_p2), %v8829_v15  ;;  %vm622_vm8 = vsmask.f32 (!%p188_p2), 7440  ;;  %vm272_vm9 = vsmask.f32 (!%p188_p2), 1280  ;;  %vm273_vm10 = vsmask.f32 (!%p188_p2), 5392 }
   0xd   : > { %s10369_s19 = smov (!%p215_p3, %s7306_s19), 1  ;;  %8239 = vmatprep.mubr.msk.bf16.mxu0 %vm9019_vm5, %v9018_v10  ;;  %8237 = vmatprep.subr.bf16.mxu0 %v9018_v10  ;;  %v255_v24 = vunpack.c.0.s8 %v254_v22  ;;  %vm809_vm11 = vsmask.f32 256  ;;  %v9117_v31 = vld [vmem:[#allocation2] sm:$0x8]  ;;  %vm9133_vm14 = vmor %vm621_vm7, %vm622_vm8 }
   0xe   : > { %s8001_s28 = sshll.u32 %s10369_s19, 3  ;;  %8246 = vmatpush3.bf16.msra.mxu1 %v8826_v11  ;;  %vm498_vm12 = vsmask.f32 6416  ;;  %vm810_vm13 = vsmask.f32 4368  ;;  %vm9139_vm15 = vmor %vm272_vm9, %vm273_vm10  ;;  %s8002_s30 = sshll.u32 %s10369_s19, 4 }
   0xf   : > { %s219_s6 = scalar_lea.vmem %s10356_s0, %s8001_s28  ;;  %8259 = vmatprep.subr.bf16.mxu1 %v9018_v10  ;;  %v258_v26 = vsub.s32 %v255_v24, %v257_v25  ;;  %v245_v49 = vld [vmem:[#allocation2] sm:$0xe]  ;;  %vm9146_vm1 = vmor %vm809_vm11, %vm810_vm13  ;;  %vm312_vm7 = vsmask.f32 6400  ;;  %vm652_vm8 = vsmask.f32 4352  ;;  %s224_s8 = scalar_lea.vmem %s10361_s5, %s8002_s30 }
  0x10   : > { %v236_v5 = vld [vmem:[%s219_s6] sm:$0xf]  ;;  %v237_v6 = vld [vmem:[%s219_s6 + $0x4] sm:$0xf]  ;;  %8238 = vmatpush3.bf16.msra.mxu0 %v8831_v18  ;;  %vm499_vm3 = vmor %vm231_vm2, %vm498_vm12  ;;  %vm538_vm2 = vsmask.f32 5376 }
  0x11   : > { %238 = vst.msk [vmem:[#allocation2 + $0x4] sm:$0xf] %vm226_vm0, %v236_v5  ;;  %239 = vst.msk [vmem:[#allocation2 + $0x8] sm:$0xf] %vm226_vm0, %v237_v6  ;;  %8251 = vmatprep.subr.bf16.mxu0 %v9018_v10  ;;  %v471_v61 = vld [vmem:[#allocation2] sm:$0xc] }
  0x12   : > { %vm838_vm9 = vsmask.f32 7424 }
  0x18   : > { %v8827_v12 = vld [vmem:[#allocation2] sm:$0xfc]   ;;  %v8828_v13 = vld [vmem:[#allocation2 + $0x8] ss:$0 sps:$4 sm:$0x33]  }
  0x19   : > { %v406_v14 = vrot.slane %v8827_v12, 2  ;;  %v407_v16 = vrot.slane %v8828_v13, 2  ;;  %v619_v55 = vld [vmem:[#allocation2 + $0x4] sm:$0xf]  ;;  %v247_v9 = vld [vmem:[#allocation2 + $0x8] sm:$0x3] }
  0x1a   : > { %v246_v3 = vld [vmem:[#allocation2 + $0x4] sm:$0xf]  ;;  %v620_v11 = vld [vmem:[#allocation2 + $0x8] sm:$0xf] }
  0x1b   : > { %v408_v19 = vsel %vm405_vm4, %v406_v14, %v407_v16  ;;  %v806_v12 = vld [vmem:[#allocation2 + $0x4] sm:$0xf] }
  0x1c   : > { %8248 = vmatmul.mubr.msk.bf16.vlgmr.msra.gmra.mrb[0].mxu1 %vm342_vm6, %v408_v19  ;;  %v472_v22 = vld [vmem:[#allocation2 + $0x4] sm:$0xf] }
  0x1d   : > { %8260 = vmatpush3.bf16.msra.mxu1 %v8830_v17  ;;  %8263 = vmatprep.mubr.msk.bf16.mxu1 %vm9019_vm5, %v9018_v10  ;;  %v807_v17 = vld [vmem:[#allocation2 + $0x8] sm:$0xf] }
  0x1e   : > { %8261 = vmatprep.subr.bf16.mxu1 %v9018_v10 }
  0x21   : > { %8262 = vmatpush3.bf16.msra.mxu1 %v8832_v20 }
  0x22   : > { %8275 = vmatprep.subr.bf16.mxu1 %v9018_v10 }
  0x86   : > { %v251_v27 = vpop.permute.xlu0 %250 }
  0x87   : > { %v477_v28 = vpop.permute.xlu1 %476  ;;  %v259_v29 = vrot.slane %v251_v27, %v258_v26 }
  0x88   : > { %v485_v30 = vrot.slane %v477_v28, %v258_v26 }
  0x89   : > { %v276_v32 = vshrl.u32 %v259_v29, 16  ;;  %v279_v33 = vshll.u32 %v259_v29, 16 }
  0x8a   : > { %v501_v34 = vshrl.u32 %v485_v30, 16  ;;  %v504_v35 = vshll.u32 %v485_v30, 16  ;;  %v263_v36 = vpop.permute.xlu0 %262 }
  0x8b   : > { %v489_v37 = vpop.permute.xlu1 %488  ;;  %v278_v38 = vrot.slane %v276_v32, 6  ;;  %v281_v39 = vrot.slane %v279_v33, 7  ;;  %v9119_v40 = vrot.slane %v279_v33, 5  ;;  %v625_v41 = vrot.slane %v276_v32, 4  ;;  %v473_v33 = vld [vmem:[#allocation2 + $0x8] sm:$0x7] }
  0x8c   : > { %v271_v42 = vrot.slane %v263_v36, %v258_v26  ;;  %v503_v43 = vrot.slane %v501_v34, 5  ;;  %v506_v44 = vrot.slane %v504_v35, 6  ;;  %v812_v45 = vrot.slane %v501_v34, 7 }
  0x8d   : > { %v9121_v46 = vor.u32 %v281_v39, %v278_v38  ;;  %v626_v47 = vor.u32 %v625_v41, %v9119_v40  ;;  %v497_v48 = vrot.slane %v489_v37, %v258_v26  ;;  %v636_v50 = vmul.bf16 %v9119_v40, %v9117_v31 }
  0x8e   : > { %v285_v51 = vshrl.u32 %v271_v42, 16  ;;  %v288_v52 = vshll.u32 %v271_v42, 16  ;;  %v9126_v53 = vor.u32 %v506_v44, %v503_v43  ;;  %v9128_v54 = vor.u32 %v812_v45, %v504_v35 }
  0x8f   : > { %v627_v56 = vrot.slane %v626_v47, 4  ;;  %v283_v57 = vrot.slane %v9121_v46, 4  ;;  %v814_v59 = vrot.slane %v812_v45, 4  ;;  %v510_v60 = vshrl.u32 %v497_v48, 16 }
  0x90   : > { %v287_v63 = vrot.slane %v285_v51, 6  ;;  %v290_v0 = vrot.slane %v288_v52, 7  ;;  %v628_v1 = vrot.slane %v288_v52, 5  ;;  %v630_v2 = vrot.slane %v285_v51, 4 }
  0x91   : > { %v508_v4 = vrot.slane %v9126_v53, 4  ;;  %v512_v6 = vrot.slane %v510_v60, 5  ;;  %v513_v7 = vshll.u32 %v497_v48, 16  ;;  %v815_v8 = vrot.slane %v510_v60, 7  ;;  %v808_v60 = vld [vmem:[#allocation2 + $0xc] sm:$0x1] }
  0x92   : > { %v291_v13 = vor.u32 %v290_v0, %v287_v63  ;;  %v9152_v14 = vsel %vm9133_vm14, %v627_v56, %v628_v1  ;;  %v631_v15 = vor.u32 %v630_v2, %v628_v1  ;;  %v297_v16 = vmul.bf16 %v9121_v46, %v245_v49 }
  0x93   : > { %v515_v18 = vrot.slane %v513_v7, 6  ;;  %v816_v19 = vor.u32 %v815_v8, %v513_v7  ;;  %v9155_v20 = vrot.slane %v815_v8, 4  ;;  %v637_v21 = vmul.bf16 %v9152_v14, %v619_v55 }
  0x94   : > { %v9160_v23 = vsel %vm9139_vm15, %v283_v57, %v291_v13  ;;  %v9162_v24 = vrot.slane %v291_v13, 4  ;;  %v9164_v25 = vrot.slane %v631_v15, 4  ;;  %v522_v26 = vmul.bf16 %v9126_v53, %v471_v61 }
  0x95   : > { %v516_v27 = vor.u32 %v515_v18, %v512_v6  ;;  %v9171_v28 = vsel %vm9146_vm1, %v814_v59, %v816_v19  ;;  %v298_v29 = vmul.bf16 %v9160_v23, %v246_v3  ;;  %v7344_v30 = vcombine.low %v636_v50, %v637_v21  ;;  %v8833_v6 = vld [vmem:[%s10357_s1 + $0x20] sm:$0xff]  }
  0x96   : > { %v299_v31 = vmul.bf16 %v9162_v24, %v247_v9  ;;  %v638_v32 = vmul.bf16 %v9164_v25, %v620_v11  ;;  %v822_v34 = vmul.bf16 %v9128_v54, %v806_v12  ;;  %v823_v35 = vmul.bf16 %v9171_v28, %v807_v17  ;;  %v8834_v12 = vld [vmem:[%s10357_s1 + $0x50] sm:$0xff]  }
  0x97   : > { %v9178_v36 = vsel %vm499_vm3, %v508_v4, %v516_v27  ;;  %v9180_v37 = vrot.slane %v516_v27, 4  ;;  %v7317_v38 = vcombine.low %v297_v16, %v298_v29  ;;  %v654_v39 = vshrl.u32 %v7344_v30, 16 }
  0x98   : > { %v7318_v41 = vcombine.low %v299_v31, %v299_v31  ;;  %v7345_v42 = vcombine.low %v638_v32, %v638_v32  ;;  %v657_v43 = vshll.u32 %v7344_v30, 16  ;;  %v523_v44 = vmul.bf16 %v9178_v36, %v472_v22  ;;  %v914_v22 = vld [vmem:[#allocation2 + $0x8] sm:$0xf]  ;;  %v915_v31 = vld [vmem:[#allocation2 + $0xc] sm:$0x3] }
  0x99   : > { %v314_v45 = vshrl.u32 %v7317_v38, 16  ;;  %v317_v47 = vshll.u32 %v7317_v38, 16  ;;  %v656_v48 = vrot.slane %v654_v39, 3  ;;  %v524_v49 = vmul.bf16 %v9180_v37, %v473_v33  ;;  %v8835_v32 = vld [vmem:[%s10357_s1 + $0x28] sm:$0xff]  }
  0x9a   : > { %v322_v50 = vshrl.u32 %v7318_v41, 16  ;;  %v325_v51 = vshll.u32 %v7318_v41, 16  ;;  %v659_v52 = vrot.slane %v657_v43, 4  ;;  %v662_v55 = vshrl.u32 %v7345_v42, 16  ;;  %v913_v41 = vld [vmem:[#allocation2 + $0x4] sm:$0xe] }
  0x9b   : > { %v316_v56 = vrot.slane %v314_v45, 1  ;;  %v319_v57 = vrot.slane %v317_v47, 2  ;;  %v665_v58 = vshll.u32 %v7345_v42, 16  ;;  %v7335_v59 = vcombine.low %v522_v26, %v523_v44 }
  0x9c   : > { %v324_v61 = vrot.slane %v322_v50, 1  ;;  %v327_v62 = vrot.slane %v325_v51, 2  ;;  %v660_v63 = vor.u32 %v659_v52, %v656_v48  ;;  %v664_v0 = vrot.slane %v662_v55, 3  ;;  %v8837_v48 = vld [vmem:[%s10357_s1 + $0x40] sm:$0xff]  }
  0x9d   : > { %v320_v1 = vor.u32 %v319_v57, %v316_v56  ;;  %v667_v2 = vrot.slane %v665_v58, 4  ;;  %v7336_v3 = vcombine.low %v524_v49, %v524_v49  ;;  %v540_v4 = vshrl.u32 %v7335_v59, 16  ;;  %v8846_v50 = vld [vmem:[#allocation2 + $0x4] sm:$0xfc]  }
  0x9e   : > { %v328_v5 = vor.u32 %v327_v62, %v324_v61  ;;  %v543_v7 = vshll.u32 %v7335_v59, 16  ;;  %v824_v8 = vmul.bf16 %v9155_v20, %v808_v60  ;;  %v7361_v9 = vcombine.low %v822_v34, %v823_v35  ;;  %v8836_v35 = vld [vmem:[%s10357_s1 + $0x58] sm:$0xff]   ;;  %v1092_v52 = vld [vmem:[#allocation2 + $0x4] sm:$0xc]  ;;  %v1093_v58 = vld [vmem:[#allocation2 + $0x8] sm:$0xf] }
  0x9f   : > { %v668_v11 = vor.u32 %v667_v2, %v664_v0  ;;  %v542_v13 = vrot.slane %v540_v4, 2  ;;  %v548_v15 = vshrl.u32 %v7336_v3, 16  ;;  %v551_v16 = vshll.u32 %v7336_v3, 16  ;;  %v8847_v55 = vld [vmem:[#allocation2 + $0xc] ss:$0 sps:$4 sm:$0x33]  }
  0xa0   : > { %v329_v17 = vsel %vm312_vm7, %v320_v1, %v328_v5  ;;  %v545_v18 = vrot.slane %v543_v7, 3  ;;  %v7362_v19 = vcombine.low %v824_v8, %v824_v8  ;;  %v840_v21 = vshrl.u32 %v7361_v9, 16  ;;  %v1094_v59 = vld [vmem:[#allocation2 + $0xc] sm:$0x7]  ;;  %v8844_v60 = vld [vmem:[%s10357_s1 + $0x70] sm:$0xff]   ;;  %v8845_v7 = vld [vmem:[%s10357_s1 + $0x78] sm:$0xff]  }
  0xa1   : > { %8240 = vmatmul.mubr.msk.bf16.vlgmr.msra.gmra.mrb[0].mxu0 %vm342_vm6, %v329_v17  ;;  %v669_v26 = vsel %vm652_vm8, %v660_v63, %v668_v11  ;;  %v550_v27 = vrot.slane %v548_v15, 2  ;;  %v553_v29 = vrot.slane %v551_v16, 3  ;;  %v842_v30 = vshll.u32 %v7361_v9, 16  ;;  %v8838_v61 = vld [vmem:[%s10357_s1 + $0x48] sm:$0xff]   ;;  %v8840_v9 = vld [vmem:[%s10357_s1 + $0x60] sm:$0xff]  }
  0xa2   : > { %8264 = vmatmul.mubr.msk.bf16.vlgmr.msra.gmra.mrb[4].mxu1 %vm342_vm6, %v669_v26  ;;  %8252 = vmatpush3.bf16.msra.mxu0 %v8833_v6  ;;  %v546_v33 = vor.u32 %v545_v18, %v542_v13  ;;  %v847_v34 = vshll.u32 %v7362_v19, 16  ;;  %v917_v43 = vmul.bf16 %v914_v22, %v9160_v23  ;;  %v918_v44 = vmul.bf16 %v915_v31, %v9162_v24  ;;  %v8839_v8 = vld [vmem:[#allocation2 + $0x4] sm:$0xff]  }
  0xa3   : > { %8276 = vmatpush3.bf16.msra.mxu1 %v8834_v12  ;;  %8253 = vmatprep.subr.bf16.mxu0 %v9018_v10  ;;  %v554_v38 = vor.u32 %v553_v29, %v550_v27  ;;  %v844_v39 = vrot.slane %v842_v30, 1  ;;  %v916_v49 = vmul.bf16 %v913_v41, %v9121_v46  ;;  %v1027_v62 = vrot.slane %v8846_v50, 2  ;;  %v8841_v19 = vld [vmem:[%s10357_s1 + $0x68] sm:$0xff]   ;;  %v8842_v31 = vld [vmem:[%s10357_s1 + $0x80] sm:$0xff]   ;;  %v8850_v50 = vld [vmem:[%s10357_s1 + $0x90] sm:$0xff]  }
  0xa4   : > { %8277 = vmatprep.subr.bf16.mxu1 %v9018_v10  ;;  %8255 = vmatprep.mubr.msk.bf16.mxu0 %vm9019_vm5, %v9018_v10  ;;  %v849_v42 = vrot.slane %v847_v34, 1  ;;  %v7371_v57 = vcombine.low %v918_v44, %v918_v44  ;;  %v1095_v63 = vmul.bf16 %v1092_v52, %v9126_v53  ;;  %v1096_v0 = vmul.bf16 %v1093_v58, %v9178_v36  ;;  %v8854_v52 = vld [vmem:[%s10357_s1 + $0x98] sm:$0xff]  }
  0xa5   : > { %8279 = vmatprep.mubr.msk.bf16.mxu1 %vm9019_vm5, %v9018_v10  ;;  %v845_v45 = vor.u32 %v844_v39, %v840_v21  ;;  %v555_v47 = vsel %vm538_vm2, %v546_v33, %v554_v38  ;;  %v7370_v56 = vcombine.low %v916_v49, %v917_v43  ;;  %v1097_v1 = vmul.bf16 %v1094_v59, %v9180_v37  ;;  %v8843_v39 = vld [vmem:[%s10357_s1 + $0x88] sm:$0xff]   ;;  %v8848_v49 = vld [vmem:[%s10357_s1 + $0xa0] sm:$0xff]  }
  0xa6   : > { %8254 = vmatpush3.bf16.msra.mxu0 %v8835_v32  ;;  %v1028_v2 = vrot.slane %v8847_v55, 2  ;;  %v941_v5 = vshrl.u32 %v7371_v57, 16  ;;  %v944_v6 = vshll.u32 %v7371_v57, 16  ;;  %v7388_v11 = vcombine.low %v1095_v63, %v1096_v0 }
  0xa7   : > { %8278 = vmatpush3.bf16.msra.mxu1 %v8836_v35  ;;  %8267 = vmatprep.subr.bf16.mxu0 %v9018_v10  ;;  %v850_v51 = vsel %vm838_vm9, %v845_v45, %v849_v42  ;;  %v933_v3 = vshrl.u32 %v7370_v56, 16  ;;  %v936_v4 = vshll.u32 %v7370_v56, 16  ;;  %v7389_v12 = vcombine.low %v1097_v1, %v1097_v1 }
  0xa8   : > { %8291 = vmatprep.subr.bf16.mxu1 %v9018_v10  ;;  %v1029_v13 = vsel %vm405_vm4, %v1027_v62, %v1028_v2  ;;  %v943_v17 = vrot.slane %v941_v5, 1  ;;  %v946_v18 = vrot.slane %v944_v6, 2  ;;  %v1112_v21 = vshrl.u32 %v7388_v11, 16 }
  0xa9   : > { %8256 = vmatmul.mubr.msk.bf16.vlgmr.msra.gmra.mrb[4].mxu0 %vm342_vm6, %v555_v47  ;;  %v935_v15 = vrot.slane %v933_v3, 1  ;;  %v938_v16 = vrot.slane %v936_v4, 2  ;;  %v1115_v22 = vshll.u32 %v7388_v11, 16  ;;  %v1120_v29 = vshrl.u32 %v7389_v12, 16 }
  0xaa   : > { %8280 = vmatmul.mubr.msk.bf16.vlgmr.msra.gmra.mrb[8].mxu1 %vm342_vm6, %v850_v51  ;;  %8268 = vmatpush3.bf16.msra.mxu0 %v8837_v48  ;;  %v947_v27 = vor.u32 %v946_v18, %v943_v17  ;;  %v1123_v30 = vshll.u32 %v7389_v12, 16  ;;  %v1114_v32 = vrot.slane %v1112_v21, 2  ;;  %v8849_v51 = vld [vmem:[%s10357_s1 + $0xa8] sm:$0xff]  }
  0xab   : > { %8269 = vmatprep.subr.bf16.mxu0 %v9018_v10  ;;  %8271 = vmatprep.mubr.msk.bf16.mxu0 %vm9019_vm5, %v9018_v10  ;;  %v939_v26 = vor.u32 %v938_v16, %v935_v15  ;;  %v1117_v34 = vrot.slane %v1115_v22, 3  ;;  %v1122_v35 = vrot.slane %v1120_v29, 2 }
  0xac   : > { %8292 = vmatpush3.bf16.msra.mxu1 %v8844_v60  ;;  %8295 = vmatprep.mubr.msk.bf16.mxu1 %vm9019_vm5, %v9018_v10  ;;  %v1125_v38 = vrot.slane %v1123_v30, 3 }
  0xad   : > { %8293 = vmatprep.subr.bf16.mxu1 %v9018_v10  ;;  %v948_v33 = vsel %vm312_vm7, %v939_v26, %v947_v27  ;;  %v1118_v41 = vor.u32 %v1117_v34, %v1114_v32 }
  0xae   : > { %8270 = vmatpush3.bf16.msra.mxu0 %v8838_v61  ;;  %v1126_v42 = vor.u32 %v1125_v38, %v1122_v35 }
  0xaf   : > { %8283 = vmatprep.subr.bf16.mxu0 %v9018_v10 }
  0xb0   : > { %8294 = vmatpush3.bf16.msra.mxu1 %v8845_v7  ;;  %v1127_v43 = vsel %vm538_vm2, %v1118_v41, %v1126_v42 }
  0xb1   : > { %8272 = vmatmul.mubr.msk.bf16.vlgmr.msra.gmra.mrb[8].mxu0 %vm342_vm6, %v8839_v8  ;;  %8307 = vmatprep.subr.bf16.mxu1 %v9018_v10 }
  0xb2   : > { %8284 = vmatpush3.bf16.msra.mxu0 %v8840_v9  ;;  %8287 = vmatprep.mubr.msk.bf16.mxu0 %vm9019_vm5, %v9018_v10 }
  0xb3   : > { %8285 = vmatprep.subr.bf16.mxu0 %v9018_v10  ;;  %8296 = vmatmul.mubr.msk.bf16.vlgmr.msra.gmra.mrb[12].mxu1 %vm342_vm6, %v1029_v13 }
  0xb4   : > { %8311 = vmatprep.mubr.msk.bf16.mxu1 %vm9019_vm5, %v9018_v10  ;;  %8308 = vmatpush3.bf16.msra.mxu1 %v8850_v50 }
  0xb5   : > { %8309 = vmatprep.subr.bf16.mxu1 %v9018_v10 }
  0xb6   : > { %8286 = vmatpush3.bf16.msra.mxu0 %v8841_v19 }
  0xb7   : > { %8299 = vmatprep.subr.bf16.mxu0 %v9018_v10 }
  0xb8   : > { %8310 = vmatpush3.bf16.msra.mxu1 %v8854_v52 }
  0xb9   : > { %8288 = vmatmul.mubr.msk.bf16.vlgmr.msra.gmra.mrb[12].mxu0 %vm342_vm6, %v948_v33  ;;  %8323 = vmatprep.subr.bf16.mxu1 %v9018_v10 }
  0xba   : > { %8300 = vmatpush3.bf16.msra.mxu0 %v8842_v31  ;;  %8303 = vmatprep.mubr.msk.bf16.mxu0 %vm9019_vm5, %v9018_v10 }
  0xbb   : > { %8301 = vmatprep.subr.bf16.mxu0 %v9018_v10 }
  0xbe   : > { %8302 = vmatpush3.bf16.msra.mxu0 %v8843_v39 }
  0xbf   : > { %8315 = vmatprep.subr.bf16.mxu0 %v9018_v10 }
  0xc1   : > { %8304 = vmatmul.mubr.msk.bf16.vlgmr.msra.gmra.mrb[16].mxu0 %vm342_vm6, %v1127_v43 }
  0xc2   : > { %8319 = vmatprep.mubr.msk.bf16.mxu0 %vm9019_vm5, %v9018_v10  ;;  %8316 = vmatpush3.bf16.msra.mxu0 %v8848_v49 }
  0xc3   : > { %8317 = vmatprep.subr.bf16.mxu0 %v9018_v10 }
  0xc6   : > { %8318 = vmatpush3.bf16.msra.mxu0 %v8849_v51 }
  0xc7   : > { %8331 = vmatprep.subr.bf16.mxu0 %v9018_v10 }
  0xef   : > { %v458_v44 = vpop.f32.mrb[0].mxu1 }
  0xf0   : > { %v8249_v45 = vpop.f32.mrb[1].mxu1 }
  0xf1   : > { %v461_v47 = vpop.f32.mrb[2].mxu1 }
  0xf2   : > { %v8250_v48 = vpop.f32.mrb[3].mxu1 }
 0x174   : > { %v380_v55 = vpop.f32.mrb[0].mxu0 }
 0x175   : > { %387 = vst.msk [vmem:[#allocation3] sm:$0xff] %vm342_vm6, %v380_v55  ;;  %v719_v56 = vpop.f32.mrb[4].mxu1  ;;  %v8241_v57 = vpop.f32.mrb[1].mxu0 }
 0x176   : > { %v8265_v58 = vpop.f32.mrb[5].mxu1  ;;  %v383_v59 = vpop.f32.mrb[2].mxu0 }
 0x177   : > { %388 = vst.msk [vmem:[#allocation3 + $0x8] sm:$0xff] %vm342_vm6, %v383_v59  ;;  %v722_v60 = vpop.f32.mrb[6].mxu1  ;;  %v8242_v61 = vpop.f32.mrb[3].mxu0 }
 0x178   : > { %v8266_v62 = vpop.f32.mrb[7].mxu1 }
 0x17c   : > { %v465_v63 = vld [vmem:[#allocation3] sm:$0xff]  ;;  %v605_v0 = vpop.f32.mrb[4].mxu0 }
 0x17d   : > { %v467_v1 = vadd.f32 %v465_v63, %v458_v44  ;;  %v900_v2 = vpop.f32.mrb[8].mxu1  ;;  %v8257_v3 = vpop.f32.mrb[5].mxu0 }
 0x17e   : > { %v466_v4 = vld [vmem:[#allocation3 + $0x8] sm:$0xff]  ;;  %v8281_v5 = vpop.f32.mrb[9].mxu1  ;;  %v608_v6 = vpop.f32.mrb[6].mxu0 }
 0x17f   : > { %469 = vst.msk [vmem:[#allocation3] sm:$0xff] %vm342_vm6, %v467_v1  ;;  %v468_v7 = vadd.f32 %v466_v4, %v461_v47  ;;  %v903_v8 = vpop.f32.mrb[10].mxu1  ;;  %v8258_v9 = vpop.f32.mrb[7].mxu0  ;;  %v1190_v4 = vld [vmem:[#allocation2 + $0x4] sm:$0xff]   ;;  %v7393_v5 = vld [vmem:[%s10358_s2] ss:$0 sm:$0xff] }
 0x180   : > { %v8282_v11 = vpop.f32.mrb[11].mxu1 }
 0x181   : > { %470 = vst.msk [vmem:[#allocation3 + $0x8] sm:$0xff] %vm342_vm6, %v468_v7  ;;  %v7394_v7 = vld [vmem:[%s10359_s3] ss:$0 sm:$0xff] }
 0x184   : > { %v793_v12 = vpop.f32.mrb[8].mxu0 }
 0x185   : > { %v8273_v13 = vpop.f32.mrb[9].mxu0 }
 0x186   : > { %v612_v15 = vld [vmem:[#allocation3] sm:$0xff]  ;;  %v796_v16 = vpop.f32.mrb[10].mxu0  ;;  %v1079_v17 = vpop.f32.mrb[12].mxu1  ;;  %v1193_v13 = vunpack.c.h.bf16 %v1190_v4 }
 0x187   : > { %v614_v18 = vadd.f32 %v612_v15, %v605_v0  ;;  %v8274_v19 = vpop.f32.mrb[11].mxu0  ;;  %v8297_v21 = vpop.f32.mrb[13].mxu1 }
 0x188   : > { %v613_v22 = vld [vmem:[#allocation3 + $0x8] sm:$0xff]  ;;  %v1082_v26 = vpop.f32.mrb[14].mxu1 }
 0x189   : > { %616 = vst.msk [vmem:[#allocation3] sm:$0xff] %vm342_vm6, %v614_v18  ;;  %v615_v27 = vadd.f32 %v613_v22, %v608_v6  ;;  %v8298_v29 = vpop.f32.mrb[15].mxu1 }
 0x18b   : > { %617 = vst.msk [vmem:[#allocation3 + $0x8] sm:$0xff] %vm342_vm6, %v615_v27 }
 0x18c   : > { %v998_v30 = vpop.f32.mrb[12].mxu0 }
 0x18d   : > { %v8289_v31 = vpop.f32.mrb[13].mxu0 }
 0x18e   : > { %v1001_v32 = vpop.f32.mrb[14].mxu0  ;;  %v1505_v31 = vld [vmem:[#allocation2] sm:$0x8] }
 0x18f   : > { %v8290_v33 = vpop.f32.mrb[15].mxu0 }
 0x190   : > { %v726_v34 = vld [vmem:[#allocation3] sm:$0xff] }
 0x191   : > { %v728_v35 = vadd.f32 %v726_v34, %v719_v56 }
 0x192   : > { %v727_v38 = vld [vmem:[#allocation3 + $0x8] sm:$0xff] }
 0x193   : > { %730 = vst.msk [vmem:[#allocation3] sm:$0xff] %vm342_vm6, %v728_v35  ;;  %v729_v39 = vadd.f32 %v727_v38, %v722_v60 }
 0x194   : > { %v1177_v41 = vpop.f32.mrb[16].mxu0 }
 0x195   : > { %731 = vst.msk [vmem:[#allocation3 + $0x8] sm:$0xff] %vm342_vm6, %v729_v39  ;;  %v8305_v42 = vpop.f32.mrb[17].mxu0 }
 0x196   : > { %v1180_v43 = vpop.f32.mrb[18].mxu0 }
 0x197   : > { %v8306_v44 = vpop.f32.mrb[19].mxu0 }
 0x198   : > { %v1508_v44 = vmul.bf16 %v1505_v31, %v9119_v40 }
 0x19a   : > { %v800_v45 = vld [vmem:[#allocation3] sm:$0xff] }
 0x19b   : > { %v802_v47 = vadd.f32 %v800_v45, %v793_v12 }
 0x19c   : > { %v801_v48 = vld [vmem:[#allocation3 + $0x8] sm:$0xff] }
 0x19d   : > { %804 = vst.msk [vmem:[#allocation3] sm:$0xff] %vm342_vm6, %v802_v47  ;;  %v803_v49 = vadd.f32 %v801_v48, %v796_v16 }
 0x19f   : > { %805 = vst.msk [vmem:[#allocation3 + $0x8] sm:$0xff] %vm342_vm6, %v803_v49 }
 0x1a4   : > { %v907_v50 = vld [vmem:[#allocation3] sm:$0xff] }
 0x1a5   : > { %v909_v51 = vadd.f32 %v907_v50, %v900_v2 }
 0x1a6   : > { %v908_v52 = vld [vmem:[#allocation3 + $0x8] sm:$0xff] }
 0x1a7   : > { %911 = vst.msk [vmem:[#allocation3] sm:$0xff] %vm342_vm6, %v909_v51  ;;  %v910_v55 = vadd.f32 %v908_v52, %v903_v8  ;;  %v1192_v8 = vunpack.c.l.bf16 %v1190_v4  ;;  %v1679_v4 = vld [vmem:[#allocation2 + $0xc] sm:$0x1] }
 0x1a9   : > { %912 = vst.msk [vmem:[#allocation3 + $0x8] sm:$0xff] %vm342_vm6, %v910_v55 }
 0x1ae   : > { %v1005_v56 = vld [vmem:[#allocation3] sm:$0xff] }
 0x1af   : > { %v1007_v57 = vadd.f32 %v1005_v56, %v998_v30  ;;  %v1232_v30 = vld [vmem:[#allocation2] sm:$0xe] }
 0x1b0   : > { %v1006_v58 = vld [vmem:[#allocation3 + $0x8] sm:$0xff]  ;;  %v1235_v35 = vmul.bf16 %v1232_v30, %v9121_v46  ;;  %v8853_v56 = vld [vmem:[%s10357_s1 + $0xc0] sm:$0xff]  }
 0x1b1   : > { %1009 = vst.msk [vmem:[#allocation3] sm:$0xff] %vm342_vm6, %v1007_v57  ;;  %v1008_v59 = vadd.f32 %v1006_v58, %v1001_v32  ;;  %v1407_v32 = vld [vmem:[#allocation2] sm:$0xc] }
 0x1b2   : > { %v1410_v52 = vmul.bf16 %v1407_v32, %v9126_v53 }
 0x1b3   : > { %1010 = vst.msk [vmem:[#allocation3 + $0x8] sm:$0xff] %vm342_vm6, %v1008_v59 }
 0x1b8   : > { %v1086_v60 = vld [vmem:[#allocation3] sm:$0xff] }
 0x1b9   : > { %v1088_v61 = vadd.f32 %v1086_v60, %v1079_v17 }
 0x1ba   : > { %v1087_v62 = vld [vmem:[#allocation3 + $0x8] sm:$0xff] }
 0x1bb   : > { %1090 = vst.msk [vmem:[#allocation3] sm:$0xff] %vm342_vm6, %v1088_v61  ;;  %v1089_v63 = vadd.f32 %v1087_v62, %v1082_v26 }
 0x1bd   : > { %1091 = vst.msk [vmem:[#allocation3 + $0x8] sm:$0xff] %vm342_vm6, %v1089_v63 }
 0x1c2   : > { %v1184_v0 = vld [vmem:[#allocation3] sm:$0xff] }
 0x1c3   : > { %v1186_v1 = vadd.f32 %v1184_v0, %v1177_v41 }
 0x1c4   : > { %v1185_v2 = vld [vmem:[#allocation3 + $0x8] sm:$0xff] }
 0x1c5   : > { %1188 = vst.msk [vmem:[#allocation3] sm:$0xff] %vm342_vm6, %v1186_v1  ;;  %v1187_v3 = vadd.f32 %v1185_v2, %v1180_v43 }
 0x1c7   : > { %1189 = vst.msk [vmem:[#allocation3 + $0x8] sm:$0xff] %vm342_vm6, %v1187_v3 }
 0x1cc   : > { %v1194_v6 = vld [vmem:[#allocation3] sm:$0xff] }
 0x1cd   : > { %v1203_v9 = vadd.f32 %v7393_v5, %v1194_v6 }
 0x1ce   : > { %v1195_v11 = vld [vmem:[#allocation3 + $0x8] sm:$0xff] }
 0x1cf   : > { %v1212_v12 = vmul.f32 %v7394_v7, %v1203_v9  ;;  %v1204_v15 = vadd.f32 %v7393_v5, %v1195_v11  ;;  %v8855_v11 = vld [vmem:[%s10357_s1 + $0xc8] sm:$0xff]  }
 0x1d1   : > { %v1214_v16 = vadd.f32 %v1212_v12, %v1192_v8  ;;  %v1213_v17 = vmul.f32 %v7394_v7, %v1204_v15 }
 0x1d3   : > { %vm1216_vm10 = vcmp.ge.f32.partialorder %v1214_v16, 0.0  ;;  %v1218_v18 = vmul.f32 0.2, %v1214_v16  ;;  %v1215_v19 = vadd.f32 %v1213_v17, %v1193_v13 }
 0x1d5   : > { %v1220_v21 = vsel %vm1216_vm10, %v1214_v16, %v1218_v18  ;;  %vm1217_vm11 = vcmp.ge.f32.partialorder %v1215_v19, 0.0  ;;  %v1219_v22 = vmul.f32 0.2, %v1215_v19 }
 0x1d6   : > { %v8003_v26 = vpack.c.bf16 %v1220_v21, %v1220_v21  ;;  %v1682_v21 = vmul.bf16 %v1679_v4, %v9155_v20  ;;  %v8860_v4 = vld [vmem:[%s10357_s1 + $0xd0] sm:$0xff]  }
 0x1d7   : > { %v1221_v27 = vsel %vm1217_vm11, %v1215_v19, %v1219_v22 }
 0x1d8   : > { %1230 = vst.msk [vmem:[#allocation2 + $0x4] sm:$0xf] %vm226_vm0, %v8003_v26  ;;  %v8004_v29 = vpack.c.bf16 %v1221_v27, %v1221_v27 }
 0x1da   : > { %1231 = vst.msk [vmem:[#allocation2 + $0x8] sm:$0xf] %vm226_vm0, %v8004_v29 }
 0x1df   : > { %v8851_v33 = vld [vmem:[#allocation2] sm:$0xfc]  }
 0x1e0   : > { %v1233_v34 = vld [vmem:[#allocation2 + $0x4] sm:$0xf]  ;;  %v1342_v43 = vrot.slane %v8851_v33, 2 }
 0x1e1   : > { %v1236_v38 = vmul.bf16 %v1233_v34, %v9160_v23  ;;  %v1506_v39 = vld [vmem:[#allocation2 + $0x4] sm:$0xf]  ;;  %v8852_v42 = vld [vmem:[#allocation2 + $0x8] ss:$0 sps:$4 sm:$0x33]  }
 0x1e2   : > { %v1408_v41 = vld [vmem:[#allocation2 + $0x4] sm:$0xf]  ;;  %v1509_v45 = vmul.bf16 %v1506_v39, %v9152_v14  ;;  %v1234_v48 = vld [vmem:[#allocation2 + $0x8] sm:$0x3]  ;;  %v1343_v55 = vrot.slane %v8852_v42, 2 }
 0x1e3   : > { %v1411_v47 = vmul.bf16 %v1408_v41, %v9178_v36  ;;  %v7401_v49 = vcombine.low %v1235_v35, %v1236_v38  ;;  %v1507_v50 = vld [vmem:[#allocation2 + $0x8] sm:$0xf]  ;;  %v1237_v57 = vmul.bf16 %v1234_v48, %v9162_v24  ;;  %v1677_v9 = vld [vmem:[#allocation2 + $0x4] sm:$0xf]  ;;  %v8856_v35 = vld [vmem:[%s10357_s1 + $0xb0] sm:$0xff]  }
 0x1e4   : > { %v1409_v51 = vld [vmem:[#allocation2 + $0x8] sm:$0x7]  ;;  %v1510_v58 = vmul.bf16 %v1507_v50, %v9164_v25  ;;  %v7428_v59 = vcombine.low %v1508_v44, %v1509_v45  ;;  %v1344_v0 = vsel %vm405_vm4, %v1342_v43, %v1343_v55  ;;  %v1680_v29 = vmul.bf16 %v1677_v9, %v9128_v54  ;;  %v8857_v44 = vld [vmem:[%s10357_s1 + $0xe0] sm:$0xff]   ;;  %v8858_v55 = vld [vmem:[%s10357_s1 + $0xb8] sm:$0xff]  }
 0x1e5   : > { %v1252_v60 = vshrl.u32 %v7401_v49, 16  ;;  %v1255_v61 = vshll.u32 %v7401_v49, 16  ;;  %v1412_v62 = vmul.bf16 %v1409_v51, %v9180_v37  ;;  %v7419_v63 = vcombine.low %v1410_v52, %v1411_v47  ;;  %8320 = vmatmul.mubr.msk.bf16.vlgmr.msra.gmra.mrb[20].mxu0 %vm342_vm6, %v1344_v0  ;;  %v1678_v19 = vld [vmem:[#allocation2 + $0x8] sm:$0xf]  ;;  %v8861_v9 = vld [vmem:[%s10357_s1 + $0x100] sm:$0xff]  }
 0x1e6   : > { %v7402_v1 = vcombine.low %v1237_v57, %v1237_v57  ;;  %v7429_v2 = vcombine.low %v1510_v58, %v1510_v58  ;;  %v1525_v3 = vshrl.u32 %v7428_v59, 16  ;;  %v1528_v7 = vshll.u32 %v7428_v59, 16  ;;  %8332 = vmatpush3.bf16.msra.mxu0 %v8853_v56  ;;  %8335 = vmatprep.mubr.msk.bf16.mxu0 %vm9019_vm5, %v9018_v10  ;;  %v1771_v52 = vld [vmem:[#allocation2 + $0x8] sm:$0xf] }
 0x1e7   : > { %v1254_v5 = vrot.slane %v1252_v60, 1  ;;  %v1257_v6 = vrot.slane %v1255_v61, 2  ;;  %v7420_v8 = vcombine.low %v1412_v62, %v1412_v62  ;;  %8333 = vmatprep.subr.bf16.mxu0 %v9018_v10  ;;  %v1427_v32 = vshrl.u32 %v7419_v63, 16  ;;  %v8859_v59 = vld [vmem:[%s10357_s1 + $0xe8] sm:$0xff]   ;;  %v1770_v61 = vld [vmem:[#allocation2 + $0x4] sm:$0xe] }
 0x1e8   : > { %v1260_v12 = vshrl.u32 %v7402_v1, 16  ;;  %v1263_v13 = vshll.u32 %v7402_v1, 16  ;;  %v1533_v15 = vshrl.u32 %v7429_v2, 16  ;;  %v1527_v16 = vrot.slane %v1525_v3, 3  ;;  %v1772_v62 = vld [vmem:[#allocation2 + $0xc] sm:$0x3] }
 0x1e9   : > { %v1530_v17 = vrot.slane %v1528_v7, 4  ;;  %v1536_v18 = vshll.u32 %v7429_v2, 16  ;;  %v1258_v30 = vor.u32 %v1257_v6, %v1254_v5  ;;  %v1435_v33 = vshrl.u32 %v7420_v8, 16 }
 0x1ea   : > { %v1262_v22 = vrot.slane %v1260_v12, 1  ;;  %v1265_v26 = vrot.slane %v1263_v13, 2  ;;  %v1535_v27 = vrot.slane %v1533_v15, 3  ;;  %8334 = vmatpush3.bf16.msra.mxu0 %v8855_v11  ;;  %v1430_v38 = vshll.u32 %v7419_v63, 16 }
 0x1eb   : > { %v1538_v31 = vrot.slane %v1536_v18, 4  ;;  %v1438_v39 = vshll.u32 %v7420_v8, 16  ;;  %v1681_v41 = vmul.bf16 %v1678_v19, %v9171_v28  ;;  %v1531_v42 = vor.u32 %v1530_v17, %v1527_v16  ;;  %8347 = vmatprep.subr.bf16.mxu0 %v9018_v10  ;;  %v8867_v12 = vld [vmem:[#allocation2 + $0xc] ss:$0 sps:$4 sm:$0x33]   ;;  %v8862_v18 = vld [vmem:[%s10357_s1 + $0xd8] sm:$0xff]  }
 0x1ec   : > { %v1266_v34 = vor.u32 %v1265_v26, %v1262_v22  ;;  %v7446_v45 = vcombine.low %v1682_v21, %v1682_v21  ;;  %v1437_v48 = vrot.slane %v1435_v33, 2  ;;  %v1429_v56 = vrot.slane %v1427_v32, 2  ;;  %v8866_v16 = vld [vmem:[#allocation2 + $0x4] sm:$0xfc]   ;;  %v1951_v26 = vld [vmem:[#allocation2 + $0xc] sm:$0x7] }
 0x1ed   : > { %v1539_v43 = vor.u32 %v1538_v31, %v1535_v27  ;;  %v1440_v49 = vrot.slane %v1438_v39, 3  ;;  %v7445_v50 = vcombine.low %v1680_v29, %v1681_v41  ;;  %v1432_v57 = vrot.slane %v1430_v38, 3  ;;  %v1950_v17 = vld [vmem:[#allocation2 + $0x8] sm:$0xf]  ;;  %v1949_v22 = vld [vmem:[#allocation2 + $0x4] sm:$0xc] }
 0x1ee   : > { %v1267_v47 = vsel %vm312_vm7, %v1258_v30, %v1266_v34  ;;  %v1704_v60 = vshll.u32 %v7446_v45, 16  ;;  %v1774_v2 = vmul.bf16 %v1771_v52, %v9160_v23  ;;  %v1773_v6 = vmul.bf16 %v1770_v61, %v9121_v46  ;;  %v8863_v21 = vld [vmem:[%s10357_s1 + $0x108] sm:$0xff]   ;;  %v8865_v33 = vld [vmem:[%s10357_s1 + $0xf0] sm:$0xff]  }
 0x1ef   : > { %8312 = vmatmul.mubr.msk.bf16.vlgmr.msra.gmra.mrb[16].mxu1 %vm342_vm6, %v1267_v47  ;;  %v1540_v51 = vsel %vm652_vm8, %v1531_v42, %v1539_v43  ;;  %v1699_v58 = vshll.u32 %v7445_v50, 16  ;;  %v1441_v63 = vor.u32 %v1440_v49, %v1437_v48  ;;  %v1697_v0 = vshrl.u32 %v7445_v50, 16  ;;  %v8864_v41 = vld [vmem:[#allocation2 + $0x4] sm:$0xff]   ;;  %v8868_v47 = vld [vmem:[%s10357_s1 + $0xf8] sm:$0xff]  }
 0x1f0   : > { %8324 = vmatpush3.bf16.msra.mxu1 %v8856_v35  ;;  %8336 = vmatmul.mubr.msk.bf16.vlgmr.msra.gmra.mrb[24].mxu0 %vm342_vm6, %v1540_v51  ;;  %v1433_v3 = vor.u32 %v1432_v57, %v1429_v56  ;;  %v1775_v7 = vmul.bf16 %v1772_v62, %v9162_v24  ;;  %v1706_v8 = vrot.slane %v1704_v60, 1  ;;  %v7454_v13 = vcombine.low %v1773_v6, %v1774_v2  ;;  %v8869_v57 = vld [vmem:[%s10357_s1 + $0x110] sm:$0xff]   ;;  %v8873_v6 = vld [vmem:[%s10357_s1 + $0x120] sm:$0xff]  }
 0x1f1   : > { %8348 = vmatpush3.bf16.msra.mxu0 %v8857_v44  ;;  %8325 = vmatprep.subr.bf16.mxu1 %v9018_v10  ;;  %v1701_v1 = vrot.slane %v1699_v58, 1  ;;  %v1953_v30 = vmul.bf16 %v1950_v17, %v9178_v36  ;;  %v1884_v31 = vrot.slane %v8866_v16, 2  ;;  %v1885_v32 = vrot.slane %v8867_v12, 2 }
 0x1f2   : > { %8349 = vmatprep.subr.bf16.mxu0 %v9018_v10  ;;  %8327 = vmatprep.mubr.msk.bf16.mxu1 %vm9019_vm5, %v9018_v10  ;;  %v1442_v11 = vsel %vm538_vm2, %v1433_v3, %v1441_v63  ;;  %v7455_v19 = vcombine.low %v1775_v7, %v1775_v7  ;;  %v1790_v27 = vshrl.u32 %v7454_v13, 16  ;;  %v1793_v29 = vshll.u32 %v7454_v13, 16  ;;  %v8870_v63 = vld [vmem:[%s10357_s1 + $0x118] sm:$0xff]  }
 0x1f3   : > { %8351 = vmatprep.mubr.msk.bf16.mxu0 %vm9019_vm5, %v9018_v10  ;;  %v1702_v5 = vor.u32 %v1701_v1, %v1697_v0  ;;  %v1952_v38 = vmul.bf16 %v1949_v22, %v9126_v53  ;;  %v1954_v39 = vmul.bf16 %v1951_v26, %v9180_v37  ;;  %v1886_v45 = vsel %vm405_vm4, %v1884_v31, %v1885_v32  ;;  %v8872_v7 = vld [vmem:[%s10357_s1 + $0x138] sm:$0xff]  }
 0x1f4   : > { %8326 = vmatpush3.bf16.msra.mxu1 %v8858_v55  ;;  %v1798_v34 = vshrl.u32 %v7455_v19, 16  ;;  %v1801_v35 = vshll.u32 %v7455_v19, 16  ;;  %v1792_v42 = vrot.slane %v1790_v27, 1  ;;  %v1795_v43 = vrot.slane %v1793_v29, 2 }
 0x1f5   : > { %8350 = vmatpush3.bf16.msra.mxu0 %v8859_v59  ;;  %8339 = vmatprep.subr.bf16.mxu1 %v9018_v10  ;;  %v1707_v15 = vsel %vm838_vm9, %v1702_v5, %v1706_v8  ;;  %v7472_v44 = vcombine.low %v1952_v38, %v1953_v30  ;;  %v7473_v50 = vcombine.low %v1954_v39, %v1954_v39  ;;  %v8871_v5 = vld [vmem:[%s10357_s1 + $0x130] sm:$0xff]   ;;  %v8877_v8 = vld [vmem:[%s10357_s1 + $0x128] sm:$0xff]  }
 0x1f6   : > { %8363 = vmatprep.subr.bf16.mxu0 %v9018_v10  ;;  %v1800_v48 = vrot.slane %v1798_v34, 1  ;;  %v1803_v49 = vrot.slane %v1801_v35, 2  ;;  %v1796_v51 = vor.u32 %v1795_v43, %v1792_v42 }
 0x1f7   : > { %8328 = vmatmul.mubr.msk.bf16.vlgmr.msra.gmra.mrb[20].mxu1 %vm342_vm6, %v1442_v11  ;;  %v1969_v52 = vshrl.u32 %v7472_v44, 16  ;;  %v1972_v55 = vshll.u32 %v7472_v44, 16  ;;  %v1977_v58 = vshrl.u32 %v7473_v50, 16  ;;  %v1980_v59 = vshll.u32 %v7473_v50, 16 }
 0x1f8   : > { %8340 = vmatpush3.bf16.msra.mxu1 %v8860_v4  ;;  %8352 = vmatmul.mubr.msk.bf16.vlgmr.msra.gmra.mrb[28].mxu0 %vm342_vm6, %v1707_v15  ;;  %v1804_v56 = vor.u32 %v1803_v49, %v1800_v48 }
 0x1f9   : > { %8364 = vmatpush3.bf16.msra.mxu0 %v8861_v9  ;;  %8341 = vmatprep.subr.bf16.mxu1 %v9018_v10  ;;  %v1971_v61 = vrot.slane %v1969_v52, 2  ;;  %v1974_v62 = vrot.slane %v1972_v55, 3  ;;  %v1979_v0 = vrot.slane %v1977_v58, 2  ;;  %v1982_v1 = vrot.slane %v1980_v59, 3 }
 0x1fa   : > { %8365 = vmatprep.subr.bf16.mxu0 %v9018_v10  ;;  %8343 = vmatprep.mubr.msk.bf16.mxu1 %vm9019_vm5, %v9018_v10  ;;  %v1805_v60 = vsel %vm312_vm7, %v1796_v51, %v1804_v56 }
 0x1fb   : > { %8367 = vmatprep.mubr.msk.bf16.mxu0 %vm9019_vm5, %v9018_v10  ;;  %v1975_v2 = vor.u32 %v1974_v62, %v1971_v61  ;;  %v1983_v3 = vor.u32 %v1982_v1, %v1979_v0 }
 0x1fc   : > { %8342 = vmatpush3.bf16.msra.mxu1 %v8862_v18 }
 0x1fd   : > { %8366 = vmatpush3.bf16.msra.mxu0 %v8863_v21  ;;  %8355 = vmatprep.subr.bf16.mxu1 %v9018_v10  ;;  %v1984_v4 = vsel %vm538_vm2, %v1975_v2, %v1983_v3 }
 0x1fe   : > { %8379 = vmatprep.subr.bf16.mxu0 %v9018_v10 }
 0x1ff   : > { %8344 = vmatmul.mubr.msk.bf16.vlgmr.msra.gmra.mrb[24].mxu1 %vm342_vm6, %v8864_v41 }
 0x200   : > { %8356 = vmatpush3.bf16.msra.mxu1 %v8865_v33  ;;  %8368 = vmatmul.mubr.msk.bf16.vlgmr.msra.gmra.mrb[32].mxu0 %vm342_vm6, %v1886_v45 }
 0x201   : > { %8357 = vmatprep.subr.bf16.mxu1 %v9018_v10  ;;  %8359 = vmatprep.mubr.msk.bf16.mxu1 %vm9019_vm5, %v9018_v10 }
 0x202   : > { %8383 = vmatprep.mubr.msk.bf16.mxu0 %vm9019_vm5, %v9018_v10  ;;  %8380 = vmatpush3.bf16.msra.mxu0 %v8873_v6 }
 0x203   : > { %8381 = vmatprep.subr.bf16.mxu0 %v9018_v10 }
 0x204   : > { %8358 = vmatpush3.bf16.msra.mxu1 %v8868_v47 }
 0x205   : > { %8371 = vmatprep.subr.bf16.mxu1 %v9018_v10 }
 0x206   : > { %8382 = vmatpush3.bf16.msra.mxu0 %v8877_v8 }
 0x207   : > { %8360 = vmatmul.mubr.msk.bf16.vlgmr.msra.gmra.mrb[28].mxu1 %vm342_vm6, %v1805_v60  ;;  %8395 = vmatprep.subr.bf16.mxu0 %v9018_v10 }
 0x208   : > { %8372 = vmatpush3.bf16.msra.mxu1 %v8869_v57  ;;  %8375 = vmatprep.mubr.msk.bf16.mxu1 %vm9019_vm5, %v9018_v10 }
 0x209   : > { %8373 = vmatprep.subr.bf16.mxu1 %v9018_v10 }
 0x20c   : > { %8374 = vmatpush3.bf16.msra.mxu1 %v8870_v63 }
 0x20d   : > { %8387 = vmatprep.subr.bf16.mxu1 %v9018_v10 }
 0x20f   : > { %8376 = vmatmul.mubr.msk.bf16.vlgmr.msra.gmra.mrb[32].mxu1 %vm342_vm6, %v1984_v4 }
 0x210   : > { %8391 = vmatprep.mubr.msk.bf16.mxu1 %vm9019_vm5, %v9018_v10  ;;  %8388 = vmatpush3.bf16.msra.mxu1 %v8871_v5 }
 0x211   : > { %8389 = vmatprep.subr.bf16.mxu1 %v9018_v10 }
 0x214   : > { %8390 = vmatpush3.bf16.msra.mxu1 %v8872_v7 }
 0x215   : > { %8403 = vmatprep.subr.bf16.mxu1 %v9018_v10 }
 0x2b8   : > { %v1394_v9 = vpop.f32.mrb[20].mxu0 }
 0x2b9   : > { %v8321_v11 = vpop.f32.mrb[21].mxu0 }
 0x2ba   : > { %v1397_v12 = vpop.f32.mrb[22].mxu0 }
 0x2bb   : > { %v8322_v13 = vpop.f32.mrb[23].mxu0 }
 0x2c2   : > { %v1317_v15 = vpop.f32.mrb[16].mxu1 }
 0x2c3   : > { %1324 = vst.msk [vmem:[#allocation3] sm:$0xff] %vm342_vm6, %v1317_v15  ;;  %v8313_v16 = vpop.f32.mrb[17].mxu1  ;;  %v1590_v17 = vpop.f32.mrb[24].mxu0 }
 0x2c4   : > { %v1320_v18 = vpop.f32.mrb[18].mxu1  ;;  %v8337_v19 = vpop.f32.mrb[25].mxu0 }
 0x2c5   : > { %1325 = vst.msk [vmem:[#allocation3 + $0x8] sm:$0xff] %vm342_vm6, %v1320_v18  ;;  %v8314_v21 = vpop.f32.mrb[19].mxu1  ;;  %v1593_v22 = vpop.f32.mrb[26].mxu0 }
 0x2c6   : > { %v8338_v26 = vpop.f32.mrb[27].mxu0 }
 0x2ca   : > { %v1401_v27 = vld [vmem:[#allocation3] sm:$0xff]  ;;  %v1492_v29 = vpop.f32.mrb[20].mxu1 }
 0x2cb   : > { %v1403_v30 = vadd.f32 %v1401_v27, %v1394_v9  ;;  %v8329_v31 = vpop.f32.mrb[21].mxu1  ;;  %v1757_v32 = vpop.f32.mrb[28].mxu0 }
 0x2cc   : > { %v1402_v33 = vld [vmem:[#allocation3 + $0x8] sm:$0xff]  ;;  %v1495_v34 = vpop.f32.mrb[22].mxu1  ;;  %v8353_v35 = vpop.f32.mrb[29].mxu0 }
 0x2cd   : > { %1405 = vst.msk [vmem:[#allocation3] sm:$0xff] %vm342_vm6, %v1403_v30  ;;  %v1404_v38 = vadd.f32 %v1402_v33, %v1397_v12  ;;  %v8330_v39 = vpop.f32.mrb[23].mxu1  ;;  %v1760_v41 = vpop.f32.mrb[30].mxu0  ;;  %v7478_v33 = vld [vmem:[%s10358_s2 + $0x1] ss:$0 sm:$0xff] }
 0x2ce   : > { %v8354_v42 = vpop.f32.mrb[31].mxu0 }
 0x2cf   : > { %1406 = vst.msk [vmem:[#allocation3 + $0x8] sm:$0xff] %vm342_vm6, %v1404_v38  ;;  %v7480_v38 = vld [vmem:[%s10359_s3 + $0x1] ss:$0 sm:$0xff] }
 0x2d2   : > { %v1664_v43 = vpop.f32.mrb[24].mxu1 }
 0x2d3   : > { %v8345_v44 = vpop.f32.mrb[25].mxu1  ;;  %v1936_v45 = vpop.f32.mrb[32].mxu0 }
 0x2d4   : > { %v1499_v47 = vld [vmem:[#allocation3] sm:$0xff]  ;;  %v1667_v48 = vpop.f32.mrb[26].mxu1  ;;  %v8369_v49 = vpop.f32.mrb[33].mxu0 }
 0x2d5   : > { %v1501_v50 = vadd.f32 %v1499_v47, %v1492_v29  ;;  %v8346_v51 = vpop.f32.mrb[27].mxu1  ;;  %v1939_v52 = vpop.f32.mrb[34].mxu0 }
 0x2d6   : > { %v1500_v55 = vld [vmem:[#allocation3 + $0x8] sm:$0xff]  ;;  %v8370_v56 = vpop.f32.mrb[35].mxu0 }
 0x2d7   : > { %1503 = vst.msk [vmem:[#allocation3] sm:$0xff] %vm342_vm6, %v1501_v50  ;;  %v1502_v57 = vadd.f32 %v1500_v55, %v1495_v34  ;;  %v2047_v34 = vld [vmem:[#allocation2 + $0x4] sm:$0xff]  }
 0x2d8   : > { %v2049_v42 = vunpack.c.l.bf16 %v2047_v34  ;;  %v2050_v47 = vunpack.c.h.bf16 %v2047_v34 }
 0x2d9   : > { %1504 = vst.msk [vmem:[#allocation3 + $0x8] sm:$0xff] %vm342_vm6, %v1502_v57 }
 0x2da   : > { %v1855_v58 = vpop.f32.mrb[28].mxu1 }
 0x2db   : > { %v8361_v59 = vpop.f32.mrb[29].mxu1 }
 0x2dc   : > { %v1858_v60 = vpop.f32.mrb[30].mxu1  ;;  %v2364_v59 = vld [vmem:[#allocation2] sm:$0x8] }
 0x2dd   : > { %v8362_v61 = vpop.f32.mrb[31].mxu1 }
 0x2de   : > { %v1597_v62 = vld [vmem:[#allocation3] sm:$0xff] }
 0x2df   : > { %v1599_v63 = vadd.f32 %v1597_v62, %v1590_v17 }
 0x2e0   : > { %v1598_v0 = vld [vmem:[#allocation3 + $0x8] sm:$0xff] }
 0x2e1   : > { %1601 = vst.msk [vmem:[#allocation3] sm:$0xff] %vm342_vm6, %v1599_v63  ;;  %v1600_v1 = vadd.f32 %v1598_v0, %v1593_v22 }
 0x2e2   : > { %v2034_v2 = vpop.f32.mrb[32].mxu1 }
 0x2e3   : > { %1602 = vst.msk [vmem:[#allocation3 + $0x8] sm:$0xff] %vm342_vm6, %v1600_v1  ;;  %v8377_v3 = vpop.f32.mrb[33].mxu1 }
 0x2e4   : > { %v2037_v4 = vpop.f32.mrb[34].mxu1 }
 0x2e5   : > { %v8378_v5 = vpop.f32.mrb[35].mxu1 }
 0x2e6   : > { %v2367_v5 = vmul.bf16 %v2364_v59, %v9119_v40 }
 0x2e8   : > { %v1671_v6 = vld [vmem:[#allocation3] sm:$0xff] }
 0x2e9   : > { %v1673_v7 = vadd.f32 %v1671_v6, %v1664_v43 }
 0x2ea   : > { %v1672_v8 = vld [vmem:[#allocation3 + $0x8] sm:$0xff] }
 0x2eb   : > { %1675 = vst.msk [vmem:[#allocation3] sm:$0xff] %vm342_vm6, %v1673_v7  ;;  %v1674_v9 = vadd.f32 %v1672_v8, %v1667_v48 }
 0x2ed   : > { %1676 = vst.msk [vmem:[#allocation3 + $0x8] sm:$0xff] %vm342_vm6, %v1674_v9 }
 0x2f2   : > { %v1764_v11 = vld [vmem:[#allocation3] sm:$0xff] }
 0x2f3   : > { %v1766_v12 = vadd.f32 %v1764_v11, %v1757_v32 }
 0x2f4   : > { %v1765_v13 = vld [vmem:[#allocation3 + $0x8] sm:$0xff] }
 0x2f5   : > { %1768 = vst.msk [vmem:[#allocation3] sm:$0xff] %vm342_vm6, %v1766_v12  ;;  %v1767_v15 = vadd.f32 %v1765_v13, %v1760_v41 }
 0x2f7   : > { %1769 = vst.msk [vmem:[#allocation3 + $0x8] sm:$0xff] %vm342_vm6, %v1767_v15 }
 0x2fc   : > { %v1862_v16 = vld [vmem:[#allocation3] sm:$0xff] }
 0x2fd   : > { %v1864_v17 = vadd.f32 %v1862_v16, %v1855_v58  ;;  %v2091_v58 = vld [vmem:[#allocation2] sm:$0xe]  ;;  %v8876_v16 = vld [vmem:[%s10357_s1 + $0x150] sm:$0xff]  }
 0x2fe   : > { %v1863_v18 = vld [vmem:[#allocation3 + $0x8] sm:$0xff]  ;;  %v2094_v63 = vmul.bf16 %v2091_v58, %v9121_v46 }
 0x2ff   : > { %1866 = vst.msk [vmem:[#allocation3] sm:$0xff] %vm342_vm6, %v1864_v17  ;;  %v1865_v19 = vadd.f32 %v1863_v18, %v1858_v60  ;;  %v2266_v60 = vld [vmem:[#allocation2] sm:$0xc] }
 0x300   : > { %v2269_v13 = vmul.bf16 %v2266_v60, %v9126_v53 }
 0x301   : > { %1867 = vst.msk [vmem:[#allocation3 + $0x8] sm:$0xff] %vm342_vm6, %v1865_v19 }
 0x306   : > { %v1943_v21 = vld [vmem:[#allocation3] sm:$0xff] }
 0x307   : > { %v1945_v22 = vadd.f32 %v1943_v21, %v1936_v45 }
 0x308   : > { %v1944_v26 = vld [vmem:[#allocation3 + $0x8] sm:$0xff] }
 0x309   : > { %1947 = vst.msk [vmem:[#allocation3] sm:$0xff] %vm342_vm6, %v1945_v22  ;;  %v1946_v27 = vadd.f32 %v1944_v26, %v1939_v52 }
 0x30b   : > { %1948 = vst.msk [vmem:[#allocation3 + $0x8] sm:$0xff] %vm342_vm6, %v1946_v27 }
 0x310   : > { %v2041_v29 = vld [vmem:[#allocation3] sm:$0xff] }
 0x311   : > { %v2043_v30 = vadd.f32 %v2041_v29, %v2034_v2 }
 0x312   : > { %v2042_v31 = vld [vmem:[#allocation3 + $0x8] sm:$0xff] }
 0x313   : > { %2045 = vst.msk [vmem:[#allocation3] sm:$0xff] %vm342_vm6, %v2043_v30  ;;  %v2044_v32 = vadd.f32 %v2042_v31, %v2037_v4 }
 0x315   : > { %2046 = vst.msk [vmem:[#allocation3 + $0x8] sm:$0xff] %vm342_vm6, %v2044_v32 }
 0x31a   : > { %v2051_v35 = vld [vmem:[#allocation3] sm:$0xff] }
 0x31b   : > { %v2061_v39 = vadd.f32 %v7478_v33, %v2051_v35 }
 0x31c   : > { %v2052_v41 = vld [vmem:[#allocation3 + $0x8] sm:$0xff] }
 0x31d   : > { %v2071_v43 = vmul.f32 %v7480_v38, %v2061_v39  ;;  %v2062_v44 = vadd.f32 %v7478_v33, %v2052_v41  ;;  %v2538_v33 = vld [vmem:[#allocation2 + $0xc] sm:$0x1] }
 0x31f   : > { %v2073_v45 = vadd.f32 %v2071_v43, %v2049_v42  ;;  %v2072_v48 = vmul.f32 %v7480_v38, %v2062_v44  ;;  %v8878_v42 = vld [vmem:[%s10357_s1 + $0x158] sm:$0xff]  }
 0x321   : > { %vm2075_vm12 = vcmp.ge.f32.partialorder %v2073_v45, 0.0  ;;  %v2077_v49 = vmul.f32 0.2, %v2073_v45  ;;  %v2074_v50 = vadd.f32 %v2072_v48, %v2050_v47 }
 0x323   : > { %v2079_v51 = vsel %vm2075_vm12, %v2073_v45, %v2077_v49  ;;  %vm2076_vm13 = vcmp.ge.f32.partialorder %v2074_v50, 0.0  ;;  %v2078_v52 = vmul.f32 0.2, %v2074_v50 }
 0x324   : > { %v8005_v55 = vpack.c.bf16 %v2079_v51, %v2079_v51  ;;  %v2541_v51 = vmul.bf16 %v2538_v33, %v9155_v20  ;;  %v8883_v33 = vld [vmem:[%s10357_s1 + $0x160] sm:$0xff]  }
 0x325   : > { %v2080_v56 = vsel %vm2076_vm13, %v2074_v50, %v2078_v52 }
 0x326   : > { %2089 = vst.msk [vmem:[#allocation2 + $0x4] sm:$0xf] %vm226_vm0, %v8005_v55  ;;  %v8006_v57 = vpack.c.bf16 %v2080_v56, %v2080_v56 }
 0x328   : > { %2090 = vst.msk [vmem:[#allocation2 + $0x8] sm:$0xf] %vm226_vm0, %v8006_v57 }
 0x32d   : > { %v8874_v61 = vld [vmem:[#allocation2] sm:$0xfc]  }
 0x32e   : > { %v2092_v62 = vld [vmem:[#allocation2 + $0x4] sm:$0xf]  ;;  %v2201_v4 = vrot.slane %v8874_v61, 2 }
 0x32f   : > { %v2095_v0 = vmul.bf16 %v2092_v62, %v9160_v23  ;;  %v2365_v1 = vld [vmem:[#allocation2 + $0x4] sm:$0xf]  ;;  %v8875_v3 = vld [vmem:[#allocation2 + $0x8] ss:$0 sps:$4 sm:$0x33]  }
 0x330   : > { %v2267_v2 = vld [vmem:[#allocation2 + $0x4] sm:$0xf]  ;;  %v2368_v6 = vmul.bf16 %v2365_v1, %v9152_v14  ;;  %v2093_v8 = vld [vmem:[#allocation2 + $0x8] sm:$0x3]  ;;  %v2202_v15 = vrot.slane %v8875_v3, 2 }
 0x331   : > { %v2270_v7 = vmul.bf16 %v2267_v2, %v9178_v36  ;;  %v7487_v9 = vcombine.low %v2094_v63, %v2095_v0  ;;  %v2366_v11 = vld [vmem:[#allocation2 + $0x8] sm:$0xf]  ;;  %v2096_v17 = vmul.bf16 %v2093_v8, %v9162_v24  ;;  %v2536_v41 = vld [vmem:[#allocation2 + $0x4] sm:$0xf] }
 0x332   : > { %v2268_v12 = vld [vmem:[#allocation2 + $0x8] sm:$0x7]  ;;  %v2369_v18 = vmul.bf16 %v2366_v11, %v9164_v25  ;;  %v7514_v19 = vcombine.low %v2367_v5, %v2368_v6  ;;  %v2203_v29 = vsel %vm405_vm4, %v2201_v4, %v2202_v15  ;;  %v2539_v57 = vmul.bf16 %v2536_v41, %v9128_v54  ;;  %v8879_v63 = vld [vmem:[%s10357_s1 + $0x140] sm:$0xff]   ;;  %v8880_v5 = vld [vmem:[%s10357_s1 + $0x170] sm:$0xff]  }
 0x333   : > { %v2111_v21 = vshrl.u32 %v7487_v9, 16  ;;  %v2114_v22 = vshll.u32 %v7487_v9, 16  ;;  %v2271_v26 = vmul.bf16 %v2268_v12, %v9180_v37  ;;  %v7505_v27 = vcombine.low %v2269_v13, %v2270_v7  ;;  %8392 = vmatmul.mubr.msk.bf16.vlgmr.msra.gmra.mrb[36].mxu1 %vm342_vm6, %v2203_v29  ;;  %v2537_v50 = vld [vmem:[#allocation2 + $0x8] sm:$0xf]  ;;  %v8884_v41 = vld [vmem:[%s10357_s1 + $0x190] sm:$0xff]  }
 0x334   : > { %v7488_v30 = vcombine.low %v2096_v17, %v2096_v17  ;;  %v7515_v31 = vcombine.low %v2369_v18, %v2369_v18  ;;  %v2384_v32 = vshrl.u32 %v7514_v19, 16  ;;  %v2387_v38 = vshll.u32 %v7514_v19, 16  ;;  %8404 = vmatpush3.bf16.msra.mxu1 %v8876_v16  ;;  %8407 = vmatprep.mubr.msk.bf16.mxu1 %vm9019_vm5, %v9018_v10  ;;  %v2630_v13 = vld [vmem:[#allocation2 + $0x8] sm:$0xf]  ;;  %v8882_v19 = vld [vmem:[%s10357_s1 + $0x178] sm:$0xff]  }
 0x335   : > { %v2113_v34 = vrot.slane %v2111_v21, 1  ;;  %v2116_v35 = vrot.slane %v2114_v22, 2  ;;  %v7506_v39 = vcombine.low %v2271_v26, %v2271_v26  ;;  %8405 = vmatprep.subr.bf16.mxu1 %v9018_v10  ;;  %v2286_v60 = vshrl.u32 %v7505_v27, 16  ;;  %v8881_v15 = vld [vmem:[%s10357_s1 + $0x148] sm:$0xff]   ;;  %v2629_v22 = vld [vmem:[#allocation2 + $0x4] sm:$0xe] }
 0x336   : > { %v2119_v43 = vshrl.u32 %v7488_v30, 16  ;;  %v2122_v44 = vshll.u32 %v7488_v30, 16  ;;  %v2392_v45 = vshrl.u32 %v7515_v31, 16  ;;  %v2386_v47 = vrot.slane %v2384_v32, 3  ;;  %v2631_v26 = vld [vmem:[#allocation2 + $0xc] sm:$0x3] }
 0x337   : > { %v2389_v48 = vrot.slane %v2387_v38, 4  ;;  %v2395_v49 = vshll.u32 %v7515_v31, 16  ;;  %v2117_v58 = vor.u32 %v2116_v35, %v2113_v34  ;;  %v2294_v61 = vshrl.u32 %v7506_v39, 16 }
 0x338   : > { %v2121_v52 = vrot.slane %v2119_v43, 1  ;;  %v2124_v55 = vrot.slane %v2122_v44, 2  ;;  %v2394_v56 = vrot.slane %v2392_v45, 3  ;;  %8406 = vmatpush3.bf16.msra.mxu1 %v8878_v42  ;;  %v2289_v0 = vshll.u32 %v7505_v27, 16 }
 0x339   : > { %v2397_v59 = vrot.slane %v2395_v49, 4  ;;  %v2297_v1 = vshll.u32 %v7506_v39, 16  ;;  %v2540_v2 = vmul.bf16 %v2537_v50, %v9171_v28  ;;  %v2390_v3 = vor.u32 %v2389_v48, %v2386_v47  ;;  %8419 = vmatprep.subr.bf16.mxu1 %v9018_v10  ;;  %v8890_v43 = vld [vmem:[#allocation2 + $0xc] ss:$0 sps:$4 sm:$0x33]  }
 0x33a   : > { %v2125_v62 = vor.u32 %v2124_v55, %v2121_v52  ;;  %v7532_v6 = vcombine.low %v2541_v51, %v2541_v51  ;;  %v2296_v8 = vrot.slane %v2294_v61, 2  ;;  %v2288_v16 = vrot.slane %v2286_v60, 2  ;;  %v8889_v47 = vld [vmem:[#allocation2 + $0x4] sm:$0xfc]   ;;  %v8886_v51 = vld [vmem:[%s10357_s1 + $0x198] sm:$0xff]  }
 0x33b   : > { %v2398_v4 = vor.u32 %v2397_v59, %v2394_v56  ;;  %v2299_v9 = vrot.slane %v2297_v1, 3  ;;  %v7531_v11 = vcombine.low %v2539_v57, %v2540_v2  ;;  %v2291_v17 = vrot.slane %v2289_v0, 3  ;;  %v2809_v48 = vld [vmem:[#allocation2 + $0x8] sm:$0xf]  ;;  %v2808_v52 = vld [vmem:[#allocation2 + $0x4] sm:$0xc] }
 0x33c   : > { %v2126_v7 = vsel %vm312_vm7, %v2117_v58, %v2125_v62  ;;  %v2563_v21 = vshll.u32 %v7532_v6, 16  ;;  %v2633_v31 = vmul.bf16 %v2630_v13, %v9160_v23  ;;  %v2632_v35 = vmul.bf16 %v2629_v22, %v9121_v46  ;;  %v8885_v49 = vld [vmem:[%s10357_s1 + $0x168] sm:$0xff]   ;;  %v8888_v61 = vld [vmem:[%s10357_s1 + $0x180] sm:$0xff]  }
 0x33d   : > { %8384 = vmatmul.mubr.msk.bf16.vlgmr.msra.gmra.mrb[36].mxu0 %vm342_vm6, %v2126_v7  ;;  %v2399_v12 = vsel %vm652_vm8, %v2390_v3, %v2398_v4  ;;  %v2558_v18 = vshll.u32 %v7531_v11, 16  ;;  %v2300_v27 = vor.u32 %v2299_v9, %v2296_v8  ;;  %v2556_v29 = vshrl.u32 %v7531_v11, 16  ;;  %v2810_v55 = vld [vmem:[#allocation2 + $0xc] sm:$0x7]  ;;  %v8887_v2 = vld [vmem:[#allocation2 + $0x4] sm:$0xff]  }
 0x33e   : > { %8396 = vmatpush3.bf16.msra.mxu0 %v8879_v63  ;;  %8408 = vmatmul.mubr.msk.bf16.vlgmr.msra.gmra.mrb[40].mxu1 %vm342_vm6, %v2399_v12  ;;  %v2292_v32 = vor.u32 %v2291_v17, %v2288_v16  ;;  %v2634_v38 = vmul.bf16 %v2631_v26, %v9162_v24  ;;  %v2565_v39 = vrot.slane %v2563_v21, 1  ;;  %v7540_v44 = vcombine.low %v2632_v35, %v2633_v31  ;;  %v8891_v7 = vld [vmem:[%s10357_s1 + $0x188] sm:$0xff]   ;;  %v8892_v17 = vld [vmem:[%s10357_s1 + $0x1a0] sm:$0xff]   ;;  %v8896_v35 = vld [vmem:[%s10357_s1 + $0x1b0] sm:$0xff]  }
 0x33f   : > { %8420 = vmatpush3.bf16.msra.mxu1 %v8880_v5  ;;  %8397 = vmatprep.subr.bf16.mxu0 %v9018_v10  ;;  %v2560_v30 = vrot.slane %v2558_v18, 1  ;;  %v2812_v58 = vmul.bf16 %v2809_v48, %v9178_v36  ;;  %v2743_v59 = vrot.slane %v8889_v47, 2  ;;  %v2744_v60 = vrot.slane %v8890_v43, 2 }
 0x340   : > { %8421 = vmatprep.subr.bf16.mxu1 %v9018_v10  ;;  %8399 = vmatprep.mubr.msk.bf16.mxu0 %vm9019_vm5, %v9018_v10  ;;  %v2301_v42 = vsel %vm538_vm2, %v2292_v32, %v2300_v27  ;;  %v7541_v50 = vcombine.low %v2634_v38, %v2634_v38  ;;  %v2649_v56 = vshrl.u32 %v7540_v44, 16  ;;  %v2652_v57 = vshll.u32 %v7540_v44, 16  ;;  %v8893_v27 = vld [vmem:[%s10357_s1 + $0x1a8] sm:$0xff]  }
 0x341   : > { %8423 = vmatprep.mubr.msk.bf16.mxu1 %vm9019_vm5, %v9018_v10  ;;  %v2561_v34 = vor.u32 %v2560_v30, %v2556_v29  ;;  %v2811_v0 = vmul.bf16 %v2808_v52, %v9126_v53  ;;  %v2813_v1 = vmul.bf16 %v2810_v55, %v9180_v37  ;;  %v2745_v6 = vsel %vm405_vm4, %v2743_v59, %v2744_v60  ;;  %v8895_v38 = vld [vmem:[%s10357_s1 + $0x1c8] sm:$0xff]  }
 0x342   : > { %8398 = vmatpush3.bf16.msra.mxu0 %v8881_v15  ;;  %v2657_v62 = vshrl.u32 %v7541_v50, 16  ;;  %v2660_v63 = vshll.u32 %v7541_v50, 16  ;;  %v2651_v3 = vrot.slane %v2649_v56, 1  ;;  %v2654_v4 = vrot.slane %v2652_v57, 2 }
 0x343   : > { %8422 = vmatpush3.bf16.msra.mxu1 %v8882_v19  ;;  %8411 = vmatprep.subr.bf16.mxu0 %v9018_v10  ;;  %v2566_v45 = vsel %vm838_vm9, %v2561_v34, %v2565_v39  ;;  %v7558_v5 = vcombine.low %v2811_v0, %v2812_v58  ;;  %v7559_v11 = vcombine.low %v2813_v1, %v2813_v1  ;;  %v8894_v34 = vld [vmem:[%s10357_s1 + $0x1c0] sm:$0xff]   ;;  %v8900_v39 = vld [vmem:[%s10357_s1 + $0x1b8] sm:$0xff]  }
 0x344   : > { %8435 = vmatprep.subr.bf16.mxu1 %v9018_v10  ;;  %v2659_v8 = vrot.slane %v2657_v62, 1  ;;  %v2662_v9 = vrot.slane %v2660_v63, 2  ;;  %v2655_v12 = vor.u32 %v2654_v4, %v2651_v3 }
 0x345   : > { %8400 = vmatmul.mubr.msk.bf16.vlgmr.msra.gmra.mrb[40].mxu0 %vm342_vm6, %v2301_v42  ;;  %v2828_v13 = vshrl.u32 %v7558_v5, 16  ;;  %v2831_v15 = vshll.u32 %v7558_v5, 16  ;;  %v2836_v18 = vshrl.u32 %v7559_v11, 16  ;;  %v2839_v19 = vshll.u32 %v7559_v11, 16 }
 0x346   : > { %8412 = vmatpush3.bf16.msra.mxu0 %v8883_v33  ;;  %8424 = vmatmul.mubr.msk.bf16.vlgmr.msra.gmra.mrb[44].mxu1 %vm342_vm6, %v2566_v45  ;;  %v2663_v16 = vor.u32 %v2662_v9, %v2659_v8 }
 0x347   : > { %8436 = vmatpush3.bf16.msra.mxu1 %v8884_v41  ;;  %8413 = vmatprep.subr.bf16.mxu0 %v9018_v10  ;;  %v2830_v22 = vrot.slane %v2828_v13, 2  ;;  %v2833_v26 = vrot.slane %v2831_v15, 3  ;;  %v2838_v29 = vrot.slane %v2836_v18, 2  ;;  %v2841_v30 = vrot.slane %v2839_v19, 3 }
 0x348   : > { %8437 = vmatprep.subr.bf16.mxu1 %v9018_v10  ;;  %8415 = vmatprep.mubr.msk.bf16.mxu0 %vm9019_vm5, %v9018_v10  ;;  %v2664_v21 = vsel %vm312_vm7, %v2655_v12, %v2663_v16 }
 0x349   : > { %8439 = vmatprep.mubr.msk.bf16.mxu1 %vm9019_vm5, %v9018_v10  ;;  %v2834_v31 = vor.u32 %v2833_v26, %v2830_v22  ;;  %v2842_v32 = vor.u32 %v2841_v30, %v2838_v29 }
 0x34a   : > { %8414 = vmatpush3.bf16.msra.mxu0 %v8885_v49 }
 0x34b   : > { %8438 = vmatpush3.bf16.msra.mxu1 %v8886_v51  ;;  %8427 = vmatprep.subr.bf16.mxu0 %v9018_v10  ;;  %v2843_v33 = vsel %vm538_vm2, %v2834_v31, %v2842_v32 }
 0x34c   : > { %8451 = vmatprep.subr.bf16.mxu1 %v9018_v10 }
 0x34d   : > { %8416 = vmatmul.mubr.msk.bf16.vlgmr.msra.gmra.mrb[44].mxu0 %vm342_vm6, %v8887_v2 }
 0x34e   : > { %8428 = vmatpush3.bf16.msra.mxu0 %v8888_v61  ;;  %8440 = vmatmul.mubr.msk.bf16.vlgmr.msra.gmra.mrb[48].mxu1 %vm342_vm6, %v2745_v6 }
 0x34f   : > { %8429 = vmatprep.subr.bf16.mxu0 %v9018_v10  ;;  %8431 = vmatprep.mubr.msk.bf16.mxu0 %vm9019_vm5, %v9018_v10 }
 0x350   : > { %8455 = vmatprep.mubr.msk.bf16.mxu1 %vm9019_vm5, %v9018_v10  ;;  %8452 = vmatpush3.bf16.msra.mxu1 %v8896_v35 }
 0x351   : > { %8453 = vmatprep.subr.bf16.mxu1 %v9018_v10 }
 0x352   : > { %8430 = vmatpush3.bf16.msra.mxu0 %v8891_v7 }
 0x353   : > { %8443 = vmatprep.subr.bf16.mxu0 %v9018_v10 }
 0x354   : > { %8454 = vmatpush3.bf16.msra.mxu1 %v8900_v39 }
 0x355   : > { %8432 = vmatmul.mubr.msk.bf16.vlgmr.msra.gmra.mrb[48].mxu0 %vm342_vm6, %v2664_v21  ;;  %8467 = vmatprep.subr.bf16.mxu1 %v9018_v10 }
 0x356   : > { %8444 = vmatpush3.bf16.msra.mxu0 %v8892_v17  ;;  %8447 = vmatprep.mubr.msk.bf16.mxu0 %vm9019_vm5, %v9018_v10 }
 0x357   : > { %8445 = vmatprep.subr.bf16.mxu0 %v9018_v10 }
 0x35a   : > { %8446 = vmatpush3.bf16.msra.mxu0 %v8893_v27 }
 0x35b   : > { %8459 = vmatprep.subr.bf16.mxu0 %v9018_v10 }
 0x35d   : > { %8448 = vmatmul.mubr.msk.bf16.vlgmr.msra.gmra.mrb[52].mxu0 %vm342_vm6, %v2843_v33 }
 0x35e   : > { %8463 = vmatprep.mubr.msk.bf16.mxu0 %vm9019_vm5, %v9018_v10  ;;  %8460 = vmatpush3.bf16.msra.mxu0 %v8894_v34 }
 0x35f   : > { %8461 = vmatprep.subr.bf16.mxu0 %v9018_v10 }
 0x362   : > { %8462 = vmatpush3.bf16.msra.mxu0 %v8895_v38 }
 0x363   : > { %8475 = vmatprep.subr.bf16.mxu0 %v9018_v10 }
 0x406   : > { %v2253_v41 = vpop.f32.mrb[36].mxu1 }
 0x407   : > { %v8393_v42 = vpop.f32.mrb[37].mxu1 }
 0x408   : > { %v2256_v43 = vpop.f32.mrb[38].mxu1 }
 0x409   : > { %v8394_v44 = vpop.f32.mrb[39].mxu1 }
 0x410   : > { %v2176_v45 = vpop.f32.mrb[36].mxu0 }
 0x411   : > { %2183 = vst.msk [vmem:[#allocation3] sm:$0xff] %vm342_vm6, %v2176_v45  ;;  %v8385_v47 = vpop.f32.mrb[37].mxu0  ;;  %v2449_v48 = vpop.f32.mrb[40].mxu1 }
 0x412   : > { %v2179_v49 = vpop.f32.mrb[38].mxu0  ;;  %v8409_v50 = vpop.f32.mrb[41].mxu1 }
 0x413   : > { %2184 = vst.msk [vmem:[#allocation3 + $0x8] sm:$0xff] %vm342_vm6, %v2179_v49  ;;  %v8386_v51 = vpop.f32.mrb[39].mxu0  ;;  %v2452_v52 = vpop.f32.mrb[42].mxu1 }
 0x414   : > { %v8410_v55 = vpop.f32.mrb[43].mxu1 }
 0x418   : > { %v2260_v56 = vld [vmem:[#allocation3] sm:$0xff]  ;;  %v2351_v57 = vpop.f32.mrb[40].mxu0 }
 0x419   : > { %v2262_v58 = vadd.f32 %v2260_v56, %v2253_v41  ;;  %v8401_v59 = vpop.f32.mrb[41].mxu0  ;;  %v2616_v60 = vpop.f32.mrb[44].mxu1 }
 0x41a   : > { %v2261_v61 = vld [vmem:[#allocation3 + $0x8] sm:$0xff]  ;;  %v2354_v62 = vpop.f32.mrb[42].mxu0  ;;  %v8425_v63 = vpop.f32.mrb[45].mxu1 }
 0x41b   : > { %2264 = vst.msk [vmem:[#allocation3] sm:$0xff] %vm342_vm6, %v2262_v58  ;;  %v2263_v0 = vadd.f32 %v2261_v61, %v2256_v43  ;;  %v8402_v1 = vpop.f32.mrb[43].mxu0  ;;  %v2619_v2 = vpop.f32.mrb[46].mxu1  ;;  %v7564_v61 = vld [vmem:[%s10358_s2 + $0x2] ss:$0 sm:$0xff] }
 0x41c   : > { %v8426_v3 = vpop.f32.mrb[47].mxu1 }
 0x41d   : > { %2265 = vst.msk [vmem:[#allocation3 + $0x8] sm:$0xff] %vm342_vm6, %v2263_v0  ;;  %v7566_v0 = vld [vmem:[%s10359_s3 + $0x2] ss:$0 sm:$0xff] }
 0x420   : > { %v2523_v4 = vpop.f32.mrb[44].mxu0 }
 0x421   : > { %v8417_v5 = vpop.f32.mrb[45].mxu0  ;;  %v2795_v6 = vpop.f32.mrb[48].mxu1 }
 0x422   : > { %v2358_v7 = vld [vmem:[#allocation3] sm:$0xff]  ;;  %v2526_v8 = vpop.f32.mrb[46].mxu0  ;;  %v8441_v9 = vpop.f32.mrb[49].mxu1 }
 0x423   : > { %v2360_v11 = vadd.f32 %v2358_v7, %v2351_v57  ;;  %v8418_v12 = vpop.f32.mrb[47].mxu0  ;;  %v2798_v13 = vpop.f32.mrb[50].mxu1 }
 0x424   : > { %v2359_v15 = vld [vmem:[#allocation3 + $0x8] sm:$0xff]  ;;  %v8442_v16 = vpop.f32.mrb[51].mxu1 }
 0x425   : > { %2362 = vst.msk [vmem:[#allocation3] sm:$0xff] %vm342_vm6, %v2360_v11  ;;  %v2361_v17 = vadd.f32 %v2359_v15, %v2354_v62  ;;  %v2906_v62 = vld [vmem:[#allocation2 + $0x4] sm:$0xff]  }
 0x426   : > { %v2908_v3 = vunpack.c.l.bf16 %v2906_v62  ;;  %v2909_v7 = vunpack.c.h.bf16 %v2906_v62 }
 0x427   : > { %2363 = vst.msk [vmem:[#allocation3 + $0x8] sm:$0xff] %vm342_vm6, %v2361_v17 }
 0x428   : > { %v2714_v18 = vpop.f32.mrb[48].mxu0 }
 0x429   : > { %v8433_v19 = vpop.f32.mrb[49].mxu0 }
 0x42a   : > { %v2717_v21 = vpop.f32.mrb[50].mxu0  ;;  %v3223_v19 = vld [vmem:[#allocation2] sm:$0x8] }
 0x42b   : > { %v8434_v22 = vpop.f32.mrb[51].mxu0 }
 0x42c   : > { %v2456_v26 = vld [vmem:[#allocation3] sm:$0xff] }
 0x42d   : > { %v2458_v27 = vadd.f32 %v2456_v26, %v2449_v48 }
 0x42e   : > { %v2457_v29 = vld [vmem:[#allocation3 + $0x8] sm:$0xff] }
 0x42f   : > { %2460 = vst.msk [vmem:[#allocation3] sm:$0xff] %vm342_vm6, %v2458_v27  ;;  %v2459_v30 = vadd.f32 %v2457_v29, %v2452_v52 }
 0x430   : > { %v2893_v31 = vpop.f32.mrb[52].mxu0 }
 0x431   : > { %2461 = vst.msk [vmem:[#allocation3 + $0x8] sm:$0xff] %vm342_vm6, %v2459_v30  ;;  %v8449_v32 = vpop.f32.mrb[53].mxu0 }
 0x432   : > { %v2896_v33 = vpop.f32.mrb[54].mxu0 }
 0x433   : > { %v8450_v34 = vpop.f32.mrb[55].mxu0 }
 0x434   : > { %v3226_v34 = vmul.bf16 %v3223_v19, %v9119_v40 }
 0x436   : > { %v2530_v35 = vld [vmem:[#allocation3] sm:$0xff] }
 0x437   : > { %v2532_v38 = vadd.f32 %v2530_v35, %v2523_v4 }
 0x438   : > { %v2531_v39 = vld [vmem:[#allocation3 + $0x8] sm:$0xff] }
 0x439   : > { %2534 = vst.msk [vmem:[#allocation3] sm:$0xff] %vm342_vm6, %v2532_v38  ;;  %v2533_v41 = vadd.f32 %v2531_v39, %v2526_v8 }
 0x43b   : > { %2535 = vst.msk [vmem:[#allocation3 + $0x8] sm:$0xff] %vm342_vm6, %v2533_v41 }
 0x440   : > { %v2623_v42 = vld [vmem:[#allocation3] sm:$0xff] }
 0x441   : > { %v2625_v43 = vadd.f32 %v2623_v42, %v2616_v60 }
 0x442   : > { %v2624_v44 = vld [vmem:[#allocation3 + $0x8] sm:$0xff] }
 0x443   : > { %2627 = vst.msk [vmem:[#allocation3] sm:$0xff] %vm342_vm6, %v2625_v43  ;;  %v2626_v45 = vadd.f32 %v2624_v44, %v2619_v2 }
 0x445   : > { %2628 = vst.msk [vmem:[#allocation3 + $0x8] sm:$0xff] %vm342_vm6, %v2626_v45 }
 0x44a   : > { %v2721_v47 = vld [vmem:[#allocation3] sm:$0xff] }
 0x44b   : > { %v2723_v48 = vadd.f32 %v2721_v47, %v2714_v18  ;;  %v2950_v18 = vld [vmem:[#allocation2] sm:$0xe] }
 0x44c   : > { %v2722_v49 = vld [vmem:[#allocation3 + $0x8] sm:$0xff]  ;;  %v2953_v27 = vmul.bf16 %v2950_v18, %v9121_v46  ;;  %v8899_v47 = vld [vmem:[%s10357_s1 + $0x1e0] sm:$0xff]  }
 0x44d   : > { %2725 = vst.msk [vmem:[#allocation3] sm:$0xff] %vm342_vm6, %v2723_v48  ;;  %v2724_v50 = vadd.f32 %v2722_v49, %v2717_v21  ;;  %v3125_v21 = vld [vmem:[#allocation2] sm:$0xc] }
 0x44e   : > { %v3128_v44 = vmul.bf16 %v3125_v21, %v9126_v53 }
 0x44f   : > { %2726 = vst.msk [vmem:[#allocation3 + $0x8] sm:$0xff] %vm342_vm6, %v2724_v50 }
 0x454   : > { %v2802_v51 = vld [vmem:[#allocation3] sm:$0xff] }
 0x455   : > { %v2804_v52 = vadd.f32 %v2802_v51, %v2795_v6 }
 0x456   : > { %v2803_v55 = vld [vmem:[#allocation3 + $0x8] sm:$0xff] }
 0x457   : > { %2806 = vst.msk [vmem:[#allocation3] sm:$0xff] %vm342_vm6, %v2804_v52  ;;  %v2805_v56 = vadd.f32 %v2803_v55, %v2798_v13 }
 0x459   : > { %2807 = vst.msk [vmem:[#allocation3 + $0x8] sm:$0xff] %vm342_vm6, %v2805_v56 }
 0x45e   : > { %v2900_v57 = vld [vmem:[#allocation3] sm:$0xff] }
 0x45f   : > { %v2902_v58 = vadd.f32 %v2900_v57, %v2893_v31 }
 0x460   : > { %v2901_v59 = vld [vmem:[#allocation3 + $0x8] sm:$0xff] }
 0x461   : > { %2904 = vst.msk [vmem:[#allocation3] sm:$0xff] %vm342_vm6, %v2902_v58  ;;  %v2903_v60 = vadd.f32 %v2901_v59, %v2896_v33 }
 0x463   : > { %2905 = vst.msk [vmem:[#allocation3 + $0x8] sm:$0xff] %vm342_vm6, %v2903_v60 }
 0x468   : > { %v2910_v63 = vld [vmem:[#allocation3] sm:$0xff] }
 0x469   : > { %v2920_v1 = vadd.f32 %v7564_v61, %v2910_v63 }
 0x46a   : > { %v2911_v2 = vld [vmem:[#allocation3 + $0x8] sm:$0xff] }
 0x46b   : > { %v2930_v4 = vmul.f32 %v7566_v0, %v2920_v1  ;;  %v2921_v5 = vadd.f32 %v7564_v61, %v2911_v2  ;;  %v3397_v61 = vld [vmem:[#allocation2 + $0xc] sm:$0x1] }
 0x46d   : > { %v2932_v6 = vadd.f32 %v2930_v4, %v2908_v3  ;;  %v2931_v8 = vmul.f32 %v7566_v0, %v2921_v5  ;;  %v8901_v3 = vld [vmem:[%s10357_s1 + $0x1e8] sm:$0xff]  }
 0x46f   : > { %vm2934_vm14 = vcmp.ge.f32.partialorder %v2932_v6, 0.0  ;;  %v2936_v9 = vmul.f32 0.2, %v2932_v6  ;;  %v2933_v11 = vadd.f32 %v2931_v8, %v2909_v7 }
 0x471   : > { %v2938_v12 = vsel %vm2934_vm14, %v2932_v6, %v2936_v9  ;;  %vm2935_vm15 = vcmp.ge.f32.partialorder %v2933_v11, 0.0  ;;  %v2937_v13 = vmul.f32 0.2, %v2933_v11 }
 0x472   : > { %v8007_v15 = vpack.c.bf16 %v2938_v12, %v2938_v12  ;;  %v3400_v12 = vmul.bf16 %v3397_v61, %v9155_v20  ;;  %v8906_v61 = vld [vmem:[%s10357_s1 + $0x1f0] sm:$0xff]  }
 0x473   : > { %v2939_v16 = vsel %vm2935_vm15, %v2933_v11, %v2937_v13 }
 0x474   : > { %2948 = vst.msk [vmem:[#allocation2 + $0x4] sm:$0xf] %vm226_vm0, %v8007_v15  ;;  %v8008_v17 = vpack.c.bf16 %v2939_v16, %v2939_v16 }
 0x476   : > { %2949 = vst.msk [vmem:[#allocation2 + $0x8] sm:$0xf] %vm226_vm0, %v8008_v17 }
 0x47b   : > { %v8897_v22 = vld [vmem:[#allocation2] sm:$0xfc]  }
 0x47c   : > { %v2951_v26 = vld [vmem:[#allocation2 + $0x4] sm:$0xf]  ;;  %v3060_v33 = vrot.slane %v8897_v22, 2 }
 0x47d   : > { %v2954_v29 = vmul.bf16 %v2951_v26, %v9160_v23  ;;  %v3224_v30 = vld [vmem:[#allocation2 + $0x4] sm:$0xf]  ;;  %v8898_v32 = vld [vmem:[#allocation2 + $0x8] ss:$0 sps:$4 sm:$0x33]  }
 0x47e   : > { %v3126_v31 = vld [vmem:[#allocation2 + $0x4] sm:$0xf]  ;;  %v3227_v35 = vmul.bf16 %v3224_v30, %v9152_v14  ;;  %v2952_v39 = vld [vmem:[#allocation2 + $0x8] sm:$0x3]  ;;  %v3061_v45 = vrot.slane %v8898_v32, 2 }
 0x47f   : > { %v3129_v38 = vmul.bf16 %v3126_v31, %v9178_v36  ;;  %v7573_v41 = vcombine.low %v2953_v27, %v2954_v29  ;;  %v3225_v42 = vld [vmem:[#allocation2 + $0x8] sm:$0xf]  ;;  %v2955_v48 = vmul.bf16 %v2952_v39, %v9162_v24  ;;  %v3395_v2 = vld [vmem:[#allocation2 + $0x4] sm:$0xf]  ;;  %v8902_v27 = vld [vmem:[%s10357_s1 + $0x1d0] sm:$0xff]  }
 0x480   : > { %v3127_v43 = vld [vmem:[#allocation2 + $0x8] sm:$0x7]  ;;  %v3228_v49 = vmul.bf16 %v3225_v42, %v9164_v25  ;;  %v7600_v50 = vcombine.low %v3226_v34, %v3227_v35  ;;  %v3062_v57 = vsel %vm405_vm4, %v3060_v33, %v3061_v45  ;;  %v3398_v17 = vmul.bf16 %v3395_v2, %v9128_v54  ;;  %v8903_v34 = vld [vmem:[%s10357_s1 + $0x200] sm:$0xff]   ;;  %v8904_v45 = vld [vmem:[%s10357_s1 + $0x1d8] sm:$0xff]  }
 0x481   : > { %v2970_v51 = vshrl.u32 %v7573_v41, 16  ;;  %v2973_v52 = vshll.u32 %v7573_v41, 16  ;;  %v3130_v55 = vmul.bf16 %v3127_v43, %v9180_v37  ;;  %v7591_v56 = vcombine.low %v3128_v44, %v3129_v38  ;;  %8464 = vmatmul.mubr.msk.bf16.vlgmr.msra.gmra.mrb[56].mxu0 %vm342_vm6, %v3062_v57  ;;  %v3396_v11 = vld [vmem:[#allocation2 + $0x8] sm:$0xf]  ;;  %v8907_v2 = vld [vmem:[%s10357_s1 + $0x220] sm:$0xff]  }
 0x482   : > { %v7574_v58 = vcombine.low %v2955_v48, %v2955_v48  ;;  %v7601_v59 = vcombine.low %v3228_v49, %v3228_v49  ;;  %v3243_v60 = vshrl.u32 %v7600_v50, 16  ;;  %v3246_v0 = vshll.u32 %v7600_v50, 16  ;;  %8476 = vmatpush3.bf16.msra.mxu0 %v8899_v47  ;;  %8479 = vmatprep.mubr.msk.bf16.mxu0 %vm9019_vm5, %v9018_v10  ;;  %v3489_v44 = vld [vmem:[#allocation2 + $0x8] sm:$0xf] }
 0x483   : > { %v2972_v62 = vrot.slane %v2970_v51, 1  ;;  %v2975_v63 = vrot.slane %v2973_v52, 2  ;;  %v7592_v1 = vcombine.low %v3130_v55, %v3130_v55  ;;  %8477 = vmatprep.subr.bf16.mxu0 %v9018_v10  ;;  %v3145_v21 = vshrl.u32 %v7591_v56, 16  ;;  %v8905_v50 = vld [vmem:[%s10357_s1 + $0x208] sm:$0xff]   ;;  %v3488_v52 = vld [vmem:[#allocation2 + $0x4] sm:$0xe] }
 0x484   : > { %v2978_v4 = vshrl.u32 %v7574_v58, 16  ;;  %v2981_v5 = vshll.u32 %v7574_v58, 16  ;;  %v3251_v6 = vshrl.u32 %v7601_v59, 16  ;;  %v3245_v7 = vrot.slane %v3243_v60, 3  ;;  %v3490_v55 = vld [vmem:[#allocation2 + $0xc] sm:$0x3] }
 0x485   : > { %v3248_v8 = vrot.slane %v3246_v0, 4  ;;  %v3254_v9 = vshll.u32 %v7601_v59, 16  ;;  %v2976_v18 = vor.u32 %v2975_v63, %v2972_v62  ;;  %v3153_v22 = vshrl.u32 %v7592_v1, 16 }
 0x486   : > { %v2980_v13 = vrot.slane %v2978_v4, 1  ;;  %v2983_v15 = vrot.slane %v2981_v5, 2  ;;  %v3253_v16 = vrot.slane %v3251_v6, 3  ;;  %8478 = vmatpush3.bf16.msra.mxu0 %v8901_v3  ;;  %v3148_v29 = vshll.u32 %v7591_v56, 16 }
 0x487   : > { %v3256_v19 = vrot.slane %v3254_v9, 4  ;;  %v3156_v30 = vshll.u32 %v7592_v1, 16  ;;  %v3399_v31 = vmul.bf16 %v3396_v11, %v9171_v28  ;;  %v3249_v32 = vor.u32 %v3248_v8, %v3245_v7  ;;  %8491 = vmatprep.subr.bf16.mxu0 %v9018_v10  ;;  %v8913_v4 = vld [vmem:[#allocation2 + $0xc] ss:$0 sps:$4 sm:$0x33]   ;;  %v8908_v9 = vld [vmem:[%s10357_s1 + $0x1f8] sm:$0xff]  }
 0x488   : > { %v2984_v26 = vor.u32 %v2983_v15, %v2980_v13  ;;  %v7618_v35 = vcombine.low %v3400_v12, %v3400_v12  ;;  %v3155_v39 = vrot.slane %v3153_v22, 2  ;;  %v3147_v47 = vrot.slane %v3145_v21, 2  ;;  %v8912_v7 = vld [vmem:[#allocation2 + $0x4] sm:$0xfc]   ;;  %v3669_v15 = vld [vmem:[#allocation2 + $0xc] sm:$0x7] }
 0x489   : > { %v3257_v33 = vor.u32 %v3256_v19, %v3253_v16  ;;  %v3158_v41 = vrot.slane %v3156_v30, 3  ;;  %v7617_v42 = vcombine.low %v3398_v17, %v3399_v31  ;;  %v3150_v48 = vrot.slane %v3148_v29, 3  ;;  %v3668_v8 = vld [vmem:[#allocation2 + $0x8] sm:$0xf]  ;;  %v3667_v13 = vld [vmem:[#allocation2 + $0x4] sm:$0xc] }
 0x48a   : > { %v2985_v38 = vsel %vm312_vm7, %v2976_v18, %v2984_v26  ;;  %v3422_v51 = vshll.u32 %v7618_v35, 16  ;;  %v3492_v59 = vmul.bf16 %v3489_v44, %v9160_v23  ;;  %v3491_v63 = vmul.bf16 %v3488_v52, %v9121_v46  ;;  %v8909_v12 = vld [vmem:[%s10357_s1 + $0x228] sm:$0xff]   ;;  %v8911_v22 = vld [vmem:[%s10357_s1 + $0x210] sm:$0xff]  }
 0x48b   : > { %8456 = vmatmul.mubr.msk.bf16.vlgmr.msra.gmra.mrb[52].mxu1 %vm342_vm6, %v2985_v38  ;;  %v3258_v43 = vsel %vm652_vm8, %v3249_v32, %v3257_v33  ;;  %v3417_v49 = vshll.u32 %v7617_v42, 16  ;;  %v3159_v56 = vor.u32 %v3158_v41, %v3155_v39  ;;  %v3415_v57 = vshrl.u32 %v7617_v42, 16  ;;  %v8910_v31 = vld [vmem:[#allocation2 + $0x4] sm:$0xff]   ;;  %v8914_v38 = vld [vmem:[%s10357_s1 + $0x218] sm:$0xff]  }
 0x48c   : > { %8468 = vmatpush3.bf16.msra.mxu1 %v8902_v27  ;;  %8480 = vmatmul.mubr.msk.bf16.vlgmr.msra.gmra.mrb[60].mxu0 %vm342_vm6, %v3258_v43  ;;  %v3151_v60 = vor.u32 %v3150_v48, %v3147_v47  ;;  %v3493_v0 = vmul.bf16 %v3490_v55, %v9162_v24  ;;  %v3424_v1 = vrot.slane %v3422_v51, 1  ;;  %v7626_v5 = vcombine.low %v3491_v63, %v3492_v59  ;;  %v8915_v48 = vld [vmem:[%s10357_s1 + $0x230] sm:$0xff]   ;;  %v8919_v63 = vld [vmem:[%s10357_s1 + $0x240] sm:$0xff]  }
 0x48d   : > { %8492 = vmatpush3.bf16.msra.mxu0 %v8903_v34  ;;  %8469 = vmatprep.subr.bf16.mxu1 %v9018_v10  ;;  %v3419_v58 = vrot.slane %v3417_v49, 1  ;;  %v3671_v18 = vmul.bf16 %v3668_v8, %v9178_v36  ;;  %v3602_v19 = vrot.slane %v8912_v7, 2  ;;  %v3603_v21 = vrot.slane %v8913_v4, 2 }
 0x48e   : > { %8493 = vmatprep.subr.bf16.mxu0 %v9018_v10  ;;  %8471 = vmatprep.mubr.msk.bf16.mxu1 %vm9019_vm5, %v9018_v10  ;;  %v3160_v3 = vsel %vm538_vm2, %v3151_v60, %v3159_v56  ;;  %v7627_v11 = vcombine.low %v3493_v0, %v3493_v0  ;;  %v3508_v16 = vshrl.u32 %v7626_v5, 16  ;;  %v3511_v17 = vshll.u32 %v7626_v5, 16  ;;  %v8916_v56 = vld [vmem:[%s10357_s1 + $0x238] sm:$0xff]  }
 0x48f   : > { %8495 = vmatprep.mubr.msk.bf16.mxu0 %vm9019_vm5, %v9018_v10  ;;  %v3420_v62 = vor.u32 %v3419_v58, %v3415_v57  ;;  %v3670_v29 = vmul.bf16 %v3667_v13, %v9126_v53  ;;  %v3672_v30 = vmul.bf16 %v3669_v15, %v9180_v37  ;;  %v3604_v35 = vsel %vm405_vm4, %v3602_v19, %v3603_v21  ;;  %v8918_v0 = vld [vmem:[%s10357_s1 + $0x258] sm:$0xff]  }
 0x490   : > { %8470 = vmatpush3.bf16.msra.mxu1 %v8904_v45  ;;  %v3516_v26 = vshrl.u32 %v7627_v11, 16  ;;  %v3519_v27 = vshll.u32 %v7627_v11, 16  ;;  %v3510_v32 = vrot.slane %v3508_v16, 1  ;;  %v3513_v33 = vrot.slane %v3511_v17, 2 }
 0x491   : > { %8494 = vmatpush3.bf16.msra.mxu0 %v8905_v50  ;;  %8483 = vmatprep.subr.bf16.mxu1 %v9018_v10  ;;  %v3425_v6 = vsel %vm838_vm9, %v3420_v62, %v3424_v1  ;;  %v7644_v34 = vcombine.low %v3670_v29, %v3671_v18  ;;  %v7645_v42 = vcombine.low %v3672_v30, %v3672_v30  ;;  %v8917_v62 = vld [vmem:[%s10357_s1 + $0x250] sm:$0xff]   ;;  %v8923_v1 = vld [vmem:[%s10357_s1 + $0x248] sm:$0xff]  }
 0x492   : > { %8507 = vmatprep.subr.bf16.mxu0 %v9018_v10  ;;  %v3518_v39 = vrot.slane %v3516_v26, 1  ;;  %v3521_v41 = vrot.slane %v3519_v27, 2  ;;  %v3514_v43 = vor.u32 %v3513_v33, %v3510_v32 }
 0x493   : > { %8472 = vmatmul.mubr.msk.bf16.vlgmr.msra.gmra.mrb[56].mxu1 %vm342_vm6, %v3160_v3  ;;  %v3687_v44 = vshrl.u32 %v7644_v34, 16  ;;  %v3690_v45 = vshll.u32 %v7644_v34, 16  ;;  %v3695_v49 = vshrl.u32 %v7645_v42, 16  ;;  %v3698_v50 = vshll.u32 %v7645_v42, 16 }
 0x494   : > { %8484 = vmatpush3.bf16.msra.mxu1 %v8906_v61  ;;  %8496 = vmatmul.mubr.msk.bf16.vlgmr.msra.gmra.mrb[64].mxu0 %vm342_vm6, %v3425_v6  ;;  %v3522_v47 = vor.u32 %v3521_v41, %v3518_v39 }
 0x495   : > { %8508 = vmatpush3.bf16.msra.mxu0 %v8907_v2  ;;  %8485 = vmatprep.subr.bf16.mxu1 %v9018_v10  ;;  %v3689_v52 = vrot.slane %v3687_v44, 2  ;;  %v3692_v55 = vrot.slane %v3690_v45, 3  ;;  %v3697_v57 = vrot.slane %v3695_v49, 2  ;;  %v3700_v58 = vrot.slane %v3698_v50, 3 }
 0x496   : > { %8509 = vmatprep.subr.bf16.mxu0 %v9018_v10  ;;  %8487 = vmatprep.mubr.msk.bf16.mxu1 %vm9019_vm5, %v9018_v10  ;;  %v3523_v51 = vsel %vm312_vm7, %v3514_v43, %v3522_v47 }
 0x497   : > { %8511 = vmatprep.mubr.msk.bf16.mxu0 %vm9019_vm5, %v9018_v10  ;;  %v3693_v59 = vor.u32 %v3692_v55, %v3689_v52  ;;  %v3701_v60 = vor.u32 %v3700_v58, %v3697_v57 }
 0x498   : > { %8486 = vmatpush3.bf16.msra.mxu1 %v8908_v9 }
 0x499   : > { %8510 = vmatpush3.bf16.msra.mxu0 %v8909_v12  ;;  %8499 = vmatprep.subr.bf16.mxu1 %v9018_v10  ;;  %v3702_v61 = vsel %vm538_vm2, %v3693_v59, %v3701_v60 }
 0x49a   : > { %8523 = vmatprep.subr.bf16.mxu0 %v9018_v10 }
 0x49b   : > { %8488 = vmatmul.mubr.msk.bf16.vlgmr.msra.gmra.mrb[60].mxu1 %vm342_vm6, %v8910_v31 }
 0x49c   : > { %8500 = vmatpush3.bf16.msra.mxu1 %v8911_v22  ;;  %8512 = vmatmul.mubr.msk.bf16.vlgmr.msra.gmra.mrb[68].mxu0 %vm342_vm6, %v3604_v35 }
 0x49d   : > { %8501 = vmatprep.subr.bf16.mxu1 %v9018_v10  ;;  %8503 = vmatprep.mubr.msk.bf16.mxu1 %vm9019_vm5, %v9018_v10 }
 0x49e   : > { %8527 = vmatprep.mubr.msk.bf16.mxu0 %vm9019_vm5, %v9018_v10  ;;  %8524 = vmatpush3.bf16.msra.mxu0 %v8919_v63 }
 0x49f   : > { %8525 = vmatprep.subr.bf16.mxu0 %v9018_v10 }
 0x4a0   : > { %8502 = vmatpush3.bf16.msra.mxu1 %v8914_v38 }
 0x4a1   : > { %8515 = vmatprep.subr.bf16.mxu1 %v9018_v10 }
 0x4a2   : > { %8526 = vmatpush3.bf16.msra.mxu0 %v8923_v1 }
 0x4a3   : > { %8504 = vmatmul.mubr.msk.bf16.vlgmr.msra.gmra.mrb[64].mxu1 %vm342_vm6, %v3523_v51  ;;  %8539 = vmatprep.subr.bf16.mxu0 %v9018_v10 }
 0x4a4   : > { %8516 = vmatpush3.bf16.msra.mxu1 %v8915_v48  ;;  %8519 = vmatprep.mubr.msk.bf16.mxu1 %vm9019_vm5, %v9018_v10 }
 0x4a5   : > { %8517 = vmatprep.subr.bf16.mxu1 %v9018_v10 }
 0x4a8   : > { %8518 = vmatpush3.bf16.msra.mxu1 %v8916_v56 }
 0x4a9   : > { %8531 = vmatprep.subr.bf16.mxu1 %v9018_v10 }
 0x4ab   : > { %8520 = vmatmul.mubr.msk.bf16.vlgmr.msra.gmra.mrb[68].mxu1 %vm342_vm6, %v3702_v61 }
 0x4ac   : > { %8535 = vmatprep.mubr.msk.bf16.mxu1 %vm9019_vm5, %v9018_v10  ;;  %8532 = vmatpush3.bf16.msra.mxu1 %v8917_v62 }
 0x4ad   : > { %8533 = vmatprep.subr.bf16.mxu1 %v9018_v10 }
 0x4b0   : > { %8534 = vmatpush3.bf16.msra.mxu1 %v8918_v0 }
 0x4b1   : > { %8547 = vmatprep.subr.bf16.mxu1 %v9018_v10 }
 0x554   : > { %v3112_v2 = vpop.f32.mrb[56].mxu0 }
 0x555   : > { %v8465_v3 = vpop.f32.mrb[57].mxu0 }
 0x556   : > { %v3115_v4 = vpop.f32.mrb[58].mxu0 }
 0x557   : > { %v8466_v5 = vpop.f32.mrb[59].mxu0 }
 0x55e   : > { %v3035_v6 = vpop.f32.mrb[52].mxu1 }
 0x55f   : > { %3042 = vst.msk [vmem:[#allocation3] sm:$0xff] %vm342_vm6, %v3035_v6  ;;  %v8457_v7 = vpop.f32.mrb[53].mxu1  ;;  %v3308_v8 = vpop.f32.mrb[60].mxu0 }
 0x560   : > { %v3038_v9 = vpop.f32.mrb[54].mxu1  ;;  %v8481_v11 = vpop.f32.mrb[61].mxu0 }
 0x561   : > { %3043 = vst.msk [vmem:[#allocation3 + $0x8] sm:$0xff] %vm342_vm6, %v3038_v9  ;;  %v8458_v12 = vpop.f32.mrb[55].mxu1  ;;  %v3311_v13 = vpop.f32.mrb[62].mxu0 }
 0x562   : > { %v8482_v15 = vpop.f32.mrb[63].mxu0 }
 0x566   : > { %v3119_v16 = vld [vmem:[#allocation3] sm:$0xff]  ;;  %v3210_v17 = vpop.f32.mrb[56].mxu1 }
 0x567   : > { %v3121_v18 = vadd.f32 %v3119_v16, %v3112_v2  ;;  %v8473_v19 = vpop.f32.mrb[57].mxu1  ;;  %v3475_v21 = vpop.f32.mrb[64].mxu0 }
 0x568   : > { %v3120_v22 = vld [vmem:[#allocation3 + $0x8] sm:$0xff]  ;;  %v3213_v26 = vpop.f32.mrb[58].mxu1  ;;  %v8497_v27 = vpop.f32.mrb[65].mxu0 }
 0x569   : > { %3123 = vst.msk [vmem:[#allocation3] sm:$0xff] %vm342_vm6, %v3121_v18  ;;  %v3122_v29 = vadd.f32 %v3120_v22, %v3115_v4  ;;  %v8474_v30 = vpop.f32.mrb[59].mxu1  ;;  %v3478_v31 = vpop.f32.mrb[66].mxu0  ;;  %v7650_v22 = vld [vmem:[%s10358_s2 + $0x3] ss:$0 sm:$0xff] }
 0x56a   : > { %v8498_v32 = vpop.f32.mrb[67].mxu0 }
 0x56b   : > { %3124 = vst.msk [vmem:[#allocation3 + $0x8] sm:$0xff] %vm342_vm6, %v3122_v29  ;;  %v7652_v29 = vld [vmem:[%s10359_s3 + $0x3] ss:$0 sm:$0xff] }
 0x56e   : > { %v3382_v33 = vpop.f32.mrb[60].mxu1 }
 0x56f   : > { %v8489_v34 = vpop.f32.mrb[61].mxu1  ;;  %v3654_v35 = vpop.f32.mrb[68].mxu0 }
 0x570   : > { %v3217_v38 = vld [vmem:[#allocation3] sm:$0xff]  ;;  %v3385_v39 = vpop.f32.mrb[62].mxu1  ;;  %v8513_v41 = vpop.f32.mrb[69].mxu0 }
 0x571   : > { %v3219_v42 = vadd.f32 %v3217_v38, %v3210_v17  ;;  %v8490_v43 = vpop.f32.mrb[63].mxu1  ;;  %v3657_v44 = vpop.f32.mrb[70].mxu0 }
 0x572   : > { %v3218_v45 = vld [vmem:[#allocation3 + $0x8] sm:$0xff]  ;;  %v8514_v47 = vpop.f32.mrb[71].mxu0 }
 0x573   : > { %3221 = vst.msk [vmem:[#allocation3] sm:$0xff] %vm342_vm6, %v3219_v42  ;;  %v3220_v48 = vadd.f32 %v3218_v45, %v3213_v26  ;;  %v3765_v26 = vld [vmem:[#allocation2 + $0x4] sm:$0xff]  }
 0x574   : > { %v3767_v32 = vunpack.c.l.bf16 %v3765_v26  ;;  %v3768_v38 = vunpack.c.h.bf16 %v3765_v26 }
 0x575   : > { %3222 = vst.msk [vmem:[#allocation3 + $0x8] sm:$0xff] %vm342_vm6, %v3220_v48 }
 0x576   : > { %v3573_v49 = vpop.f32.mrb[64].mxu1 }
 0x577   : > { %v8505_v50 = vpop.f32.mrb[65].mxu1 }
 0x578   : > { %v3576_v51 = vpop.f32.mrb[66].mxu1  ;;  %v4082_v50 = vld [vmem:[#allocation2] sm:$0x8] }
 0x579   : > { %v8506_v52 = vpop.f32.mrb[67].mxu1 }
 0x57a   : > { %v3315_v55 = vld [vmem:[#allocation3] sm:$0xff] }
 0x57b   : > { %v3317_v56 = vadd.f32 %v3315_v55, %v3308_v8 }
 0x57c   : > { %v3316_v57 = vld [vmem:[#allocation3 + $0x8] sm:$0xff] }
 0x57d   : > { %3319 = vst.msk [vmem:[#allocation3] sm:$0xff] %vm342_vm6, %v3317_v56  ;;  %v3318_v58 = vadd.f32 %v3316_v57, %v3311_v13 }
 0x57e   : > { %v3752_v59 = vpop.f32.mrb[68].mxu1 }
 0x57f   : > { %3320 = vst.msk [vmem:[#allocation3 + $0x8] sm:$0xff] %vm342_vm6, %v3318_v58  ;;  %v8521_v60 = vpop.f32.mrb[69].mxu1 }
 0x580   : > { %v3755_v61 = vpop.f32.mrb[70].mxu1 }
 0x581   : > { %v8522_v62 = vpop.f32.mrb[71].mxu1 }
 0x582   : > { %v4085_v62 = vmul.bf16 %v4082_v50, %v9119_v40 }
 0x584   : > { %v3389_v63 = vld [vmem:[#allocation3] sm:$0xff] }
 0x585   : > { %v3391_v0 = vadd.f32 %v3389_v63, %v3382_v33 }
 0x586   : > { %v3390_v1 = vld [vmem:[#allocation3 + $0x8] sm:$0xff] }
 0x587   : > { %3393 = vst.msk [vmem:[#allocation3] sm:$0xff] %vm342_vm6, %v3391_v0  ;;  %v3392_v2 = vadd.f32 %v3390_v1, %v3385_v39 }
 0x589   : > { %3394 = vst.msk [vmem:[#allocation3 + $0x8] sm:$0xff] %vm342_vm6, %v3392_v2 }
 0x58e   : > { %v3482_v3 = vld [vmem:[#allocation3] sm:$0xff] }
 0x58f   : > { %v3484_v4 = vadd.f32 %v3482_v3, %v3475_v21 }
 0x590   : > { %v3483_v5 = vld [vmem:[#allocation3 + $0x8] sm:$0xff] }
 0x591   : > { %3486 = vst.msk [vmem:[#allocation3] sm:$0xff] %vm342_vm6, %v3484_v4  ;;  %v3485_v6 = vadd.f32 %v3483_v5, %v3478_v31 }
 0x593   : > { %3487 = vst.msk [vmem:[#allocation3 + $0x8] sm:$0xff] %vm342_vm6, %v3485_v6 }
 0x598   : > { %v3580_v7 = vld [vmem:[#allocation3] sm:$0xff] }
 0x599   : > { %v3582_v8 = vadd.f32 %v3580_v7, %v3573_v49  ;;  %v3809_v49 = vld [vmem:[#allocation2] sm:$0xe]  ;;  %v8922_v7 = vld [vmem:[%s10357_s1 + $0x270] sm:$0xff]  }
 0x59a   : > { %v3581_v9 = vld [vmem:[#allocation3 + $0x8] sm:$0xff]  ;;  %v3812_v56 = vmul.bf16 %v3809_v49, %v9121_v46 }
 0x59b   : > { %3584 = vst.msk [vmem:[#allocation3] sm:$0xff] %vm342_vm6, %v3582_v8  ;;  %v3583_v11 = vadd.f32 %v3581_v9, %v3576_v51  ;;  %v3984_v51 = vld [vmem:[#allocation2] sm:$0xc] }
 0x59c   : > { %v3987_v5 = vmul.bf16 %v3984_v51, %v9126_v53 }
 0x59d   : > { %3585 = vst.msk [vmem:[#allocation3 + $0x8] sm:$0xff] %vm342_vm6, %v3583_v11 }
 0x5a2   : > { %v3661_v12 = vld [vmem:[#allocation3] sm:$0xff] }
 0x5a3   : > { %v3663_v13 = vadd.f32 %v3661_v12, %v3654_v35 }
 0x5a4   : > { %v3662_v15 = vld [vmem:[#allocation3 + $0x8] sm:$0xff] }
 0x5a5   : > { %3665 = vst.msk [vmem:[#allocation3] sm:$0xff] %vm342_vm6, %v3663_v13  ;;  %v3664_v16 = vadd.f32 %v3662_v15, %v3657_v44 }
 0x5a7   : > { %3666 = vst.msk [vmem:[#allocation3 + $0x8] sm:$0xff] %vm342_vm6, %v3664_v16 }
 0x5ac   : > { %v3759_v17 = vld [vmem:[#allocation3] sm:$0xff] }
 0x5ad   : > { %v3761_v18 = vadd.f32 %v3759_v17, %v3752_v59 }
 0x5ae   : > { %v3760_v19 = vld [vmem:[#allocation3 + $0x8] sm:$0xff] }
 0x5af   : > { %3763 = vst.msk [vmem:[#allocation3] sm:$0xff] %vm342_vm6, %v3761_v18  ;;  %v3762_v21 = vadd.f32 %v3760_v19, %v3755_v61 }
 0x5b1   : > { %3764 = vst.msk [vmem:[#allocation3 + $0x8] sm:$0xff] %vm342_vm6, %v3762_v21 }
 0x5b6   : > { %v3769_v27 = vld [vmem:[#allocation3] sm:$0xff] }
 0x5b7   : > { %v3779_v30 = vadd.f32 %v7650_v22, %v3769_v27 }
 0x5b8   : > { %v3770_v31 = vld [vmem:[#allocation3 + $0x8] sm:$0xff] }
 0x5b9   : > { %v3789_v33 = vmul.f32 %v7652_v29, %v3779_v30  ;;  %v3780_v34 = vadd.f32 %v7650_v22, %v3770_v31  ;;  %v4256_v22 = vld [vmem:[#allocation2 + $0xc] sm:$0x1] }
 0x5bb   : > { %v3791_v35 = vadd.f32 %v3789_v33, %v3767_v32  ;;  %v3790_v39 = vmul.f32 %v7652_v29, %v3780_v34  ;;  %v8924_v32 = vld [vmem:[%s10357_s1 + $0x278] sm:$0xff]  }
 0x5bd   : > { %vm3793_vm1 = vcmp.ge.f32.partialorder %v3791_v35, 0.0  ;;  %v3795_v41 = vmul.f32 0.2, %v3791_v35  ;;  %v3792_v42 = vadd.f32 %v3790_v39, %v3768_v38 }
 0x5bf   : > { %v3797_v43 = vsel %vm3793_vm1, %v3791_v35, %v3795_v41  ;;  %vm3794_vm3 = vcmp.ge.f32.partialorder %v3792_v42, 0.0  ;;  %v3796_v44 = vmul.f32 0.2, %v3792_v42 }
 0x5c0   : > { %v8009_v45 = vpack.c.bf16 %v3797_v43, %v3797_v43  ;;  %v4259_v43 = vmul.bf16 %v4256_v22, %v9155_v20  ;;  %v8929_v22 = vld [vmem:[%s10357_s1 + $0x280] sm:$0xff]  }
 0x5c1   : > { %v3798_v47 = vsel %vm3794_vm3, %v3792_v42, %v3796_v44 }
 0x5c2   : > { %3807 = vst.msk [vmem:[#allocation2 + $0x4] sm:$0xf] %vm226_vm0, %v8009_v45  ;;  %v8010_v48 = vpack.c.bf16 %v3798_v47, %v3798_v47 }
 0x5c4   : > { %3808 = vst.msk [vmem:[#allocation2 + $0x8] sm:$0xf] %vm226_vm0, %v8010_v48 }
 0x5c9   : > { %v8920_v52 = vld [vmem:[#allocation2] sm:$0xfc]  }
 0x5ca   : > { %v3810_v55 = vld [vmem:[#allocation2 + $0x4] sm:$0xf]  ;;  %v3919_v61 = vrot.slane %v8920_v52, 2 }
 0x5cb   : > { %v3813_v57 = vmul.bf16 %v3810_v55, %v9160_v23  ;;  %v4083_v58 = vld [vmem:[#allocation2 + $0x4] sm:$0xf]  ;;  %v8921_v60 = vld [vmem:[#allocation2 + $0x8] ss:$0 sps:$4 sm:$0x33]  }
 0x5cc   : > { %v3985_v59 = vld [vmem:[#allocation2 + $0x4] sm:$0xf]  ;;  %v4086_v63 = vmul.bf16 %v4083_v58, %v9152_v14  ;;  %v3811_v1 = vld [vmem:[#allocation2 + $0x8] sm:$0x3]  ;;  %v3920_v6 = vrot.slane %v8921_v60, 2 }
 0x5cd   : > { %v3988_v0 = vmul.bf16 %v3985_v59, %v9178_v36  ;;  %v7659_v2 = vcombine.low %v3812_v56, %v3813_v57  ;;  %v4084_v3 = vld [vmem:[#allocation2 + $0x8] sm:$0xf]  ;;  %v3814_v8 = vmul.bf16 %v3811_v1, %v9162_v24  ;;  %v4254_v31 = vld [vmem:[#allocation2 + $0x4] sm:$0xf] }
 0x5ce   : > { %v3986_v4 = vld [vmem:[#allocation2 + $0x8] sm:$0x7]  ;;  %v4087_v9 = vmul.bf16 %v4084_v3, %v9164_v25  ;;  %v7686_v11 = vcombine.low %v4085_v62, %v4086_v63  ;;  %v3921_v17 = vsel %vm405_vm4, %v3919_v61, %v3920_v6  ;;  %v4257_v48 = vmul.bf16 %v4254_v31, %v9128_v54  ;;  %v8925_v56 = vld [vmem:[%s10357_s1 + $0x260] sm:$0xff]   ;;  %v8926_v62 = vld [vmem:[%s10357_s1 + $0x290] sm:$0xff]  }
 0x5cf   : > { %v3829_v12 = vshrl.u32 %v7659_v2, 16  ;;  %v3832_v13 = vshll.u32 %v7659_v2, 16  ;;  %v3989_v15 = vmul.bf16 %v3986_v4, %v9180_v37  ;;  %v7677_v16 = vcombine.low %v3987_v5, %v3988_v0  ;;  %8536 = vmatmul.mubr.msk.bf16.vlgmr.msra.gmra.mrb[72].mxu1 %vm342_vm6, %v3921_v17  ;;  %v4255_v42 = vld [vmem:[#allocation2 + $0x8] sm:$0xf]  ;;  %v8930_v31 = vld [vmem:[%s10357_s1 + $0x2b0] sm:$0xff]  }
 0x5d0   : > { %v7660_v18 = vcombine.low %v3814_v8, %v3814_v8  ;;  %v7687_v19 = vcombine.low %v4087_v9, %v4087_v9  ;;  %v4102_v21 = vshrl.u32 %v7686_v11, 16  ;;  %v4105_v29 = vshll.u32 %v7686_v11, 16  ;;  %8548 = vmatpush3.bf16.msra.mxu1 %v8922_v7  ;;  %8551 = vmatprep.mubr.msk.bf16.mxu1 %vm9019_vm5, %v9018_v10  ;;  %v4348_v5 = vld [vmem:[#allocation2 + $0x8] sm:$0xf]  ;;  %v8928_v11 = vld [vmem:[%s10357_s1 + $0x298] sm:$0xff]  }
 0x5d1   : > { %v3831_v26 = vrot.slane %v3829_v12, 1  ;;  %v3834_v27 = vrot.slane %v3832_v13, 2  ;;  %v7678_v30 = vcombine.low %v3989_v15, %v3989_v15  ;;  %8549 = vmatprep.subr.bf16.mxu1 %v9018_v10  ;;  %v4004_v51 = vshrl.u32 %v7677_v16, 16  ;;  %v8927_v6 = vld [vmem:[%s10357_s1 + $0x268] sm:$0xff]   ;;  %v4347_v13 = vld [vmem:[#allocation2 + $0x4] sm:$0xe] }
 0x5d2   : > { %v3837_v33 = vshrl.u32 %v7660_v18, 16  ;;  %v3840_v34 = vshll.u32 %v7660_v18, 16  ;;  %v4110_v35 = vshrl.u32 %v7687_v19, 16  ;;  %v4104_v38 = vrot.slane %v4102_v21, 3  ;;  %v4349_v15 = vld [vmem:[#allocation2 + $0xc] sm:$0x3] }
 0x5d3   : > { %v4107_v39 = vrot.slane %v4105_v29, 4  ;;  %v4113_v41 = vshll.u32 %v7687_v19, 16  ;;  %v3835_v49 = vor.u32 %v3834_v27, %v3831_v26  ;;  %v4012_v52 = vshrl.u32 %v7678_v30, 16 }
 0x5d4   : > { %v3839_v44 = vrot.slane %v3837_v33, 1  ;;  %v3842_v45 = vrot.slane %v3840_v34, 2  ;;  %v4112_v47 = vrot.slane %v4110_v35, 3  ;;  %8550 = vmatpush3.bf16.msra.mxu1 %v8924_v32  ;;  %v4007_v57 = vshll.u32 %v7677_v16, 16 }
 0x5d5   : > { %v4115_v50 = vrot.slane %v4113_v41, 4  ;;  %v4015_v58 = vshll.u32 %v7678_v30, 16  ;;  %v4258_v59 = vmul.bf16 %v4255_v42, %v9171_v28  ;;  %v4108_v60 = vor.u32 %v4107_v39, %v4104_v38  ;;  %8563 = vmatprep.subr.bf16.mxu1 %v9018_v10  ;;  %v8936_v33 = vld [vmem:[#allocation2 + $0xc] ss:$0 sps:$4 sm:$0x33]  }
 0x5d6   : > { %v3843_v55 = vor.u32 %v3842_v45, %v3839_v44  ;;  %v7704_v63 = vcombine.low %v4259_v43, %v4259_v43  ;;  %v4014_v1 = vrot.slane %v4012_v52, 2  ;;  %v4006_v7 = vrot.slane %v4004_v51, 2  ;;  %v8935_v38 = vld [vmem:[#allocation2 + $0x4] sm:$0xfc]   ;;  %v8932_v43 = vld [vmem:[%s10357_s1 + $0x2b8] sm:$0xff]  }
 0x5d7   : > { %v4116_v61 = vor.u32 %v4115_v50, %v4112_v47  ;;  %v4017_v2 = vrot.slane %v4015_v58, 3  ;;  %v7703_v3 = vcombine.low %v4257_v48, %v4258_v59  ;;  %v4009_v8 = vrot.slane %v4007_v57, 3  ;;  %v4527_v39 = vld [vmem:[#allocation2 + $0x8] sm:$0xf]  ;;  %v4526_v44 = vld [vmem:[#allocation2 + $0x4] sm:$0xc] }
 0x5d8   : > { %v3844_v0 = vsel %vm312_vm7, %v3835_v49, %v3843_v55  ;;  %v4281_v12 = vshll.u32 %v7704_v63, 16  ;;  %v4351_v19 = vmul.bf16 %v4348_v5, %v9160_v23  ;;  %v4350_v27 = vmul.bf16 %v4347_v13, %v9121_v46  ;;  %v8931_v41 = vld [vmem:[%s10357_s1 + $0x288] sm:$0xff]   ;;  %v8934_v52 = vld [vmem:[%s10357_s1 + $0x2a0] sm:$0xff]  }
 0x5d9   : > { %8528 = vmatmul.mubr.msk.bf16.vlgmr.msra.gmra.mrb[72].mxu0 %vm342_vm6, %v3844_v0  ;;  %v4117_v4 = vsel %vm652_vm8, %v4108_v60, %v4116_v61  ;;  %v4276_v9 = vshll.u32 %v7703_v3, 16  ;;  %v4018_v16 = vor.u32 %v4017_v2, %v4014_v1  ;;  %v4274_v17 = vshrl.u32 %v7703_v3, 16  ;;  %v4528_v45 = vld [vmem:[#allocation2 + $0xc] sm:$0x7]  ;;  %v8933_v59 = vld [vmem:[#allocation2 + $0x4] sm:$0xff]  }
 0x5da   : > { %8540 = vmatpush3.bf16.msra.mxu0 %v8925_v56  ;;  %8552 = vmatmul.mubr.msk.bf16.vlgmr.msra.gmra.mrb[76].mxu1 %vm342_vm6, %v4117_v4  ;;  %v4010_v21 = vor.u32 %v4009_v8, %v4006_v7  ;;  %v4352_v29 = vmul.bf16 %v4349_v15, %v9162_v24  ;;  %v4283_v30 = vrot.slane %v4281_v12, 1  ;;  %v7712_v34 = vcombine.low %v4350_v27, %v4351_v19  ;;  %v8937_v0 = vld [vmem:[%s10357_s1 + $0x2a8] sm:$0xff]   ;;  %v8938_v8 = vld [vmem:[%s10357_s1 + $0x2c0] sm:$0xff]   ;;  %v8942_v27 = vld [vmem:[%s10357_s1 + $0x2d0] sm:$0xff]  }
 0x5db   : > { %8564 = vmatpush3.bf16.msra.mxu1 %v8926_v62  ;;  %8541 = vmatprep.subr.bf16.mxu0 %v9018_v10  ;;  %v4278_v18 = vrot.slane %v4276_v9, 1  ;;  %v4530_v49 = vmul.bf16 %v4527_v39, %v9178_v36  ;;  %v4461_v50 = vrot.slane %v8935_v38, 2  ;;  %v4462_v51 = vrot.slane %v8936_v33, 2 }
 0x5dc   : > { %8565 = vmatprep.subr.bf16.mxu1 %v9018_v10  ;;  %8543 = vmatprep.mubr.msk.bf16.mxu0 %vm9019_vm5, %v9018_v10  ;;  %v4019_v32 = vsel %vm538_vm2, %v4010_v21, %v4018_v16  ;;  %v7713_v42 = vcombine.low %v4352_v29, %v4352_v29  ;;  %v4367_v47 = vshrl.u32 %v7712_v34, 16  ;;  %v4370_v48 = vshll.u32 %v7712_v34, 16  ;;  %v8939_v16 = vld [vmem:[%s10357_s1 + $0x2c8] sm:$0xff]  }
 0x5dd   : > { %8567 = vmatprep.mubr.msk.bf16.mxu1 %vm9019_vm5, %v9018_v10  ;;  %v4279_v26 = vor.u32 %v4278_v18, %v4274_v17  ;;  %v4529_v57 = vmul.bf16 %v4526_v44, %v9126_v53  ;;  %v4531_v58 = vmul.bf16 %v4528_v45, %v9180_v37  ;;  %v4463_v63 = vsel %vm405_vm4, %v4461_v50, %v4462_v51  ;;  %v8941_v29 = vld [vmem:[%s10357_s1 + $0x2e8] sm:$0xff]  }
 0x5de   : > { %8542 = vmatpush3.bf16.msra.mxu0 %v8927_v6  ;;  %v4375_v55 = vshrl.u32 %v7713_v42, 16  ;;  %v4378_v56 = vshll.u32 %v7713_v42, 16  ;;  %v4369_v60 = vrot.slane %v4367_v47, 1  ;;  %v4372_v61 = vrot.slane %v4370_v48, 2 }
 0x5df   : > { %8566 = vmatpush3.bf16.msra.mxu1 %v8928_v11  ;;  %8555 = vmatprep.subr.bf16.mxu0 %v9018_v10  ;;  %v4284_v35 = vsel %vm838_vm9, %v4279_v26, %v4283_v30  ;;  %v7730_v62 = vcombine.low %v4529_v57, %v4530_v49  ;;  %v7731_v3 = vcombine.low %v4531_v58, %v4531_v58  ;;  %v8940_v26 = vld [vmem:[%s10357_s1 + $0x2e0] sm:$0xff]   ;;  %v8946_v30 = vld [vmem:[%s10357_s1 + $0x2d8] sm:$0xff]  }
 0x5e0   : > { %8579 = vmatprep.subr.bf16.mxu1 %v9018_v10  ;;  %v4377_v1 = vrot.slane %v4375_v55, 1  ;;  %v4380_v2 = vrot.slane %v4378_v56, 2  ;;  %v4373_v4 = vor.u32 %v4372_v61, %v4369_v60 }
 0x5e1   : > { %8544 = vmatmul.mubr.msk.bf16.vlgmr.msra.gmra.mrb[76].mxu0 %vm342_vm6, %v4019_v32  ;;  %v4546_v5 = vshrl.u32 %v7730_v62, 16  ;;  %v4549_v6 = vshll.u32 %v7730_v62, 16  ;;  %v4554_v9 = vshrl.u32 %v7731_v3, 16  ;;  %v4557_v11 = vshll.u32 %v7731_v3, 16 }
 0x5e2   : > { %8556 = vmatpush3.bf16.msra.mxu0 %v8929_v22  ;;  %8568 = vmatmul.mubr.msk.bf16.vlgmr.msra.gmra.mrb[80].mxu1 %vm342_vm6, %v4284_v35  ;;  %v4381_v7 = vor.u32 %v4380_v2, %v4377_v1 }
 0x5e3   : > { %8580 = vmatpush3.bf16.msra.mxu1 %v8930_v31  ;;  %8557 = vmatprep.subr.bf16.mxu0 %v9018_v10  ;;  %v4548_v13 = vrot.slane %v4546_v5, 2  ;;  %v4551_v15 = vrot.slane %v4549_v6, 3  ;;  %v4556_v17 = vrot.slane %v4554_v9, 2  ;;  %v4559_v18 = vrot.slane %v4557_v11, 3 }
 0x5e4   : > { %8581 = vmatprep.subr.bf16.mxu1 %v9018_v10  ;;  %8559 = vmatprep.mubr.msk.bf16.mxu0 %vm9019_vm5, %v9018_v10  ;;  %v4382_v12 = vsel %vm312_vm7, %v4373_v4, %v4381_v7 }
 0x5e5   : > { %8583 = vmatprep.mubr.msk.bf16.mxu1 %vm9019_vm5, %v9018_v10  ;;  %v4552_v19 = vor.u32 %v4551_v15, %v4548_v13  ;;  %v4560_v21 = vor.u32 %v4559_v18, %v4556_v17 }
 0x5e6   : > { %8558 = vmatpush3.bf16.msra.mxu0 %v8931_v41 }
 0x5e7   : > { %8582 = vmatpush3.bf16.msra.mxu1 %v8932_v43  ;;  %8571 = vmatprep.subr.bf16.mxu0 %v9018_v10  ;;  %v4561_v22 = vsel %vm538_vm2, %v4552_v19, %v4560_v21 }
 0x5e8   : > { %8595 = vmatprep.subr.bf16.mxu1 %v9018_v10 }
 0x5e9   : > { %8560 = vmatmul.mubr.msk.bf16.vlgmr.msra.gmra.mrb[80].mxu0 %vm342_vm6, %v8933_v59 }
 0x5ea   : > { %8572 = vmatpush3.bf16.msra.mxu0 %v8934_v52  ;;  %8584 = vmatmul.mubr.msk.bf16.vlgmr.msra.gmra.mrb[84].mxu1 %vm342_vm6, %v4463_v63 }
 0x5eb   : > { %8573 = vmatprep.subr.bf16.mxu0 %v9018_v10  ;;  %8575 = vmatprep.mubr.msk.bf16.mxu0 %vm9019_vm5, %v9018_v10 }
 0x5ec   : > { %8599 = vmatprep.mubr.msk.bf16.mxu1 %vm9019_vm5, %v9018_v10  ;;  %8596 = vmatpush3.bf16.msra.mxu1 %v8942_v27 }
 0x5ed   : > { %8597 = vmatprep.subr.bf16.mxu1 %v9018_v10 }
 0x5ee   : > { %8574 = vmatpush3.bf16.msra.mxu0 %v8937_v0 }
 0x5ef   : > { %8587 = vmatprep.subr.bf16.mxu0 %v9018_v10 }
 0x5f0   : > { %8598 = vmatpush3.bf16.msra.mxu1 %v8946_v30 }
 0x5f1   : > { %8576 = vmatmul.mubr.msk.bf16.vlgmr.msra.gmra.mrb[84].mxu0 %vm342_vm6, %v4382_v12  ;;  %8611 = vmatprep.subr.bf16.mxu1 %v9018_v10 }
 0x5f2   : > { %8588 = vmatpush3.bf16.msra.mxu0 %v8938_v8  ;;  %8591 = vmatprep.mubr.msk.bf16.mxu0 %vm9019_vm5, %v9018_v10 }
 0x5f3   : > { %8589 = vmatprep.subr.bf16.mxu0 %v9018_v10 }
 0x5f6   : > { %8590 = vmatpush3.bf16.msra.mxu0 %v8939_v16 }
 0x5f7   : > { %8603 = vmatprep.subr.bf16.mxu0 %v9018_v10 }
 0x5f9   : > { %8592 = vmatmul.mubr.msk.bf16.vlgmr.msra.gmra.mrb[88].mxu0 %vm342_vm6, %v4561_v22 }
 0x5fa   : > { %8607 = vmatprep.mubr.msk.bf16.mxu0 %vm9019_vm5, %v9018_v10  ;;  %8604 = vmatpush3.bf16.msra.mxu0 %v8940_v26 }
 0x5fb   : > { %8605 = vmatprep.subr.bf16.mxu0 %v9018_v10 }
 0x5fe   : > { %8606 = vmatpush3.bf16.msra.mxu0 %v8941_v29 }
 0x5ff   : > { %8619 = vmatprep.subr.bf16.mxu0 %v9018_v10 }
 0x6a2   : > { %v3971_v31 = vpop.f32.mrb[72].mxu1 }
 0x6a3   : > { %v8537_v32 = vpop.f32.mrb[73].mxu1 }
 0x6a4   : > { %v3974_v33 = vpop.f32.mrb[74].mxu1 }
 0x6a5   : > { %v8538_v34 = vpop.f32.mrb[75].mxu1 }
 0x6ac   : > { %v3894_v35 = vpop.f32.mrb[72].mxu0 }
 0x6ad   : > { %3901 = vst.msk [vmem:[#allocation3] sm:$0xff] %vm342_vm6, %v3894_v35  ;;  %v8529_v38 = vpop.f32.mrb[73].mxu0  ;;  %v4167_v39 = vpop.f32.mrb[76].mxu1 }
 0x6ae   : > { %v3897_v41 = vpop.f32.mrb[74].mxu0  ;;  %v8553_v42 = vpop.f32.mrb[77].mxu1 }
 0x6af   : > { %3902 = vst.msk [vmem:[#allocation3 + $0x8] sm:$0xff] %vm342_vm6, %v3897_v41  ;;  %v8530_v43 = vpop.f32.mrb[75].mxu0  ;;  %v4170_v44 = vpop.f32.mrb[78].mxu1 }
 0x6b0   : > { %v8554_v45 = vpop.f32.mrb[79].mxu1 }
 0x6b4   : > { %v3978_v47 = vld [vmem:[#allocation3] sm:$0xff]  ;;  %v4069_v48 = vpop.f32.mrb[76].mxu0 }
 0x6b5   : > { %v3980_v49 = vadd.f32 %v3978_v47, %v3971_v31  ;;  %v8545_v50 = vpop.f32.mrb[77].mxu0  ;;  %v4334_v51 = vpop.f32.mrb[80].mxu1 }
 0x6b6   : > { %v3979_v52 = vld [vmem:[#allocation3 + $0x8] sm:$0xff]  ;;  %v4072_v55 = vpop.f32.mrb[78].mxu0  ;;  %v8569_v56 = vpop.f32.mrb[81].mxu1 }
 0x6b7   : > { %3982 = vst.msk [vmem:[#allocation3] sm:$0xff] %vm342_vm6, %v3980_v49  ;;  %v3981_v57 = vadd.f32 %v3979_v52, %v3974_v33  ;;  %v8546_v58 = vpop.f32.mrb[79].mxu0  ;;  %v4337_v59 = vpop.f32.mrb[82].mxu1  ;;  %v7736_v52 = vld [vmem:[%s10358_s2 + $0x4] ss:$0 sm:$0xff] }
 0x6b8   : > { %v8570_v60 = vpop.f32.mrb[83].mxu1 }
 0x6b9   : > { %3983 = vst.msk [vmem:[#allocation3 + $0x8] sm:$0xff] %vm342_vm6, %v3981_v57  ;;  %v7738_v57 = vld [vmem:[%s10359_s3 + $0x4] ss:$0 sm:$0xff] }
 0x6bc   : > { %v4241_v61 = vpop.f32.mrb[80].mxu0 }
 0x6bd   : > { %v8561_v62 = vpop.f32.mrb[81].mxu0  ;;  %v4513_v63 = vpop.f32.mrb[84].mxu1 }
 0x6be   : > { %v4076_v0 = vld [vmem:[#allocation3] sm:$0xff]  ;;  %v4244_v1 = vpop.f32.mrb[82].mxu0  ;;  %v8585_v2 = vpop.f32.mrb[85].mxu1 }
 0x6bf   : > { %v4078_v3 = vadd.f32 %v4076_v0, %v4069_v48  ;;  %v8562_v4 = vpop.f32.mrb[83].mxu0  ;;  %v4516_v5 = vpop.f32.mrb[86].mxu1 }
 0x6c0   : > { %v4077_v6 = vld [vmem:[#allocation3 + $0x8] sm:$0xff]  ;;  %v8586_v7 = vpop.f32.mrb[87].mxu1 }
 0x6c1   : > { %4080 = vst.msk [vmem:[#allocation3] sm:$0xff] %vm342_vm6, %v4078_v3  ;;  %v4079_v8 = vadd.f32 %v4077_v6, %v4072_v55  ;;  %v4624_v55 = vld [vmem:[#allocation2 + $0x4] sm:$0xff]  }
 0x6c2   : > { %v4626_v60 = vunpack.c.l.bf16 %v4624_v55  ;;  %v4627_v0 = vunpack.c.h.bf16 %v4624_v55 }
 0x6c3   : > { %4081 = vst.msk [vmem:[#allocation3 + $0x8] sm:$0xff] %vm342_vm6, %v4079_v8 }
 0x6c4   : > { %v4432_v9 = vpop.f32.mrb[84].mxu0 }
 0x6c5   : > { %v8577_v11 = vpop.f32.mrb[85].mxu0 }
 0x6c6   : > { %v4435_v12 = vpop.f32.mrb[86].mxu0  ;;  %v4941_v11 = vld [vmem:[#allocation2] sm:$0x8] }
 0x6c7   : > { %v8578_v13 = vpop.f32.mrb[87].mxu0 }
 0x6c8   : > { %v4174_v15 = vld [vmem:[#allocation3] sm:$0xff] }
 0x6c9   : > { %v4176_v16 = vadd.f32 %v4174_v15, %v4167_v39 }
 0x6ca   : > { %v4175_v17 = vld [vmem:[#allocation3 + $0x8] sm:$0xff] }
 0x6cb   : > { %4178 = vst.msk [vmem:[#allocation3] sm:$0xff] %vm342_vm6, %v4176_v16  ;;  %v4177_v18 = vadd.f32 %v4175_v17, %v4170_v44 }
 0x6cc   : > { %v4611_v19 = vpop.f32.mrb[88].mxu0 }
 0x6cd   : > { %4179 = vst.msk [vmem:[#allocation3 + $0x8] sm:$0xff] %vm342_vm6, %v4177_v18  ;;  %v8593_v21 = vpop.f32.mrb[89].mxu0 }
 0x6ce   : > { %v4614_v22 = vpop.f32.mrb[90].mxu0 }
 0x6cf   : > { %v8594_v26 = vpop.f32.mrb[91].mxu0 }
 0x6d0   : > { %v4944_v26 = vmul.bf16 %v4941_v11, %v9119_v40 }
 0x6d2   : > { %v4248_v27 = vld [vmem:[#allocation3] sm:$0xff] }
 0x6d3   : > { %v4250_v29 = vadd.f32 %v4248_v27, %v4241_v61 }
 0x6d4   : > { %v4249_v30 = vld [vmem:[#allocation3 + $0x8] sm:$0xff] }
 0x6d5   : > { %4252 = vst.msk [vmem:[#allocation3] sm:$0xff] %vm342_vm6, %v4250_v29  ;;  %v4251_v31 = vadd.f32 %v4249_v30, %v4244_v1 }
 0x6d7   : > { %4253 = vst.msk [vmem:[#allocation3 + $0x8] sm:$0xff] %vm342_vm6, %v4251_v31 }
 0x6dc   : > { %v4341_v32 = vld [vmem:[#allocation3] sm:$0xff] }
 0x6dd   : > { %v4343_v33 = vadd.f32 %v4341_v32, %v4334_v51 }
 0x6de   : > { %v4342_v34 = vld [vmem:[#allocation3 + $0x8] sm:$0xff] }
 0x6df   : > { %4345 = vst.msk [vmem:[#allocation3] sm:$0xff] %vm342_vm6, %v4343_v33  ;;  %v4344_v35 = vadd.f32 %v4342_v34, %v4337_v59 }
 0x6e1   : > { %4346 = vst.msk [vmem:[#allocation3 + $0x8] sm:$0xff] %vm342_vm6, %v4344_v35 }
 0x6e6   : > { %v4439_v38 = vld [vmem:[#allocation3] sm:$0xff] }
 0x6e7   : > { %v4441_v39 = vadd.f32 %v4439_v38, %v4432_v9  ;;  %v4668_v9 = vld [vmem:[#allocation2] sm:$0xe] }
 0x6e8   : > { %v4440_v41 = vld [vmem:[#allocation3 + $0x8] sm:$0xff]  ;;  %v4671_v16 = vmul.bf16 %v4668_v9, %v9121_v46  ;;  %v8945_v38 = vld [vmem:[%s10357_s1 + $0x300] sm:$0xff]  }
 0x6e9   : > { %4443 = vst.msk [vmem:[#allocation3] sm:$0xff] %vm342_vm6, %v4441_v39  ;;  %v4442_v42 = vadd.f32 %v4440_v41, %v4435_v12  ;;  %v4843_v12 = vld [vmem:[#allocation2] sm:$0xc] }
 0x6ea   : > { %v4846_v34 = vmul.bf16 %v4843_v12, %v9126_v53 }
 0x6eb   : > { %4444 = vst.msk [vmem:[#allocation3 + $0x8] sm:$0xff] %vm342_vm6, %v4442_v42 }
 0x6f0   : > { %v4520_v43 = vld [vmem:[#allocation3] sm:$0xff] }
 0x6f1   : > { %v4522_v44 = vadd.f32 %v4520_v43, %v4513_v63 }
 0x6f2   : > { %v4521_v45 = vld [vmem:[#allocation3 + $0x8] sm:$0xff] }
 0x6f3   : > { %4524 = vst.msk [vmem:[#allocation3] sm:$0xff] %vm342_vm6, %v4522_v44  ;;  %v4523_v47 = vadd.f32 %v4521_v45, %v4516_v5 }
 0x6f5   : > { %4525 = vst.msk [vmem:[#allocation3 + $0x8] sm:$0xff] %vm342_vm6, %v4523_v47 }
 0x6fa   : > { %v4618_v48 = vld [vmem:[#allocation3] sm:$0xff] }
 0x6fb   : > { %v4620_v49 = vadd.f32 %v4618_v48, %v4611_v19 }
 0x6fc   : > { %v4619_v50 = vld [vmem:[#allocation3 + $0x8] sm:$0xff] }
 0x6fd   : > { %4622 = vst.msk [vmem:[#allocation3] sm:$0xff] %vm342_vm6, %v4620_v49  ;;  %v4621_v51 = vadd.f32 %v4619_v50, %v4614_v22 }
 0x6ff   : > { %4623 = vst.msk [vmem:[#allocation3 + $0x8] sm:$0xff] %vm342_vm6, %v4621_v51 }
 0x704   : > { %v4628_v56 = vld [vmem:[#allocation3] sm:$0xff] }
 0x705   : > { %v4638_v58 = vadd.f32 %v7736_v52, %v4628_v56 }
 0x706   : > { %v4629_v59 = vld [vmem:[#allocation3 + $0x8] sm:$0xff] }
 0x707   : > { %v4648_v61 = vmul.f32 %v7738_v57, %v4638_v58  ;;  %v4639_v62 = vadd.f32 %v7736_v52, %v4629_v59  ;;  %v5115_v52 = vld [vmem:[#allocation2 + $0xc] sm:$0x1] }
 0x709   : > { %v4650_v63 = vadd.f32 %v4648_v61, %v4626_v60  ;;  %v4649_v1 = vmul.f32 %v7738_v57, %v4639_v62  ;;  %v8947_v60 = vld [vmem:[%s10357_s1 + $0x308] sm:$0xff]  }
 0x70b   : > { %vm4652_vm10 = vcmp.ge.f32.partialorder %v4650_v63, 0.0  ;;  %v4654_v2 = vmul.f32 0.2, %v4650_v63  ;;  %v4651_v3 = vadd.f32 %v4649_v1, %v4627_v0 }
 0x70d   : > { %v4656_v4 = vsel %vm4652_vm10, %v4650_v63, %v4654_v2  ;;  %vm4653_vm11 = vcmp.ge.f32.partialorder %v4651_v3, 0.0  ;;  %v4655_v5 = vmul.f32 0.2, %v4651_v3 }
 0x70e   : > { %v8011_v6 = vpack.c.bf16 %v4656_v4, %v4656_v4  ;;  %v5118_v4 = vmul.bf16 %v5115_v52, %v9155_v20  ;;  %v8952_v52 = vld [vmem:[%s10357_s1 + $0x310] sm:$0xff]  }
 0x70f   : > { %v4657_v7 = vsel %vm4653_vm11, %v4651_v3, %v4655_v5 }
 0x710   : > { %4666 = vst.msk [vmem:[#allocation2 + $0x4] sm:$0xf] %vm226_vm0, %v8011_v6  ;;  %v8012_v8 = vpack.c.bf16 %v4657_v7, %v4657_v7 }
 0x712   : > { %4667 = vst.msk [vmem:[#allocation2 + $0x8] sm:$0xf] %vm226_vm0, %v8012_v8 }
 0x717   : > { %v8943_v13 = vld [vmem:[#allocation2] sm:$0xfc]  }
 0x718   : > { %v4669_v15 = vld [vmem:[#allocation2 + $0x4] sm:$0xf]  ;;  %v4778_v22 = vrot.slane %v8943_v13, 2 }
 0x719   : > { %v4672_v17 = vmul.bf16 %v4669_v15, %v9160_v23  ;;  %v4942_v18 = vld [vmem:[#allocation2 + $0x4] sm:$0xf]  ;;  %v8944_v21 = vld [vmem:[#allocation2 + $0x8] ss:$0 sps:$4 sm:$0x33]  }
 0x71a   : > { %v4844_v19 = vld [vmem:[#allocation2 + $0x4] sm:$0xf]  ;;  %v4945_v27 = vmul.bf16 %v4942_v18, %v9152_v14  ;;  %v4670_v30 = vld [vmem:[#allocation2 + $0x8] sm:$0x3]  ;;  %v4779_v35 = vrot.slane %v8944_v21, 2 }
 0x71b   : > { %v4847_v29 = vmul.bf16 %v4844_v19, %v9178_v36  ;;  %v7745_v31 = vcombine.low %v4671_v16, %v4672_v17  ;;  %v4943_v32 = vld [vmem:[#allocation2 + $0x8] sm:$0xf]  ;;  %v4673_v39 = vmul.bf16 %v4670_v30, %v9162_v24  ;;  %v5113_v59 = vld [vmem:[#allocation2 + $0x4] sm:$0xf]  ;;  %v8948_v16 = vld [vmem:[%s10357_s1 + $0x2f0] sm:$0xff]  }
 0x71c   : > { %v4845_v33 = vld [vmem:[#allocation2 + $0x8] sm:$0x7]  ;;  %v4946_v41 = vmul.bf16 %v4943_v32, %v9164_v25  ;;  %v7772_v42 = vcombine.low %v4944_v26, %v4945_v27  ;;  %v4780_v48 = vsel %vm405_vm4, %v4778_v22, %v4779_v35  ;;  %v5116_v8 = vmul.bf16 %v5113_v59, %v9128_v54  ;;  %v8949_v26 = vld [vmem:[%s10357_s1 + $0x320] sm:$0xff]   ;;  %v8950_v35 = vld [vmem:[%s10357_s1 + $0x2f8] sm:$0xff]  }
 0x71d   : > { %v4688_v43 = vshrl.u32 %v7745_v31, 16  ;;  %v4691_v44 = vshll.u32 %v7745_v31, 16  ;;  %v4848_v45 = vmul.bf16 %v4845_v33, %v9180_v37  ;;  %v7763_v47 = vcombine.low %v4846_v34, %v4847_v29  ;;  %8608 = vmatmul.mubr.msk.bf16.vlgmr.msra.gmra.mrb[92].mxu0 %vm342_vm6, %v4780_v48  ;;  %v5114_v3 = vld [vmem:[#allocation2 + $0x8] sm:$0xf]  ;;  %v8953_v59 = vld [vmem:[%s10357_s1 + $0x340] sm:$0xff]  }
 0x71e   : > { %v7746_v49 = vcombine.low %v4673_v39, %v4673_v39  ;;  %v7773_v50 = vcombine.low %v4946_v41, %v4946_v41  ;;  %v4961_v51 = vshrl.u32 %v7772_v42, 16  ;;  %v4964_v57 = vshll.u32 %v7772_v42, 16  ;;  %8620 = vmatpush3.bf16.msra.mxu0 %v8945_v38  ;;  %8623 = vmatprep.mubr.msk.bf16.mxu0 %vm9019_vm5, %v9018_v10  ;;  %v5207_v34 = vld [vmem:[#allocation2 + $0x8] sm:$0xf] }
 0x71f   : > { %v4690_v55 = vrot.slane %v4688_v43, 1  ;;  %v4693_v56 = vrot.slane %v4691_v44, 2  ;;  %v7764_v58 = vcombine.low %v4848_v45, %v4848_v45  ;;  %8621 = vmatprep.subr.bf16.mxu0 %v9018_v10  ;;  %v4863_v12 = vshrl.u32 %v7763_v47, 16  ;;  %v8951_v42 = vld [vmem:[%s10357_s1 + $0x328] sm:$0xff]   ;;  %v5206_v44 = vld [vmem:[#allocation2 + $0x4] sm:$0xe] }
 0x720   : > { %v4696_v61 = vshrl.u32 %v7746_v49, 16  ;;  %v4699_v62 = vshll.u32 %v7746_v49, 16  ;;  %v4969_v63 = vshrl.u32 %v7773_v50, 16  ;;  %v4963_v0 = vrot.slane %v4961_v51, 3  ;;  %v5208_v45 = vld [vmem:[#allocation2 + $0xc] sm:$0x3] }
 0x721   : > { %v4966_v1 = vrot.slane %v4964_v57, 4  ;;  %v4972_v2 = vshll.u32 %v7773_v50, 16  ;;  %v4694_v9 = vor.u32 %v4693_v56, %v4690_v55  ;;  %v4871_v13 = vshrl.u32 %v7764_v58, 16 }
 0x722   : > { %v4698_v5 = vrot.slane %v4696_v61, 1  ;;  %v4701_v6 = vrot.slane %v4699_v62, 2  ;;  %v4971_v7 = vrot.slane %v4969_v63, 3  ;;  %8622 = vmatpush3.bf16.msra.mxu0 %v8947_v60  ;;  %v4866_v17 = vshll.u32 %v7763_v47, 16 }
 0x723   : > { %v4974_v11 = vrot.slane %v4972_v2, 4  ;;  %v4874_v18 = vshll.u32 %v7764_v58, 16  ;;  %v5117_v19 = vmul.bf16 %v5114_v3, %v9171_v28  ;;  %v4967_v21 = vor.u32 %v4966_v1, %v4963_v0  ;;  %8635 = vmatprep.subr.bf16.mxu0 %v9018_v10  ;;  %v8959_v61 = vld [vmem:[#allocation2 + $0xc] ss:$0 sps:$4 sm:$0x33]   ;;  %v8954_v2 = vld [vmem:[%s10357_s1 + $0x318] sm:$0xff]  }
 0x724   : > { %v4702_v15 = vor.u32 %v4701_v6, %v4698_v5  ;;  %v7790_v27 = vcombine.low %v5118_v4, %v5118_v4  ;;  %v4873_v30 = vrot.slane %v4871_v13, 2  ;;  %v4865_v38 = vrot.slane %v4863_v12, 2  ;;  %v8958_v0 = vld [vmem:[#allocation2 + $0x4] sm:$0xfc]   ;;  %v5387_v6 = vld [vmem:[#allocation2 + $0xc] sm:$0x7] }
 0x725   : > { %v4975_v22 = vor.u32 %v4974_v11, %v4971_v7  ;;  %v4876_v31 = vrot.slane %v4874_v18, 3  ;;  %v7789_v32 = vcombine.low %v5116_v8, %v5117_v19  ;;  %v4868_v39 = vrot.slane %v4866_v17, 3  ;;  %v5386_v1 = vld [vmem:[#allocation2 + $0x8] sm:$0xf]  ;;  %v5385_v5 = vld [vmem:[#allocation2 + $0x4] sm:$0xc] }
 0x726   : > { %v4703_v29 = vsel %vm312_vm7, %v4694_v9, %v4702_v15  ;;  %v5140_v43 = vshll.u32 %v7790_v27, 16  ;;  %v5210_v50 = vmul.bf16 %v5207_v34, %v9160_v23  ;;  %v5209_v56 = vmul.bf16 %v5206_v44, %v9121_v46  ;;  %v8955_v4 = vld [vmem:[%s10357_s1 + $0x348] sm:$0xff]   ;;  %v8957_v13 = vld [vmem:[%s10357_s1 + $0x330] sm:$0xff]  }
 0x727   : > { %8600 = vmatmul.mubr.msk.bf16.vlgmr.msra.gmra.mrb[88].mxu1 %vm342_vm6, %v4703_v29  ;;  %v4976_v33 = vsel %vm652_vm8, %v4967_v21, %v4975_v22  ;;  %v5135_v41 = vshll.u32 %v7789_v32, 16  ;;  %v4877_v47 = vor.u32 %v4876_v31, %v4873_v30  ;;  %v5133_v48 = vshrl.u32 %v7789_v32, 16  ;;  %v8956_v19 = vld [vmem:[#allocation2 + $0x4] sm:$0xff]   ;;  %v8960_v29 = vld [vmem:[%s10357_s1 + $0x338] sm:$0xff]  }
 0x728   : > { %8612 = vmatpush3.bf16.msra.mxu1 %v8948_v16  ;;  %8624 = vmatmul.mubr.msk.bf16.vlgmr.msra.gmra.mrb[96].mxu0 %vm342_vm6, %v4976_v33  ;;  %v4869_v51 = vor.u32 %v4868_v39, %v4865_v38  ;;  %v5211_v57 = vmul.bf16 %v5208_v45, %v9162_v24  ;;  %v5142_v58 = vrot.slane %v5140_v43, 1  ;;  %v7798_v62 = vcombine.low %v5209_v56, %v5210_v50  ;;  %v8961_v39 = vld [vmem:[%s10357_s1 + $0x350] sm:$0xff]   ;;  %v8965_v56 = vld [vmem:[%s10357_s1 + $0x360] sm:$0xff]  }
 0x729   : > { %8636 = vmatpush3.bf16.msra.mxu0 %v8949_v26  ;;  %8613 = vmatprep.subr.bf16.mxu1 %v9018_v10  ;;  %v5137_v49 = vrot.slane %v5135_v41, 1  ;;  %v5389_v9 = vmul.bf16 %v5386_v1, %v9178_v36  ;;  %v5320_v11 = vrot.slane %v8958_v0, 2  ;;  %v5321_v12 = vrot.slane %v8959_v61, 2 }
 0x72a   : > { %8637 = vmatprep.subr.bf16.mxu0 %v9018_v10  ;;  %8615 = vmatprep.mubr.msk.bf16.mxu1 %vm9019_vm5, %v9018_v10  ;;  %v4878_v60 = vsel %vm538_vm2, %v4869_v51, %v4877_v47  ;;  %v7799_v3 = vcombine.low %v5211_v57, %v5211_v57  ;;  %v5226_v7 = vshrl.u32 %v7798_v62, 16  ;;  %v5229_v8 = vshll.u32 %v7798_v62, 16  ;;  %v8962_v47 = vld [vmem:[%s10357_s1 + $0x358] sm:$0xff]  }
 0x72b   : > { %8639 = vmatprep.mubr.msk.bf16.mxu0 %vm9019_vm5, %v9018_v10  ;;  %v5138_v55 = vor.u32 %v5137_v49, %v5133_v48  ;;  %v5388_v17 = vmul.bf16 %v5385_v5, %v9126_v53  ;;  %v5390_v18 = vmul.bf16 %v5387_v6, %v9180_v37  ;;  %v5322_v27 = vsel %vm405_vm4, %v5320_v11, %v5321_v12  ;;  %v8964_v57 = vld [vmem:[%s10357_s1 + $0x378] sm:$0xff]  }
 0x72c   : > { %8614 = vmatpush3.bf16.msra.mxu1 %v8950_v35  ;;  %v5234_v15 = vshrl.u32 %v7799_v3, 16  ;;  %v5237_v16 = vshll.u32 %v7799_v3, 16  ;;  %v5228_v21 = vrot.slane %v5226_v7, 1  ;;  %v5231_v22 = vrot.slane %v5229_v8, 2 }
 0x72d   : > { %8638 = vmatpush3.bf16.msra.mxu0 %v8951_v42  ;;  %8627 = vmatprep.subr.bf16.mxu1 %v9018_v10  ;;  %v5143_v63 = vsel %vm838_vm9, %v5138_v55, %v5142_v58  ;;  %v7816_v26 = vcombine.low %v5388_v17, %v5389_v9  ;;  %v7817_v32 = vcombine.low %v5390_v18, %v5390_v18  ;;  %v8963_v55 = vld [vmem:[%s10357_s1 + $0x370] sm:$0xff]   ;;  %v8969_v58 = vld [vmem:[%s10357_s1 + $0x368] sm:$0xff]  }
 0x72e   : > { %8651 = vmatprep.subr.bf16.mxu0 %v9018_v10  ;;  %v5236_v30 = vrot.slane %v5234_v15, 1  ;;  %v5239_v31 = vrot.slane %v5237_v16, 2  ;;  %v5232_v33 = vor.u32 %v5231_v22, %v5228_v21 }
 0x72f   : > { %8616 = vmatmul.mubr.msk.bf16.vlgmr.msra.gmra.mrb[92].mxu1 %vm342_vm6, %v4878_v60  ;;  %v5405_v34 = vshrl.u32 %v7816_v26, 16  ;;  %v5408_v35 = vshll.u32 %v7816_v26, 16  ;;  %v5413_v41 = vshrl.u32 %v7817_v32, 16  ;;  %v5416_v42 = vshll.u32 %v7817_v32, 16 }
 0x730   : > { %8628 = vmatpush3.bf16.msra.mxu1 %v8952_v52  ;;  %8640 = vmatmul.mubr.msk.bf16.vlgmr.msra.gmra.mrb[100].mxu0 %vm342_vm6, %v5143_v63  ;;  %v5240_v38 = vor.u32 %v5239_v31, %v5236_v30 }
 0x731   : > { %8652 = vmatpush3.bf16.msra.mxu0 %v8953_v59  ;;  %8629 = vmatprep.subr.bf16.mxu1 %v9018_v10  ;;  %v5407_v44 = vrot.slane %v5405_v34, 2  ;;  %v5410_v45 = vrot.slane %v5408_v35, 3  ;;  %v5415_v48 = vrot.slane %v5413_v41, 2  ;;  %v5418_v49 = vrot.slane %v5416_v42, 3 }
 0x732   : > { %8653 = vmatprep.subr.bf16.mxu0 %v9018_v10  ;;  %8631 = vmatprep.mubr.msk.bf16.mxu1 %vm9019_vm5, %v9018_v10  ;;  %v5241_v43 = vsel %vm312_vm7, %v5232_v33, %v5240_v38 }
 0x733   : > { %8655 = vmatprep.mubr.msk.bf16.mxu0 %vm9019_vm5, %v9018_v10  ;;  %v5411_v50 = vor.u32 %v5410_v45, %v5407_v44  ;;  %v5419_v51 = vor.u32 %v5418_v49, %v5415_v48 }
 0x734   : > { %8630 = vmatpush3.bf16.msra.mxu1 %v8954_v2 }
 0x735   : > { %8654 = vmatpush3.bf16.msra.mxu0 %v8955_v4  ;;  %8643 = vmatprep.subr.bf16.mxu1 %v9018_v10  ;;  %v5420_v52 = vsel %vm538_vm2, %v5411_v50, %v5419_v51 }
 0x736   : > { %8667 = vmatprep.subr.bf16.mxu0 %v9018_v10 }
 0x737   : > { %8632 = vmatmul.mubr.msk.bf16.vlgmr.msra.gmra.mrb[96].mxu1 %vm342_vm6, %v8956_v19 }
 0x738   : > { %8644 = vmatpush3.bf16.msra.mxu1 %v8957_v13  ;;  %8656 = vmatmul.mubr.msk.bf16.vlgmr.msra.gmra.mrb[104].mxu0 %vm342_vm6, %v5322_v27 }
 0x739   : > { %8645 = vmatprep.subr.bf16.mxu1 %v9018_v10  ;;  %8647 = vmatprep.mubr.msk.bf16.mxu1 %vm9019_vm5, %v9018_v10 }
 0x73a   : > { %8671 = vmatprep.mubr.msk.bf16.mxu0 %vm9019_vm5, %v9018_v10  ;;  %8668 = vmatpush3.bf16.msra.mxu0 %v8965_v56 }
 0x73b   : > { %8669 = vmatprep.subr.bf16.mxu0 %v9018_v10 }
 0x73c   : > { %8646 = vmatpush3.bf16.msra.mxu1 %v8960_v29 }
 0x73d   : > { %8659 = vmatprep.subr.bf16.mxu1 %v9018_v10 }
 0x73e   : > { %8670 = vmatpush3.bf16.msra.mxu0 %v8969_v58 }
 0x73f   : > { %8648 = vmatmul.mubr.msk.bf16.vlgmr.msra.gmra.mrb[100].mxu1 %vm342_vm6, %v5241_v43  ;;  %8683 = vmatprep.subr.bf16.mxu0 %v9018_v10 }
 0x740   : > { %8660 = vmatpush3.bf16.msra.mxu1 %v8961_v39  ;;  %8663 = vmatprep.mubr.msk.bf16.mxu1 %vm9019_vm5, %v9018_v10 }
 0x741   : > { %8661 = vmatprep.subr.bf16.mxu1 %v9018_v10 }
 0x744   : > { %8662 = vmatpush3.bf16.msra.mxu1 %v8962_v47 }
 0x745   : > { %8675 = vmatprep.subr.bf16.mxu1 %v9018_v10 }
 0x747   : > { %8664 = vmatmul.mubr.msk.bf16.vlgmr.msra.gmra.mrb[104].mxu1 %vm342_vm6, %v5420_v52 }
 0x748   : > { %8679 = vmatprep.mubr.msk.bf16.mxu1 %vm9019_vm5, %v9018_v10  ;;  %8676 = vmatpush3.bf16.msra.mxu1 %v8963_v55 }
 0x749   : > { %8677 = vmatprep.subr.bf16.mxu1 %v9018_v10 }
 0x74c   : > { %8678 = vmatpush3.bf16.msra.mxu1 %v8964_v57 }
 0x74d   : > { %8691 = vmatprep.subr.bf16.mxu1 %v9018_v10 }
 0x7f0   : > { %v4830_v59 = vpop.f32.mrb[92].mxu0 }
 0x7f1   : > { %v8609_v60 = vpop.f32.mrb[93].mxu0 }
 0x7f2   : > { %v4833_v61 = vpop.f32.mrb[94].mxu0 }
 0x7f3   : > { %v8610_v62 = vpop.f32.mrb[95].mxu0 }
 0x7fa   : > { %v4753_v63 = vpop.f32.mrb[88].mxu1 }
 0x7fb   : > { %4760 = vst.msk [vmem:[#allocation3] sm:$0xff] %vm342_vm6, %v4753_v63  ;;  %v8601_v0 = vpop.f32.mrb[89].mxu1  ;;  %v5026_v1 = vpop.f32.mrb[96].mxu0 }
 0x7fc   : > { %v4756_v2 = vpop.f32.mrb[90].mxu1  ;;  %v8625_v3 = vpop.f32.mrb[97].mxu0 }
 0x7fd   : > { %4761 = vst.msk [vmem:[#allocation3 + $0x8] sm:$0xff] %vm342_vm6, %v4756_v2  ;;  %v8602_v4 = vpop.f32.mrb[91].mxu1  ;;  %v5029_v5 = vpop.f32.mrb[98].mxu0 }
 0x7fe   : > { %v8626_v6 = vpop.f32.mrb[99].mxu0 }
 0x802   : > { %v4837_v7 = vld [vmem:[#allocation3] sm:$0xff]  ;;  %v4928_v8 = vpop.f32.mrb[92].mxu1 }
 0x803   : > { %v4839_v9 = vadd.f32 %v4837_v7, %v4830_v59  ;;  %v8617_v11 = vpop.f32.mrb[93].mxu1  ;;  %v5193_v12 = vpop.f32.mrb[100].mxu0 }
 0x804   : > { %v4838_v13 = vld [vmem:[#allocation3 + $0x8] sm:$0xff]  ;;  %v4931_v15 = vpop.f32.mrb[94].mxu1  ;;  %v8641_v16 = vpop.f32.mrb[101].mxu0 }
 0x805   : > { %4841 = vst.msk [vmem:[#allocation3] sm:$0xff] %vm342_vm6, %v4839_v9  ;;  %v4840_v17 = vadd.f32 %v4838_v13, %v4833_v61  ;;  %v8618_v18 = vpop.f32.mrb[95].mxu1  ;;  %v5196_v19 = vpop.f32.mrb[102].mxu0  ;;  %v7822_v13 = vld [vmem:[%s10358_s2 + $0x5] ss:$0 sm:$0xff] }
 0x806   : > { %v8642_v21 = vpop.f32.mrb[103].mxu0 }
 0x807   : > { %4842 = vst.msk [vmem:[#allocation3 + $0x8] sm:$0xff] %vm342_vm6, %v4840_v17  ;;  %v7824_v17 = vld [vmem:[%s10359_s3 + $0x5] ss:$0 sm:$0xff] }
 0x80a   : > { %v5100_v22 = vpop.f32.mrb[96].mxu1 }
 0x80b   : > { %v8633_v26 = vpop.f32.mrb[97].mxu1  ;;  %v5372_v27 = vpop.f32.mrb[104].mxu0 }
 0x80c   : > { %v4935_v29 = vld [vmem:[#allocation3] sm:$0xff]  ;;  %v5103_v30 = vpop.f32.mrb[98].mxu1  ;;  %v8657_v31 = vpop.f32.mrb[105].mxu0 }
 0x80d   : > { %v4937_v32 = vadd.f32 %v4935_v29, %v4928_v8  ;;  %v8634_v33 = vpop.f32.mrb[99].mxu1  ;;  %v5375_v34 = vpop.f32.mrb[106].mxu0 }
 0x80e   : > { %v4936_v35 = vld [vmem:[#allocation3 + $0x8] sm:$0xff]  ;;  %v8658_v38 = vpop.f32.mrb[107].mxu0 }
 0x80f   : > { %4939 = vst.msk [vmem:[#allocation3] sm:$0xff] %vm342_vm6, %v4937_v32  ;;  %v4938_v39 = vadd.f32 %v4936_v35, %v4931_v15  ;;  %v5483_v15 = vld [vmem:[#allocation2 + $0x4] sm:$0xff]  }
 0x810   : > { %v5485_v21 = vunpack.c.l.bf16 %v5483_v15  ;;  %v5486_v29 = vunpack.c.h.bf16 %v5483_v15 }
 0x811   : > { %4940 = vst.msk [vmem:[#allocation3 + $0x8] sm:$0xff] %vm342_vm6, %v4938_v39 }
 0x812   : > { %v5291_v41 = vpop.f32.mrb[100].mxu1 }
 0x813   : > { %v8649_v42 = vpop.f32.mrb[101].mxu1 }
 0x814   : > { %v5294_v43 = vpop.f32.mrb[102].mxu1  ;;  %v5800_v42 = vld [vmem:[#allocation2] sm:$0x8] }
 0x815   : > { %v8650_v44 = vpop.f32.mrb[103].mxu1 }
 0x816   : > { %v5033_v45 = vld [vmem:[#allocation3] sm:$0xff] }
 0x817   : > { %v5035_v47 = vadd.f32 %v5033_v45, %v5026_v1 }
 0x818   : > { %v5034_v48 = vld [vmem:[#allocation3 + $0x8] sm:$0xff] }
 0x819   : > { %5037 = vst.msk [vmem:[#allocation3] sm:$0xff] %vm342_vm6, %v5035_v47  ;;  %v5036_v49 = vadd.f32 %v5034_v48, %v5029_v5 }
 0x81a   : > { %v5470_v50 = vpop.f32.mrb[104].mxu1 }
 0x81b   : > { %5038 = vst.msk [vmem:[#allocation3 + $0x8] sm:$0xff] %vm342_vm6, %v5036_v49  ;;  %v8665_v51 = vpop.f32.mrb[105].mxu1 }
 0x81c   : > { %v5473_v52 = vpop.f32.mrb[106].mxu1 }
 0x81d   : > { %v8666_v55 = vpop.f32.mrb[107].mxu1 }
 0x81e   : > { %v5803_v55 = vmul.bf16 %v5800_v42, %v9119_v40 }
 0x820   : > { %v5107_v56 = vld [vmem:[#allocation3] sm:$0xff] }
 0x821   : > { %v5109_v57 = vadd.f32 %v5107_v56, %v5100_v22 }
 0x822   : > { %v5108_v58 = vld [vmem:[#allocation3 + $0x8] sm:$0xff] }
 0x823   : > { %5111 = vst.msk [vmem:[#allocation3] sm:$0xff] %vm342_vm6, %v5109_v57  ;;  %v5110_v59 = vadd.f32 %v5108_v58, %v5103_v30 }
 0x825   : > { %5112 = vst.msk [vmem:[#allocation3 + $0x8] sm:$0xff] %vm342_vm6, %v5110_v59 }
 0x82a   : > { %v5200_v60 = vld [vmem:[#allocation3] sm:$0xff] }
 0x82b   : > { %v5202_v61 = vadd.f32 %v5200_v60, %v5193_v12 }
 0x82c   : > { %v5201_v62 = vld [vmem:[#allocation3 + $0x8] sm:$0xff] }
 0x82d   : > { %5204 = vst.msk [vmem:[#allocation3] sm:$0xff] %vm342_vm6, %v5202_v61  ;;  %v5203_v63 = vadd.f32 %v5201_v62, %v5196_v19 }
 0x82f   : > { %5205 = vst.msk [vmem:[#allocation3 + $0x8] sm:$0xff] %vm342_vm6, %v5203_v63 }
 0x834   : > { %v5298_v0 = vld [vmem:[#allocation3] sm:$0xff] }
 0x835   : > { %v5300_v1 = vadd.f32 %v5298_v0, %v5291_v41  ;;  %v5527_v41 = vld [vmem:[#allocation2] sm:$0xe]  ;;  %v8968_v0 = vld [vmem:[%s10357_s1 + $0x390] sm:$0xff]  }
 0x836   : > { %v5299_v2 = vld [vmem:[#allocation3 + $0x8] sm:$0xff]  ;;  %v5530_v47 = vmul.bf16 %v5527_v41, %v9121_v46 }
 0x837   : > { %5302 = vst.msk [vmem:[#allocation3] sm:$0xff] %vm342_vm6, %v5300_v1  ;;  %v5301_v3 = vadd.f32 %v5299_v2, %v5294_v43  ;;  %v5702_v43 = vld [vmem:[#allocation2] sm:$0xc] }
 0x838   : > { %v5705_v62 = vmul.bf16 %v5702_v43, %v9126_v53 }
 0x839   : > { %5303 = vst.msk [vmem:[#allocation3 + $0x8] sm:$0xff] %vm342_vm6, %v5301_v3 }
 0x83e   : > { %v5379_v4 = vld [vmem:[#allocation3] sm:$0xff] }
 0x83f   : > { %v5381_v5 = vadd.f32 %v5379_v4, %v5372_v27 }
 0x840   : > { %v5380_v6 = vld [vmem:[#allocation3 + $0x8] sm:$0xff] }
 0x841   : > { %5383 = vst.msk [vmem:[#allocation3] sm:$0xff] %vm342_vm6, %v5381_v5  ;;  %v5382_v7 = vadd.f32 %v5380_v6, %v5375_v34 }
 0x843   : > { %5384 = vst.msk [vmem:[#allocation3 + $0x8] sm:$0xff] %vm342_vm6, %v5382_v7 }
 0x848   : > { %v5477_v8 = vld [vmem:[#allocation3] sm:$0xff] }
 0x849   : > { %v5479_v9 = vadd.f32 %v5477_v8, %v5470_v50 }
 0x84a   : > { %v5478_v11 = vld [vmem:[#allocation3 + $0x8] sm:$0xff] }
 0x84b   : > { %5481 = vst.msk [vmem:[#allocation3] sm:$0xff] %vm342_vm6, %v5479_v9  ;;  %v5480_v12 = vadd.f32 %v5478_v11, %v5473_v52 }
 0x84d   : > { %5482 = vst.msk [vmem:[#allocation3 + $0x8] sm:$0xff] %vm342_vm6, %v5480_v12 }
 0x852   : > { %v5487_v16 = vld [vmem:[#allocation3] sm:$0xff] }
 0x853   : > { %v5497_v18 = vadd.f32 %v7822_v13, %v5487_v16 }
 0x854   : > { %v5488_v19 = vld [vmem:[#allocation3 + $0x8] sm:$0xff] }
 0x855   : > { %v5507_v22 = vmul.f32 %v7824_v17, %v5497_v18  ;;  %v5498_v26 = vadd.f32 %v7822_v13, %v5488_v19  ;;  %v5974_v13 = vld [vmem:[#allocation2 + $0xc] sm:$0x1] }
 0x857   : > { %v5509_v27 = vadd.f32 %v5507_v22, %v5485_v21  ;;  %v5508_v30 = vmul.f32 %v7824_v17, %v5498_v26  ;;  %v8970_v21 = vld [vmem:[%s10357_s1 + $0x398] sm:$0xff]  }
 0x859   : > { %vm5511_vm12 = vcmp.ge.f32.partialorder %v5509_v27, 0.0  ;;  %v5513_v31 = vmul.f32 0.2, %v5509_v27  ;;  %v5510_v32 = vadd.f32 %v5508_v30, %v5486_v29 }
 0x85b   : > { %v5515_v33 = vsel %vm5511_vm12, %v5509_v27, %v5513_v31  ;;  %vm5512_vm13 = vcmp.ge.f32.partialorder %v5510_v32, 0.0  ;;  %v5514_v34 = vmul.f32 0.2, %v5510_v32 }
 0x85c   : > { %v8013_v35 = vpack.c.bf16 %v5515_v33, %v5515_v33  ;;  %v5977_v33 = vmul.bf16 %v5974_v13, %v9155_v20  ;;  %v8975_v13 = vld [vmem:[%s10357_s1 + $0x3a0] sm:$0xff]  }
 0x85d   : > { %v5516_v38 = vsel %vm5512_vm13, %v5510_v32, %v5514_v34 }
 0x85e   : > { %5525 = vst.msk [vmem:[#allocation2 + $0x4] sm:$0xf] %vm226_vm0, %v8013_v35  ;;  %v8014_v39 = vpack.c.bf16 %v5516_v38, %v5516_v38 }
 0x860   : > { %5526 = vst.msk [vmem:[#allocation2 + $0x8] sm:$0xf] %vm226_vm0, %v8014_v39 }
 0x865   : > { %v8966_v44 = vld [vmem:[#allocation2] sm:$0xfc]  }
 0x866   : > { %v5528_v45 = vld [vmem:[#allocation2 + $0x4] sm:$0xf]  ;;  %v5637_v52 = vrot.slane %v8966_v44, 2 }
 0x867   : > { %v5531_v48 = vmul.bf16 %v5528_v45, %v9160_v23  ;;  %v5801_v49 = vld [vmem:[#allocation2 + $0x4] sm:$0xf]  ;;  %v8967_v51 = vld [vmem:[#allocation2 + $0x8] ss:$0 sps:$4 sm:$0x33]  }
 0x868   : > { %v5703_v50 = vld [vmem:[#allocation2 + $0x4] sm:$0xf]  ;;  %v5804_v56 = vmul.bf16 %v5801_v49, %v9152_v14  ;;  %v5529_v58 = vld [vmem:[#allocation2 + $0x8] sm:$0x3]  ;;  %v5638_v63 = vrot.slane %v8967_v51, 2 }
 0x869   : > { %v5706_v57 = vmul.bf16 %v5703_v50, %v9178_v36  ;;  %v7831_v59 = vcombine.low %v5530_v47, %v5531_v48  ;;  %v5802_v60 = vld [vmem:[#allocation2 + $0x8] sm:$0xf]  ;;  %v5532_v1 = vmul.bf16 %v5529_v58, %v9162_v24  ;;  %v5972_v19 = vld [vmem:[#allocation2 + $0x4] sm:$0xf] }
 0x86a   : > { %v5704_v61 = vld [vmem:[#allocation2 + $0x8] sm:$0x7]  ;;  %v5805_v2 = vmul.bf16 %v5802_v60, %v9164_v25  ;;  %v7858_v3 = vcombine.low %v5803_v55, %v5804_v56  ;;  %v5639_v8 = vsel %vm405_vm4, %v5637_v52, %v5638_v63  ;;  %v5975_v39 = vmul.bf16 %v5972_v19, %v9128_v54  ;;  %v8971_v47 = vld [vmem:[%s10357_s1 + $0x380] sm:$0xff]   ;;  %v8972_v55 = vld [vmem:[%s10357_s1 + $0x3b0] sm:$0xff]  }
 0x86b   : > { %v5547_v4 = vshrl.u32 %v7831_v59, 16  ;;  %v5550_v5 = vshll.u32 %v7831_v59, 16  ;;  %v5707_v6 = vmul.bf16 %v5704_v61, %v9180_v37  ;;  %v7849_v7 = vcombine.low %v5705_v62, %v5706_v57  ;;  %8680 = vmatmul.mubr.msk.bf16.vlgmr.msra.gmra.mrb[108].mxu1 %vm342_vm6, %v5639_v8  ;;  %v5973_v32 = vld [vmem:[#allocation2 + $0x8] sm:$0xf]  ;;  %v8976_v19 = vld [vmem:[%s10357_s1 + $0x3d0] sm:$0xff]  }
 0x86c   : > { %v7832_v9 = vcombine.low %v5532_v1, %v5532_v1  ;;  %v7859_v11 = vcombine.low %v5805_v2, %v5805_v2  ;;  %v5820_v12 = vshrl.u32 %v7858_v3, 16  ;;  %v5823_v17 = vshll.u32 %v7858_v3, 16  ;;  %8692 = vmatpush3.bf16.msra.mxu1 %v8968_v0  ;;  %8695 = vmatprep.mubr.msk.bf16.mxu1 %vm9019_vm5, %v9018_v10  ;;  %v6066_v62 = vld [vmem:[#allocation2 + $0x8] sm:$0xf]  ;;  %v8974_v3 = vld [vmem:[%s10357_s1 + $0x3b8] sm:$0xff]  }
 0x86d   : > { %v5549_v15 = vrot.slane %v5547_v4, 1  ;;  %v5552_v16 = vrot.slane %v5550_v5, 2  ;;  %v7850_v18 = vcombine.low %v5707_v6, %v5707_v6  ;;  %8693 = vmatprep.subr.bf16.mxu1 %v9018_v10  ;;  %v5722_v43 = vshrl.u32 %v7849_v7, 16  ;;  %v8973_v63 = vld [vmem:[%s10357_s1 + $0x388] sm:$0xff]   ;;  %v6065_v5 = vld [vmem:[#allocation2 + $0x4] sm:$0xe] }
 0x86e   : > { %v5555_v22 = vshrl.u32 %v7832_v9, 16  ;;  %v5558_v26 = vshll.u32 %v7832_v9, 16  ;;  %v5828_v27 = vshrl.u32 %v7859_v11, 16  ;;  %v5822_v29 = vrot.slane %v5820_v12, 3  ;;  %v6067_v6 = vld [vmem:[#allocation2 + $0xc] sm:$0x3] }
 0x86f   : > { %v5825_v30 = vrot.slane %v5823_v17, 4  ;;  %v5831_v31 = vshll.u32 %v7859_v11, 16  ;;  %v5553_v41 = vor.u32 %v5552_v16, %v5549_v15  ;;  %v5730_v44 = vshrl.u32 %v7850_v18, 16 }
 0x870   : > { %v5557_v34 = vrot.slane %v5555_v22, 1  ;;  %v5560_v35 = vrot.slane %v5558_v26, 2  ;;  %v5830_v38 = vrot.slane %v5828_v27, 3  ;;  %8694 = vmatpush3.bf16.msra.mxu1 %v8970_v21  ;;  %v5725_v48 = vshll.u32 %v7849_v7, 16 }
 0x871   : > { %v5833_v42 = vrot.slane %v5831_v31, 4  ;;  %v5733_v49 = vshll.u32 %v7850_v18, 16  ;;  %v5976_v50 = vmul.bf16 %v5973_v32, %v9171_v28  ;;  %v5826_v51 = vor.u32 %v5825_v30, %v5822_v29  ;;  %8707 = vmatprep.subr.bf16.mxu1 %v9018_v10  ;;  %v8982_v22 = vld [vmem:[#allocation2 + $0xc] ss:$0 sps:$4 sm:$0x33]  }
 0x872   : > { %v5561_v45 = vor.u32 %v5560_v35, %v5557_v34  ;;  %v7876_v56 = vcombine.low %v5977_v33, %v5977_v33  ;;  %v5732_v58 = vrot.slane %v5730_v44, 2  ;;  %v5724_v0 = vrot.slane %v5722_v43, 2  ;;  %v8981_v29 = vld [vmem:[#allocation2 + $0x4] sm:$0xfc]   ;;  %v8978_v33 = vld [vmem:[%s10357_s1 + $0x3d8] sm:$0xff]  }
 0x873   : > { %v5834_v52 = vor.u32 %v5833_v42, %v5830_v38  ;;  %v5735_v59 = vrot.slane %v5733_v49, 3  ;;  %v7875_v60 = vcombine.low %v5975_v39, %v5976_v50  ;;  %v5727_v1 = vrot.slane %v5725_v48, 3  ;;  %v6245_v30 = vld [vmem:[#allocation2 + $0x8] sm:$0xf]  ;;  %v6244_v34 = vld [vmem:[#allocation2 + $0x4] sm:$0xc] }
 0x874   : > { %v5562_v57 = vsel %vm312_vm7, %v5553_v41, %v5561_v45  ;;  %v5999_v4 = vshll.u32 %v7876_v56, 16  ;;  %v6069_v11 = vmul.bf16 %v6066_v62, %v9160_v23  ;;  %v6068_v16 = vmul.bf16 %v6065_v5, %v9121_v46  ;;  %v8977_v31 = vld [vmem:[%s10357_s1 + $0x3a8] sm:$0xff]   ;;  %v8980_v44 = vld [vmem:[%s10357_s1 + $0x3c0] sm:$0xff]  }
 0x875   : > { %8672 = vmatmul.mubr.msk.bf16.vlgmr.msra.gmra.mrb[108].mxu0 %vm342_vm6, %v5562_v57  ;;  %v5835_v61 = vsel %vm652_vm8, %v5826_v51, %v5834_v52  ;;  %v5994_v2 = vshll.u32 %v7875_v60, 16  ;;  %v5736_v7 = vor.u32 %v5735_v59, %v5732_v58  ;;  %v5992_v8 = vshrl.u32 %v7875_v60, 16  ;;  %v6246_v35 = vld [vmem:[#allocation2 + $0xc] sm:$0x7]  ;;  %v8979_v50 = vld [vmem:[#allocation2 + $0x4] sm:$0xff]  }
 0x876   : > { %8684 = vmatpush3.bf16.msra.mxu0 %v8971_v47  ;;  %8696 = vmatmul.mubr.msk.bf16.vlgmr.msra.gmra.mrb[112].mxu1 %vm342_vm6, %v5835_v61  ;;  %v5728_v12 = vor.u32 %v5727_v1, %v5724_v0  ;;  %v6070_v17 = vmul.bf16 %v6067_v6, %v9162_v24  ;;  %v6001_v18 = vrot.slane %v5999_v4, 1  ;;  %v7884_v26 = vcombine.low %v6068_v16, %v6069_v11  ;;  %v8983_v57 = vld [vmem:[%s10357_s1 + $0x3c8] sm:$0xff]   ;;  %v8984_v1 = vld [vmem:[%s10357_s1 + $0x3e0] sm:$0xff]   ;;  %v8988_v16 = vld [vmem:[%s10357_s1 + $0x3f0] sm:$0xff]  }
 0x877   : > { %8708 = vmatpush3.bf16.msra.mxu1 %v8972_v55  ;;  %8685 = vmatprep.subr.bf16.mxu0 %v9018_v10  ;;  %v5996_v9 = vrot.slane %v5994_v2, 1  ;;  %v6248_v41 = vmul.bf16 %v6245_v30, %v9178_v36  ;;  %v6179_v42 = vrot.slane %v8981_v29, 2  ;;  %v6180_v43 = vrot.slane %v8982_v22, 2 }
 0x878   : > { %8709 = vmatprep.subr.bf16.mxu1 %v9018_v10  ;;  %8687 = vmatprep.mubr.msk.bf16.mxu0 %vm9019_vm5, %v9018_v10  ;;  %v5737_v21 = vsel %vm538_vm2, %v5728_v12, %v5736_v7  ;;  %v7885_v32 = vcombine.low %v6070_v17, %v6070_v17  ;;  %v6085_v38 = vshrl.u32 %v7884_v26, 16  ;;  %v6088_v39 = vshll.u32 %v7884_v26, 16  ;;  %v8985_v7 = vld [vmem:[%s10357_s1 + $0x3e8] sm:$0xff]  }
 0x879   : > { %8711 = vmatprep.mubr.msk.bf16.mxu1 %vm9019_vm5, %v9018_v10  ;;  %v5997_v15 = vor.u32 %v5996_v9, %v5992_v8  ;;  %v6247_v48 = vmul.bf16 %v6244_v34, %v9126_v53  ;;  %v6249_v49 = vmul.bf16 %v6246_v35, %v9180_v37  ;;  %v6181_v56 = vsel %vm405_vm4, %v6179_v42, %v6180_v43  ;;  %v8987_v17 = vld [vmem:[%s10357_s1 + $0x408] sm:$0xff]  }
 0x87a   : > { %8686 = vmatpush3.bf16.msra.mxu0 %v8973_v63  ;;  %v6093_v45 = vshrl.u32 %v7885_v32, 16  ;;  %v6096_v47 = vshll.u32 %v7885_v32, 16  ;;  %v6087_v51 = vrot.slane %v6085_v38, 1  ;;  %v6090_v52 = vrot.slane %v6088_v39, 2 }
 0x87b   : > { %8710 = vmatpush3.bf16.msra.mxu1 %v8974_v3  ;;  %8699 = vmatprep.subr.bf16.mxu0 %v9018_v10  ;;  %v6002_v27 = vsel %vm838_vm9, %v5997_v15, %v6001_v18  ;;  %v7902_v55 = vcombine.low %v6247_v48, %v6248_v41  ;;  %v7903_v60 = vcombine.low %v6249_v49, %v6249_v49  ;;  %v8986_v15 = vld [vmem:[%s10357_s1 + $0x400] sm:$0xff]   ;;  %v8992_v18 = vld [vmem:[%s10357_s1 + $0x3f8] sm:$0xff]  }
 0x87c   : > { %8723 = vmatprep.subr.bf16.mxu1 %v9018_v10  ;;  %v6095_v58 = vrot.slane %v6093_v45, 1  ;;  %v6098_v59 = vrot.slane %v6096_v47, 2  ;;  %v6091_v61 = vor.u32 %v6090_v52, %v6087_v51 }
 0x87d   : > { %8688 = vmatmul.mubr.msk.bf16.vlgmr.msra.gmra.mrb[112].mxu0 %vm342_vm6, %v5737_v21  ;;  %v6264_v62 = vshrl.u32 %v7902_v55, 16  ;;  %v6267_v63 = vshll.u32 %v7902_v55, 16  ;;  %v6272_v2 = vshrl.u32 %v7903_v60, 16  ;;  %v6275_v3 = vshll.u32 %v7903_v60, 16 }
 0x87e   : > { %8700 = vmatpush3.bf16.msra.mxu0 %v8975_v13  ;;  %8712 = vmatmul.mubr.msk.bf16.vlgmr.msra.gmra.mrb[116].mxu1 %vm342_vm6, %v6002_v27  ;;  %v6099_v0 = vor.u32 %v6098_v59, %v6095_v58 }
 0x87f   : > { %8724 = vmatpush3.bf16.msra.mxu1 %v8976_v19  ;;  %8701 = vmatprep.subr.bf16.mxu0 %v9018_v10  ;;  %v6266_v5 = vrot.slane %v6264_v62, 2  ;;  %v6269_v6 = vrot.slane %v6267_v63, 3  ;;  %v6274_v8 = vrot.slane %v6272_v2, 2  ;;  %v6277_v9 = vrot.slane %v6275_v3, 3 }
 0x880   : > { %8725 = vmatprep.subr.bf16.mxu1 %v9018_v10  ;;  %8703 = vmatprep.mubr.msk.bf16.mxu0 %vm9019_vm5, %v9018_v10  ;;  %v6100_v4 = vsel %vm312_vm7, %v6091_v61, %v6099_v0 }
 0x881   : > { %8727 = vmatprep.mubr.msk.bf16.mxu1 %vm9019_vm5, %v9018_v10  ;;  %v6270_v11 = vor.u32 %v6269_v6, %v6266_v5  ;;  %v6278_v12 = vor.u32 %v6277_v9, %v6274_v8 }
 0x882   : > { %8702 = vmatpush3.bf16.msra.mxu0 %v8977_v31 }
 0x883   : > { %8726 = vmatpush3.bf16.msra.mxu1 %v8978_v33  ;;  %8715 = vmatprep.subr.bf16.mxu0 %v9018_v10  ;;  %v6279_v13 = vsel %vm538_vm2, %v6270_v11, %v6278_v12 }
 0x884   : > { %8739 = vmatprep.subr.bf16.mxu1 %v9018_v10 }
 0x885   : > { %8704 = vmatmul.mubr.msk.bf16.vlgmr.msra.gmra.mrb[116].mxu0 %vm342_vm6, %v8979_v50 }
 0x886   : > { %8716 = vmatpush3.bf16.msra.mxu0 %v8980_v44  ;;  %8728 = vmatmul.mubr.msk.bf16.vlgmr.msra.gmra.mrb[120].mxu1 %vm342_vm6, %v6181_v56 }
 0x887   : > { %8717 = vmatprep.subr.bf16.mxu0 %v9018_v10  ;;  %8719 = vmatprep.mubr.msk.bf16.mxu0 %vm9019_vm5, %v9018_v10 }
 0x888   : > { %8743 = vmatprep.mubr.msk.bf16.mxu1 %vm9019_vm5, %v9018_v10  ;;  %8740 = vmatpush3.bf16.msra.mxu1 %v8988_v16 }
 0x889   : > { %8741 = vmatprep.subr.bf16.mxu1 %v9018_v10 }
 0x88a   : > { %8718 = vmatpush3.bf16.msra.mxu0 %v8983_v57 }
 0x88b   : > { %8731 = vmatprep.subr.bf16.mxu0 %v9018_v10 }
 0x88c   : > { %8742 = vmatpush3.bf16.msra.mxu1 %v8992_v18 }
 0x88d   : > { %8720 = vmatmul.mubr.msk.bf16.vlgmr.msra.gmra.mrb[120].mxu0 %vm342_vm6, %v6100_v4  ;;  %8755 = vmatprep.subr.bf16.mxu1 %v9018_v10 }
 0x88e   : > { %8732 = vmatpush3.bf16.msra.mxu0 %v8984_v1  ;;  %8735 = vmatprep.mubr.msk.bf16.mxu0 %vm9019_vm5, %v9018_v10 }
 0x88f   : > { %8733 = vmatprep.subr.bf16.mxu0 %v9018_v10 }
 0x892   : > { %8734 = vmatpush3.bf16.msra.mxu0 %v8985_v7 }
 0x893   : > { %8747 = vmatprep.subr.bf16.mxu0 %v9018_v10 }
 0x895   : > { %8736 = vmatmul.mubr.msk.bf16.vlgmr.msra.gmra.mrb[124].mxu0 %vm342_vm6, %v6279_v13 }
 0x896   : > { %8751 = vmatprep.mubr.msk.bf16.mxu0 %vm9019_vm5, %v9018_v10  ;;  %8748 = vmatpush3.bf16.msra.mxu0 %v8986_v15 }
 0x897   : > { %8749 = vmatprep.subr.bf16.mxu0 %v9018_v10 }
 0x89a   : > { %8750 = vmatpush3.bf16.msra.mxu0 %v8987_v17 }
 0x89b   : > { %8763 = vmatprep.subr.bf16.mxu0 %v9018_v10 }
 0x93e   : > { %v5689_v19 = vpop.f32.mrb[108].mxu1 }
 0x93f   : > { %v8681_v21 = vpop.f32.mrb[109].mxu1 }
 0x940   : > { %v5692_v22 = vpop.f32.mrb[110].mxu1 }
 0x941   : > { %v8682_v26 = vpop.f32.mrb[111].mxu1 }
 0x948   : > { %v5612_v27 = vpop.f32.mrb[108].mxu0 }
 0x949   : > { %5619 = vst.msk [vmem:[#allocation3] sm:$0xff] %vm342_vm6, %v5612_v27  ;;  %v8673_v29 = vpop.f32.mrb[109].mxu0  ;;  %v5885_v30 = vpop.f32.mrb[112].mxu1 }
 0x94a   : > { %v5615_v31 = vpop.f32.mrb[110].mxu0  ;;  %v8697_v32 = vpop.f32.mrb[113].mxu1 }
 0x94b   : > { %5620 = vst.msk [vmem:[#allocation3 + $0x8] sm:$0xff] %vm342_vm6, %v5615_v31  ;;  %v8674_v33 = vpop.f32.mrb[111].mxu0  ;;  %v5888_v34 = vpop.f32.mrb[114].mxu1 }
 0x94c   : > { %v8698_v35 = vpop.f32.mrb[115].mxu1 }
 0x950   : > { %v5696_v38 = vld [vmem:[#allocation3] sm:$0xff]  ;;  %v5787_v39 = vpop.f32.mrb[112].mxu0 }
 0x951   : > { %v5698_v41 = vadd.f32 %v5696_v38, %v5689_v19  ;;  %v8689_v42 = vpop.f32.mrb[113].mxu0  ;;  %v6052_v43 = vpop.f32.mrb[116].mxu1 }
 0x952   : > { %v5697_v44 = vld [vmem:[#allocation3 + $0x8] sm:$0xff]  ;;  %v5790_v45 = vpop.f32.mrb[114].mxu0  ;;  %v8713_v47 = vpop.f32.mrb[117].mxu1 }
 0x953   : > { %5700 = vst.msk [vmem:[#allocation3] sm:$0xff] %vm342_vm6, %v5698_v41  ;;  %v5699_v48 = vadd.f32 %v5697_v44, %v5692_v22  ;;  %v8690_v49 = vpop.f32.mrb[115].mxu0  ;;  %v6055_v50 = vpop.f32.mrb[118].mxu1  ;;  %v7908_v44 = vld [vmem:[%s10358_s2 + $0x6] ss:$0 sm:$0xff] }
 0x954   : > { %v8714_v51 = vpop.f32.mrb[119].mxu1 }
 0x955   : > { %5701 = vst.msk [vmem:[#allocation3 + $0x8] sm:$0xff] %vm342_vm6, %v5699_v48  ;;  %v7910_v48 = vld [vmem:[%s10359_s3 + $0x6] ss:$0 sm:$0xff] }
 0x958   : > { %v5959_v52 = vpop.f32.mrb[116].mxu0 }
 0x959   : > { %v8705_v55 = vpop.f32.mrb[117].mxu0  ;;  %v6231_v56 = vpop.f32.mrb[120].mxu1 }
 0x95a   : > { %v5794_v57 = vld [vmem:[#allocation3] sm:$0xff]  ;;  %v5962_v58 = vpop.f32.mrb[118].mxu0  ;;  %v8729_v59 = vpop.f32.mrb[121].mxu1 }
 0x95b   : > { %v5796_v60 = vadd.f32 %v5794_v57, %v5787_v39  ;;  %v8706_v61 = vpop.f32.mrb[119].mxu0  ;;  %v6234_v62 = vpop.f32.mrb[122].mxu1 }
 0x95c   : > { %v5795_v63 = vld [vmem:[#allocation3 + $0x8] sm:$0xff]  ;;  %v8730_v0 = vpop.f32.mrb[123].mxu1 }
 0x95d   : > { %5798 = vst.msk [vmem:[#allocation3] sm:$0xff] %vm342_vm6, %v5796_v60  ;;  %v5797_v1 = vadd.f32 %v5795_v63, %v5790_v45  ;;  %v6342_v45 = vld [vmem:[#allocation2 + $0x4] sm:$0xff]  }
 0x95e   : > { %v6344_v51 = vunpack.c.l.bf16 %v6342_v45  ;;  %v6345_v57 = vunpack.c.h.bf16 %v6342_v45 }
 0x95f   : > { %5799 = vst.msk [vmem:[#allocation3 + $0x8] sm:$0xff] %vm342_vm6, %v5797_v1 }
 0x960   : > { %v6150_v2 = vpop.f32.mrb[120].mxu0 }
 0x961   : > { %v8721_v3 = vpop.f32.mrb[121].mxu0 }
 0x962   : > { %v6153_v4 = vpop.f32.mrb[122].mxu0  ;;  %v6659_v3 = vld [vmem:[#allocation2] sm:$0x8] }
 0x963   : > { %v8722_v5 = vpop.f32.mrb[123].mxu0 }
 0x964   : > { %v5892_v6 = vld [vmem:[#allocation3] sm:$0xff] }
 0x965   : > { %v5894_v7 = vadd.f32 %v5892_v6, %v5885_v30 }
 0x966   : > { %v5893_v8 = vld [vmem:[#allocation3 + $0x8] sm:$0xff] }
 0x967   : > { %5896 = vst.msk [vmem:[#allocation3] sm:$0xff] %vm342_vm6, %v5894_v7  ;;  %v5895_v9 = vadd.f32 %v5893_v8, %v5888_v34 }
 0x968   : > { %v6329_v11 = vpop.f32.mrb[124].mxu0 }
 0x969   : > { %5897 = vst.msk [vmem:[#allocation3 + $0x8] sm:$0xff] %vm342_vm6, %v5895_v9  ;;  %v8737_v12 = vpop.f32.mrb[125].mxu0 }
 0x96a   : > { %v6332_v13 = vpop.f32.mrb[126].mxu0 }
 0x96b   : > { %v8738_v15 = vpop.f32.mrb[127].mxu0 }
 0x96c   : > { %v6662_v15 = vmul.bf16 %v6659_v3, %v9119_v40 }
 0x96e   : > { %v5966_v16 = vld [vmem:[#allocation3] sm:$0xff] }
 0x96f   : > { %v5968_v17 = vadd.f32 %v5966_v16, %v5959_v52 }
 0x970   : > { %v5967_v18 = vld [vmem:[#allocation3 + $0x8] sm:$0xff] }
 0x971   : > { %5970 = vst.msk [vmem:[#allocation3] sm:$0xff] %vm342_vm6, %v5968_v17  ;;  %v5969_v19 = vadd.f32 %v5967_v18, %v5962_v58 }
 0x973   : > { %5971 = vst.msk [vmem:[#allocation3 + $0x8] sm:$0xff] %vm342_vm6, %v5969_v19 }
 0x978   : > { %v6059_v21 = vld [vmem:[#allocation3] sm:$0xff] }
 0x979   : > { %v6061_v22 = vadd.f32 %v6059_v21, %v6052_v43 }
 0x97a   : > { %v6060_v26 = vld [vmem:[#allocation3 + $0x8] sm:$0xff] }
 0x97b   : > { %6063 = vst.msk [vmem:[#allocation3] sm:$0xff] %vm342_vm6, %v6061_v22  ;;  %v6062_v27 = vadd.f32 %v6060_v26, %v6055_v50 }
 0x97d   : > { %6064 = vst.msk [vmem:[#allocation3 + $0x8] sm:$0xff] %vm342_vm6, %v6062_v27 }
 0x982   : > { %v6157_v29 = vld [vmem:[#allocation3] sm:$0xff] }
 0x983   : > { %v6159_v30 = vadd.f32 %v6157_v29, %v6150_v2  ;;  %v6386_v2 = vld [vmem:[#allocation2] sm:$0xe] }
 0x984   : > { %v6158_v31 = vld [vmem:[#allocation3 + $0x8] sm:$0xff]  ;;  %v6389_v7 = vmul.bf16 %v6386_v2, %v9121_v46  ;;  %v8991_v29 = vld [vmem:[%s10357_s1 + $0x420] sm:$0xff]  }
 0x985   : > { %6161 = vst.msk [vmem:[#allocation3] sm:$0xff] %vm342_vm6, %v6159_v30  ;;  %v6160_v32 = vadd.f32 %v6158_v31, %v6153_v4  ;;  %v6561_v4 = vld [vmem:[#allocation2] sm:$0xc] }
 0x986   : > { %v6564_v26 = vmul.bf16 %v6561_v4, %v9126_v53  ;;  %v8994_v4 = vld [vmem:[%s10357_s1 + $0x410] sm:$0xff]  }
 0x987   : > { %6162 = vst.msk [vmem:[#allocation3 + $0x8] sm:$0xff] %vm342_vm6, %v6160_v32 }
 0x98c   : > { %v6238_v33 = vld [vmem:[#allocation3] sm:$0xff] }
 0x98d   : > { %v6240_v34 = vadd.f32 %v6238_v33, %v6231_v56 }
 0x98e   : > { %v6239_v35 = vld [vmem:[#allocation3 + $0x8] sm:$0xff] }
 0x98f   : > { %6242 = vst.msk [vmem:[#allocation3] sm:$0xff] %vm342_vm6, %v6240_v34  ;;  %v6241_v38 = vadd.f32 %v6239_v35, %v6234_v62 }
 0x991   : > { %6243 = vst.msk [vmem:[#allocation3 + $0x8] sm:$0xff] %vm342_vm6, %v6241_v38 }
 0x996   : > { %v6336_v39 = vld [vmem:[#allocation3] sm:$0xff] }
 0x997   : > { %v6338_v41 = vadd.f32 %v6336_v39, %v6329_v11 }
 0x998   : > { %v6337_v42 = vld [vmem:[#allocation3 + $0x8] sm:$0xff] }
 0x999   : > { %6340 = vst.msk [vmem:[#allocation3] sm:$0xff] %vm342_vm6, %v6338_v41  ;;  %v6339_v43 = vadd.f32 %v6337_v42, %v6332_v13  ;;  %v6833_v42 = vld [vmem:[#allocation2 + $0xc] sm:$0x1] }
 0x99b   : > { %6341 = vst.msk [vmem:[#allocation3 + $0x8] sm:$0xff] %vm342_vm6, %v6339_v43 }
 0x9a0   : > { %v6346_v47 = vld [vmem:[#allocation3] sm:$0xff] }
 0x9a1   : > { %v6356_v49 = vadd.f32 %v7908_v44, %v6346_v47 }
 0x9a2   : > { %v6347_v50 = vld [vmem:[#allocation3 + $0x8] sm:$0xff] }
 0x9a3   : > { %v6366_v52 = vmul.f32 %v7910_v48, %v6356_v49  ;;  %v6357_v55 = vadd.f32 %v7908_v44, %v6347_v50 }
 0x9a5   : > { %v6368_v56 = vadd.f32 %v6366_v52, %v6344_v51  ;;  %v6367_v58 = vmul.f32 %v7910_v48, %v6357_v55 }
 0x9a7   : > { %vm6370_vm14 = vcmp.ge.f32.partialorder %v6368_v56, 0.0  ;;  %v6372_v59 = vmul.f32 0.2, %v6368_v56  ;;  %v6369_v60 = vadd.f32 %v6367_v58, %v6345_v57  ;;  %v6836_v58 = vmul.bf16 %v6833_v42, %v9155_v20  ;;  %v9005_v42 = vld [vmem:[#allocation2 + $0xc] ss:$0 sps:$4 sm:$0x33]  }
 0x9a9   : > { %v6374_v61 = vsel %vm6370_vm14, %v6368_v56, %v6372_v59  ;;  %vm6371_vm15 = vcmp.ge.f32.partialorder %v6369_v60, 0.0  ;;  %v6373_v62 = vmul.f32 0.2, %v6369_v60 }
 0x9aa   : > { %v8015_v63 = vpack.c.bf16 %v6374_v61, %v6374_v61 }
 0x9ab   : > { %v6375_v0 = vsel %vm6371_vm15, %v6369_v60, %v6373_v62 }
 0x9ac   : > { %6384 = vst.msk [vmem:[#allocation2 + $0x4] sm:$0xf] %vm226_vm0, %v8015_v63  ;;  %v8016_v1 = vpack.c.bf16 %v6375_v0, %v6375_v0 }
 0x9ae   : > { %6385 = vst.msk [vmem:[#allocation2 + $0x8] sm:$0xf] %vm226_vm0, %v8016_v1 }
 0x9b3   : > { %v8989_v5 = vld [vmem:[#allocation2] sm:$0xfc]  }
 0x9b4   : > { %v6387_v6 = vld [vmem:[#allocation2 + $0x4] sm:$0xf]  ;;  %v6496_v13 = vrot.slane %v8989_v5, 2 }
 0x9b5   : > { %v6390_v8 = vmul.bf16 %v6387_v6, %v9160_v23  ;;  %v6660_v9 = vld [vmem:[#allocation2 + $0x4] sm:$0xf]  ;;  %v8990_v12 = vld [vmem:[#allocation2 + $0x8] ss:$0 sps:$4 sm:$0x33]  }
 0x9b6   : > { %v6562_v11 = vld [vmem:[#allocation2 + $0x4] sm:$0xf]  ;;  %v6663_v16 = vmul.bf16 %v6660_v9, %v9152_v14  ;;  %v6388_v18 = vld [vmem:[#allocation2 + $0x8] sm:$0x3]  ;;  %v6497_v27 = vrot.slane %v8990_v12, 2  ;;  %v7962_v9 = vcombine.low %v6836_v58, %v6836_v58 }
 0x9b7   : > { %v6565_v17 = vmul.bf16 %v6562_v11, %v9178_v36  ;;  %v7917_v19 = vcombine.low %v6389_v7, %v6390_v8  ;;  %v6661_v21 = vld [vmem:[#allocation2 + $0x8] sm:$0xf]  ;;  %v6391_v30 = vmul.bf16 %v6388_v18, %v9162_v24  ;;  %v6831_v48 = vld [vmem:[#allocation2 + $0x4] sm:$0xf] }
 0x9b8   : > { %v6563_v22 = vld [vmem:[#allocation2 + $0x8] sm:$0x7]  ;;  %v6664_v31 = vmul.bf16 %v6661_v21, %v9164_v25  ;;  %v7944_v40 = vcombine.low %v6662_v15, %v6663_v16  ;;  %v6498_v35 = vsel %vm405_vm4, %v6496_v13, %v6497_v27  ;;  %v6834_v62 = vmul.bf16 %v6831_v48, %v9128_v54  ;;  %v8995_v54 = vld [vmem:[%s10357_s1 + $0x440] sm:$0xff]  }
 0x9b9   : > { %v6406_v32 = vshrl.u32 %v7917_v19, 16  ;;  %v6409_v14 = vshll.u32 %v7917_v19, 16  ;;  %v6566_v33 = vmul.bf16 %v6563_v22, %v9180_v37  ;;  %v7935_v34 = vcombine.low %v6564_v26, %v6565_v17  ;;  %8752 = vmatmul.mubr.msk.bf16.vlgmr.msra.gmra.mrb[128].mxu0 %vm342_vm6, %v6498_v35  ;;  %v8993_v25 = vld [vmem:[%s10357_s1 + $0x428] sm:$0xff]   ;;  %v6924_v27 = vld [vmem:[#allocation2 + $0x4] sm:$0xe] }
 0x9ba   : > { %v7918_v38 = vcombine.low %v6391_v30, %v6391_v30  ;;  %v7945_v39 = vcombine.low %v6664_v31, %v6664_v31  ;;  %v6679_v41 = vshrl.u32 %v7944_v40, 16  ;;  %v6682_v45 = vshll.u32 %v7944_v40, 16  ;;  %8764 = vmatpush3.bf16.msra.mxu0 %v8991_v29  ;;  %8767 = vmatprep.mubr.msk.bf16.mxu0 %vm9019_vm5, %v9018_v10  ;;  %v6832_v57 = vld [vmem:[#allocation2 + $0x8] sm:$0xf]  ;;  %v6926_v29 = vld [vmem:[#allocation2 + $0xc] sm:$0x3] }
 0x9bb   : > { %v6408_v43 = vrot.slane %v6406_v32, 1  ;;  %v6411_v44 = vrot.slane %v6409_v14, 2  ;;  %v7936_v47 = vcombine.low %v6566_v33, %v6566_v33  ;;  %8765 = vmatprep.subr.bf16.mxu0 %v9018_v10  ;;  %v6581_v1 = vshrl.u32 %v7935_v34, 16  ;;  %v6925_v17 = vld [vmem:[#allocation2 + $0x8] sm:$0xf]  ;;  %v8998_v33 = vld [vmem:[%s10357_s1 + $0x430] sm:$0xff]  }
 0x9bc   : > { %v6414_v49 = vshrl.u32 %v7918_v38, 16  ;;  %v6417_v50 = vshll.u32 %v7918_v38, 16  ;;  %v6687_v51 = vshrl.u32 %v7945_v39, 16  ;;  %v6681_v52 = vrot.slane %v6679_v41, 3  ;;  %v8997_v22 = vld [vmem:[%s10357_s1 + $0x448] sm:$0xff]  }
 0x9bd   : > { %v6684_v55 = vrot.slane %v6682_v45, 4  ;;  %v6690_v56 = vshll.u32 %v7945_v39, 16  ;;  %v6412_v63 = vor.u32 %v6411_v44, %v6408_v43  ;;  %v6589_v2 = vshrl.u32 %v7936_v47, 16  ;;  %v9004_v44 = vld [vmem:[#allocation2 + $0x4] sm:$0xfc]   ;;  %v9000_v45 = vld [vmem:[%s10357_s1 + $0x438] sm:$0xff]  }
 0x9be   : > { %v6416_v59 = vrot.slane %v6414_v49, 1  ;;  %v6419_v60 = vrot.slane %v6417_v50, 2  ;;  %v6689_v61 = vrot.slane %v6687_v51, 3  ;;  %8766 = vmatpush3.bf16.msra.mxu0 %v8993_v25  ;;  %v6584_v5 = vshll.u32 %v7935_v34, 16  ;;  %v9001_v48 = vld [vmem:[%s10357_s1 + $0x468] sm:$0xff]  }
 0x9bf   : > { %v6692_v0 = vrot.slane %v6690_v56, 4  ;;  %v6592_v6 = vshll.u32 %v7936_v47, 16  ;;  %v6835_v7 = vmul.bf16 %v6832_v57, %v9171_v28  ;;  %v6685_v20 = vor.u32 %v6684_v55, %v6681_v52  ;;  %8779 = vmatprep.subr.bf16.mxu0 %v9018_v10  ;;  %v8996_v28 = vld [vmem:[%s10357_s1 + $0x418] sm:$0xff]   ;;  %v7103_v25 = vld [vmem:[#allocation2 + $0x4] sm:$0xc]  ;;  %v9003_v57 = vld [vmem:[%s10357_s1 + $0x450] sm:$0xff]  }
 0x9c0   : > { %v6420_v3 = vor.u32 %v6419_v60, %v6416_v59  ;;  %v6591_v12 = vrot.slane %v6589_v2, 2  ;;  %v6583_v18 = vrot.slane %v6581_v1, 2  ;;  %v6586_v19 = vrot.slane %v6584_v5, 3  ;;  %v7105_v49 = vld [vmem:[#allocation2 + $0xc] sm:$0x7] }
 0x9c1   : > { %v6693_v8 = vor.u32 %v6692_v0, %v6689_v61  ;;  %v6594_v13 = vrot.slane %v6592_v6, 3  ;;  %v7961_v15 = vcombine.low %v6834_v62, %v6835_v7  ;;  %v6858_v26 = vshll.u32 %v7962_v9, 16  ;;  %v9002_v62 = vld [vmem:[#allocation2 + $0x4] sm:$0xff]  }
 0x9c2   : > { %v6421_v11 = vsel %vm312_vm7, %v6412_v63, %v6420_v3  ;;  %v6928_v32 = vmul.bf16 %v6925_v17, %v9160_v23  ;;  %v6587_v14 = vor.u32 %v6586_v19, %v6583_v18  ;;  %v6927_v35 = vmul.bf16 %v6924_v27, %v9121_v46  ;;  %v8999_v23 = vld [vmem:[%s10357_s1 + $0x460] sm:$0xff]  }
 0x9c3   : > { %8744 = vmatmul.mubr.msk.bf16.vlgmr.msra.gmra.mrb[124].mxu1 %vm342_vm6, %v6421_v11  ;;  %v6694_v16 = vsel %vm652_vm8, %v6685_v20, %v6693_v8  ;;  %v6853_v21 = vshll.u32 %v7961_v15, 16  ;;  %v6595_v30 = vor.u32 %v6594_v13, %v6591_v12  ;;  %v6851_v31 = vshrl.u32 %v7961_v15, 16  ;;  %v9007_v20 = vld [vmem:[%s10357_s1 + $0x470] sm:$0xff]   ;;  %v9008_v13 = vld [vmem:[%s10357_s1 + $0x478] sm:$0xff]  }
 0x9c4   : > { %8756 = vmatpush3.bf16.msra.mxu1 %v8994_v4  ;;  %8768 = vmatmul.mubr.msk.bf16.vlgmr.msra.gmra.mrb[132].mxu0 %vm342_vm6, %v6694_v16  ;;  %v6929_v38 = vmul.bf16 %v6926_v29, %v9162_v24  ;;  %v6860_v39 = vrot.slane %v6858_v26, 1  ;;  %v7970_v43 = vcombine.low %v6927_v35, %v6928_v32  ;;  %v7104_v24 = vld [vmem:[#allocation2 + $0x8] sm:$0xf]  ;;  %v7038_v55 = vrot.slane %v9004_v44, 2 }
 0x9c5   : > { %8780 = vmatpush3.bf16.msra.mxu0 %v8995_v54  ;;  %8757 = vmatprep.subr.bf16.mxu1 %v9018_v10  ;;  %v6855_v40 = vrot.slane %v6853_v21, 1  ;;  %v6596_v41 = vsel %vm538_vm2, %v6587_v14, %v6595_v30  ;;  %v7107_v52 = vmul.bf16 %v7104_v24, %v9178_v36  ;;  %v7039_v56 = vrot.slane %v9005_v42, 2 }
 0x9c6   : > { %8781 = vmatprep.subr.bf16.mxu0 %v9018_v10  ;;  %8759 = vmatprep.mubr.msk.bf16.mxu1 %vm9019_vm5, %v9018_v10  ;;  %v7971_v47 = vcombine.low %v6929_v38, %v6929_v38  ;;  %v6944_v50 = vshrl.u32 %v7970_v43, 16  ;;  %v6947_v51 = vshll.u32 %v7970_v43, 16  ;;  %v7106_v60 = vmul.bf16 %v7103_v25, %v9126_v53  ;;  %v9006_v53 = vld [vmem:[%s10357_s1 + $0x458] sm:$0xff]  }
 0x9c7   : > { %8783 = vmatprep.mubr.msk.bf16.mxu0 %vm9019_vm5, %v9018_v10  ;;  %v6856_v34 = vor.u32 %v6855_v40, %v6851_v31  ;;  %v7108_v61 = vmul.bf16 %v7105_v49, %v9180_v37  ;;  %v7040_v1 = vsel %vm405_vm4, %v7038_v55, %v7039_v56 }
 0x9c8   : > { %8758 = vmatpush3.bf16.msra.mxu1 %v8996_v28  ;;  %v6952_v58 = vshrl.u32 %v7971_v47, 16  ;;  %v6955_v59 = vshll.u32 %v7971_v47, 16  ;;  %v6946_v36 = vrot.slane %v6944_v50, 1  ;;  %v6949_v63 = vrot.slane %v6947_v51, 2 }
 0x9c9   : > { %8782 = vmatpush3.bf16.msra.mxu0 %v8997_v22  ;;  %8771 = vmatprep.subr.bf16.mxu1 %v9018_v10  ;;  %v6861_v46 = vsel %vm838_vm9, %v6856_v34, %v6860_v39  ;;  %v7988_v0 = vcombine.low %v7106_v60, %v7107_v52  ;;  %v7989_v3 = vcombine.low %v7108_v61, %v7108_v61 }
 0x9ca   : > { %8795 = vmatprep.subr.bf16.mxu0 %v9018_v10  ;;  %v6954_v2 = vrot.slane %v6952_v58, 1  ;;  %v6957_v37 = vrot.slane %v6955_v59, 2  ;;  %v6950_v4 = vor.u32 %v6949_v63, %v6946_v36 }
 0x9cb   : > { %8760 = vmatmul.mubr.msk.bf16.vlgmr.msra.gmra.mrb[128].mxu1 %vm342_vm6, %v6596_v41  ;;  %v7123_v5 = vshrl.u32 %v7988_v0, 16  ;;  %v7126_v6 = vshll.u32 %v7988_v0, 16  ;;  %v7131_v8 = vshrl.u32 %v7989_v3, 16  ;;  %v7134_v54 = vshll.u32 %v7989_v3, 16 }
 0x9cc   : > { %8772 = vmatpush3.bf16.msra.mxu1 %v8998_v33  ;;  %8784 = vmatmul.mubr.msk.bf16.vlgmr.msra.gmra.mrb[136].mxu0 %vm342_vm6, %v6861_v46  ;;  %v6958_v7 = vor.u32 %v6957_v37, %v6954_v2 }
 0x9cd   : > { %8796 = vmatpush3.bf16.msra.mxu0 %v8999_v23  ;;  %8773 = vmatprep.subr.bf16.mxu1 %v9018_v10  ;;  %v7125_v11 = vrot.slane %v7123_v5, 2  ;;  %v7128_v12 = vrot.slane %v7126_v6, 3  ;;  %v7133_v15 = vrot.slane %v7131_v8, 2  ;;  %v7136_v16 = vrot.slane %v7134_v54, 3 }
 0x9ce   : > { %8797 = vmatprep.subr.bf16.mxu0 %v9018_v10  ;;  %8775 = vmatprep.mubr.msk.bf16.mxu1 %vm9019_vm5, %v9018_v10  ;;  %v6959_v9 = vsel %vm312_vm7, %v6950_v4, %v6958_v7 }
 0x9cf   : > { %8799 = vmatprep.mubr.msk.bf16.mxu0 %vm9019_vm5, %v9018_v10  ;;  %v7129_v17 = vor.u32 %v7128_v12, %v7125_v11  ;;  %v7137_v28 = vor.u32 %v7136_v16, %v7133_v15 }
 0x9d0   : > { %8774 = vmatpush3.bf16.msra.mxu1 %v9000_v45 }
 0x9d1   : > { %8798 = vmatpush3.bf16.msra.mxu0 %v9001_v48  ;;  %8787 = vmatprep.subr.bf16.mxu1 %v9018_v10  ;;  %v7138_v18 = vsel %vm538_vm2, %v7129_v17, %v7137_v28 }
 0x9d3   : > { %8776 = vmatmul.mubr.msk.bf16.vlgmr.msra.gmra.mrb[132].mxu1 %vm342_vm6, %v9002_v62 }
 0x9d4   : > { %8788 = vmatpush3.bf16.msra.mxu1 %v9003_v57  ;;  %8800 = vmatmul.mubr.msk.bf16.vlgmr.msra.gmra.mrb[140].mxu0 %vm342_vm6, %v7040_v1 }
 0x9d5   : > { %8789 = vmatprep.subr.bf16.mxu1 %v9018_v10  ;;  %8791 = vmatprep.mubr.msk.bf16.mxu1 %vm9019_vm5, %v9018_v10 }
 0x9d8   : > { %8790 = vmatpush3.bf16.msra.mxu1 %v9006_v53 }
 0x9d9   : > { %8803 = vmatprep.subr.bf16.mxu1 %v9018_v10 }
 0x9db   : > { %8792 = vmatmul.mubr.msk.bf16.vlgmr.msra.gmra.mrb[136].mxu1 %vm342_vm6, %v6959_v9 }
 0x9dc   : > { %8804 = vmatpush3.bf16.msra.mxu1 %v9007_v20  ;;  %8807 = vmatprep.mubr.msk.bf16.mxu1 %vm9019_vm5, %v9018_v10 }
 0x9dd   : > { %8805 = vmatprep.subr.bf16.mxu1 %v9018_v10 }
 0x9e0   : > { %8806 = vmatpush3.bf16.msra.mxu1 %v9008_v13 }
 0x9e3   : > { %8808 = vmatmul.mubr.msk.bf16.vlgmr.msra.gmra.mrb[140].mxu1 %vm342_vm6, %v7138_v18 }
 0xa8c   : > { %v6548_v19 = vpop.f32.mrb[128].mxu0 }
 0xa8d   : > { %v8753_v21 = vpop.f32.mrb[129].mxu0 }
 0xa8e   : > { %v6551_v22 = vpop.f32.mrb[130].mxu0 }
 0xa8f   : > { %v8754_v26 = vpop.f32.mrb[131].mxu0 }
 0xa96   : > { %v6471_v27 = vpop.f32.mrb[124].mxu1 }
 0xa97   : > { %6478 = vst.msk [vmem:[#allocation3] sm:$0xff] %vm342_vm6, %v6471_v27  ;;  %v8745_v29 = vpop.f32.mrb[125].mxu1  ;;  %v6744_v30 = vpop.f32.mrb[132].mxu0  ;;  %v7994_v27 = vld [vmem:[%s10358_s2 + $0x7] ss:$0 sm:$0xff] }
 0xa98   : > { %v6474_v31 = vpop.f32.mrb[126].mxu1  ;;  %v8769_v40 = vpop.f32.mrb[133].mxu0  ;;  %v7201_v29 = vld [vmem:[#allocation2 + $0x4] sm:$0xff]  }
 0xa99   : > { %6479 = vst.msk [vmem:[#allocation3 + $0x8] sm:$0xff] %vm342_vm6, %v6474_v31  ;;  %v8746_v10 = vpop.f32.mrb[127].mxu1  ;;  %v6747_v32 = vpop.f32.mrb[134].mxu0  ;;  %v7996_v31 = vld [vmem:[%s10359_s3 + $0x7] ss:$0 sm:$0xff] }
 0xa9a   : > { %v8770_v14 = vpop.f32.mrb[135].mxu0 }
 0xa9e   : > { %v6555_v33 = vld [vmem:[#allocation3] sm:$0xff]  ;;  %v6646_v34 = vpop.f32.mrb[128].mxu1 }
 0xa9f   : > { %v6557_v35 = vadd.f32 %v6555_v33, %v6548_v19  ;;  %v8761_v38 = vpop.f32.mrb[129].mxu1  ;;  %v6911_v39 = vpop.f32.mrb[136].mxu0 }
 0xaa0   : > { %v6556_v23 = vld [vmem:[#allocation3 + $0x8] sm:$0xff]  ;;  %v6649_v41 = vpop.f32.mrb[130].mxu1  ;;  %v8785_v42 = vpop.f32.mrb[137].mxu0 }
 0xaa1   : > { %6559 = vst.msk [vmem:[#allocation3] sm:$0xff] %vm342_vm6, %v6557_v35  ;;  %v6558_v43 = vadd.f32 %v6556_v23, %v6551_v22  ;;  %v8762_v46 = vpop.f32.mrb[131].mxu1  ;;  %v6914_v44 = vpop.f32.mrb[138].mxu0  ;;  %v7204_v35 = vunpack.c.h.bf16 %v7201_v29 }
 0xaa2   : > { %v8786_v24 = vpop.f32.mrb[139].mxu0 }
 0xaa3   : > { %6560 = vst.msk [vmem:[#allocation3 + $0x8] sm:$0xff] %vm342_vm6, %v6558_v43 }
 0xaa6   : > { %v6818_v45 = vpop.f32.mrb[132].mxu1 }
 0xaa7   : > { %v8777_v47 = vpop.f32.mrb[133].mxu1  ;;  %v7090_v48 = vpop.f32.mrb[140].mxu0 }
 0xaa8   : > { %v6653_v25 = vld [vmem:[#allocation3] sm:$0xff]  ;;  %v6821_v49 = vpop.f32.mrb[134].mxu1  ;;  %v8801_v50 = vpop.f32.mrb[141].mxu0 }
 0xaa9   : > { %v6655_v51 = vadd.f32 %v6653_v25, %v6646_v34  ;;  %v8778_v52 = vpop.f32.mrb[135].mxu1  ;;  %v7093_v55 = vpop.f32.mrb[142].mxu0 }
 0xaaa   : > { %v6654_v56 = vld [vmem:[#allocation3 + $0x8] sm:$0xff]  ;;  %v8802_v57 = vpop.f32.mrb[143].mxu0 }
 0xaab   : > { %6657 = vst.msk [vmem:[#allocation3] sm:$0xff] %vm342_vm6, %v6655_v51  ;;  %v6656_v58 = vadd.f32 %v6654_v56, %v6649_v41 }
 0xaad   : > { %6658 = vst.msk [vmem:[#allocation3 + $0x8] sm:$0xff] %vm342_vm6, %v6656_v58 }
 0xaae   : > { %v7009_v59 = vpop.f32.mrb[136].mxu1 }
 0xaaf   : > { %v8793_v60 = vpop.f32.mrb[137].mxu1 }
 0xab0   : > { %v7012_v61 = vpop.f32.mrb[138].mxu1 }
 0xab1   : > { %v8794_v62 = vpop.f32.mrb[139].mxu1 }
 0xab2   : > { %v6751_v36 = vld [vmem:[#allocation3] sm:$0xff] }
 0xab3   : > { %v6753_v63 = vadd.f32 %v6751_v36, %v6744_v30 }
 0xab4   : > { %v6752_v0 = vld [vmem:[#allocation3 + $0x8] sm:$0xff] }
 0xab5   : > { %6755 = vst.msk [vmem:[#allocation3] sm:$0xff] %vm342_vm6, %v6753_v63  ;;  %v6754_v1 = vadd.f32 %v6752_v0, %v6747_v32  ;;  %v7203_v32 = vunpack.c.l.bf16 %v7201_v29 }
 0xab6   : > { %v7188_v53 = vpop.f32.mrb[140].mxu1 }
 0xab7   : > { %6756 = vst.msk [vmem:[#allocation3 + $0x8] sm:$0xff] %vm342_vm6, %v6754_v1  ;;  %v8809_v2 = vpop.f32.mrb[141].mxu1 }
 0xab8   : > { %v7191_v37 = vpop.f32.mrb[142].mxu1 }
 0xab9   : > { %v8810_v3 = vpop.f32.mrb[143].mxu1 }
 0xabc   : > { %v6825_v4 = vld [vmem:[#allocation3] sm:$0xff] }
 0xabd   : > { %v6827_v5 = vadd.f32 %v6825_v4, %v6818_v45 }
 0xabe   : > { %v6826_v6 = vld [vmem:[#allocation3 + $0x8] sm:$0xff] }
 0xabf   : > { %6829 = vst.msk [vmem:[#allocation3] sm:$0xff] %vm342_vm6, %v6827_v5  ;;  %v6828_v7 = vadd.f32 %v6826_v6, %v6821_v49 }
 0xac1   : > { %6830 = vst.msk [vmem:[#allocation3 + $0x8] sm:$0xff] %vm342_vm6, %v6828_v7 }
 0xac6   : > { %v6918_v20 = vld [vmem:[#allocation3] sm:$0xff] }
 0xac7   : > { %v6920_v8 = vadd.f32 %v6918_v20, %v6911_v39 }
 0xac8   : > { %v6919_v54 = vld [vmem:[#allocation3 + $0x8] sm:$0xff] }
 0xac9   : > { %6922 = vst.msk [vmem:[#allocation3] sm:$0xff] %vm342_vm6, %v6920_v8  ;;  %v6921_v9 = vadd.f32 %v6919_v54, %v6914_v44 }
 0xacb   : > { %6923 = vst.msk [vmem:[#allocation3 + $0x8] sm:$0xff] %vm342_vm6, %v6921_v9 }
 0xad0   : > { %v7016_v11 = vld [vmem:[#allocation3] sm:$0xff] }
 0xad1   : > { %v7018_v12 = vadd.f32 %v7016_v11, %v7009_v59 }
 0xad2   : > { %v7017_v13 = vld [vmem:[#allocation3 + $0x8] sm:$0xff] }
 0xad3   : > { %7020 = vst.msk [vmem:[#allocation3] sm:$0xff] %vm342_vm6, %v7018_v12  ;;  %v7019_v15 = vadd.f32 %v7017_v13, %v7012_v61 }
 0xad5   : > { %7021 = vst.msk [vmem:[#allocation3 + $0x8] sm:$0xff] %vm342_vm6, %v7019_v15 }
 0xada   : > { %v7097_v16 = vld [vmem:[#allocation3] sm:$0xff] }
 0xadb   : > { %v7099_v17 = vadd.f32 %v7097_v16, %v7090_v48 }
 0xadc   : > { %v7098_v28 = vld [vmem:[#allocation3 + $0x8] sm:$0xff] }
 0xadd   : > { %7101 = vst.msk [vmem:[#allocation3] sm:$0xff] %vm342_vm6, %v7099_v17  ;;  %v7100_v18 = vadd.f32 %v7098_v28, %v7093_v55 }
 0xadf   : > { %7102 = vst.msk [vmem:[#allocation3 + $0x8] sm:$0xff] %vm342_vm6, %v7100_v18 }
 0xae4   : > { %v7195_v19 = vld [vmem:[#allocation3] sm:$0xff] }
 0xae5   : > { %v7197_v21 = vadd.f32 %v7195_v19, %v7188_v53 }
 0xae6   : > { %v7196_v22 = vld [vmem:[#allocation3 + $0x8] sm:$0xff] }
 0xae7   : > { %7199 = vst.msk [vmem:[#allocation3] sm:$0xff] %vm342_vm6, %v7197_v21  ;;  %v7198_v26 = vadd.f32 %v7196_v22, %v7191_v37 }
 0xae9   : > { %7200 = vst.msk [vmem:[#allocation3 + $0x8] sm:$0xff] %vm342_vm6, %v7198_v26 }
 0xaee   : > { %v7205_v30 = vld [vmem:[#allocation3] sm:$0xff] }
 0xaef   : > { %v7215_v40 = vadd.f32 %v7994_v27, %v7205_v30 }
 0xaf0   : > { %v7206_v10 = vld [vmem:[#allocation3 + $0x8] sm:$0xff] }
 0xaf1   : > { %v7225_v14 = vmul.f32 %v7996_v31, %v7215_v40  ;;  %v7216_v33 = vadd.f32 %v7994_v27, %v7206_v10 }
 0xaf3   : > { %v7227_v34 = vadd.f32 %v7225_v14, %v7203_v32  ;;  %v7226_v38 = vmul.f32 %v7996_v31, %v7216_v33 }
 0xaf5   : > { %vm7229_vm4 = vcmp.ge.f32.partialorder %v7227_v34, 0.0  ;;  %v7231_v39 = vmul.f32 0.2, %v7227_v34  ;;  %v7228_v23 = vadd.f32 %v7226_v38, %v7204_v35 }
 0xaf7   : > { %v7233_v41 = vsel %vm7229_vm4, %v7227_v34, %v7231_v39  ;;  %vm7230_vm5 = vcmp.ge.f32.partialorder %v7228_v23, 0.0  ;;  %v7232_v42 = vmul.f32 0.2, %v7228_v23 }
 0xaf8   : > { %v8017_v43 = vpack.c.bf16 %v7233_v41, %v7233_v41 }
 0xaf9   : > { %v7234_v46 = vsel %vm7230_vm5, %v7228_v23, %v7232_v42 }
 0xafa   : > { %7243 = vst.msk [vmem:[#allocation2 + $0x4] sm:$0xf] %vm226_vm0, %v8017_v43  ;;  %v8018_v44 = vpack.c.bf16 %v7234_v46, %v7234_v46 }
 0xafc   : > { %7244 = vst.msk [vmem:[#allocation2 + $0x8] sm:$0xf] %vm226_vm0, %v8018_v44 }
 0xb01   : > { %v7245_v24 = vld [vmem:[#allocation2 + $0x4] sm:$0xf] }
 0xb02   : > { %v7247_v45 = vunpack.c.l.bf16 %v7245_v24 }
 0xb03   : > { %v7246_v47 = vld [vmem:[#allocation2 + $0x8] sm:$0xf] }
 0xb04   : > { %7249 = vst.msk [vmem:[%s224_s8] sm:$0xff] %vm342_vm6, %v7247_v45  ;;  %v7248_v48 = vunpack.c.l.bf16 %v7246_v47 }
 0xb06   : > { %7250 = vst.msk [vmem:[%s224_s8 + $0x8] sm:$0xff] %vm342_vm6, %v7248_v48 }
 0xb07 PF: > { %s15_s18 = sadd.s32 1, %s9015_s18  }
 0xb08   : > { %p12_p4 = scmp.ge.s32.totalorder %s15_s18, 4  }
 0xb0a   :  { %14 = sbr.rel (!%p12_p4) target bundleno = 1 (0x1), region = 156 }

</bundles_post_ra>
